<compile_context>
chip_gen: v7x
topology: tpu7x:2x2x1
jax: 0.10.0
libtpu: 0.0.40
codegen_flags: <defaults>
</compile_context>

<pallas_src>
import functools

import jax
import jax.numpy as jnp
from jax import lax
from jax.experimental import pallas as pl
from jax.experimental.pallas import tpu as pltpu


def _cross_attn_fwd_kernel(q_ref, k_ref, v_ref, o_ref,
                           m_sc, l_sc, acc_sc,
                           *, scale, num_heads, head_dim, kv_rem, mask_tail):
    """One (batch, q-block, kv-block) step of head-batched online-softmax attention.

    q_ref : (1, H, tq, Dh)   k_ref/v_ref : (1, H, tk, Dh)
    o_ref : (1, tq, H*Dh)    scratch: m/l (H, tq, 1) f32, acc (H, tq, Dh) f32
    """
    ki = pl.program_id(2)
    nk = pl.num_programs(2)

    @pl.when(ki == 0)
    def _init():
        m_sc[...] = jnp.full(m_sc.shape, -jnp.inf, dtype=m_sc.dtype)
        l_sc[...] = jnp.zeros(l_sc.shape, dtype=l_sc.dtype)
        acc_sc[...] = jnp.zeros(acc_sc.shape, dtype=acc_sc.dtype)

    # Scale Q (tq*Dh muls) instead of the scores (tq*tk muls).
    q = q_ref[0] * scale          # (H, tq, Dh)
    k = k_ref[0]                  # (H, tk, Dh)
    v = v_ref[0]                  # (H, tk, Dh)

    # Head-batched QK^T on the MXU, f32 accumulation.
    s = jnp.einsum("htd,hkd->htk", q, k,
                   preferred_element_type=jnp.float32)        # (H, tq, tk)

    def _accumulate(s_blk, v_blk):
        m_prev = m_sc[...]                                    # (H, tq, 1)
        m_new = jnp.maximum(m_prev, s_blk.max(axis=-1, keepdims=True))
        alpha = jnp.exp(m_prev - m_new)
        p = jnp.exp(s_blk - m_new)                            # (H, tq, tk)
        l_sc[...] = alpha * l_sc[...] + p.sum(axis=-1, keepdims=True)
        acc_sc[...] = alpha * acc_sc[...] + jnp.einsum(
            "htk,hkd->htd", p.astype(v_blk.dtype), v_blk,
            preferred_element_type=jnp.float32)
        m_sc[...] = m_new

    if mask_tail:
        # Only the last KV block is ragged: interior steps carry no mask work.
        @pl.when(ki < nk - 1)
        def _interior():
            _accumulate(s, v)

        @pl.when(ki == nk - 1)
        def _tail():
            col = lax.broadcasted_iota(jnp.int32, s.shape, 2)
            s_m = jnp.where(col < kv_rem, s, -jnp.inf)
            row = lax.broadcasted_iota(jnp.int32, v.shape, 1)
            v_m = jnp.where(row < kv_rem, v, jnp.zeros_like(v))  # 0*garbage guard
            _accumulate(s_m, v_m)
    else:
        _accumulate(s, v)

    @pl.when(ki == nk - 1)
    def _finalize():
        inv_l = pl.reciprocal(l_sc[...], approx=True)         # EUP slot, ~free
        # Write each head's slice into the fused (tq, H*Dh) output block with
        # STATIC lane offsets (python loop over heads).
        for h in range(num_heads):
            o_ref[0, :, h * head_dim:(h + 1) * head_dim] = (
                acc_sc[h] * inv_l[h]).astype(o_ref.dtype)


def cross_attention_pure(tokens_q, memory_k, memory_v, shape,
                         scale=None, block_q=256, block_k=512):
    """Forward of Cross_Attention_pure.

    tokens_q : [B, H, Sq, Dh]
    memory_k : [B, H, Sk, Dh]
    memory_v : [B, H, Sk, Dh]
    shape    : output shape (normally (B, Sq, H*Dh)), as in the PyTorch module.
    """
    B, H, Sq, Dh = tokens_q.shape
    _, _, Sk, _ = memory_k.shape
    assert memory_v.shape == memory_k.shape
    if scale is None:
        scale = float(Dh) ** -0.5

    tq = min(block_q, Sq)
    tk = min(block_k, Sk)
    nq = pl.cdiv(Sq, tq)
    nk = pl.cdiv(Sk, tk)
    kv_rem = Sk % tk
    mask_tail = kv_rem != 0

    kernel = functools.partial(
        _cross_attn_fwd_kernel, scale=scale, num_heads=H, head_dim=Dh,
        kv_rem=kv_rem, mask_tail=mask_tail)

    q_spec = pl.BlockSpec((1, H, tq, Dh), lambda b, qi, ki: (b, 0, qi, 0))
    kv_spec = pl.BlockSpec((1, H, tk, Dh), lambda b, qi, ki: (b, 0, ki, 0))
    # Fused output layout: one resident block per (b, q-block), constant across
    # the KV axis; lane-dense (H*Dh) writeback.
    o_spec = pl.BlockSpec((1, tq, H * Dh), lambda b, qi, ki: (b, qi, 0))

    itemsize = tokens_q.dtype.itemsize
    cost = pl.CostEstimate(
        flops=4 * B * H * Sq * Sk * Dh,
        transcendentals=B * H * Sq * Sk,
        bytes_accessed=(tokens_q.size + memory_k.size + memory_v.size
                        + B * Sq * H * Dh) * itemsize)

    out = pl.pallas_call(
        kernel,
        out_shape=jax.ShapeDtypeStruct((B, Sq, H * Dh), tokens_q.dtype),
        grid_spec=pltpu.PrefetchScalarGridSpec(
            num_scalar_prefetch=0,
            grid=(B, nq, nk),
            in_specs=[q_spec, kv_spec, kv_spec],
            out_specs=o_spec,
            scratch_shapes=[
                pltpu.VMEM((H, tq, 1), jnp.float32),    # running max
                pltpu.VMEM((H, tq, 1), jnp.float32),    # running denominator
                pltpu.VMEM((H, tq, Dh), jnp.float32),   # output accumulator
            ]),
        compiler_params=pltpu.CompilerParams(
            dimension_semantics=("parallel", "parallel", "arbitrary")),
        cost_estimate=cost,
    )(tokens_q, memory_k, memory_v)

    # Output is already in (B, Sq, H*Dh) memory order; reshape is a free
    # metadata op (matches PyTorch's .reshape(shape[0], shape[1], shape[2])).
    return out.reshape(shape[0], shape[1], shape[2])


def _reference(q, k, v, shape, scale):
    """Pure-JAX f32 reference mirroring the PyTorch forward."""
    qf = q.astype(jnp.float32)
    kf = k.astype(jnp.float32)
    vf = v.astype(jnp.float32)
    attn = jnp.einsum("bhqd,bhkd->bhqk", qf, kf) * scale
    attn = jax.nn.softmax(attn, axis=-1)
    x = jnp.einsum("bhqk,bhkd->bhqd", attn, vf)
    return jnp.transpose(x, (0, 2, 1, 3)).reshape(shape)


if __name__ == "__main__":
    key = jax.random.PRNGKey(0)
    kq, kk, kv = jax.random.split(key, 3)

    B, H, Dh = 2, 4, 64
    dim = H * Dh
    scale = Dh ** -0.5

    # Case 1: even tiling, 2 KV blocks (exercises online-softmax accumulation).
    Sq, Sk = 128, 256
    q = jax.random.normal(kq, (B, H, Sq, Dh), dtype=jnp.float32)
    k = jax.random.normal(kk, (B, H, Sk, Dh), dtype=jnp.float32)
    v = jax.random.normal(kv, (B, H, Sk, Dh), dtype=jnp.float32)
    shape1 = (B, Sq, dim)
    out1 = jax.block_until_ready(
        cross_attention_pure(q, k, v, shape1, block_q=128, block_k=128))
    ref1 = _reference(q, k, v, shape1, scale)
    assert out1.shape == shape1, out1.shape
    assert jnp.allclose(out1, ref1, atol=2e-3, rtol=2e-3), (
        float(jnp.max(jnp.abs(out1 - ref1))))

    # Case 2: ragged KV length (tail-masked last block) and full-Sq query block.
    Sq2, Sk2 = 80, 192
    q2 = jax.random.normal(kq, (B, H, Sq2, Dh), dtype=jnp.float32)
    k2 = jax.random.normal(kk, (B, H, Sk2, Dh), dtype=jnp.float32)
    v2 = jax.random.normal(kv, (B, H, Sk2, Dh), dtype=jnp.float32)
    shape2 = (B, Sq2, dim)
    out2 = jax.block_until_ready(
        cross_attention_pure(q2, k2, v2, shape2, block_q=128, block_k=128))
    ref2 = _reference(q2, k2, v2, shape2, scale)
    assert out2.shape == shape2, out2.shape
    assert jnp.allclose(out2, ref2, atol=2e-3, rtol=2e-3), (
        float(jnp.max(jnp.abs(out2 - ref2))))

    # Case 3: bf16 inputs (halved HBM traffic path), default block sizes.
    qb = q.astype(jnp.bfloat16)
    kb = k.astype(jnp.bfloat16)
    vb = v.astype(jnp.bfloat16)
    out3 = jax.block_until_ready(cross_attention_pure(qb, kb, vb, shape1))
    ref3 = _reference(qb, kb, vb, shape1, scale)
    assert out3.shape == shape1, out3.shape
    assert jnp.allclose(out3.astype(jnp.float32), ref3, atol=4e-2, rtol=4e-2), (
        float(jnp.max(jnp.abs(out3.astype(jnp.float32) - ref3))))

    print("KERNEL_OK")
</pallas_src>

<mosaic_0001>
module attributes {stable_mosaic.version = 11 : i64} {
  func.func @_cross_attn_fwd_kernel(%arg0: i32, %arg1: i32, %arg2: i32, %arg3: memref<1x4x128x64xf32, #tpu.memory_space<vmem>>, %arg4: memref<1x4x128x64xf32, #tpu.memory_space<vmem>>, %arg5: memref<1x4x128x64xf32, #tpu.memory_space<vmem>>, %arg6: memref<1x128x256xf32, #tpu.memory_space<vmem>>, %arg7: memref<4x128x1xf32, #tpu.memory_space<vmem>>, %arg8: memref<4x128x1xf32, #tpu.memory_space<vmem>>, %arg9: memref<4x128x64xf32, #tpu.memory_space<vmem>>) attributes {dimension_semantics = [#tpu.dimension_semantics<parallel>, #tpu.dimension_semantics<parallel>, #tpu.dimension_semantics<arbitrary>], iteration_bounds = array<i64: 2, 1, 2>, scalar_prefetch = 0 : i64, scratch_operands = 3 : i64, tpu.core_type = #tpu.core_type<tc>, window_params = [{transform_indices = @transform_0, window_bounds = array<i64: 1, 4, 128, 64>}, {transform_indices = @transform_1, window_bounds = array<i64: 1, 4, 128, 64>}, {transform_indices = @transform_2, window_bounds = array<i64: 1, 4, 128, 64>}, {transform_indices = @transform_3, window_bounds = array<i64: 1, 128, 256>}]} {
    %c0_i32 = arith.constant 0 : i32
    %0 = arith.cmpi eq, %arg2, %c0_i32 : i32
    %1 = arith.extui %0 : i1 to i32
    %c0_i32_0 = arith.constant 0 : i32
    %2 = arith.cmpi ne, %1, %c0_i32_0 : i32
    scf.if %2 {
      %cst_35 = arith.constant 0xFF800000 : f32
      %37 = vector.broadcast %cst_35 : f32 to vector<4x128x1xf32>
      %c0_36 = arith.constant 0 : index
      %c0_37 = arith.constant 0 : index
      %c0_38 = arith.constant 0 : index
      %38 = vector.load %arg7[%c0_36, %c0_37, %c0_38] : memref<4x128x1xf32, #tpu.memory_space<vmem>>, vector<4x128x1xf32>
      tpu.vector_store %arg7[%c0_36, %c0_37, %c0_38], %37 {strides = array<i32>} : memref<4x128x1xf32, #tpu.memory_space<vmem>>, vector<4x128x1xf32>,
      %cst_39 = arith.constant 0.000000e+00 : f32
      %39 = vector.broadcast %cst_39 : f32 to vector<4x128x1xf32>
      %c0_40 = arith.constant 0 : index
      %c0_41 = arith.constant 0 : index
      %c0_42 = arith.constant 0 : index
      %40 = vector.load %arg8[%c0_40, %c0_41, %c0_42] : memref<4x128x1xf32, #tpu.memory_space<vmem>>, vector<4x128x1xf32>
      tpu.vector_store %arg8[%c0_40, %c0_41, %c0_42], %39 {strides = array<i32>} : memref<4x128x1xf32, #tpu.memory_space<vmem>>, vector<4x128x1xf32>,
      %cst_43 = arith.constant 0.000000e+00 : f32
      %41 = vector.broadcast %cst_43 : f32 to vector<4x128x64xf32>
      %c0_44 = arith.constant 0 : index
      %c0_45 = arith.constant 0 : index
      %c0_46 = arith.constant 0 : index
      %42 = vector.load %arg9[%c0_44, %c0_45, %c0_46] : memref<4x128x64xf32, #tpu.memory_space<vmem>>, vector<4x128x64xf32>
      tpu.vector_store %arg9[%c0_44, %c0_45, %c0_46], %41 {strides = array<i32>} : memref<4x128x64xf32, #tpu.memory_space<vmem>>, vector<4x128x64xf32>,
    } else {
    }
    %c0 = arith.constant 0 : index
    %c0_1 = arith.constant 0 : index
    %c0_2 = arith.constant 0 : index
    %c0_3 = arith.constant 0 : index
    %3 = vector.load %arg3[%c0, %c0_1, %c0_2, %c0_3] : memref<1x4x128x64xf32, #tpu.memory_space<vmem>>, vector<1x4x128x64xf32>
    %4 = vector.shape_cast %3 : vector<1x4x128x64xf32> to vector<4x128x64xf32>
    %cst = arith.constant 1.250000e-01 : f32
    %5 = vector.broadcast %cst : f32 to vector<4x128x64xf32>
    %6 = arith.mulf %4, %5 : vector<4x128x64xf32>
    %c0_4 = arith.constant 0 : index
    %c0_5 = arith.constant 0 : index
    %c0_6 = arith.constant 0 : index
    %c0_7 = arith.constant 0 : index
    %7 = vector.load %arg4[%c0_4, %c0_5, %c0_6, %c0_7] : memref<1x4x128x64xf32, #tpu.memory_space<vmem>>, vector<1x4x128x64xf32>
    %8 = vector.shape_cast %7 : vector<1x4x128x64xf32> to vector<4x128x64xf32>
    %c0_8 = arith.constant 0 : index
    %c0_9 = arith.constant 0 : index
    %c0_10 = arith.constant 0 : index
    %c0_11 = arith.constant 0 : index
    %9 = vector.load %arg5[%c0_8, %c0_9, %c0_10, %c0_11] : memref<1x4x128x64xf32, #tpu.memory_space<vmem>>, vector<1x4x128x64xf32>
    %10 = vector.shape_cast %9 : vector<1x4x128x64xf32> to vector<4x128x64xf32>
    "tpu.trace_start"() <{level = 10 : i32, message = "htd,hkd->htk"}> : () -> ()
    %cst_12 = arith.constant dense<0.000000e+00> : vector<4x128x128xf32>
    %11 = tpu.matmul %6, %8, %cst_12 {dimension_numbers = #tpu.dot_dimension_numbers<[2], [2], [1], [1], [0, 0, 0, 1, 1, 1], [0], [0]>} : vector<4x128x64xf32>, vector<4x128x64xf32>, vector<4x128x128xf32> -> vector<4x128x128xf32>
    "tpu.trace_stop"() : () -> ()
    %c0_13 = arith.constant 0 : index
    %c0_14 = arith.constant 0 : index
    %c0_15 = arith.constant 0 : index
    %12 = vector.load %arg7[%c0_13, %c0_14, %c0_15] : memref<4x128x1xf32, #tpu.memory_space<vmem>>, vector<4x128x1xf32>
    %cst_16 = arith.constant dense<0xFF800000> : vector<4x128xf32>
    %13 = vector.multi_reduction <maximumf>, %11, %cst_16 [2] : vector<4x128x128xf32> to vector<4x128xf32>
    %14 = vector.shape_cast %13 : vector<4x128xf32> to vector<4x128x1xf32>
    %15 = arith.maximumf %12, %14 : vector<4x128x1xf32>
    %16 = arith.subf %12, %15 : vector<4x128x1xf32>
    %17 = math.exp %16 : vector<4x128x1xf32>
    %18 = vector.broadcast %15 : vector<4x128x1xf32> to vector<4x128x128xf32>
    %19 = arith.subf %11, %18 : vector<4x128x128xf32>
    %20 = math.exp %19 : vector<4x128x128xf32>
    %c0_17 = arith.constant 0 : index
    %c0_18 = arith.constant 0 : index
    %c0_19 = arith.constant 0 : index
    %21 = vector.load %arg8[%c0_17, %c0_18, %c0_19] : memref<4x128x1xf32, #tpu.memory_space<vmem>>, vector<4x128x1xf32>
    %22 = arith.mulf %17, %21 : vector<4x128x1xf32>
    %cst_20 = arith.constant dense<0.000000e+00> : vector<4x128xf32>
    %23 = vector.multi_reduction <add>, %20, %cst_20 [2] : vector<4x128x128xf32> to vector<4x128xf32>
    %24 = vector.shape_cast %23 : vector<4x128xf32> to vector<4x128x1xf32>
    %25 = arith.addf %22, %24 : vector<4x128x1xf32>
    %c0_21 = arith.constant 0 : index
    %c0_22 = arith.constant 0 : index
    %c0_23 = arith.constant 0 : index
    %26 = vector.load %arg8[%c0_21, %c0_22, %c0_23] : memref<4x128x1xf32, #tpu.memory_space<vmem>>, vector<4x128x1xf32>
    tpu.vector_store %arg8[%c0_21, %c0_22, %c0_23], %25 {strides = array<i32>} : memref<4x128x1xf32, #tpu.memory_space<vmem>>, vector<4x128x1xf32>,
    %c0_24 = arith.constant 0 : index
    %c0_25 = arith.constant 0 : index
    %c0_26 = arith.constant 0 : index
    %27 = vector.load %arg9[%c0_24, %c0_25, %c0_26] : memref<4x128x64xf32, #tpu.memory_space<vmem>>, vector<4x128x64xf32>
    %28 = vector.broadcast %17 : vector<4x128x1xf32> to vector<4x128x64xf32>
    %29 = arith.mulf %28, %27 : vector<4x128x64xf32>
    "tpu.trace_start"() <{level = 10 : i32, message = "htk,hkd->htd"}> : () -> ()
    %cst_27 = arith.constant dense<0.000000e+00> : vector<4x128x64xf32>
    %30 = tpu.matmul %20, %10, %cst_27 {dimension_numbers = #tpu.dot_dimension_numbers<[2], [1], [1], [2], [0, 0, 0, 1, 1, 2], [0], [0]>} : vector<4x128x128xf32>, vector<4x128x64xf32>, vector<4x128x64xf32> -> vector<4x128x64xf32>
    "tpu.trace_stop"() : () -> ()
    %31 = arith.addf %29, %30 : vector<4x128x64xf32>
    %c0_28 = arith.constant 0 : index
    %c0_29 = arith.constant 0 : index
    %c0_30 = arith.constant 0 : index
    %32 = vector.load %arg9[%c0_28, %c0_29, %c0_30] : memref<4x128x64xf32, #tpu.memory_space<vmem>>, vector<4x128x64xf32>
    tpu.vector_store %arg9[%c0_28, %c0_29, %c0_30], %31 {strides = array<i32>} : memref<4x128x64xf32, #tpu.memory_space<vmem>>, vector<4x128x64xf32>,
    %c0_31 = arith.constant 0 : index
    %c0_32 = arith.constant 0 : index
    %c0_33 = arith.constant 0 : index
    %33 = vector.load %arg7[%c0_31, %c0_32, %c0_33] : memref<4x128x1xf32, #tpu.memory_space<vmem>>, vector<4x128x1xf32>
    tpu.vector_store %arg7[%c0_31, %c0_32, %c0_33], %15 {strides = array<i32>} : memref<4x128x1xf32, #tpu.memory_space<vmem>>, vector<4x128x1xf32>,
    %c1_i32 = arith.constant 1 : i32
    %34 = arith.cmpi eq, %arg2, %c1_i32 : i32
    %35 = arith.extui %34 : i1 to i32
    %c0_i32_34 = arith.constant 0 : i32
    %36 = arith.cmpi ne, %35, %c0_i32_34 : i32
    scf.if %36 {
      %c0_35 = arith.constant 0 : index
      %c0_36 = arith.constant 0 : index
      %c0_37 = arith.constant 0 : index
      %37 = vector.load %arg8[%c0_35, %c0_36, %c0_37] : memref<4x128x1xf32, #tpu.memory_space<vmem>>, vector<4x128x1xf32>
      %38 = tpu.reciprocal %37 {approx = true} : vector<4x128x1xf32> -> vector<4x128x1xf32>
      %c0_38 = arith.constant 0 : index
      %c0_39 = arith.constant 0 : index
      %c0_40 = arith.constant 0 : index
      %39 = vector.load %arg9[%c0_38, %c0_39, %c0_40] : memref<4x128x64xf32, #tpu.memory_space<vmem>>, vector<1x128x64xf32>
      %40 = vector.shape_cast %39 : vector<1x128x64xf32> to vector<128x64xf32>
      %41 = vector.extract_strided_slice %38 {offsets = [0, 0, 0], sizes = [1, 128, 1], strides = [1, 1, 1]} : vector<4x128x1xf32> to vector<1x128x1xf32>
      %42 = vector.shape_cast %41 : vector<1x128x1xf32> to vector<128x1xf32>
      %43 = vector.broadcast %42 : vector<128x1xf32> to vector<128x64xf32>
      %44 = arith.mulf %40, %43 : vector<128x64xf32>
      %c0_41 = arith.constant 0 : index
      %c0_42 = arith.constant 0 : index
      %c0_43 = arith.constant 0 : index
      %45 = vector.load %arg6[%c0_41, %c0_42, %c0_43] : memref<1x128x256xf32, #tpu.memory_space<vmem>>, vector<1x128x64xf32>
      %46 = vector.shape_cast %45 : vector<1x128x64xf32> to vector<128x64xf32>
      %47 = vector.shape_cast %44 : vector<128x64xf32> to vector<1x128x64xf32>
      tpu.vector_store %arg6[%c0_41, %c0_42, %c0_43], %47 {strides = array<i32>} : memref<1x128x256xf32, #tpu.memory_space<vmem>>, vector<1x128x64xf32>,
      %c1 = arith.constant 1 : index
      %c0_44 = arith.constant 0 : index
      %c0_45 = arith.constant 0 : index
      %48 = vector.load %arg9[%c1, %c0_44, %c0_45] : memref<4x128x64xf32, #tpu.memory_space<vmem>>, vector<1x128x64xf32>
      %49 = vector.shape_cast %48 : vector<1x128x64xf32> to vector<128x64xf32>
      %50 = vector.extract_strided_slice %38 {offsets = [1, 0, 0], sizes = [1, 128, 1], strides = [1, 1, 1]} : vector<4x128x1xf32> to vector<1x128x1xf32>
      %51 = vector.shape_cast %50 : vector<1x128x1xf32> to vector<128x1xf32>
      %52 = vector.broadcast %51 : vector<128x1xf32> to vector<128x64xf32>
      %53 = arith.mulf %49, %52 : vector<128x64xf32>
      %c0_46 = arith.constant 0 : index
      %c0_47 = arith.constant 0 : index
      %c64 = arith.constant 64 : index
      %54 = vector.load %arg6[%c0_46, %c0_47, %c64] : memref<1x128x256xf32, #tpu.memory_space<vmem>>, vector<1x128x64xf32>
      %55 = vector.shape_cast %54 : vector<1x128x64xf32> to vector<128x64xf32>
      %56 = vector.shape_cast %53 : vector<128x64xf32> to vector<1x128x64xf32>
      tpu.vector_store %arg6[%c0_46, %c0_47, %c64], %56 {strides = array<i32>} : memref<1x128x256xf32, #tpu.memory_space<vmem>>, vector<1x128x64xf32>,
      %c2 = arith.constant 2 : index
      %c0_48 = arith.constant 0 : index
      %c0_49 = arith.constant 0 : index
      %57 = vector.load %arg9[%c2, %c0_48, %c0_49] : memref<4x128x64xf32, #tpu.memory_space<vmem>>, vector<1x128x64xf32>
      %58 = vector.shape_cast %57 : vector<1x128x64xf32> to vector<128x64xf32>
      %59 = vector.extract_strided_slice %38 {offsets = [2, 0, 0], sizes = [1, 128, 1], strides = [1, 1, 1]} : vector<4x128x1xf32> to vector<1x128x1xf32>
      %60 = vector.shape_cast %59 : vector<1x128x1xf32> to vector<128x1xf32>
      %61 = vector.broadcast %60 : vector<128x1xf32> to vector<128x64xf32>
      %62 = arith.mulf %58, %61 : vector<128x64xf32>
      %c0_50 = arith.constant 0 : index
      %c0_51 = arith.constant 0 : index
      %c128 = arith.constant 128 : index
      %63 = vector.load %arg6[%c0_50, %c0_51, %c128] : memref<1x128x256xf32, #tpu.memory_space<vmem>>, vector<1x128x64xf32>
      %64 = vector.shape_cast %63 : vector<1x128x64xf32> to vector<128x64xf32>
      %65 = vector.shape_cast %62 : vector<128x64xf32> to vector<1x128x64xf32>
      tpu.vector_store %arg6[%c0_50, %c0_51, %c128], %65 {strides = array<i32>} : memref<1x128x256xf32, #tpu.memory_space<vmem>>, vector<1x128x64xf32>,
      %c3 = arith.constant 3 : index
      %c0_52 = arith.constant 0 : index
      %c0_53 = arith.constant 0 : index
      %66 = vector.load %arg9[%c3, %c0_52, %c0_53] : memref<4x128x64xf32, #tpu.memory_space<vmem>>, vector<1x128x64xf32>
      %67 = vector.shape_cast %66 : vector<1x128x64xf32> to vector<128x64xf32>
      %68 = vector.extract_strided_slice %38 {offsets = [3, 0, 0], sizes = [1, 128, 1], strides = [1, 1, 1]} : vector<4x128x1xf32> to vector<1x128x1xf32>
      %69 = vector.shape_cast %68 : vector<1x128x1xf32> to vector<128x1xf32>
      %70 = vector.broadcast %69 : vector<128x1xf32> to vector<128x64xf32>
      %71 = arith.mulf %67, %70 : vector<128x64xf32>
      %c0_54 = arith.constant 0 : index
      %c0_55 = arith.constant 0 : index
      %c192 = arith.constant 192 : index
      %72 = vector.load %arg6[%c0_54, %c0_55, %c192] : memref<1x128x256xf32, #tpu.memory_space<vmem>>, vector<1x128x64xf32>
      %73 = vector.shape_cast %72 : vector<1x128x64xf32> to vector<128x64xf32>
      %74 = vector.shape_cast %71 : vector<128x64xf32> to vector<1x128x64xf32>
      tpu.vector_store %arg6[%c0_54, %c0_55, %c192], %74 {strides = array<i32>} : memref<1x128x256xf32, #tpu.memory_space<vmem>>, vector<1x128x64xf32>,
    } else {
    }
    return
  }
  func.func @transform_0(%arg0: i32, %arg1: i32, %arg2: i32) -> (i32, i32, i32, i32) {
    %c0_i32 = arith.constant 0 : i32
    %c0_i32_0 = arith.constant 0 : i32
    %c0_i32_1 = arith.constant 0 : i32
    return %arg0, %c0_i32, %arg1, %c0_i32_0 : i32, i32, i32, i32
  }
  func.func @transform_1(%arg0: i32, %arg1: i32, %arg2: i32) -> (i32, i32, i32, i32) {
    %c0_i32 = arith.constant 0 : i32
    %c0_i32_0 = arith.constant 0 : i32
    %c0_i32_1 = arith.constant 0 : i32
    return %arg0, %c0_i32, %arg2, %c0_i32_0 : i32, i32, i32, i32
  }
  func.func @transform_2(%arg0: i32, %arg1: i32, %arg2: i32) -> (i32, i32, i32, i32) {
    %c0_i32 = arith.constant 0 : i32
    %c0_i32_0 = arith.constant 0 : i32
    %c0_i32_1 = arith.constant 0 : i32
    return %arg0, %c0_i32, %arg2, %c0_i32_0 : i32, i32, i32, i32
  }
  func.func @transform_3(%arg0: i32, %arg1: i32, %arg2: i32) -> (i32, i32, i32) {
    %c0_i32 = arith.constant 0 : i32
    %c0_i32_0 = arith.constant 0 : i32
    return %arg0, %arg1, %c0_i32 : i32, i32, i32
  }
}

</mosaic_0001>

<bundles_post_ra>
// kernel: tpu_custom_call.1
= control target key start
LH: loop header
LB: loop body
LE: loop exit
PB: predicated region body
PF: predicated region fallthrough
CT: control target
= control target key end

     0   :  { %s10730_s0 = inlined_call_operand.vmem [shape: f32[2,4,128,64], index: 0, kind: input, shape index: {}]   ;;  %s10731_s1 = inlined_call_operand.vmem [shape: f32[2,4,256,64], index: 1, kind: input, shape index: {}]   ;;  %s10732_s2 = inlined_call_operand.vmem [shape: f32[2,4,256,64], index: 2, kind: input, shape index: {}]   ;;  %s10733_s3 = inlined_call_operand.hbm [shape: f32[2,128,256], index: 3, kind: output, shape index: {}]  }
   0x1   :  { %10883 = sst [smem:[#allocation131_spill]] %s10731_s1 }
   0x2   :  { %8 = vsyncpa [#allocation8], 0 }
   0x3   :  { %10 = vsyncpa [#allocation8 + $0x1], 0  ;;  %s7536_s12 = smov 0   ;;  %s7538_s13 = smov 0  }
   0x4   :  { %s7540_s14 = smov 0   ;;  %s7542_s15 = smov 0  }
   0x5   :  { %s7544_s16 = smov 0   ;;  %s7546_s17 = smov 0  }
   0x6   :  { %s7548_s18 = smov 0   ;;  %s7550_s19 = smov 0  }
   0x7   :  { %s7552_s20 = smov 0   ;;  %s7554_s21 = smov 0  }
   0x8 LB: > { %s5735_s22 = sadd.s32 4294967295, %s7506_s21   ;;  %s5736_s23 = sadd.s32 4294967294, %s7506_s21   ;;  %s7506_s21 = sphi %s7554_s21, %s16_s21   ;;  %s7502_s20 = sphi %s7552_s20, %s11252_s20   ;;  %s7498_s19 = sphi %s7550_s19, %s11251_s19   ;;  %s7494_s18 = sphi %s7548_s18, %s11250_s18   ;;  %s7490_s17 = sphi %s7546_s17, %s11249_s17   ;;  %s7486_s16 = sphi %s7544_s16, %s11248_s16   ;;  %s7482_s15 = sphi %s7542_s15, %s11247_s15   ;;  %s7478_s14 = sphi %s7540_s14, %s11246_s14   ;;  %s7474_s13 = sphi %s7538_s13, %s11245_s13   ;;  %s7470_s12 = sphi %s7536_s12, %s11244_s12  }
   0x9   : > { %s28_s24 = sadd.s32 1, %s7498_s19  ;;  %s35_s25 = sadd.s32 1, %s7502_s20 }
   0xa   : > { %p29_p0 = scmp.ge.s32.totalorder %s28_s24, 2  ;;  %s72_s26 = sadd.s32 1, %s7486_s16 }
   0xb   : > { %p79_p1 = scmp.ne.s32.totalorder %s7486_s16, %s7482_s15  ;;  %p80_p2 = scmp.eq.s32.totalorder %s7506_s21, 0 }
   0xc   : > { %s11254_s24 = smov (%p29_p0, %s28_s24), 0  ;;  %s11256_s25 = smov (!%p29_p0, %s35_s25), %s7502_s20 }
   0xd   : > { %s68_s27 = ssub.s32 %s7498_s19, %s11254_s24  ;;  %p7599_p3 = por %p80_p2, %p79_p1 }
   0xe   : > { %p37_p4 = scmp.ge.s32.totalorder %s11256_s25, 2  ;;  %s128_s29 = sadd.s32 1, %s7478_s14 }
   0xf   : > { %p138_p5 = scmp.ne.s32.totalorder %s7478_s14, %s7474_s13  ;;  %p139_p6 = scmp.eq.s32.totalorder %s5735_s22, 3 }
  0x10   : > { %s11258_s25 = smov (%p37_p4, %s11256_s25), 0  ;;  %p144_p8 = scmp.ne.s32.totalorder %s7474_s13, %s7470_s12 }
  0x11   : > { %p7608_p7 = por %p139_p6, %p138_p5  ;;  %s67_s4 = ssub.s32 %s7502_s20, %s11258_s25 }
  0x12   : > { %p145_p9 = scmp.eq.s32.totalorder %s5736_s23, 3  ;;  %s69_s5 = sor.u32 %s68_s27, %s67_s4 }
  0x13   : > { %p126_p10 = scmp.eq.s32.totalorder %s67_s4, 0  ;;  %p70_p11 = scmp.eq.s32.totalorder %s69_s5, 0 }
  0x14   : > { %p7616_p12 = por %p145_p9, %p144_p8  ;;  %p5738_p13 = scmp.ge.s32.totalorder %s7506_s21, 4 }
  0x15   : > { %s7621_s7 = scalar_select %p126_p10, %s7478_s14, %s128_s29  }
  0x16   : > { %s7624_s8 = scalar_select %p70_p11, %s7486_s16, %s72_s26  }
  0x17   : > { %161 = sbr.rel (%p5738_p13) target bundleno = 111 (0x6f), region = 16 }
  0x1e   : > { %177 = sbr.rel (!%p7599_p3) target bundleno = 72 (0x48), region = 24  ;;  %s179_s9 = sand.u32 (%p7599_p3), 1, %s7486_s16  }
  0x1f   : > { %s5740_s10 = sshll.u32 (%p7599_p3), %s7498_s19, 4  ;;  %s5739_s11 = sshll.u32 (%p7599_p3), %s179_s9, 9 }
  0x20   : > { %s5741_s22 = sshll.u32 (%p7599_p3), %s7502_s20, 7  ;;  %s10887_s1 = sld [smem:[#allocation131_spill]] (%p7599_p3) }
  0x21   : > { %s184_s23 = sadd.s32 (%p7599_p3), %s5741_s22, %s5740_s10  ;;  %s7640_s5 = scalar_lea.vmem (%p7599_p3), [#allocation5], %s5739_s11 }
  0x22   : > { %s5742_s27 = sshll.u32 (%p7599_p3), %s184_s23, 3 }
  0x26   : > { %s7635_s26 = scalar_lea.vmem %s10887_s1, %s5742_s27 }
  0x27   : > { %v340_v0 = vld [vmem:[%s7635_s26] sm:$0xff]  ;;  %v342_v1 = vld [vmem:[%s7635_s26 + $0x8] sm:$0xff]  ;;  %v344_v2 = vld [vmem:[%s7635_s26 + $0x10] sm:$0xff] }
  0x28   : > { %341 = vst [vmem:[%s7640_s5] sm:$0xff] %v340_v0  ;;  %343 = vst [vmem:[%s7640_s5 + $0x8] sm:$0xff] %v342_v1  ;;  %v346_v3 = vld [vmem:[%s7635_s26 + $0x18] sm:$0xff]  ;;  %v348_v4 = vld [vmem:[%s7635_s26 + $0x20] sm:$0xff] }
  0x29   : > { %345 = vst [vmem:[%s7640_s5 + $0x10] sm:$0xff] %v344_v2  ;;  %v350_v5 = vld [vmem:[%s7635_s26 + $0x28] sm:$0xff]  ;;  %347 = vst [vmem:[%s7640_s5 + $0x18] sm:$0xff] %v346_v3  ;;  %v352_v6 = vld [vmem:[%s7635_s26 + $0x30] sm:$0xff] }
  0x2a   : > { %349 = vst [vmem:[%s7640_s5 + $0x20] sm:$0xff] %v348_v4  ;;  %351 = vst [vmem:[%s7640_s5 + $0x28] sm:$0xff] %v350_v5  ;;  %v354_v7 = vld [vmem:[%s7635_s26 + $0x38] sm:$0xff]  ;;  %v356_v8 = vld [vmem:[%s7635_s26 + $0x40] sm:$0xff] }
  0x2b   : > { %353 = vst [vmem:[%s7640_s5 + $0x30] sm:$0xff] %v352_v6  ;;  %355 = vst [vmem:[%s7640_s5 + $0x38] sm:$0xff] %v354_v7  ;;  %v358_v9 = vld [vmem:[%s7635_s26 + $0x48] sm:$0xff]  ;;  %v360_v10 = vld [vmem:[%s7635_s26 + $0x50] sm:$0xff] }
  0x2c   : > { %357 = vst [vmem:[%s7640_s5 + $0x40] sm:$0xff] %v356_v8  ;;  %v362_v11 = vld [vmem:[%s7635_s26 + $0x58] sm:$0xff]  ;;  %359 = vst [vmem:[%s7640_s5 + $0x48] sm:$0xff] %v358_v9  ;;  %v364_v12 = vld [vmem:[%s7635_s26 + $0x60] sm:$0xff] }
  0x2d   : > { %361 = vst [vmem:[%s7640_s5 + $0x50] sm:$0xff] %v360_v10  ;;  %363 = vst [vmem:[%s7640_s5 + $0x58] sm:$0xff] %v362_v11  ;;  %v366_v13 = vld [vmem:[%s7635_s26 + $0x68] sm:$0xff]  ;;  %v368_v14 = vld [vmem:[%s7635_s26 + $0x70] sm:$0xff] }
  0x2e   : > { %365 = vst [vmem:[%s7640_s5 + $0x60] sm:$0xff] %v364_v12  ;;  %367 = vst [vmem:[%s7640_s5 + $0x68] sm:$0xff] %v366_v13  ;;  %v370_v15 = vld [vmem:[%s7635_s26 + $0x78] sm:$0xff]  ;;  %v372_v16 = vld [vmem:[%s7635_s26 + $0x100] sm:$0xff] }
  0x2f   : > { %369 = vst [vmem:[%s7640_s5 + $0x70] sm:$0xff] %v368_v14  ;;  %v374_v17 = vld [vmem:[%s7635_s26 + $0x108] sm:$0xff]  ;;  %371 = vst [vmem:[%s7640_s5 + $0x78] sm:$0xff] %v370_v15  ;;  %v376_v18 = vld [vmem:[%s7635_s26 + $0x110] sm:$0xff] }
  0x30   : > { %373 = vst [vmem:[%s7640_s5 + $0x80] sm:$0xff] %v372_v16  ;;  %375 = vst [vmem:[%s7640_s5 + $0x88] sm:$0xff] %v374_v17  ;;  %v378_v19 = vld [vmem:[%s7635_s26 + $0x118] sm:$0xff]  ;;  %v380_v20 = vld [vmem:[%s7635_s26 + $0x120] sm:$0xff] }
  0x31   : > { %377 = vst [vmem:[%s7640_s5 + $0x90] sm:$0xff] %v376_v18  ;;  %379 = vst [vmem:[%s7640_s5 + $0x98] sm:$0xff] %v378_v19  ;;  %v382_v21 = vld [vmem:[%s7635_s26 + $0x128] sm:$0xff]  ;;  %v384_v22 = vld [vmem:[%s7635_s26 + $0x130] sm:$0xff] }
  0x32   : > { %381 = vst [vmem:[%s7640_s5 + $0xa0] sm:$0xff] %v380_v20  ;;  %v386_v23 = vld [vmem:[%s7635_s26 + $0x138] sm:$0xff]  ;;  %383 = vst [vmem:[%s7640_s5 + $0xa8] sm:$0xff] %v382_v21  ;;  %v388_v24 = vld [vmem:[%s7635_s26 + $0x140] sm:$0xff] }
  0x33   : > { %385 = vst [vmem:[%s7640_s5 + $0xb0] sm:$0xff] %v384_v22  ;;  %387 = vst [vmem:[%s7640_s5 + $0xb8] sm:$0xff] %v386_v23  ;;  %v390_v25 = vld [vmem:[%s7635_s26 + $0x148] sm:$0xff]  ;;  %v392_v26 = vld [vmem:[%s7635_s26 + $0x150] sm:$0xff] }
  0x34   : > { %389 = vst [vmem:[%s7640_s5 + $0xc0] sm:$0xff] %v388_v24  ;;  %391 = vst [vmem:[%s7640_s5 + $0xc8] sm:$0xff] %v390_v25  ;;  %v394_v27 = vld [vmem:[%s7635_s26 + $0x158] sm:$0xff]  ;;  %v396_v28 = vld [vmem:[%s7635_s26 + $0x160] sm:$0xff] }
  0x35   : > { %393 = vst [vmem:[%s7640_s5 + $0xd0] sm:$0xff] %v392_v26  ;;  %v398_v29 = vld [vmem:[%s7635_s26 + $0x168] sm:$0xff]  ;;  %395 = vst [vmem:[%s7640_s5 + $0xd8] sm:$0xff] %v394_v27  ;;  %v400_v30 = vld [vmem:[%s7635_s26 + $0x170] sm:$0xff] }
  0x36   : > { %397 = vst [vmem:[%s7640_s5 + $0xe0] sm:$0xff] %v396_v28  ;;  %399 = vst [vmem:[%s7640_s5 + $0xe8] sm:$0xff] %v398_v29  ;;  %v402_v31 = vld [vmem:[%s7635_s26 + $0x178] sm:$0xff]  ;;  %v404_v32 = vld [vmem:[%s7635_s26 + $0x200] sm:$0xff] }
  0x37   : > { %401 = vst [vmem:[%s7640_s5 + $0xf0] sm:$0xff] %v400_v30  ;;  %403 = vst [vmem:[%s7640_s5 + $0xf8] sm:$0xff] %v402_v31  ;;  %v406_v33 = vld [vmem:[%s7635_s26 + $0x208] sm:$0xff]  ;;  %v408_v34 = vld [vmem:[%s7635_s26 + $0x210] sm:$0xff] }
  0x38   : > { %405 = vst [vmem:[%s7640_s5 + $0x100] sm:$0xff] %v404_v32  ;;  %v410_v35 = vld [vmem:[%s7635_s26 + $0x218] sm:$0xff]  ;;  %407 = vst [vmem:[%s7640_s5 + $0x108] sm:$0xff] %v406_v33  ;;  %v412_v36 = vld [vmem:[%s7635_s26 + $0x220] sm:$0xff] }
  0x39   : > { %409 = vst [vmem:[%s7640_s5 + $0x110] sm:$0xff] %v408_v34  ;;  %411 = vst [vmem:[%s7640_s5 + $0x118] sm:$0xff] %v410_v35  ;;  %v414_v37 = vld [vmem:[%s7635_s26 + $0x228] sm:$0xff]  ;;  %v416_v38 = vld [vmem:[%s7635_s26 + $0x230] sm:$0xff] }
  0x3a   : > { %413 = vst [vmem:[%s7640_s5 + $0x120] sm:$0xff] %v412_v36  ;;  %415 = vst [vmem:[%s7640_s5 + $0x128] sm:$0xff] %v414_v37  ;;  %v418_v39 = vld [vmem:[%s7635_s26 + $0x238] sm:$0xff]  ;;  %v420_v40 = vld [vmem:[%s7635_s26 + $0x240] sm:$0xff] }
  0x3b   : > { %417 = vst [vmem:[%s7640_s5 + $0x130] sm:$0xff] %v416_v38  ;;  %v422_v41 = vld [vmem:[%s7635_s26 + $0x248] sm:$0xff]  ;;  %419 = vst [vmem:[%s7640_s5 + $0x138] sm:$0xff] %v418_v39  ;;  %v424_v42 = vld [vmem:[%s7635_s26 + $0x250] sm:$0xff] }
  0x3c   : > { %421 = vst [vmem:[%s7640_s5 + $0x140] sm:$0xff] %v420_v40  ;;  %423 = vst [vmem:[%s7640_s5 + $0x148] sm:$0xff] %v422_v41  ;;  %v426_v43 = vld [vmem:[%s7635_s26 + $0x258] sm:$0xff]  ;;  %v428_v44 = vld [vmem:[%s7635_s26 + $0x260] sm:$0xff] }
  0x3d   : > { %425 = vst [vmem:[%s7640_s5 + $0x150] sm:$0xff] %v424_v42  ;;  %427 = vst [vmem:[%s7640_s5 + $0x158] sm:$0xff] %v426_v43  ;;  %v430_v45 = vld [vmem:[%s7635_s26 + $0x268] sm:$0xff]  ;;  %v432_v46 = vld [vmem:[%s7635_s26 + $0x270] sm:$0xff] }
  0x3e   : > { %429 = vst [vmem:[%s7640_s5 + $0x160] sm:$0xff] %v428_v44  ;;  %v434_v47 = vld [vmem:[%s7635_s26 + $0x278] sm:$0xff]  ;;  %431 = vst [vmem:[%s7640_s5 + $0x168] sm:$0xff] %v430_v45  ;;  %v436_v48 = vld [vmem:[%s7635_s26 + $0x300] sm:$0xff] }
  0x3f   : > { %433 = vst [vmem:[%s7640_s5 + $0x170] sm:$0xff] %v432_v46  ;;  %435 = vst [vmem:[%s7640_s5 + $0x178] sm:$0xff] %v434_v47  ;;  %v438_v49 = vld [vmem:[%s7635_s26 + $0x308] sm:$0xff]  ;;  %v440_v50 = vld [vmem:[%s7635_s26 + $0x310] sm:$0xff] }
  0x40   : > { %437 = vst [vmem:[%s7640_s5 + $0x180] sm:$0xff] %v436_v48  ;;  %439 = vst [vmem:[%s7640_s5 + $0x188] sm:$0xff] %v438_v49  ;;  %v442_v51 = vld [vmem:[%s7635_s26 + $0x318] sm:$0xff]  ;;  %v444_v52 = vld [vmem:[%s7635_s26 + $0x320] sm:$0xff] }
  0x41   : > { %441 = vst [vmem:[%s7640_s5 + $0x190] sm:$0xff] %v440_v50  ;;  %v446_v53 = vld [vmem:[%s7635_s26 + $0x328] sm:$0xff]  ;;  %443 = vst [vmem:[%s7640_s5 + $0x198] sm:$0xff] %v442_v51  ;;  %v448_v54 = vld [vmem:[%s7635_s26 + $0x330] sm:$0xff] }
  0x42   : > { %445 = vst [vmem:[%s7640_s5 + $0x1a0] sm:$0xff] %v444_v52  ;;  %447 = vst [vmem:[%s7640_s5 + $0x1a8] sm:$0xff] %v446_v53  ;;  %v450_v55 = vld [vmem:[%s7635_s26 + $0x338] sm:$0xff]  ;;  %v452_v56 = vld [vmem:[%s7635_s26 + $0x340] sm:$0xff] }
  0x43   : > { %449 = vst [vmem:[%s7640_s5 + $0x1b0] sm:$0xff] %v448_v54  ;;  %451 = vst [vmem:[%s7640_s5 + $0x1b8] sm:$0xff] %v450_v55  ;;  %v454_v57 = vld [vmem:[%s7635_s26 + $0x348] sm:$0xff]  ;;  %v456_v58 = vld [vmem:[%s7635_s26 + $0x350] sm:$0xff] }
  0x44   : > { %453 = vst [vmem:[%s7640_s5 + $0x1c0] sm:$0xff] %v452_v56  ;;  %v458_v59 = vld [vmem:[%s7635_s26 + $0x358] sm:$0xff]  ;;  %455 = vst [vmem:[%s7640_s5 + $0x1c8] sm:$0xff] %v454_v57  ;;  %v460_v60 = vld [vmem:[%s7635_s26 + $0x360] sm:$0xff] }
  0x45   : > { %457 = vst [vmem:[%s7640_s5 + $0x1d0] sm:$0xff] %v456_v58  ;;  %459 = vst [vmem:[%s7640_s5 + $0x1d8] sm:$0xff] %v458_v59  ;;  %v462_v61 = vld [vmem:[%s7635_s26 + $0x368] sm:$0xff]  ;;  %v464_v62 = vld [vmem:[%s7635_s26 + $0x370] sm:$0xff] }
  0x46   : > { %461 = vst [vmem:[%s7640_s5 + $0x1e0] sm:$0xff] %v460_v60  ;;  %463 = vst [vmem:[%s7640_s5 + $0x1e8] sm:$0xff] %v462_v61  ;;  %v466_v63 = vld [vmem:[%s7635_s26 + $0x378] sm:$0xff] }
  0x47   : > { %465 = vst [vmem:[%s7640_s5 + $0x1f0] sm:$0xff] %v464_v62  ;;  %467 = vst [vmem:[%s7640_s5 + $0x1f8] sm:$0xff] %v466_v63 }
  0x48 PF: > { %473 = sbr.rel (!%p7599_p3) target bundleno = 111 (0x6f), region = 62  ;;  %s475_s9 = sand.u32 (%p7599_p3), 1, %s7486_s16  }
  0x49   : > { %s5744_s10 = sshll.u32 (%p7599_p3), %s7498_s19, 4  ;;  %s5743_s11 = sshll.u32 (%p7599_p3), %s475_s9, 9 }
  0x4a   : > { %s5745_s22 = sshll.u32 (%p7599_p3), %s7502_s20, 7  ;;  %s7780_s28 = scalar_lea.vmem (%p7599_p3), [#allocation6], %s5743_s11 }
  0x4b   : > { %s480_s23 = sadd.s32 (%p7599_p3), %s5745_s22, %s5744_s10 }
  0x4c   : > { %s5746_s27 = sshll.u32 (%p7599_p3), %s480_s23, 3 }
  0x4d   : > { %s7775_s1 = scalar_lea.vmem (%p7599_p3), %s10732_s2, %s5746_s27 }
  0x4e   : > { %v636_v0 = vld [vmem:[%s7775_s1] sm:$0xff] (%p7599_p3)  ;;  %v638_v1 = vld [vmem:[%s7775_s1 + $0x8] sm:$0xff] (%p7599_p3)  ;;  %v640_v2 = vld [vmem:[%s7775_s1 + $0x10] sm:$0xff] (%p7599_p3) }
  0x4f   : > { %637 = vst [vmem:[%s7780_s28] sm:$0xff] %v636_v0  ;;  %639 = vst [vmem:[%s7780_s28 + $0x8] sm:$0xff] %v638_v1  ;;  %v642_v3 = vld [vmem:[%s7775_s1 + $0x18] sm:$0xff]  ;;  %v644_v4 = vld [vmem:[%s7775_s1 + $0x20] sm:$0xff] }
  0x50   : > { %641 = vst [vmem:[%s7780_s28 + $0x10] sm:$0xff] %v640_v2  ;;  %v646_v5 = vld [vmem:[%s7775_s1 + $0x28] sm:$0xff]  ;;  %643 = vst [vmem:[%s7780_s28 + $0x18] sm:$0xff] %v642_v3  ;;  %v648_v6 = vld [vmem:[%s7775_s1 + $0x30] sm:$0xff] }
  0x51   : > { %645 = vst [vmem:[%s7780_s28 + $0x20] sm:$0xff] %v644_v4  ;;  %647 = vst [vmem:[%s7780_s28 + $0x28] sm:$0xff] %v646_v5  ;;  %v650_v7 = vld [vmem:[%s7775_s1 + $0x38] sm:$0xff]  ;;  %v652_v8 = vld [vmem:[%s7775_s1 + $0x40] sm:$0xff] }
  0x52   : > { %649 = vst [vmem:[%s7780_s28 + $0x30] sm:$0xff] %v648_v6  ;;  %651 = vst [vmem:[%s7780_s28 + $0x38] sm:$0xff] %v650_v7  ;;  %v654_v9 = vld [vmem:[%s7775_s1 + $0x48] sm:$0xff]  ;;  %v656_v10 = vld [vmem:[%s7775_s1 + $0x50] sm:$0xff] }
  0x53   : > { %653 = vst [vmem:[%s7780_s28 + $0x40] sm:$0xff] %v652_v8  ;;  %v658_v11 = vld [vmem:[%s7775_s1 + $0x58] sm:$0xff]  ;;  %655 = vst [vmem:[%s7780_s28 + $0x48] sm:$0xff] %v654_v9  ;;  %v660_v12 = vld [vmem:[%s7775_s1 + $0x60] sm:$0xff] }
  0x54   : > { %657 = vst [vmem:[%s7780_s28 + $0x50] sm:$0xff] %v656_v10  ;;  %659 = vst [vmem:[%s7780_s28 + $0x58] sm:$0xff] %v658_v11  ;;  %v662_v13 = vld [vmem:[%s7775_s1 + $0x68] sm:$0xff]  ;;  %v664_v14 = vld [vmem:[%s7775_s1 + $0x70] sm:$0xff] }
  0x55   : > { %661 = vst [vmem:[%s7780_s28 + $0x60] sm:$0xff] %v660_v12  ;;  %663 = vst [vmem:[%s7780_s28 + $0x68] sm:$0xff] %v662_v13  ;;  %v666_v15 = vld [vmem:[%s7775_s1 + $0x78] sm:$0xff]  ;;  %v668_v16 = vld [vmem:[%s7775_s1 + $0x100] sm:$0xff] }
  0x56   : > { %665 = vst [vmem:[%s7780_s28 + $0x70] sm:$0xff] %v664_v14  ;;  %v670_v17 = vld [vmem:[%s7775_s1 + $0x108] sm:$0xff]  ;;  %667 = vst [vmem:[%s7780_s28 + $0x78] sm:$0xff] %v666_v15  ;;  %v672_v18 = vld [vmem:[%s7775_s1 + $0x110] sm:$0xff] }
  0x57   : > { %669 = vst [vmem:[%s7780_s28 + $0x80] sm:$0xff] %v668_v16  ;;  %671 = vst [vmem:[%s7780_s28 + $0x88] sm:$0xff] %v670_v17  ;;  %v674_v19 = vld [vmem:[%s7775_s1 + $0x118] sm:$0xff]  ;;  %v676_v20 = vld [vmem:[%s7775_s1 + $0x120] sm:$0xff] }
  0x58   : > { %673 = vst [vmem:[%s7780_s28 + $0x90] sm:$0xff] %v672_v18  ;;  %675 = vst [vmem:[%s7780_s28 + $0x98] sm:$0xff] %v674_v19  ;;  %v678_v21 = vld [vmem:[%s7775_s1 + $0x128] sm:$0xff]  ;;  %v680_v22 = vld [vmem:[%s7775_s1 + $0x130] sm:$0xff] }
  0x59   : > { %677 = vst [vmem:[%s7780_s28 + $0xa0] sm:$0xff] %v676_v20  ;;  %v682_v23 = vld [vmem:[%s7775_s1 + $0x138] sm:$0xff]  ;;  %679 = vst [vmem:[%s7780_s28 + $0xa8] sm:$0xff] %v678_v21  ;;  %v684_v24 = vld [vmem:[%s7775_s1 + $0x140] sm:$0xff] }
  0x5a   : > { %681 = vst [vmem:[%s7780_s28 + $0xb0] sm:$0xff] %v680_v22  ;;  %683 = vst [vmem:[%s7780_s28 + $0xb8] sm:$0xff] %v682_v23  ;;  %v686_v25 = vld [vmem:[%s7775_s1 + $0x148] sm:$0xff]  ;;  %v688_v26 = vld [vmem:[%s7775_s1 + $0x150] sm:$0xff] }
  0x5b   : > { %685 = vst [vmem:[%s7780_s28 + $0xc0] sm:$0xff] %v684_v24  ;;  %687 = vst [vmem:[%s7780_s28 + $0xc8] sm:$0xff] %v686_v25  ;;  %v690_v27 = vld [vmem:[%s7775_s1 + $0x158] sm:$0xff]  ;;  %v692_v28 = vld [vmem:[%s7775_s1 + $0x160] sm:$0xff] }
  0x5c   : > { %689 = vst [vmem:[%s7780_s28 + $0xd0] sm:$0xff] %v688_v26  ;;  %v694_v29 = vld [vmem:[%s7775_s1 + $0x168] sm:$0xff]  ;;  %691 = vst [vmem:[%s7780_s28 + $0xd8] sm:$0xff] %v690_v27  ;;  %v696_v30 = vld [vmem:[%s7775_s1 + $0x170] sm:$0xff] }
  0x5d   : > { %693 = vst [vmem:[%s7780_s28 + $0xe0] sm:$0xff] %v692_v28  ;;  %695 = vst [vmem:[%s7780_s28 + $0xe8] sm:$0xff] %v694_v29  ;;  %v698_v31 = vld [vmem:[%s7775_s1 + $0x178] sm:$0xff]  ;;  %v700_v32 = vld [vmem:[%s7775_s1 + $0x200] sm:$0xff] }
  0x5e   : > { %697 = vst [vmem:[%s7780_s28 + $0xf0] sm:$0xff] %v696_v30  ;;  %699 = vst [vmem:[%s7780_s28 + $0xf8] sm:$0xff] %v698_v31  ;;  %v702_v33 = vld [vmem:[%s7775_s1 + $0x208] sm:$0xff]  ;;  %v704_v34 = vld [vmem:[%s7775_s1 + $0x210] sm:$0xff] }
  0x5f   : > { %701 = vst [vmem:[%s7780_s28 + $0x100] sm:$0xff] %v700_v32  ;;  %v706_v35 = vld [vmem:[%s7775_s1 + $0x218] sm:$0xff]  ;;  %703 = vst [vmem:[%s7780_s28 + $0x108] sm:$0xff] %v702_v33  ;;  %v708_v36 = vld [vmem:[%s7775_s1 + $0x220] sm:$0xff] }
  0x60   : > { %705 = vst [vmem:[%s7780_s28 + $0x110] sm:$0xff] %v704_v34  ;;  %707 = vst [vmem:[%s7780_s28 + $0x118] sm:$0xff] %v706_v35  ;;  %v710_v37 = vld [vmem:[%s7775_s1 + $0x228] sm:$0xff]  ;;  %v712_v38 = vld [vmem:[%s7775_s1 + $0x230] sm:$0xff] }
  0x61   : > { %709 = vst [vmem:[%s7780_s28 + $0x120] sm:$0xff] %v708_v36  ;;  %711 = vst [vmem:[%s7780_s28 + $0x128] sm:$0xff] %v710_v37  ;;  %v714_v39 = vld [vmem:[%s7775_s1 + $0x238] sm:$0xff]  ;;  %v716_v40 = vld [vmem:[%s7775_s1 + $0x240] sm:$0xff] }
  0x62   : > { %713 = vst [vmem:[%s7780_s28 + $0x130] sm:$0xff] %v712_v38  ;;  %v718_v41 = vld [vmem:[%s7775_s1 + $0x248] sm:$0xff]  ;;  %715 = vst [vmem:[%s7780_s28 + $0x138] sm:$0xff] %v714_v39  ;;  %v720_v42 = vld [vmem:[%s7775_s1 + $0x250] sm:$0xff] }
  0x63   : > { %717 = vst [vmem:[%s7780_s28 + $0x140] sm:$0xff] %v716_v40  ;;  %719 = vst [vmem:[%s7780_s28 + $0x148] sm:$0xff] %v718_v41  ;;  %v722_v43 = vld [vmem:[%s7775_s1 + $0x258] sm:$0xff]  ;;  %v724_v44 = vld [vmem:[%s7775_s1 + $0x260] sm:$0xff] }
  0x64   : > { %721 = vst [vmem:[%s7780_s28 + $0x150] sm:$0xff] %v720_v42  ;;  %723 = vst [vmem:[%s7780_s28 + $0x158] sm:$0xff] %v722_v43  ;;  %v726_v45 = vld [vmem:[%s7775_s1 + $0x268] sm:$0xff]  ;;  %v728_v46 = vld [vmem:[%s7775_s1 + $0x270] sm:$0xff] }
  0x65   : > { %725 = vst [vmem:[%s7780_s28 + $0x160] sm:$0xff] %v724_v44  ;;  %v730_v47 = vld [vmem:[%s7775_s1 + $0x278] sm:$0xff]  ;;  %727 = vst [vmem:[%s7780_s28 + $0x168] sm:$0xff] %v726_v45  ;;  %v732_v48 = vld [vmem:[%s7775_s1 + $0x300] sm:$0xff] }
  0x66   : > { %729 = vst [vmem:[%s7780_s28 + $0x170] sm:$0xff] %v728_v46  ;;  %731 = vst [vmem:[%s7780_s28 + $0x178] sm:$0xff] %v730_v47  ;;  %v734_v49 = vld [vmem:[%s7775_s1 + $0x308] sm:$0xff]  ;;  %v736_v50 = vld [vmem:[%s7775_s1 + $0x310] sm:$0xff] }
  0x67   : > { %733 = vst [vmem:[%s7780_s28 + $0x180] sm:$0xff] %v732_v48  ;;  %735 = vst [vmem:[%s7780_s28 + $0x188] sm:$0xff] %v734_v49  ;;  %v738_v51 = vld [vmem:[%s7775_s1 + $0x318] sm:$0xff]  ;;  %v740_v52 = vld [vmem:[%s7775_s1 + $0x320] sm:$0xff] }
  0x68   : > { %737 = vst [vmem:[%s7780_s28 + $0x190] sm:$0xff] %v736_v50  ;;  %v742_v53 = vld [vmem:[%s7775_s1 + $0x328] sm:$0xff]  ;;  %739 = vst [vmem:[%s7780_s28 + $0x198] sm:$0xff] %v738_v51  ;;  %v744_v54 = vld [vmem:[%s7775_s1 + $0x330] sm:$0xff] }
  0x69   : > { %741 = vst [vmem:[%s7780_s28 + $0x1a0] sm:$0xff] %v740_v52  ;;  %743 = vst [vmem:[%s7780_s28 + $0x1a8] sm:$0xff] %v742_v53  ;;  %v746_v55 = vld [vmem:[%s7775_s1 + $0x338] sm:$0xff]  ;;  %v748_v56 = vld [vmem:[%s7775_s1 + $0x340] sm:$0xff] }
  0x6a   : > { %745 = vst [vmem:[%s7780_s28 + $0x1b0] sm:$0xff] %v744_v54  ;;  %747 = vst [vmem:[%s7780_s28 + $0x1b8] sm:$0xff] %v746_v55  ;;  %v750_v57 = vld [vmem:[%s7775_s1 + $0x348] sm:$0xff]  ;;  %v752_v58 = vld [vmem:[%s7775_s1 + $0x350] sm:$0xff] }
  0x6b   : > { %749 = vst [vmem:[%s7780_s28 + $0x1c0] sm:$0xff] %v748_v56  ;;  %v754_v59 = vld [vmem:[%s7775_s1 + $0x358] sm:$0xff]  ;;  %751 = vst [vmem:[%s7780_s28 + $0x1c8] sm:$0xff] %v750_v57  ;;  %v756_v60 = vld [vmem:[%s7775_s1 + $0x360] sm:$0xff] }
  0x6c   : > { %753 = vst [vmem:[%s7780_s28 + $0x1d0] sm:$0xff] %v752_v58  ;;  %755 = vst [vmem:[%s7780_s28 + $0x1d8] sm:$0xff] %v754_v59  ;;  %v758_v61 = vld [vmem:[%s7775_s1 + $0x368] sm:$0xff]  ;;  %v760_v62 = vld [vmem:[%s7775_s1 + $0x370] sm:$0xff] }
  0x6d   : > { %757 = vst [vmem:[%s7780_s28 + $0x1e0] sm:$0xff] %v756_v60  ;;  %759 = vst [vmem:[%s7780_s28 + $0x1e8] sm:$0xff] %v758_v61  ;;  %v762_v63 = vld [vmem:[%s7775_s1 + $0x378] sm:$0xff] }
  0x6e   : > { %761 = vst [vmem:[%s7780_s28 + $0x1f0] sm:$0xff] %v760_v62  ;;  %763 = vst [vmem:[%s7780_s28 + $0x1f8] sm:$0xff] %v762_v63 }
  0x6f PF: > { %p5747_p0 = scmp.ge.s32.totalorder %s7506_s21, 1  ;;  %p768_p1 = scmp.lt.s32.totalorder %s7506_s21, 5 }
  0x71   : > { %p769_p2 = pnand %p5747_p0, %p768_p1 }
  0x73   : > { %772 = sbr.rel (%p769_p2) target bundleno = 1676 (0x68c), region = 100 }
  0x7a   : > { %s775_s26 = sand.u32 1, %s7482_s15   ;;  %s815_s5 = sand.u32 1, %s7474_s13  }
  0x7b   : > { %s5748_s9 = sshll.u32 %s775_s26, 9  ;;  %s5750_s10 = sshll.u32 %s815_s5, 8 }
  0x7c   : > { %p819_p3 = scmp.lt.s32.totalorder %s7494_s18, 1  ;;  %s7920_s4 = scalar_lea.vmem [#allocation5], %s5748_s9 }
  0x7d   : > { %s7922_s29 = scalar_lea.vmem [#allocation6], %s5748_s9  ;;  %s7924_s28 = scalar_lea.vmem [#allocation7], %s5750_s10 }
  0x7e   : > { %s820_s1 = scalar_select %p819_p3, %s7494_s18, 1 }
  0x7f   : > { %p5753_p4 = scmp.ne.s32.totalorder %s7490_s17, 0 }
  0x80   : > { %s5888_s11 = sshll.u32 %s820_s1, 9  ;;  %vm835_vm0 = vcmask (!%p5753_p4), 7168   ;;  %vm964_vm1 = vcmask (!%p5753_p4), 523264   ;;  %v7508_v0 = vmov (!%p5753_p4), -inf   ;;  %v7509_v1 = vmov (!%p5753_p4), 0.0  }
  0x81   : > { %s7918_s27 = scalar_lea.vmem %s10730_s0, %s5888_s11  ;;  %834 = sbr.rel (%p5753_p4) target bundleno = 225 (0xe1), region = 112  ;;  %836 = vst.msk [vmem:[#allocation2] sm:$0xff] (!%p5753_p4), %vm835_vm0, %v7508_v0  ;;  %837 = vst.msk [vmem:[#allocation2 + $0x8] sm:$0xff] (!%p5753_p4), %vm835_vm0, %v7508_v0 }
  0x82   : > { %838 = vst.msk [vmem:[#allocation2 + $0x10] sm:$0xff] (!%p5753_p4), %vm835_vm0, %v7508_v0  ;;  %839 = vst.msk [vmem:[#allocation2 + $0x18] sm:$0xff] (!%p5753_p4), %vm835_vm0, %v7508_v0 }
  0x83   : > { %840 = vst.msk [vmem:[#allocation2 + $0x20] sm:$0xff] (!%p5753_p4), %vm835_vm0, %v7508_v0  ;;  %841 = vst.msk [vmem:[#allocation2 + $0x28] sm:$0xff] (!%p5753_p4), %vm835_vm0, %v7508_v0 }
  0x84   : > { %842 = vst.msk [vmem:[#allocation2 + $0x30] sm:$0xff] (!%p5753_p4), %vm835_vm0, %v7508_v0  ;;  %843 = vst.msk [vmem:[#allocation2 + $0x38] sm:$0xff] (!%p5753_p4), %vm835_vm0, %v7508_v0 }
  0x85   : > { %844 = vst.msk [vmem:[#allocation2 + $0x40] sm:$0xff] (!%p5753_p4), %vm835_vm0, %v7508_v0  ;;  %845 = vst.msk [vmem:[#allocation2 + $0x48] sm:$0xff] (!%p5753_p4), %vm835_vm0, %v7508_v0 }
  0x86   : > { %846 = vst.msk [vmem:[#allocation2 + $0x50] sm:$0xff] (!%p5753_p4), %vm835_vm0, %v7508_v0  ;;  %847 = vst.msk [vmem:[#allocation2 + $0x58] sm:$0xff] (!%p5753_p4), %vm835_vm0, %v7508_v0 }
  0x87   : > { %848 = vst.msk [vmem:[#allocation2 + $0x60] sm:$0xff] (!%p5753_p4), %vm835_vm0, %v7508_v0  ;;  %849 = vst.msk [vmem:[#allocation2 + $0x68] sm:$0xff] (!%p5753_p4), %vm835_vm0, %v7508_v0 }
  0x88   : > { %850 = vst.msk [vmem:[#allocation2 + $0x70] sm:$0xff] %vm835_vm0, %v7508_v0  ;;  %851 = vst.msk [vmem:[#allocation2 + $0x78] sm:$0xff] %vm835_vm0, %v7508_v0 }
  0x89   : > { %852 = vst.msk [vmem:[#allocation2 + $0x80] sm:$0xff] %vm835_vm0, %v7508_v0  ;;  %853 = vst.msk [vmem:[#allocation2 + $0x88] sm:$0xff] %vm835_vm0, %v7508_v0 }
  0x8a   : > { %854 = vst.msk [vmem:[#allocation2 + $0x90] sm:$0xff] %vm835_vm0, %v7508_v0  ;;  %855 = vst.msk [vmem:[#allocation2 + $0x98] sm:$0xff] %vm835_vm0, %v7508_v0 }
  0x8b   : > { %856 = vst.msk [vmem:[#allocation2 + $0xa0] sm:$0xff] %vm835_vm0, %v7508_v0  ;;  %857 = vst.msk [vmem:[#allocation2 + $0xa8] sm:$0xff] %vm835_vm0, %v7508_v0 }
  0x8c   : > { %858 = vst.msk [vmem:[#allocation2 + $0xb0] sm:$0xff] %vm835_vm0, %v7508_v0  ;;  %859 = vst.msk [vmem:[#allocation2 + $0xb8] sm:$0xff] %vm835_vm0, %v7508_v0 }
  0x8d   : > { %860 = vst.msk [vmem:[#allocation2 + $0xc0] sm:$0xff] %vm835_vm0, %v7508_v0  ;;  %861 = vst.msk [vmem:[#allocation2 + $0xc8] sm:$0xff] %vm835_vm0, %v7508_v0 }
  0x8e   : > { %862 = vst.msk [vmem:[#allocation2 + $0xd0] sm:$0xff] %vm835_vm0, %v7508_v0  ;;  %863 = vst.msk [vmem:[#allocation2 + $0xd8] sm:$0xff] %vm835_vm0, %v7508_v0 }
  0x8f   : > { %864 = vst.msk [vmem:[#allocation2 + $0xe0] sm:$0xff] %vm835_vm0, %v7508_v0  ;;  %865 = vst.msk [vmem:[#allocation2 + $0xe8] sm:$0xff] %vm835_vm0, %v7508_v0 }
  0x90   : > { %866 = vst.msk [vmem:[#allocation2 + $0xf0] sm:$0xff] %vm835_vm0, %v7508_v0  ;;  %867 = vst.msk [vmem:[#allocation2 + $0xf8] sm:$0xff] %vm835_vm0, %v7508_v0 }
  0x91   : > { %868 = vst.msk [vmem:[#allocation2 + $0x100] sm:$0xff] %vm835_vm0, %v7508_v0  ;;  %869 = vst.msk [vmem:[#allocation2 + $0x108] sm:$0xff] %vm835_vm0, %v7508_v0 }
  0x92   : > { %870 = vst.msk [vmem:[#allocation2 + $0x110] sm:$0xff] %vm835_vm0, %v7508_v0  ;;  %871 = vst.msk [vmem:[#allocation2 + $0x118] sm:$0xff] %vm835_vm0, %v7508_v0 }
  0x93   : > { %872 = vst.msk [vmem:[#allocation2 + $0x120] sm:$0xff] %vm835_vm0, %v7508_v0  ;;  %873 = vst.msk [vmem:[#allocation2 + $0x128] sm:$0xff] %vm835_vm0, %v7508_v0 }
  0x94   : > { %874 = vst.msk [vmem:[#allocation2 + $0x130] sm:$0xff] %vm835_vm0, %v7508_v0  ;;  %875 = vst.msk [vmem:[#allocation2 + $0x138] sm:$0xff] %vm835_vm0, %v7508_v0 }
  0x95   : > { %876 = vst.msk [vmem:[#allocation2 + $0x140] sm:$0xff] %vm835_vm0, %v7508_v0  ;;  %877 = vst.msk [vmem:[#allocation2 + $0x148] sm:$0xff] %vm835_vm0, %v7508_v0 }
  0x96   : > { %878 = vst.msk [vmem:[#allocation2 + $0x150] sm:$0xff] %vm835_vm0, %v7508_v0  ;;  %879 = vst.msk [vmem:[#allocation2 + $0x158] sm:$0xff] %vm835_vm0, %v7508_v0 }
  0x97   : > { %880 = vst.msk [vmem:[#allocation2 + $0x160] sm:$0xff] %vm835_vm0, %v7508_v0  ;;  %881 = vst.msk [vmem:[#allocation2 + $0x168] sm:$0xff] %vm835_vm0, %v7508_v0 }
  0x98   : > { %882 = vst.msk [vmem:[#allocation2 + $0x170] sm:$0xff] %vm835_vm0, %v7508_v0  ;;  %883 = vst.msk [vmem:[#allocation2 + $0x178] sm:$0xff] %vm835_vm0, %v7508_v0 }
  0x99   : > { %884 = vst.msk [vmem:[#allocation2 + $0x180] sm:$0xff] %vm835_vm0, %v7508_v0  ;;  %885 = vst.msk [vmem:[#allocation2 + $0x188] sm:$0xff] %vm835_vm0, %v7508_v0 }
  0x9a   : > { %886 = vst.msk [vmem:[#allocation2 + $0x190] sm:$0xff] %vm835_vm0, %v7508_v0  ;;  %887 = vst.msk [vmem:[#allocation2 + $0x198] sm:$0xff] %vm835_vm0, %v7508_v0 }
  0x9b   : > { %888 = vst.msk [vmem:[#allocation2 + $0x1a0] sm:$0xff] %vm835_vm0, %v7508_v0  ;;  %889 = vst.msk [vmem:[#allocation2 + $0x1a8] sm:$0xff] %vm835_vm0, %v7508_v0 }
  0x9c   : > { %890 = vst.msk [vmem:[#allocation2 + $0x1b0] sm:$0xff] %vm835_vm0, %v7508_v0  ;;  %891 = vst.msk [vmem:[#allocation2 + $0x1b8] sm:$0xff] %vm835_vm0, %v7508_v0 }
  0x9d   : > { %892 = vst.msk [vmem:[#allocation2 + $0x1c0] sm:$0xff] %vm835_vm0, %v7508_v0  ;;  %893 = vst.msk [vmem:[#allocation2 + $0x1c8] sm:$0xff] %vm835_vm0, %v7508_v0 }
  0x9e   : > { %894 = vst.msk [vmem:[#allocation2 + $0x1d0] sm:$0xff] %vm835_vm0, %v7508_v0  ;;  %895 = vst.msk [vmem:[#allocation2 + $0x1d8] sm:$0xff] %vm835_vm0, %v7508_v0 }
  0x9f   : > { %896 = vst.msk [vmem:[#allocation2 + $0x1e0] sm:$0xff] %vm835_vm0, %v7508_v0  ;;  %897 = vst.msk [vmem:[#allocation2 + $0x1e8] sm:$0xff] %vm835_vm0, %v7508_v0 }
  0xa0   : > { %898 = vst.msk [vmem:[#allocation2 + $0x1f0] sm:$0xff] %vm835_vm0, %v7508_v0  ;;  %899 = vst.msk [vmem:[#allocation2 + $0x1f8] sm:$0xff] %vm835_vm0, %v7508_v0 }
  0xa1   : > { %900 = vst.msk [vmem:[#allocation3] sm:$0xff] %vm835_vm0, %v7509_v1  ;;  %901 = vst.msk [vmem:[#allocation3 + $0x8] sm:$0xff] %vm835_vm0, %v7509_v1 }
  0xa2   : > { %902 = vst.msk [vmem:[#allocation3 + $0x10] sm:$0xff] %vm835_vm0, %v7509_v1  ;;  %903 = vst.msk [vmem:[#allocation3 + $0x18] sm:$0xff] %vm835_vm0, %v7509_v1 }
  0xa3   : > { %904 = vst.msk [vmem:[#allocation3 + $0x20] sm:$0xff] %vm835_vm0, %v7509_v1  ;;  %905 = vst.msk [vmem:[#allocation3 + $0x28] sm:$0xff] %vm835_vm0, %v7509_v1 }
  0xa4   : > { %906 = vst.msk [vmem:[#allocation3 + $0x30] sm:$0xff] %vm835_vm0, %v7509_v1  ;;  %907 = vst.msk [vmem:[#allocation3 + $0x38] sm:$0xff] %vm835_vm0, %v7509_v1 }
  0xa5   : > { %908 = vst.msk [vmem:[#allocation3 + $0x40] sm:$0xff] %vm835_vm0, %v7509_v1  ;;  %909 = vst.msk [vmem:[#allocation3 + $0x48] sm:$0xff] %vm835_vm0, %v7509_v1 }
  0xa6   : > { %910 = vst.msk [vmem:[#allocation3 + $0x50] sm:$0xff] %vm835_vm0, %v7509_v1  ;;  %911 = vst.msk [vmem:[#allocation3 + $0x58] sm:$0xff] %vm835_vm0, %v7509_v1 }
  0xa7   : > { %912 = vst.msk [vmem:[#allocation3 + $0x60] sm:$0xff] %vm835_vm0, %v7509_v1  ;;  %913 = vst.msk [vmem:[#allocation3 + $0x68] sm:$0xff] %vm835_vm0, %v7509_v1 }
  0xa8   : > { %914 = vst.msk [vmem:[#allocation3 + $0x70] sm:$0xff] %vm835_vm0, %v7509_v1  ;;  %915 = vst.msk [vmem:[#allocation3 + $0x78] sm:$0xff] %vm835_vm0, %v7509_v1 }
  0xa9   : > { %916 = vst.msk [vmem:[#allocation3 + $0x80] sm:$0xff] %vm835_vm0, %v7509_v1  ;;  %917 = vst.msk [vmem:[#allocation3 + $0x88] sm:$0xff] %vm835_vm0, %v7509_v1 }
  0xaa   : > { %918 = vst.msk [vmem:[#allocation3 + $0x90] sm:$0xff] %vm835_vm0, %v7509_v1  ;;  %919 = vst.msk [vmem:[#allocation3 + $0x98] sm:$0xff] %vm835_vm0, %v7509_v1 }
  0xab   : > { %920 = vst.msk [vmem:[#allocation3 + $0xa0] sm:$0xff] %vm835_vm0, %v7509_v1  ;;  %921 = vst.msk [vmem:[#allocation3 + $0xa8] sm:$0xff] %vm835_vm0, %v7509_v1 }
  0xac   : > { %922 = vst.msk [vmem:[#allocation3 + $0xb0] sm:$0xff] %vm835_vm0, %v7509_v1  ;;  %923 = vst.msk [vmem:[#allocation3 + $0xb8] sm:$0xff] %vm835_vm0, %v7509_v1 }
  0xad   : > { %924 = vst.msk [vmem:[#allocation3 + $0xc0] sm:$0xff] %vm835_vm0, %v7509_v1  ;;  %925 = vst.msk [vmem:[#allocation3 + $0xc8] sm:$0xff] %vm835_vm0, %v7509_v1 }
  0xae   : > { %926 = vst.msk [vmem:[#allocation3 + $0xd0] sm:$0xff] %vm835_vm0, %v7509_v1  ;;  %927 = vst.msk [vmem:[#allocation3 + $0xd8] sm:$0xff] %vm835_vm0, %v7509_v1 }
  0xaf   : > { %928 = vst.msk [vmem:[#allocation3 + $0xe0] sm:$0xff] %vm835_vm0, %v7509_v1  ;;  %929 = vst.msk [vmem:[#allocation3 + $0xe8] sm:$0xff] %vm835_vm0, %v7509_v1 }
  0xb0   : > { %930 = vst.msk [vmem:[#allocation3 + $0xf0] sm:$0xff] %vm835_vm0, %v7509_v1  ;;  %931 = vst.msk [vmem:[#allocation3 + $0xf8] sm:$0xff] %vm835_vm0, %v7509_v1 }
  0xb1   : > { %932 = vst.msk [vmem:[#allocation3 + $0x100] sm:$0xff] %vm835_vm0, %v7509_v1  ;;  %933 = vst.msk [vmem:[#allocation3 + $0x108] sm:$0xff] %vm835_vm0, %v7509_v1 }
  0xb2   : > { %934 = vst.msk [vmem:[#allocation3 + $0x110] sm:$0xff] %vm835_vm0, %v7509_v1  ;;  %935 = vst.msk [vmem:[#allocation3 + $0x118] sm:$0xff] %vm835_vm0, %v7509_v1 }
  0xb3   : > { %936 = vst.msk [vmem:[#allocation3 + $0x120] sm:$0xff] %vm835_vm0, %v7509_v1  ;;  %937 = vst.msk [vmem:[#allocation3 + $0x128] sm:$0xff] %vm835_vm0, %v7509_v1 }
  0xb4   : > { %938 = vst.msk [vmem:[#allocation3 + $0x130] sm:$0xff] %vm835_vm0, %v7509_v1  ;;  %939 = vst.msk [vmem:[#allocation3 + $0x138] sm:$0xff] %vm835_vm0, %v7509_v1 }
  0xb5   : > { %940 = vst.msk [vmem:[#allocation3 + $0x140] sm:$0xff] %vm835_vm0, %v7509_v1  ;;  %941 = vst.msk [vmem:[#allocation3 + $0x148] sm:$0xff] %vm835_vm0, %v7509_v1 }
  0xb6   : > { %942 = vst.msk [vmem:[#allocation3 + $0x150] sm:$0xff] %vm835_vm0, %v7509_v1  ;;  %943 = vst.msk [vmem:[#allocation3 + $0x158] sm:$0xff] %vm835_vm0, %v7509_v1 }
  0xb7   : > { %944 = vst.msk [vmem:[#allocation3 + $0x160] sm:$0xff] %vm835_vm0, %v7509_v1  ;;  %945 = vst.msk [vmem:[#allocation3 + $0x168] sm:$0xff] %vm835_vm0, %v7509_v1 }
  0xb8   : > { %946 = vst.msk [vmem:[#allocation3 + $0x170] sm:$0xff] %vm835_vm0, %v7509_v1  ;;  %947 = vst.msk [vmem:[#allocation3 + $0x178] sm:$0xff] %vm835_vm0, %v7509_v1 }
  0xb9   : > { %948 = vst.msk [vmem:[#allocation3 + $0x180] sm:$0xff] %vm835_vm0, %v7509_v1  ;;  %949 = vst.msk [vmem:[#allocation3 + $0x188] sm:$0xff] %vm835_vm0, %v7509_v1 }
  0xba   : > { %950 = vst.msk [vmem:[#allocation3 + $0x190] sm:$0xff] %vm835_vm0, %v7509_v1  ;;  %951 = vst.msk [vmem:[#allocation3 + $0x198] sm:$0xff] %vm835_vm0, %v7509_v1 }
  0xbb   : > { %952 = vst.msk [vmem:[#allocation3 + $0x1a0] sm:$0xff] %vm835_vm0, %v7509_v1  ;;  %953 = vst.msk [vmem:[#allocation3 + $0x1a8] sm:$0xff] %vm835_vm0, %v7509_v1 }
  0xbc   : > { %954 = vst.msk [vmem:[#allocation3 + $0x1b0] sm:$0xff] %vm835_vm0, %v7509_v1  ;;  %955 = vst.msk [vmem:[#allocation3 + $0x1b8] sm:$0xff] %vm835_vm0, %v7509_v1 }
  0xbd   : > { %956 = vst.msk [vmem:[#allocation3 + $0x1c0] sm:$0xff] %vm835_vm0, %v7509_v1  ;;  %957 = vst.msk [vmem:[#allocation3 + $0x1c8] sm:$0xff] %vm835_vm0, %v7509_v1 }
  0xbe   : > { %958 = vst.msk [vmem:[#allocation3 + $0x1d0] sm:$0xff] %vm835_vm0, %v7509_v1  ;;  %959 = vst.msk [vmem:[#allocation3 + $0x1d8] sm:$0xff] %vm835_vm0, %v7509_v1 }
  0xbf   : > { %960 = vst.msk [vmem:[#allocation3 + $0x1e0] sm:$0xff] %vm835_vm0, %v7509_v1  ;;  %961 = vst.msk [vmem:[#allocation3 + $0x1e8] sm:$0xff] %vm835_vm0, %v7509_v1 }
  0xc0   : > { %962 = vst.msk [vmem:[#allocation3 + $0x1f0] sm:$0xff] %vm835_vm0, %v7509_v1  ;;  %963 = vst.msk [vmem:[#allocation3 + $0x1f8] sm:$0xff] %vm835_vm0, %v7509_v1 }
  0xc1   : > { %965 = vst.msk [vmem:[#allocation4] sm:$0xff] %vm964_vm1, %v7509_v1  ;;  %966 = vst.msk [vmem:[#allocation4 + $0x8] sm:$0xff] %vm964_vm1, %v7509_v1 }
  0xc2   : > { %967 = vst.msk [vmem:[#allocation4 + $0x10] sm:$0xff] %vm964_vm1, %v7509_v1  ;;  %968 = vst.msk [vmem:[#allocation4 + $0x18] sm:$0xff] %vm964_vm1, %v7509_v1 }
  0xc3   : > { %969 = vst.msk [vmem:[#allocation4 + $0x20] sm:$0xff] %vm964_vm1, %v7509_v1  ;;  %970 = vst.msk [vmem:[#allocation4 + $0x28] sm:$0xff] %vm964_vm1, %v7509_v1 }
  0xc4   : > { %971 = vst.msk [vmem:[#allocation4 + $0x30] sm:$0xff] %vm964_vm1, %v7509_v1  ;;  %972 = vst.msk [vmem:[#allocation4 + $0x38] sm:$0xff] %vm964_vm1, %v7509_v1 }
  0xc5   : > { %973 = vst.msk [vmem:[#allocation4 + $0x40] sm:$0xff] %vm964_vm1, %v7509_v1  ;;  %974 = vst.msk [vmem:[#allocation4 + $0x48] sm:$0xff] %vm964_vm1, %v7509_v1 }
  0xc6   : > { %975 = vst.msk [vmem:[#allocation4 + $0x50] sm:$0xff] %vm964_vm1, %v7509_v1  ;;  %976 = vst.msk [vmem:[#allocation4 + $0x58] sm:$0xff] %vm964_vm1, %v7509_v1 }
  0xc7   : > { %977 = vst.msk [vmem:[#allocation4 + $0x60] sm:$0xff] %vm964_vm1, %v7509_v1  ;;  %978 = vst.msk [vmem:[#allocation4 + $0x68] sm:$0xff] %vm964_vm1, %v7509_v1 }
  0xc8   : > { %979 = vst.msk [vmem:[#allocation4 + $0x70] sm:$0xff] %vm964_vm1, %v7509_v1  ;;  %980 = vst.msk [vmem:[#allocation4 + $0x78] sm:$0xff] %vm964_vm1, %v7509_v1 }
  0xc9   : > { %981 = vst.msk [vmem:[#allocation4 + $0x80] sm:$0xff] %vm964_vm1, %v7509_v1  ;;  %982 = vst.msk [vmem:[#allocation4 + $0x88] sm:$0xff] %vm964_vm1, %v7509_v1 }
  0xca   : > { %983 = vst.msk [vmem:[#allocation4 + $0x90] sm:$0xff] %vm964_vm1, %v7509_v1  ;;  %984 = vst.msk [vmem:[#allocation4 + $0x98] sm:$0xff] %vm964_vm1, %v7509_v1 }
  0xcb   : > { %985 = vst.msk [vmem:[#allocation4 + $0xa0] sm:$0xff] %vm964_vm1, %v7509_v1  ;;  %986 = vst.msk [vmem:[#allocation4 + $0xa8] sm:$0xff] %vm964_vm1, %v7509_v1 }
  0xcc   : > { %987 = vst.msk [vmem:[#allocation4 + $0xb0] sm:$0xff] %vm964_vm1, %v7509_v1  ;;  %988 = vst.msk [vmem:[#allocation4 + $0xb8] sm:$0xff] %vm964_vm1, %v7509_v1 }
  0xcd   : > { %989 = vst.msk [vmem:[#allocation4 + $0xc0] sm:$0xff] %vm964_vm1, %v7509_v1  ;;  %990 = vst.msk [vmem:[#allocation4 + $0xc8] sm:$0xff] %vm964_vm1, %v7509_v1 }
  0xce   : > { %991 = vst.msk [vmem:[#allocation4 + $0xd0] sm:$0xff] %vm964_vm1, %v7509_v1  ;;  %992 = vst.msk [vmem:[#allocation4 + $0xd8] sm:$0xff] %vm964_vm1, %v7509_v1 }
  0xcf   : > { %993 = vst.msk [vmem:[#allocation4 + $0xe0] sm:$0xff] %vm964_vm1, %v7509_v1  ;;  %994 = vst.msk [vmem:[#allocation4 + $0xe8] sm:$0xff] %vm964_vm1, %v7509_v1 }
  0xd0   : > { %995 = vst.msk [vmem:[#allocation4 + $0xf0] sm:$0xff] %vm964_vm1, %v7509_v1  ;;  %996 = vst.msk [vmem:[#allocation4 + $0xf8] sm:$0xff] %vm964_vm1, %v7509_v1 }
  0xd1   : > { %997 = vst.msk [vmem:[#allocation4 + $0x100] sm:$0xff] %vm964_vm1, %v7509_v1  ;;  %998 = vst.msk [vmem:[#allocation4 + $0x108] sm:$0xff] %vm964_vm1, %v7509_v1 }
  0xd2   : > { %999 = vst.msk [vmem:[#allocation4 + $0x110] sm:$0xff] %vm964_vm1, %v7509_v1  ;;  %1000 = vst.msk [vmem:[#allocation4 + $0x118] sm:$0xff] %vm964_vm1, %v7509_v1 }
  0xd3   : > { %1001 = vst.msk [vmem:[#allocation4 + $0x120] sm:$0xff] %vm964_vm1, %v7509_v1  ;;  %1002 = vst.msk [vmem:[#allocation4 + $0x128] sm:$0xff] %vm964_vm1, %v7509_v1 }
  0xd4   : > { %1003 = vst.msk [vmem:[#allocation4 + $0x130] sm:$0xff] %vm964_vm1, %v7509_v1  ;;  %1004 = vst.msk [vmem:[#allocation4 + $0x138] sm:$0xff] %vm964_vm1, %v7509_v1 }
  0xd5   : > { %1005 = vst.msk [vmem:[#allocation4 + $0x140] sm:$0xff] %vm964_vm1, %v7509_v1  ;;  %1006 = vst.msk [vmem:[#allocation4 + $0x148] sm:$0xff] %vm964_vm1, %v7509_v1 }
  0xd6   : > { %1007 = vst.msk [vmem:[#allocation4 + $0x150] sm:$0xff] %vm964_vm1, %v7509_v1  ;;  %1008 = vst.msk [vmem:[#allocation4 + $0x158] sm:$0xff] %vm964_vm1, %v7509_v1 }
  0xd7   : > { %1009 = vst.msk [vmem:[#allocation4 + $0x160] sm:$0xff] %vm964_vm1, %v7509_v1  ;;  %1010 = vst.msk [vmem:[#allocation4 + $0x168] sm:$0xff] %vm964_vm1, %v7509_v1 }
  0xd8   : > { %1011 = vst.msk [vmem:[#allocation4 + $0x170] sm:$0xff] %vm964_vm1, %v7509_v1  ;;  %1012 = vst.msk [vmem:[#allocation4 + $0x178] sm:$0xff] %vm964_vm1, %v7509_v1 }
  0xd9   : > { %1013 = vst.msk [vmem:[#allocation4 + $0x180] sm:$0xff] %vm964_vm1, %v7509_v1  ;;  %1014 = vst.msk [vmem:[#allocation4 + $0x188] sm:$0xff] %vm964_vm1, %v7509_v1 }
  0xda   : > { %1015 = vst.msk [vmem:[#allocation4 + $0x190] sm:$0xff] %vm964_vm1, %v7509_v1  ;;  %1016 = vst.msk [vmem:[#allocation4 + $0x198] sm:$0xff] %vm964_vm1, %v7509_v1 }
  0xdb   : > { %1017 = vst.msk [vmem:[#allocation4 + $0x1a0] sm:$0xff] %vm964_vm1, %v7509_v1  ;;  %1018 = vst.msk [vmem:[#allocation4 + $0x1a8] sm:$0xff] %vm964_vm1, %v7509_v1 }
  0xdc   : > { %1019 = vst.msk [vmem:[#allocation4 + $0x1b0] sm:$0xff] %vm964_vm1, %v7509_v1  ;;  %1020 = vst.msk [vmem:[#allocation4 + $0x1b8] sm:$0xff] %vm964_vm1, %v7509_v1 }
  0xdd   : > { %1021 = vst.msk [vmem:[#allocation4 + $0x1c0] sm:$0xff] %vm964_vm1, %v7509_v1  ;;  %1022 = vst.msk [vmem:[#allocation4 + $0x1c8] sm:$0xff] %vm964_vm1, %v7509_v1 }
  0xde   : > { %1023 = vst.msk [vmem:[#allocation4 + $0x1d0] sm:$0xff] %vm964_vm1, %v7509_v1  ;;  %1024 = vst.msk [vmem:[#allocation4 + $0x1d8] sm:$0xff] %vm964_vm1, %v7509_v1 }
  0xdf   : > { %1025 = vst.msk [vmem:[#allocation4 + $0x1e0] sm:$0xff] %vm964_vm1, %v7509_v1  ;;  %1026 = vst.msk [vmem:[#allocation4 + $0x1e8] sm:$0xff] %vm964_vm1, %v7509_v1 }
  0xe0   : > { %1027 = vst.msk [vmem:[#allocation4 + $0x1f0] sm:$0xff] %vm964_vm1, %v7509_v1  ;;  %1028 = vst.msk [vmem:[#allocation4 + $0x1f8] sm:$0xff] %vm964_vm1, %v7509_v1 }
  0xe1 PF: > { %v1157_v2 = vld [vmem:[%s7920_s4] sm:$0xff]  ;;  %v1158_v3 = vld [vmem:[%s7920_s4 + $0x8] sm:$0xff]  ;;  %vm1285_vm2 = vcmask 523264   ;;  %v1159_v8 = vld [vmem:[%s7920_s4 + $0x10] sm:$0xff]  ;;  %vm3530_vm4 = vcmask 7168   ;;  %p5882_p5 = scmp.ne.s32.totalorder %s7490_s17, 1 }
  0xe2   : > { %v1173_v4 = vld [vmem:[%s7920_s4 + $0x80] sm:$0xff]  ;;  %v6594_v5 = vpack.c.bf16 %v1158_v3, %v1157_v2  ;;  %vm8316_vm3 = vmpackc.low %vm1285_vm2, %vm1285_vm2  ;;  %v1174_v7 = vld [vmem:[%s7920_s4 + $0x88] sm:$0xff]  ;;  %s7512_s15 = smov (!%p5882_p5), 64   ;;  %vm5252_vm5 = vcmask (!%p5882_p5), 1048064  }
  0xe3   : > { %v6642_v9 = vpack.c.bf16 %v1174_v7, %v1173_v4  ;;  %v1160_v10 = vld [vmem:[%s7920_s4 + $0x18] sm:$0xff]  ;;  %v1175_v11 = vld [vmem:[%s7920_s4 + $0x90] sm:$0xff]  ;;  %v1161_v15 = vld [vmem:[%s7920_s4 + $0x20] sm:$0xff] }
  0xe4   : > { %v1176_v12 = vld [vmem:[%s7920_s4 + $0x98] sm:$0xff]  ;;  %6596 = vmatprep.subr.msk.bf16.mxu0 %vm8316_vm3, %v6594_v5  ;;  %v6600_v13 = vpack.c.bf16 %v1160_v10, %v1159_v8  ;;  %v1162_v16 = vld [vmem:[%s7920_s4 + $0x28] sm:$0xff]  ;;  %v1177_v17 = vld [vmem:[%s7920_s4 + $0xa0] sm:$0xff] }
  0xe5   : > { %v6648_v14 = vpack.c.bf16 %v1176_v12, %v1175_v11  ;;  %6644 = vmatprep.subr.msk.bf16.mxu1 %vm8316_vm3, %v6642_v9  ;;  %6599 = vmatpush3.bf16.xpose.msk.msra.mxu0 %vm8316_vm3, %v6594_v5  ;;  %v1178_v18 = vld [vmem:[%s7920_s4 + $0xa8] sm:$0xff]  ;;  %v6606_v19 = vpack.c.bf16 %v1162_v16, %v1161_v15  ;;  %v1029_v21 = vld [vmem:[%s7918_s27] sm:$0xff]  ;;  %v1163_v25 = vld [vmem:[%s7920_s4 + $0x30] sm:$0xff] }
  0xe6   : > { %6647 = vmatpush3.bf16.xpose.msk.msra.mxu1 %vm8316_vm3, %v6642_v9  ;;  %6602 = vmatprep.subr.msk.bf16.mxu0 %vm8316_vm3, %v6600_v13  ;;  %v6654_v20 = vpack.c.bf16 %v1178_v18, %v1177_v17  ;;  %v1045_v22 = vld [vmem:[%s7918_s27 + $0x80] sm:$0xff]  ;;  %v1093_v23 = vmul.f32 0.125, %v1029_v21  ;;  %v1164_v26 = vld [vmem:[%s7920_s4 + $0x38] sm:$0xff]  ;;  %v1179_v27 = vld [vmem:[%s7920_s4 + $0xb0] sm:$0xff] }
  0xe7   : > { %6650 = vmatprep.subr.msk.bf16.mxu1 %vm8316_vm3, %v6648_v14  ;;  %v1109_v24 = vmul.f32 0.125, %v1045_v22  ;;  %v1180_v28 = vld [vmem:[%s7920_s4 + $0xb8] sm:$0xff]  ;;  %v6612_v29 = vpack.c.bf16 %v1164_v26, %v1163_v25  ;;  %v1165_v31 = vld [vmem:[%s7920_s4 + $0x40] sm:$0xff]  ;;  %v1166_v32 = vld [vmem:[%s7920_s4 + $0x48] sm:$0xff] }
  0xe8   : > { %6178 = vmatprep.mubr.msk.f32.mxu0 %vm1285_vm2, %v1093_v23  ;;  %v6660_v30 = vpack.c.bf16 %v1180_v28, %v1179_v27  ;;  %v1181_v33 = vld [vmem:[%s7920_s4 + $0xc0] sm:$0xff]  ;;  %v1182_v34 = vld [vmem:[%s7920_s4 + $0xc8] sm:$0xff]  ;;  %v6618_v35 = vpack.c.bf16 %v1166_v32, %v1165_v31  ;;  %v1167_v37 = vld [vmem:[%s7920_s4 + $0x50] sm:$0xff] }
  0xe9   : > { %6234 = vmatprep.mubr.msk.f32.mxu1 %vm1285_vm2, %v1109_v24  ;;  %v6666_v36 = vpack.c.bf16 %v1182_v34, %v1181_v33  ;;  %v1168_v38 = vld [vmem:[%s7920_s4 + $0x58] sm:$0xff]  ;;  %v1183_v39 = vld [vmem:[%s7920_s4 + $0xd0] sm:$0xff]  ;;  %v1169_v43 = vld [vmem:[%s7920_s4 + $0x60] sm:$0xff] }
  0xea   : > { %v1184_v40 = vld [vmem:[%s7920_s4 + $0xd8] sm:$0xff]  ;;  %v6624_v41 = vpack.c.bf16 %v1168_v38, %v1167_v37  ;;  %v1170_v44 = vld [vmem:[%s7920_s4 + $0x68] sm:$0xff]  ;;  %v1185_v45 = vld [vmem:[%s7920_s4 + $0xe0] sm:$0xff] }
  0xeb   : > { %v6672_v42 = vpack.c.bf16 %v1184_v40, %v1183_v39  ;;  %v1186_v46 = vld [vmem:[%s7920_s4 + $0xe8] sm:$0xff]  ;;  %v6630_v47 = vpack.c.bf16 %v1170_v44, %v1169_v43  ;;  %v1171_v49 = vld [vmem:[%s7920_s4 + $0x70] sm:$0xff]  ;;  %v1172_v50 = vld [vmem:[%s7920_s4 + $0x78] sm:$0xff] }
  0xec   : > { %v6678_v48 = vpack.c.bf16 %v1186_v46, %v1185_v45  ;;  %v1187_v51 = vld [vmem:[%s7920_s4 + $0xf0] sm:$0xff]  ;;  %v1188_v52 = vld [vmem:[%s7920_s4 + $0xf8] sm:$0xff]  ;;  %v6636_v53 = vpack.c.bf16 %v1172_v50, %v1171_v49  ;;  %v1189_v55 = vld [vmem:[%s7920_s4 + $0x100] sm:$0xff] }
  0xed   : > { %6605 = vmatpush3.bf16.xpose.msk.msra.mxu0 %vm8316_vm3, %v6600_v13  ;;  %v6684_v54 = vpack.c.bf16 %v1188_v52, %v1187_v51  ;;  %v1190_v56 = vld [vmem:[%s7920_s4 + $0x108] sm:$0xff]  ;;  %v1205_v57 = vld [vmem:[%s7920_s4 + $0x180] sm:$0xff]  ;;  %v1031_v63 = vld [vmem:[%s7918_s27 + $0x10] sm:$0xff] }
  0xee   : > { %6653 = vmatpush3.bf16.xpose.msk.msra.mxu1 %vm8316_vm3, %v6648_v14  ;;  %6608 = vmatprep.subr.msk.bf16.mxu0 %vm8316_vm3, %v6606_v19  ;;  %v1206_v58 = vld [vmem:[%s7920_s4 + $0x188] sm:$0xff]  ;;  %v6690_v59 = vpack.c.bf16 %v1190_v56, %v1189_v55  ;;  %v1047_v1 = vld [vmem:[%s7918_s27 + $0x90] sm:$0xff]  ;;  %v1192_v3 = vld [vmem:[%s7920_s4 + $0x118] sm:$0xff]  ;;  %v1095_v9 = vmul.f32 0.125, %v1031_v63 }
  0xef   : > { %6656 = vmatprep.subr.msk.bf16.mxu1 %vm8316_vm3, %v6654_v20  ;;  %v6738_v60 = vpack.c.bf16 %v1206_v58, %v1205_v57  ;;  %v1030_v61 = vld [vmem:[%s7918_s27 + $0x8] sm:$0xff]  ;;  %v1191_v2 = vld [vmem:[%s7920_s4 + $0x110] sm:$0xff]  ;;  %v1032_v5 = vld [vmem:[%s7918_s27 + $0x18] sm:$0xff]  ;;  %v1111_v12 = vmul.f32 0.125, %v1047_v1 }
  0xf0   : > { %v1046_v62 = vld [vmem:[%s7918_s27 + $0x88] sm:$0xff]  ;;  %v1094_v0 = vmul.f32 0.125, %v1030_v61  ;;  %v1207_v7 = vld [vmem:[%s7920_s4 + $0x190] sm:$0xff]  ;;  %v1208_v8 = vld [vmem:[%s7920_s4 + $0x198] sm:$0xff]  ;;  %v6696_v13 = vpack.c.bf16 %v1192_v3, %v1191_v2  ;;  %v1096_v15 = vmul.f32 0.125, %v1032_v5 }
  0xf1   : > { %v1110_v4 = vmul.f32 0.125, %v1046_v62  ;;  %v1048_v10 = vld [vmem:[%s7918_s27 + $0x98] sm:$0xff]  ;;  %v1033_v11 = vld [vmem:[%s7918_s27 + $0x20] sm:$0xff]  ;;  %v6744_v16 = vpack.c.bf16 %v1208_v8, %v1207_v7  ;;  %v1050_v21 = vld [vmem:[%s7918_s27 + $0xa8] sm:$0xff] }
  0xf2   : > { %v1049_v14 = vld [vmem:[%s7918_s27 + $0xa0] sm:$0xff]  ;;  %v1112_v17 = vmul.f32 0.125, %v1048_v10  ;;  %v1097_v18 = vmul.f32 0.125, %v1033_v11  ;;  %v1194_v23 = vld [vmem:[%s7920_s4 + $0x128] sm:$0xff]  ;;  %v1035_v27 = vld [vmem:[%s7918_s27 + $0x30] sm:$0xff]  ;;  %v1114_v28 = vmul.f32 0.125, %v1050_v21 }
  0xf3   : > { %v1193_v22 = vld [vmem:[%s7920_s4 + $0x120] sm:$0xff]  ;;  %v1210_v26 = vld [vmem:[%s7920_s4 + $0x1a8] sm:$0xff]  ;;  %v1052_v32 = vld [vmem:[%s7918_s27 + $0xb8] sm:$0xff] }
  0xf4   : > { %v1209_v25 = vld [vmem:[%s7920_s4 + $0x1a0] sm:$0xff]  ;;  %v6702_v31 = vpack.c.bf16 %v1194_v23, %v1193_v22  ;;  %v1116_v39 = vmul.f32 0.125, %v1052_v32  ;;  %v1054_v43 = vld [vmem:[%s7918_s27 + $0xc8] sm:$0xff]  ;;  %v1195_v44 = vld [vmem:[%s7920_s4 + $0x130] sm:$0xff] }
  0xf5   : > { %6611 = vmatpush3.bf16.xpose.msk.msra.mxu0 %vm8316_vm3, %v6606_v19  ;;  %v1034_v19 = vld [vmem:[%s7918_s27 + $0x28] sm:$0xff]  ;;  %v1037_v33 = vld [vmem:[%s7918_s27 + $0x40] sm:$0xff]  ;;  %v6750_v34 = vpack.c.bf16 %v1210_v26, %v1209_v25  ;;  %v1196_v45 = vld [vmem:[%s7920_s4 + $0x138] sm:$0xff]  ;;  %v1118_v50 = vmul.f32 0.125, %v1054_v43 }
  0xf6   : > { %6659 = vmatpush3.bf16.xpose.msk.msra.mxu1 %vm8316_vm3, %v6654_v20  ;;  %6614 = vmatprep.subr.msk.bf16.mxu0 %vm8316_vm3, %v6612_v29  ;;  %v1113_v20 = vmul.f32 0.125, %v1049_v14  ;;  %v1098_v24 = vmul.f32 0.125, %v1034_v19  ;;  %v1101_v40 = vmul.f32 0.125, %v1037_v33  ;;  %v1211_v46 = vld [vmem:[%s7920_s4 + $0x1b0] sm:$0xff]  ;;  %v1040_v51 = vld [vmem:[%s7918_s27 + $0x58] sm:$0xff]  ;;  %v1041_v55 = vld [vmem:[%s7918_s27 + $0x60] sm:$0xff] }
  0xf7   : > { %6662 = vmatprep.subr.msk.bf16.mxu1 %vm8316_vm3, %v6660_v30  ;;  %v1039_v49 = vld [vmem:[%s7918_s27 + $0x50] sm:$0xff]  ;;  %v1057_v58 = vld [vmem:[%s7918_s27 + $0xe0] sm:$0xff]  ;;  %v1105_v62 = vmul.f32 0.125, %v1041_v55  ;;  %v1042_v63 = vld [vmem:[%s7918_s27 + $0x68] sm:$0xff] }
  0xf8   : > { %v1055_v52 = vld [vmem:[%s7918_s27 + $0xd0] sm:$0xff]  ;;  %v1103_v57 = vmul.f32 0.125, %v1039_v49  ;;  %v1058_v1 = vld [vmem:[%s7918_s27 + $0xe8] sm:$0xff]  ;;  %v1197_v2 = vld [vmem:[%s7920_s4 + $0x140] sm:$0xff]  ;;  %v1106_v7 = vmul.f32 0.125, %v1042_v63 }
  0xf9   : > { %v1198_v3 = vld [vmem:[%s7920_s4 + $0x148] sm:$0xff]  ;;  %v1043_v8 = vld [vmem:[%s7918_s27 + $0x70] sm:$0xff]  ;;  %v1044_v10 = vld [vmem:[%s7918_s27 + $0x78] sm:$0xff] }
  0xfa   : > { %v1214_v5 = vld [vmem:[%s7920_s4 + $0x1c8] sm:$0xff]  ;;  %v1059_v11 = vld [vmem:[%s7918_s27 + $0xf0] sm:$0xff]  ;;  %v1061_v14 = vld [vmem:[%s7918_s27 + $0x100] sm:$0xff] }
  0xfb   : > { %v1123_v19 = vmul.f32 0.125, %v1059_v11  ;;  %v1125_v21 = vmul.f32 0.125, %v1061_v14  ;;  %v1199_v23 = vld [vmem:[%s7920_s4 + $0x150] sm:$0xff]  ;;  %v1216_v26 = vld [vmem:[%s7920_s4 + $0x1d8] sm:$0xff]  ;;  %v1218_v32 = vld [vmem:[%s7920_s4 + $0x1e8] sm:$0xff] }
  0xfc   : > { %v1215_v25 = vld [vmem:[%s7920_s4 + $0x1d0] sm:$0xff]  ;;  %v1066_v55 = vld [vmem:[%s7918_s27 + $0x128] sm:$0xff]  ;;  %v1068_v63 = vld [vmem:[%s7918_s27 + $0x138] sm:$0xff] }
  0xfd   : > { %6617 = vmatpush3.bf16.xpose.msk.msra.mxu0 %vm8316_vm3, %v6612_v29  ;;  %v1036_v29 = vld [vmem:[%s7918_s27 + $0x38] sm:$0xff]  ;;  %v1063_v43 = vld [vmem:[%s7918_s27 + $0x110] sm:$0xff] }
  0xfe   : > { %6665 = vmatpush3.bf16.xpose.msk.msra.mxu1 %vm8316_vm3, %v6660_v30  ;;  %6620 = vmatprep.subr.msk.bf16.mxu0 %vm8316_vm3, %v6618_v35  ;;  %v1051_v30 = vld [vmem:[%s7918_s27 + $0xb0] sm:$0xff]  ;;  %v1100_v37 = vmul.f32 0.125, %v1036_v29  ;;  %v1201_v29 = vld [vmem:[%s7920_s4 + $0x160] sm:$0xff] }
  0xff   : > { %6668 = vmatprep.subr.msk.bf16.mxu1 %vm8316_vm3, %v6666_v36  ;;  %v1115_v38 = vmul.f32 0.125, %v1051_v30  ;;  %v1202_v30 = vld [vmem:[%s7920_s4 + $0x168] sm:$0xff]  ;;  %v1071_v11 = vld [vmem:[%s7918_s27 + $0x150] sm:$0xff] }
 0x100   : > { %v6726_v33 = vpack.c.bf16 %v1202_v30, %v1201_v29 }
 0x105   : > { %6623 = vmatpush3.bf16.xpose.msk.msra.mxu0 %vm8316_vm3, %v6618_v35  ;;  %v1099_v35 = vmul.f32 0.125, %v1035_v27 }
 0x106   : > { %6671 = vmatpush3.bf16.xpose.msk.msra.mxu1 %vm8316_vm3, %v6666_v36  ;;  %6626 = vmatprep.subr.msk.bf16.mxu0 %vm8316_vm3, %v6624_v41  ;;  %v1053_v36 = vld [vmem:[%s7918_s27 + $0xc0] sm:$0xff] }
 0x107   : > { %6674 = vmatprep.subr.msk.bf16.mxu1 %vm8316_vm3, %v6672_v42 }
 0x10d   : > { %6629 = vmatpush3.bf16.xpose.msk.msra.mxu0 %vm8316_vm3, %v6624_v41  ;;  %v1038_v41 = vld [vmem:[%s7918_s27 + $0x48] sm:$0xff] }
 0x10e   : > { %6677 = vmatpush3.bf16.xpose.msk.msra.mxu1 %vm8316_vm3, %v6672_v42  ;;  %6632 = vmatprep.subr.msk.bf16.mxu0 %vm8316_vm3, %v6630_v47  ;;  %v1117_v42 = vmul.f32 0.125, %v1053_v36  ;;  %v1204_v36 = vld [vmem:[%s7920_s4 + $0x178] sm:$0xff] }
 0x10f   : > { %6680 = vmatprep.subr.msk.bf16.mxu1 %vm8316_vm3, %v6678_v48 }
 0x115   : > { %6635 = vmatpush3.bf16.xpose.msk.msra.mxu0 %vm8316_vm3, %v6630_v47  ;;  %v1212_v47 = vld [vmem:[%s7920_s4 + $0x1b8] sm:$0xff] }
 0x116   : > { %6683 = vmatpush3.bf16.xpose.msk.msra.mxu1 %vm8316_vm3, %v6678_v48  ;;  %6638 = vmatprep.subr.msk.bf16.mxu0 %vm8316_vm3, %v6636_v53  ;;  %v1102_v48 = vmul.f32 0.125, %v1038_v41  ;;  %v6756_v56 = vpack.c.bf16 %v1212_v47, %v1211_v46  ;;  %v1062_v41 = vld [vmem:[%s7918_s27 + $0x108] sm:$0xff]  ;;  %v1127_v47 = vmul.f32 0.125, %v1063_v43 }
 0x117   : > { %6686 = vmatprep.subr.msk.bf16.mxu1 %vm8316_vm3, %v6684_v54 }
 0x11d   : > { %6641 = vmatpush3.bf16.xpose.msk.msra.mxu0 %vm8316_vm3, %v6636_v53  ;;  %v6708_v53 = vpack.c.bf16 %v1196_v45, %v1195_v44  ;;  %v1079_v44 = vld [vmem:[%s7918_s27 + $0x190] sm:$0xff]  ;;  %v1126_v45 = vmul.f32 0.125, %v1062_v41 }
 0x11e   : > { %6689 = vmatpush3.bf16.xpose.msk.msra.mxu1 %vm8316_vm3, %v6684_v54  ;;  %6692 = vmatprep.subr.msk.bf16.mxu0 %vm8316_vm3, %v6690_v59  ;;  %v1056_v54 = vld [vmem:[%s7918_s27 + $0xd8] sm:$0xff]  ;;  %v1143_v49 = vmul.f32 0.125, %v1079_v44 }
 0x11f   : > { %6740 = vmatprep.subr.msk.bf16.mxu1 %vm8316_vm3, %v6738_v60  ;;  %v1120_v61 = vmul.f32 0.125, %v1056_v54 }
 0x124   : > { %6179 = vmatmul.mubr.msk.f32.vlgmr.msra.gmra.mrb[0].mxu0 %vm1285_vm2, %v1094_v0  ;;  %v1121_v0 = vmul.f32 0.125, %v1057_v58  ;;  %v1067_v58 = vld [vmem:[%s7918_s27 + $0x130] sm:$0xff] }
 0x125   : > { %6235 = vmatmul.mubr.msk.f32.vlgmr.msra.gmra.mrb[0].mxu1 %vm1285_vm2, %v1110_v4  ;;  %6695 = vmatpush3.bf16.xpose.msk.msra.mxu0 %vm8316_vm3, %v6690_v59  ;;  %v1104_v59 = vmul.f32 0.125, %v1040_v51  ;;  %v1213_v4 = vld [vmem:[%s7920_s4 + $0x1c0] sm:$0xff] }
 0x126   : > { %6181 = vmatprep.mubr.msk.f32.mxu0 %vm1285_vm2, %v1095_v9  ;;  %6743 = vmatpush3.bf16.xpose.msk.msra.mxu1 %vm8316_vm3, %v6738_v60  ;;  %v1119_v60 = vmul.f32 0.125, %v1055_v52  ;;  %v1122_v9 = vmul.f32 0.125, %v1058_v1  ;;  %v1065_v51 = vld [vmem:[%s7918_s27 + $0x120] sm:$0xff]  ;;  %v1084_v1 = vld [vmem:[%s7918_s27 + $0x1b8] sm:$0xff] }
 0x127   : > { %6237 = vmatprep.mubr.msk.f32.mxu1 %vm1285_vm2, %v1111_v12  ;;  %6698 = vmatprep.subr.msk.bf16.mxu0 %vm8316_vm3, %v6696_v13  ;;  %v6714_v12 = vpack.c.bf16 %v1198_v3, %v1197_v2  ;;  %v1081_v52 = vld [vmem:[%s7918_s27 + $0x1a0] sm:$0xff]  ;;  %v1129_v54 = vmul.f32 0.125, %v1065_v51 }
 0x128   : > { %6182 = vmatmul.mubr.msk.f32.gmra.mrb[2].mxu0 %vm1285_vm2, %v1096_v15  ;;  %6746 = vmatprep.subr.msk.bf16.mxu1 %vm8316_vm3, %v6744_v16  ;;  %v6762_v15 = vpack.c.bf16 %v1214_v5, %v1213_v4  ;;  %v1069_v2 = vld [vmem:[%s7918_s27 + $0x140] sm:$0xff]  ;;  %v1132_v4 = vmul.f32 0.125, %v1068_v63  ;;  %v1148_v5 = vmul.f32 0.125, %v1084_v1 }
 0x129   : > { %6238 = vmatmul.mubr.msk.f32.gmra.mrb[2].mxu1 %vm1285_vm2, %v1112_v17  ;;  %6184 = vmatprep.mubr.msk.f32.mxu0 %vm1285_vm2, %v1097_v18  ;;  %v1077_v17 = vld [vmem:[%s7918_s27 + $0x180] sm:$0xff]  ;;  %v1108_v18 = vmul.f32 0.125, %v1044_v10  ;;  %v1086_v10 = vld [vmem:[%s7918_s27 + $0x1c8] sm:$0xff] }
 0x12a   : > { %6240 = vmatprep.mubr.msk.f32.mxu1 %vm1285_vm2, %v1113_v20  ;;  %v1141_v22 = vmul.f32 0.125, %v1077_v17  ;;  %v1085_v3 = vld [vmem:[%s7918_s27 + $0x1c0] sm:$0xff]  ;;  %v1150_v14 = vmul.f32 0.125, %v1086_v10 }
 0x12c   : > { %6185 = vmatmul.mubr.msk.f32.gmra.mrb[4].mxu0 %vm1285_vm2, %v1098_v24  ;;  %v1200_v24 = vld [vmem:[%s7920_s4 + $0x158] sm:$0xff] }
 0x12d   : > { %6701 = vmatpush3.bf16.xpose.msk.msra.mxu0 %vm8316_vm3, %v6696_v13  ;;  %6241 = vmatmul.mubr.msk.f32.gmra.mrb[4].mxu1 %vm1285_vm2, %v1114_v28  ;;  %v1060_v13 = vld [vmem:[%s7918_s27 + $0xf8] sm:$0xff]  ;;  %v6720_v27 = vpack.c.bf16 %v1200_v24, %v1199_v23  ;;  %v6768_v28 = vpack.c.bf16 %v1216_v26, %v1215_v25  ;;  %v1074_v24 = vld [vmem:[%s7918_s27 + $0x168] sm:$0xff] }
 0x12e   : > { %6749 = vmatpush3.bf16.xpose.msk.msra.mxu1 %vm8316_vm3, %v6744_v16  ;;  %6704 = vmatprep.subr.msk.bf16.mxu0 %vm8316_vm3, %v6702_v31  ;;  %v1107_v16 = vmul.f32 0.125, %v1043_v8  ;;  %v1124_v20 = vmul.f32 0.125, %v1060_v13  ;;  %v1070_v8 = vld [vmem:[%s7918_s27 + $0x148] sm:$0xff]  ;;  %v1138_v29 = vmul.f32 0.125, %v1074_v24 }
 0x12f   : > { %6752 = vmatprep.subr.msk.bf16.mxu1 %vm8316_vm3, %v6750_v34  ;;  %6187 = vmatprep.mubr.msk.f32.mxu0 %vm1285_vm2, %v1099_v35  ;;  %v1203_v35 = vld [vmem:[%s7920_s4 + $0x170] sm:$0xff]  ;;  %v1134_v13 = vmul.f32 0.125, %v1070_v8  ;;  %v1090_v26 = vld [vmem:[%s7918_s27 + $0x1e8] sm:$0xff] }
 0x130   : > { %6188 = vmatmul.mubr.msk.f32.gmra.mrb[6].mxu0 %vm1285_vm2, %v1100_v37  ;;  %6243 = vmatprep.mubr.msk.f32.mxu1 %vm1285_vm2, %v1115_v38  ;;  %v1219_v37 = vld [vmem:[%s7920_s4 + $0x1f0] sm:$0xff]  ;;  %v1220_v38 = vld [vmem:[%s7920_s4 + $0x1f8] sm:$0xff]  ;;  %v1154_v30 = vmul.f32 0.125, %v1090_v26 }
 0x131   : > { %6244 = vmatmul.mubr.msk.f32.gmra.mrb[6].mxu1 %vm1285_vm2, %v1116_v39  ;;  %6190 = vmatprep.mubr.msk.f32.mxu0 %vm1285_vm2, %v1101_v40  ;;  %v6732_v39 = vpack.c.bf16 %v1204_v36, %v1203_v35  ;;  %v6780_v40 = vpack.c.bf16 %v1220_v38, %v1219_v37 }
 0x132   : > { %6246 = vmatprep.mubr.msk.f32.mxu1 %vm1285_vm2, %v1117_v42  ;;  %v1078_v42 = vld [vmem:[%s7918_s27 + $0x188] sm:$0xff] }
 0x133   : > { %v1142_v46 = vmul.f32 0.125, %v1078_v42 }
 0x134   : > { %6191 = vmatmul.mubr.msk.f32.gmra.mrb[8].mxu0 %vm1285_vm2, %v1102_v48  ;;  %v1064_v48 = vld [vmem:[%s7918_s27 + $0x118] sm:$0xff] }
 0x135   : > { %6707 = vmatpush3.bf16.xpose.msk.msra.mxu0 %vm8316_vm3, %v6702_v31  ;;  %6247 = vmatmul.mubr.msk.f32.gmra.mrb[8].mxu1 %vm1285_vm2, %v1118_v50  ;;  %v1217_v31 = vld [vmem:[%s7920_s4 + $0x1e0] sm:$0xff]  ;;  %v1080_v50 = vld [vmem:[%s7918_s27 + $0x198] sm:$0xff] }
 0x136   : > { %6755 = vmatpush3.bf16.xpose.msk.msra.mxu1 %vm8316_vm3, %v6750_v34  ;;  %6710 = vmatprep.subr.msk.bf16.mxu0 %vm8316_vm3, %v6708_v53  ;;  %v6774_v34 = vpack.c.bf16 %v1218_v32, %v1217_v31  ;;  %v1144_v6 = vmul.f32 0.125, %v1080_v50  ;;  %v1076_v32 = vld [vmem:[%s7918_s27 + $0x178] sm:$0xff] }
 0x137   : > { %6758 = vmatprep.subr.msk.bf16.mxu1 %vm8316_vm3, %v6756_v56  ;;  %6193 = vmatprep.mubr.msk.f32.mxu0 %vm1285_vm2, %v1103_v57  ;;  %v1082_v57 = vld [vmem:[%s7918_s27 + $0x1a8] sm:$0xff]  ;;  %v1140_v35 = vmul.f32 0.125, %v1076_v32 }
 0x138   : > { %6194 = vmatmul.mubr.msk.f32.gmra.mrb[10].mxu0 %vm1285_vm2, %v1104_v59  ;;  %6249 = vmatprep.mubr.msk.f32.mxu1 %vm1285_vm2, %v1119_v60  ;;  %v1083_v59 = vld [vmem:[%s7918_s27 + $0x1b0] sm:$0xff]  ;;  %v1130_v60 = vmul.f32 0.125, %v1066_v55  ;;  %v7510_v55 = vmov 0  }
 0x139   : > { %6250 = vmatmul.mubr.msk.f32.gmra.mrb[10].mxu1 %vm1285_vm2, %v1120_v61  ;;  %6196 = vmatprep.mubr.msk.f32.mxu0 %vm1285_vm2, %v1105_v62  ;;  %v1146_v61 = vmul.f32 0.125, %v1082_v57  ;;  %v1131_v62 = vmul.f32 0.125, %v1067_v58 }
 0x13a   : > { %6252 = vmatprep.mubr.msk.f32.mxu1 %vm1285_vm2, %v1121_v0  ;;  %v1147_v0 = vmul.f32 0.125, %v1083_v59  ;;  %7008 = vset.pattern.permute.xlu1 %v7510_v55 }
 0x13b   : > { %7009 = vset.pattern.permute.xlu0 %v7510_v55 }
 0x13c   : > { %6197 = vmatmul.mubr.msk.f32.gmra.mrb[12].mxu0 %vm1285_vm2, %v1106_v7  ;;  %v1133_v7 = vmul.f32 0.125, %v1069_v2 }
 0x13d   : > { %6713 = vmatpush3.bf16.xpose.msk.msra.mxu0 %vm8316_vm3, %v6708_v53  ;;  %6253 = vmatmul.mubr.msk.f32.gmra.mrb[12].mxu1 %vm1285_vm2, %v1122_v9  ;;  %v1128_v53 = vmul.f32 0.125, %v1064_v48  ;;  %v1149_v9 = vmul.f32 0.125, %v1085_v3 }
 0x13e   : > { %6761 = vmatpush3.bf16.xpose.msk.msra.mxu1 %vm8316_vm3, %v6756_v56  ;;  %6716 = vmatprep.subr.msk.bf16.mxu0 %vm8316_vm3, %v6714_v12  ;;  %v1145_v56 = vmul.f32 0.125, %v1081_v52 }
 0x13f   : > { %6764 = vmatprep.subr.msk.bf16.mxu1 %vm8316_vm3, %v6762_v15  ;;  %6199 = vmatprep.mubr.msk.f32.mxu0 %vm1285_vm2, %v1107_v16  ;;  %v1072_v16 = vld [vmem:[%s7918_s27 + $0x158] sm:$0xff] }
 0x140   : > { %6200 = vmatmul.mubr.msk.f32.gmra.mrb[14].mxu0 %vm1285_vm2, %v1108_v18  ;;  %6255 = vmatprep.mubr.msk.f32.mxu1 %vm1285_vm2, %v1123_v19  ;;  %v1088_v18 = vld [vmem:[%s7918_s27 + $0x1d8] sm:$0xff]  ;;  %v1073_v19 = vld [vmem:[%s7918_s27 + $0x160] sm:$0xff] }
 0x141   : > { %6256 = vmatmul.mubr.msk.f32.gmra.mrb[14].mxu1 %vm1285_vm2, %v1124_v20  ;;  %6290 = vmatprep.mubr.msk.f32.mxu0 %vm1285_vm2, %v1125_v21  ;;  %v1089_v20 = vld [vmem:[%s7918_s27 + $0x1e0] sm:$0xff]  ;;  %v1136_v21 = vmul.f32 0.125, %v1072_v16  ;;  %v1137_v23 = vmul.f32 0.125, %v1073_v19 }
 0x142   : > { %6346 = vmatprep.mubr.msk.f32.mxu1 %vm1285_vm2, %v1141_v22  ;;  %v1152_v22 = vmul.f32 0.125, %v1088_v18  ;;  %v1153_v25 = vmul.f32 0.125, %v1089_v20 }
 0x145   : > { %6719 = vmatpush3.bf16.xpose.msk.msra.mxu0 %vm8316_vm3, %v6714_v12  ;;  %v1087_v12 = vld [vmem:[%s7918_s27 + $0x1d0] sm:$0xff] }
 0x146   : > { %6767 = vmatpush3.bf16.xpose.msk.msra.mxu1 %vm8316_vm3, %v6762_v15  ;;  %6722 = vmatprep.subr.msk.bf16.mxu0 %vm8316_vm3, %v6720_v27  ;;  %v1135_v15 = vmul.f32 0.125, %v1071_v11  ;;  %v1151_v17 = vmul.f32 0.125, %v1087_v12 }
 0x147   : > { %6770 = vmatprep.subr.msk.bf16.mxu1 %vm8316_vm3, %v6768_v28 }
 0x14d   : > { %6725 = vmatpush3.bf16.xpose.msk.msra.mxu0 %vm8316_vm3, %v6720_v27  ;;  %v1075_v27 = vld [vmem:[%s7918_s27 + $0x170] sm:$0xff] }
 0x14e   : > { %6773 = vmatpush3.bf16.xpose.msk.msra.mxu1 %vm8316_vm3, %v6768_v28  ;;  %6728 = vmatprep.subr.msk.bf16.mxu0 %vm8316_vm3, %v6726_v33  ;;  %v1091_v28 = vld [vmem:[%s7918_s27 + $0x1f0] sm:$0xff]  ;;  %v1139_v31 = vmul.f32 0.125, %v1075_v27 }
 0x14f   : > { %6776 = vmatprep.subr.msk.bf16.mxu1 %vm8316_vm3, %v6774_v34 }
 0x155   : > { %6731 = vmatpush3.bf16.xpose.msk.msra.mxu0 %vm8316_vm3, %v6726_v33  ;;  %v1155_v33 = vmul.f32 0.125, %v1091_v28 }
 0x156   : > { %6779 = vmatpush3.bf16.xpose.msk.msra.mxu1 %vm8316_vm3, %v6774_v34  ;;  %6734 = vmatprep.subr.msk.bf16.mxu0 %vm8316_vm3, %v6732_v39  ;;  %v1092_v34 = vld [vmem:[%s7918_s27 + $0x1f8] sm:$0xff] }
 0x157   : > { %6782 = vmatprep.subr.msk.bf16.mxu1 %vm8316_vm3, %v6780_v40  ;;  %v1156_v36 = vmul.f32 0.125, %v1092_v34 }
 0x15d   : > { %6737 = vmatpush3.bf16.xpose.msk.msra.mxu0 %vm8316_vm3, %v6732_v39 }
 0x15e   : > { %6785 = vmatpush3.bf16.xpose.msk.msra.mxu1 %vm8316_vm3, %v6780_v40 }
 0x164   : > { %6291 = vmatmul.mubr.msk.f32.vlgmr.msra.gmra.mrb[16].mxu0 %vm1285_vm2, %v1126_v45 }
 0x165   : > { %6347 = vmatmul.mubr.msk.f32.vlgmr.msra.gmra.mrb[16].mxu1 %vm1285_vm2, %v1142_v46  ;;  %6293 = vmatprep.mubr.msk.f32.mxu0 %vm1285_vm2, %v1127_v47 }
 0x166   : > { %6349 = vmatprep.mubr.msk.f32.mxu1 %vm1285_vm2, %v1143_v49 }
 0x168   : > { %6294 = vmatmul.mubr.msk.f32.gmra.mrb[18].mxu0 %vm1285_vm2, %v1128_v53 }
 0x169   : > { %6350 = vmatmul.mubr.msk.f32.gmra.mrb[18].mxu1 %vm1285_vm2, %v1144_v6  ;;  %6296 = vmatprep.mubr.msk.f32.mxu0 %vm1285_vm2, %v1129_v54 }
 0x16a   : > { %6352 = vmatprep.mubr.msk.f32.mxu1 %vm1285_vm2, %v1145_v56 }
 0x16c   : > { %6297 = vmatmul.mubr.msk.f32.gmra.mrb[20].mxu0 %vm1285_vm2, %v1130_v60 }
 0x16d   : > { %6353 = vmatmul.mubr.msk.f32.gmra.mrb[20].mxu1 %vm1285_vm2, %v1146_v61  ;;  %6299 = vmatprep.mubr.msk.f32.mxu0 %vm1285_vm2, %v1131_v62 }
 0x16e   : > { %6355 = vmatprep.mubr.msk.f32.mxu1 %vm1285_vm2, %v1147_v0 }
 0x170   : > { %6300 = vmatmul.mubr.msk.f32.gmra.mrb[22].mxu0 %vm1285_vm2, %v1132_v4 }
 0x171   : > { %6356 = vmatmul.mubr.msk.f32.gmra.mrb[22].mxu1 %vm1285_vm2, %v1148_v5  ;;  %6302 = vmatprep.mubr.msk.f32.mxu0 %vm1285_vm2, %v1133_v7 }
 0x172   : > { %6358 = vmatprep.mubr.msk.f32.mxu1 %vm1285_vm2, %v1149_v9 }
 0x174   : > { %6303 = vmatmul.mubr.msk.f32.gmra.mrb[24].mxu0 %vm1285_vm2, %v1134_v13 }
 0x175   : > { %6359 = vmatmul.mubr.msk.f32.gmra.mrb[24].mxu1 %vm1285_vm2, %v1150_v14  ;;  %6305 = vmatprep.mubr.msk.f32.mxu0 %vm1285_vm2, %v1135_v15 }
 0x176   : > { %6361 = vmatprep.mubr.msk.f32.mxu1 %vm1285_vm2, %v1151_v17 }
 0x178   : > { %6306 = vmatmul.mubr.msk.f32.gmra.mrb[26].mxu0 %vm1285_vm2, %v1136_v21 }
 0x179   : > { %6362 = vmatmul.mubr.msk.f32.gmra.mrb[26].mxu1 %vm1285_vm2, %v1152_v22  ;;  %6308 = vmatprep.mubr.msk.f32.mxu0 %vm1285_vm2, %v1137_v23 }
 0x17a   : > { %6364 = vmatprep.mubr.msk.f32.mxu1 %vm1285_vm2, %v1153_v25 }
 0x17c   : > { %6309 = vmatmul.mubr.msk.f32.gmra.mrb[28].mxu0 %vm1285_vm2, %v1138_v29 }
 0x17d   : > { %6365 = vmatmul.mubr.msk.f32.gmra.mrb[28].mxu1 %vm1285_vm2, %v1154_v30  ;;  %6311 = vmatprep.mubr.msk.f32.mxu0 %vm1285_vm2, %v1139_v31 }
 0x17e   : > { %6367 = vmatprep.mubr.msk.f32.mxu1 %vm1285_vm2, %v1155_v33 }
 0x180   : > { %6312 = vmatmul.mubr.msk.f32.gmra.mrb[30].mxu0 %vm1285_vm2, %v1140_v35 }
 0x181   : > { %6368 = vmatmul.mubr.msk.f32.gmra.mrb[30].mxu1 %vm1285_vm2, %v1156_v36 }
 0x1f7   : > { %v8637_v37 = vpop.f32.mrb[0].mxu0 }
 0x1f8   : > { %v8639_v38 = vpop.f32.mrb[0].mxu1  ;;  %2316 = vmax.xlane.f32.xlu0 %v8637_v37  ;;  %v8642_v39 = vpop.f32.mrb[1].mxu0 }
 0x1f9   : > { %2348 = vmax.xlane.f32.xlu1 %v8639_v38  ;;  %v8645_v40 = vpop.f32.mrb[1].mxu1 }
 0x1fb   : > { %v8647_v41 = vpop.f32.mrb[2].mxu0 }
 0x1fc   : > { %2314 = vmax.xlane.f32.xlu0 %v8642_v39  ;;  %v8650_v42 = vpop.f32.mrb[3].mxu0  ;;  %v8652_v43 = vpop.f32.mrb[2].mxu1 }
 0x1fd   : > { %2320 = vmax.xlane.f32.xlu1 %v8647_v41  ;;  %v8655_v44 = vpop.f32.mrb[3].mxu1 }
 0x1ff   : > { %v8657_v45 = vpop.f32.mrb[4].mxu0 }
 0x200   : > { %2346 = vmax.xlane.f32.xlu0 %v8645_v40  ;;  %v8660_v46 = vpop.f32.mrb[5].mxu0  ;;  %v8662_v47 = vpop.f32.mrb[4].mxu1 }
 0x201   : > { %10890 = vst [vmem:[#allocation10_spill] sm:$0xff] %v8660_v46  ;;  %10891 = vst [vmem:[#allocation11_spill] sm:$0xff] %v8662_v47  ;;  %2352 = vmax.xlane.f32.xlu1 %v8652_v43  ;;  %v8665_v48 = vpop.f32.mrb[5].mxu1 }
 0x202   : > { %10892 = vst [vmem:[#allocation12_spill] sm:$0xff] %v8665_v48 }
 0x203   : > { %v8667_v49 = vpop.f32.mrb[6].mxu0 }
 0x204   : > { %10893 = vst [vmem:[#allocation13_spill] sm:$0xff] %v8667_v49  ;;  %2350 = vmax.xlane.f32.xlu0 %v8655_v44  ;;  %v8670_v50 = vpop.f32.mrb[7].mxu0  ;;  %v8672_v51 = vpop.f32.mrb[6].mxu1 }
 0x205   : > { %10894 = vst [vmem:[#allocation14_spill] sm:$0xff] %v8670_v50  ;;  %10895 = vst [vmem:[#allocation15_spill] sm:$0xff] %v8672_v51  ;;  %2318 = vmax.xlane.f32.xlu1 %v8650_v42  ;;  %v8675_v52 = vpop.f32.mrb[7].mxu1 }
 0x206   : > { %10896 = vst [vmem:[#allocation16_spill] sm:$0xff] %v8675_v52 }
 0x207   : > { %v8677_v53 = vpop.f32.mrb[8].mxu0 }
 0x208   : > { %10897 = vst [vmem:[#allocation17_spill] sm:$0xff] %v8677_v53  ;;  %2322 = vmax.xlane.f32.xlu0 %v8660_v46  ;;  %v8680_v6 = vpop.f32.mrb[9].mxu0  ;;  %v8682_v54 = vpop.f32.mrb[8].mxu1 }
 0x209   : > { %10898 = vst [vmem:[#allocation18_spill] sm:$0xff] %v8680_v6  ;;  %10899 = vst [vmem:[#allocation19_spill] sm:$0xff] %v8682_v54  ;;  %2324 = vmax.xlane.f32.xlu1 %v8657_v45  ;;  %v8685_v56 = vpop.f32.mrb[9].mxu1 }
 0x20a   : > { %10900 = vst [vmem:[#allocation20_spill] sm:$0xff] %v8685_v56 }
 0x20b   : > { %v8687_v57 = vpop.f32.mrb[10].mxu0 }
 0x20c   : > { %10901 = vst [vmem:[#allocation21_spill] sm:$0xff] %v8687_v57  ;;  %2354 = vmax.xlane.f32.xlu0 %v8665_v48  ;;  %v8690_v58 = vpop.f32.mrb[11].mxu0  ;;  %v8692_v59 = vpop.f32.mrb[10].mxu1 }
 0x20d   : > { %10902 = vst [vmem:[#allocation22_spill] sm:$0xff] %v8690_v58  ;;  %10903 = vst [vmem:[#allocation23_spill] sm:$0xff] %v8692_v59  ;;  %2356 = vmax.xlane.f32.xlu1 %v8662_v47  ;;  %v8695_v60 = vpop.f32.mrb[11].mxu1 }
 0x20e   : > { %10904 = vst [vmem:[#allocation24_spill] sm:$0xff] %v8695_v60 }
 0x20f   : > { %v8697_v61 = vpop.f32.mrb[12].mxu0 }
 0x210   : > { %10905 = vst [vmem:[#allocation25_spill] sm:$0xff] %v8697_v61  ;;  %2326 = vmax.xlane.f32.xlu0 %v8670_v50  ;;  %v8700_v62 = vpop.f32.mrb[13].mxu0  ;;  %v8702_v63 = vpop.f32.mrb[12].mxu1 }
 0x211   : > { %10906 = vst [vmem:[#allocation26_spill] sm:$0xff] %v8700_v62  ;;  %10907 = vst [vmem:[#allocation27_spill] sm:$0xff] %v8702_v63  ;;  %2328 = vmax.xlane.f32.xlu1 %v8667_v49  ;;  %v8705_v0 = vpop.f32.mrb[13].mxu1 }
 0x212   : > { %10908 = vst [vmem:[#allocation28_spill] sm:$0xff] %v8705_v0 }
 0x213   : > { %v8707_v1 = vpop.f32.mrb[14].mxu0 }
 0x214   : > { %10909 = vst [vmem:[#allocation29_spill] sm:$0xff] %v8707_v1  ;;  %2358 = vmax.xlane.f32.xlu0 %v8675_v52  ;;  %v8710_v2 = vpop.f32.mrb[15].mxu0  ;;  %v8712_v3 = vpop.f32.mrb[14].mxu1 }
 0x215   : > { %10910 = vst [vmem:[#allocation30_spill] sm:$0xff] %v8710_v2  ;;  %10911 = vst [vmem:[#allocation31_spill] sm:$0xff] %v8712_v3  ;;  %2360 = vmax.xlane.f32.xlu1 %v8672_v51  ;;  %v8715_v4 = vpop.f32.mrb[15].mxu1 }
 0x216   : > { %10912 = vst [vmem:[#allocation32_spill] sm:$0xff] %v8715_v4 }
 0x218   : > { %2330 = vmax.xlane.f32.xlu0 %v8680_v6  ;;  %v9089_v6 = vld [vmem:[#allocation2 + $0xe0] sm:$0xff] }
 0x219   : > { %2332 = vmax.xlane.f32.xlu1 %v8677_v53 }
 0x21c   : > { %2362 = vmax.xlane.f32.xlu0 %v8685_v56 }
 0x21d   : > { %2364 = vmax.xlane.f32.xlu1 %v8682_v54 }
 0x220   : > { %2334 = vmax.xlane.f32.xlu0 %v8690_v58 }
 0x221   : > { %2336 = vmax.xlane.f32.xlu1 %v8687_v57 }
 0x224   : > { %2366 = vmax.xlane.f32.xlu0 %v8695_v60 }
 0x225   : > { %2368 = vmax.xlane.f32.xlu1 %v8692_v59  ;;  %v9027_v59 = vld [vmem:[#allocation2 + $0x50] sm:$0xff] }
 0x228   : > { %2338 = vmax.xlane.f32.xlu0 %v8700_v62  ;;  %v9003_v62 = vld [vmem:[#allocation2 + $0xc0] sm:$0xff] }
 0x229   : > { %2340 = vmax.xlane.f32.xlu1 %v8697_v61 }
 0x22c   : > { %2370 = vmax.xlane.f32.xlu0 %v8705_v0 }
 0x22d   : > { %2372 = vmax.xlane.f32.xlu1 %v8702_v63 }
 0x230   : > { %2342 = vmax.xlane.f32.xlu0 %v8710_v2 }
 0x231   : > { %2344 = vmax.xlane.f32.xlu1 %v8707_v1 }
 0x234   : > { %2374 = vmax.xlane.f32.xlu0 %v8715_v4 }
 0x235   : > { %2376 = vmax.xlane.f32.xlu1 %v8712_v3  ;;  %v8950_v3 = vld [vmem:[#allocation2 + $0x30] sm:$0xff] }
 0x237   : > { %v8733_v5 = vpop.f32.mrb[16].mxu0 }
 0x238   : > { %10913 = vst [vmem:[#allocation33_spill] sm:$0xff] %v8733_v5  ;;  %v8735_v7 = vpop.f32.mrb[17].mxu0  ;;  %v8737_v8 = vpop.f32.mrb[16].mxu1 }
 0x239   : > { %10914 = vst [vmem:[#allocation34_spill] sm:$0xff] %v8735_v7  ;;  %10915 = vst [vmem:[#allocation35_spill] sm:$0xff] %v8737_v8  ;;  %2378 = vmax.xlane.f32.xlu0 %v8735_v7  ;;  %2380 = vmax.xlane.f32.xlu1 %v8733_v5  ;;  %v8741_v9 = vpop.f32.mrb[17].mxu1  ;;  %v1252_v5 = vld [vmem:[%s7922_s29 + $0xf8] sm:$0xff] }
 0x23a   : > { %10916 = vst [vmem:[#allocation36_spill] sm:$0xff] %v8741_v9 }
 0x23b   : > { %v8743_v10 = vpop.f32.mrb[18].mxu0 }
 0x23c   : > { %10917 = vst [vmem:[#allocation37_spill] sm:$0xff] %v8743_v10  ;;  %v8745_v11 = vpop.f32.mrb[19].mxu0  ;;  %v8747_v12 = vpop.f32.mrb[18].mxu1 }
 0x23d   : > { %10918 = vst [vmem:[#allocation38_spill] sm:$0xff] %v8745_v11  ;;  %10919 = vst [vmem:[#allocation39_spill] sm:$0xff] %v8747_v12  ;;  %2410 = vmax.xlane.f32.xlu0 %v8741_v9  ;;  %2412 = vmax.xlane.f32.xlu1 %v8737_v8  ;;  %v8751_v13 = vpop.f32.mrb[19].mxu1  ;;  %v1250_v9 = vld [vmem:[%s7922_s29 + $0xe8] sm:$0xff] }
 0x23e   : > { %10920 = vst [vmem:[#allocation40_spill] sm:$0xff] %v8751_v13 }
 0x23f   : > { %v8753_v14 = vpop.f32.mrb[20].mxu0 }
 0x240   : > { %10921 = vst [vmem:[#allocation41_spill] sm:$0xff] %v8753_v14  ;;  %v8755_v15 = vpop.f32.mrb[21].mxu0  ;;  %v8757_v16 = vpop.f32.mrb[20].mxu1 }
 0x241   : > { %10922 = vst [vmem:[#allocation42_spill] sm:$0xff] %v8755_v15  ;;  %10923 = vst [vmem:[#allocation43_spill] sm:$0xff] %v8757_v16  ;;  %2382 = vmax.xlane.f32.xlu0 %v8745_v11  ;;  %2384 = vmax.xlane.f32.xlu1 %v8743_v10  ;;  %v8761_v17 = vpop.f32.mrb[21].mxu1  ;;  %v1249_v10 = vld [vmem:[%s7922_s29 + $0xe0] sm:$0xff] }
 0x242   : > { %10924 = vst [vmem:[#allocation44_spill] sm:$0xff] %v8761_v17  ;;  %v6842_v7 = vpack.c.bf16 %v1250_v9, %v1249_v10 }
 0x243   : > { %v8763_v18 = vpop.f32.mrb[22].mxu0 }
 0x244   : > { %10925 = vst [vmem:[#allocation45_spill] sm:$0xff] %v8763_v18  ;;  %v8765_v19 = vpop.f32.mrb[23].mxu0  ;;  %v8767_v20 = vpop.f32.mrb[22].mxu1 }
 0x245   : > { %10926 = vst [vmem:[#allocation46_spill] sm:$0xff] %v8765_v19  ;;  %10927 = vst [vmem:[#allocation47_spill] sm:$0xff] %v8767_v20  ;;  %2414 = vmax.xlane.f32.xlu0 %v8751_v13  ;;  %2416 = vmax.xlane.f32.xlu1 %v8747_v12  ;;  %v8771_v21 = vpop.f32.mrb[23].mxu1  ;;  %v8910_v12 = vld [vmem:[#allocation2 + $0x20] sm:$0xff] }
 0x246   : > { %10928 = vst [vmem:[#allocation48_spill] sm:$0xff] %v8771_v21 }
 0x247   : > { %v8773_v22 = vpop.f32.mrb[24].mxu0 }
 0x248   : > { %10929 = vst [vmem:[#allocation49_spill] sm:$0xff] %v8773_v22  ;;  %v8775_v23 = vpop.f32.mrb[25].mxu0  ;;  %v8777_v24 = vpop.f32.mrb[24].mxu1 }
 0x249   : > { %10930 = vst [vmem:[#allocation50_spill] sm:$0xff] %v8775_v23  ;;  %10931 = vst [vmem:[#allocation51_spill] sm:$0xff] %v8777_v24  ;;  %2386 = vmax.xlane.f32.xlu0 %v8755_v15  ;;  %2388 = vmax.xlane.f32.xlu1 %v8753_v14  ;;  %v8781_v25 = vpop.f32.mrb[25].mxu1  ;;  %v1247_v15 = vld [vmem:[%s7922_s29 + $0xd0] sm:$0xff]  ;;  %v1248_v14 = vld [vmem:[%s7922_s29 + $0xd8] sm:$0xff] }
 0x24a   : > { %10932 = vst [vmem:[#allocation52_spill] sm:$0xff] %v8781_v25 }
 0x24b   : > { %v8783_v26 = vpop.f32.mrb[26].mxu0 }
 0x24c   : > { %10933 = vst [vmem:[#allocation53_spill] sm:$0xff] %v8783_v26  ;;  %v8785_v27 = vpop.f32.mrb[27].mxu0  ;;  %v8787_v28 = vpop.f32.mrb[26].mxu1 }
 0x24d   : > { %10934 = vst [vmem:[#allocation54_spill] sm:$0xff] %v8785_v27  ;;  %10935 = vst [vmem:[#allocation55_spill] sm:$0xff] %v8787_v28  ;;  %2418 = vmax.xlane.f32.xlu0 %v8761_v17  ;;  %2420 = vmax.xlane.f32.xlu1 %v8757_v16  ;;  %v8791_v29 = vpop.f32.mrb[27].mxu1  ;;  %v8890_v16 = vld [vmem:[#allocation2 + $0x90] sm:$0xff] }
 0x24e   : > { %10936 = vst [vmem:[#allocation56_spill] sm:$0xff] %v8791_v29 }
 0x24f   : > { %v8793_v30 = vpop.f32.mrb[28].mxu0 }
 0x250   : > { %10937 = vst [vmem:[#allocation57_spill] sm:$0xff] %v8793_v30  ;;  %v8795_v31 = vpop.f32.mrb[29].mxu0  ;;  %v8797_v32 = vpop.f32.mrb[28].mxu1 }
 0x251   : > { %10938 = vst [vmem:[#allocation58_spill] sm:$0xff] %v8795_v31  ;;  %10939 = vst [vmem:[#allocation59_spill] sm:$0xff] %v8797_v32  ;;  %2390 = vmax.xlane.f32.xlu0 %v8765_v19  ;;  %2392 = vmax.xlane.f32.xlu1 %v8763_v18  ;;  %v8801_v33 = vpop.f32.mrb[29].mxu1  ;;  %v1246_v18 = vld [vmem:[%s7922_s29 + $0xc8] sm:$0xff] }
 0x252   : > { %10940 = vst [vmem:[#allocation60_spill] sm:$0xff] %v8801_v33 }
 0x253   : > { %v8803_v34 = vpop.f32.mrb[30].mxu0 }
 0x254   : > { %10941 = vst [vmem:[#allocation61_spill] sm:$0xff] %v8803_v34  ;;  %v8805_v35 = vpop.f32.mrb[31].mxu0  ;;  %v8807_v36 = vpop.f32.mrb[30].mxu1 }
 0x255   : > { %10942 = vst [vmem:[#allocation62_spill] sm:$0xff] %v8805_v35  ;;  %10943 = vst [vmem:[#allocation63_spill] sm:$0xff] %v8807_v36  ;;  %2422 = vmax.xlane.f32.xlu0 %v8771_v21  ;;  %2424 = vmax.xlane.f32.xlu1 %v8767_v20  ;;  %v8811_v55 = vpop.f32.mrb[31].mxu1 }
 0x256   : > { %10944 = vst [vmem:[#allocation64_spill] sm:$0xff] %v8811_v55 }
 0x259   : > { %2394 = vmax.xlane.f32.xlu0 %v8775_v23  ;;  %2396 = vmax.xlane.f32.xlu1 %v8773_v22  ;;  %v1243_v23 = vld [vmem:[%s7922_s29 + $0xb0] sm:$0xff]  ;;  %v1244_v22 = vld [vmem:[%s7922_s29 + $0xb8] sm:$0xff] }
 0x25a   : > { %v6830_v20 = vpack.c.bf16 %v1244_v22, %v1243_v23  ;;  %v1245_v23 = vld [vmem:[%s7922_s29 + $0xc0] sm:$0xff] }
 0x25d   : > { %2426 = vmax.xlane.f32.xlu0 %v8781_v25  ;;  %2428 = vmax.xlane.f32.xlu1 %v8777_v24  ;;  %v1242_v24 = vld [vmem:[%s7922_s29 + $0xa8] sm:$0xff] }
 0x261   : > { %2398 = vmax.xlane.f32.xlu0 %v8785_v27  ;;  %2400 = vmax.xlane.f32.xlu1 %v8783_v26  ;;  %v1238_v27 = vld [vmem:[%s7922_s29 + $0x88] sm:$0xff] }
 0x265   : > { %2430 = vmax.xlane.f32.xlu0 %v8791_v29  ;;  %2432 = vmax.xlane.f32.xlu1 %v8787_v28  ;;  %v1221_v29 = vld [vmem:[%s7922_s29] sm:$0xff] }
 0x269   : > { %2402 = vmax.xlane.f32.xlu0 %v8795_v31  ;;  %2404 = vmax.xlane.f32.xlu1 %v8793_v30  ;;  %v1222_v31 = vld [vmem:[%s7922_s29 + $0x8] sm:$0xff]  ;;  %v1237_v30 = vld [vmem:[%s7922_s29 + $0x80] sm:$0xff] }
 0x26a   : > { %v6786_v28 = vpack.c.bf16 %v1222_v31, %v1221_v29  ;;  %v6818_v26 = vpack.c.bf16 %v1238_v27, %v1237_v30  ;;  %v8839_v29 = vld [vmem:[#allocation2 + $0x88] sm:$0xff] }
 0x26b   : > { %v1226_v30 = vld [vmem:[%s7922_s29 + $0x28] sm:$0xff] }
 0x26c   : > { %6787 = vmatprep.subr.bf16.mxu0 %v6786_v28  ;;  %6819 = vmatprep.subr.bf16.mxu1 %v6818_v26 }
 0x26d   : > { %2434 = vmax.xlane.f32.xlu0 %v8801_v33  ;;  %2436 = vmax.xlane.f32.xlu1 %v8797_v32  ;;  %v1224_v33 = vld [vmem:[%s7922_s29 + $0x18] sm:$0xff]  ;;  %v1239_v32 = vld [vmem:[%s7922_s29 + $0x90] sm:$0xff] }
 0x26e   : > { %6789 = vmatpush3.bf16.msra.mxu0 %v6786_v28  ;;  %6821 = vmatpush3.bf16.msra.mxu1 %v6818_v26  ;;  %v1225_v28 = vld [vmem:[%s7922_s29 + $0x20] sm:$0xff] }
 0x271   : > { %2406 = vmax.xlane.f32.xlu0 %v8805_v35  ;;  %2408 = vmax.xlane.f32.xlu1 %v8803_v34  ;;  %v1223_v35 = vld [vmem:[%s7922_s29 + $0x10] sm:$0xff] }
 0x272   : > { %v6790_v34 = vpack.c.bf16 %v1224_v33, %v1223_v35  ;;  %v6794_v33 = vpack.c.bf16 %v1226_v30, %v1225_v28  ;;  %v1241_v35 = vld [vmem:[%s7922_s29 + $0xa0] sm:$0xff]  ;;  %v1227_v28 = vld [vmem:[%s7922_s29 + $0x30] sm:$0xff]  ;;  %v1228_v30 = vld [vmem:[%s7922_s29 + $0x38] sm:$0xff] }
 0x274   : > { %6791 = vmatprep.subr.bf16.mxu0 %v6790_v34 }
 0x275   : > { %2438 = vmax.xlane.f32.xlu0 %v8811_v55  ;;  %2440 = vmax.xlane.f32.xlu1 %v8807_v36  ;;  %v1240_v55 = vld [vmem:[%s7922_s29 + $0x98] sm:$0xff]  ;;  %v8837_v36 = vld [vmem:[#allocation2 + $0x8] sm:$0xff] }
 0x276   : > { %v6822_v25 = vpack.c.bf16 %v1240_v55, %v1239_v32  ;;  %6793 = vmatpush3.bf16.msra.mxu0 %v6790_v34  ;;  %v8851_v55 = vld [vmem:[#allocation2] sm:$0xff]  ;;  %v6826_v34 = vpack.c.bf16 %v1242_v24, %v1241_v35  ;;  %v6798_v35 = vpack.c.bf16 %v1228_v30, %v1227_v28  ;;  %v1230_v30 = vld [vmem:[%s7922_s29 + $0x48] sm:$0xff] }
 0x277   : > { %6795 = vmatprep.subr.bf16.mxu0 %v6794_v33  ;;  %v1229_v28 = vld [vmem:[%s7922_s29 + $0x40] sm:$0xff] }
 0x278   : > { %6823 = vmatprep.subr.bf16.mxu1 %v6822_v25  ;;  %v6802_v22 = vpack.c.bf16 %v1230_v30, %v1229_v28  ;;  %v1232_v28 = vld [vmem:[%s7922_s29 + $0x58] sm:$0xff] }
 0x279   : > { %6825 = vmatpush3.bf16.msra.mxu1 %v6822_v25 }
 0x27a   : > { %6797 = vmatpush3.bf16.msra.mxu0 %v6794_v33  ;;  %6827 = vmatprep.subr.bf16.mxu1 %v6826_v34  ;;  %v8871_v33 = vld [vmem:[#allocation2 + $0x80] sm:$0xff] }
 0x27b   : > { %6799 = vmatprep.subr.bf16.mxu0 %v6798_v35 }
 0x27d   : > { %6829 = vmatpush3.bf16.msra.mxu1 %v6826_v34 }
 0x27e   : > { %6801 = vmatpush3.bf16.msra.mxu0 %v6798_v35  ;;  %6831 = vmatprep.subr.bf16.mxu1 %v6830_v20  ;;  %v6834_v35 = vpack.c.bf16 %v1246_v18, %v1245_v23 }
 0x27f   : > { %6803 = vmatprep.subr.bf16.mxu0 %v6802_v22 }
 0x281   : > { %6833 = vmatpush3.bf16.msra.mxu1 %v6830_v20  ;;  %v8895_v20 = vld [vmem:[#allocation2 + $0x10] sm:$0xff] }
 0x282   : > { %6805 = vmatpush3.bf16.msra.mxu0 %v6802_v22  ;;  %6835 = vmatprep.subr.bf16.mxu1 %v6834_v35  ;;  %v6838_v22 = vpack.c.bf16 %v1248_v14, %v1247_v15 }
 0x285   : > { %v2317_v27 = vpop.xlane.xlu0 %2316  ;;  %6837 = vmatpush3.bf16.msra.mxu1 %v6834_v35  ;;  %v8915_v35 = vld [vmem:[#allocation2 + $0x28] sm:$0xff] }
 0x286   : > { %v2349_v31 = vpop.xlane.xlu1 %2348  ;;  %v8844_v26 = vmax.f32 %v8837_v36, %v2317_v27  ;;  %v8856_v27 = vld [vmem:[#allocation2 + $0x18] sm:$0xff]  ;;  %6839 = vmatprep.subr.bf16.mxu1 %v6838_v22 }
 0x287   : > { %v8849_v32 = vmax.f32 %v8839_v29, %v2349_v31 }
 0x288   : > { %4752 = vst.msk [vmem:[#allocation2 + $0x8] sm:$0xff] %vm3530_vm4, %v8844_v26  ;;  %2705 = vperm.xlu1 %7008, %v8844_v26   ;;  %v2507_v1 = vsub.f32 %v8837_v36, %v8844_v26 }
 0x289   : > { %4768 = vst.msk [vmem:[#allocation2 + $0x88] sm:$0xff] %vm3530_vm4, %v8849_v32  ;;  %v2315_v25 = vpop.xlane.xlu0 %2314  ;;  %v2523_v14 = vsub.f32 %v8839_v29, %v8849_v32  ;;  %6841 = vmatpush3.bf16.msra.mxu1 %v6838_v22  ;;  %v8934_v29 = vld [vmem:[#allocation2 + $0xa8] sm:$0xff]  ;;  %v1235_v22 = vld [vmem:[%s7922_s29 + $0x70] sm:$0xff] }
 0x28a   : > { %v8863_v31 = vmax.f32 %v8851_v55, %v2315_v25  ;;  %v2321_v24 = vpop.xlane.xlu1 %2320  ;;  %v8875_v25 = vld [vmem:[#allocation2 + $0x98] sm:$0xff]  ;;  %6843 = vmatprep.subr.bf16.mxu1 %v6842_v7 }
 0x28b   : > { %v8868_v21 = vmax.f32 %v8856_v27, %v2321_v24  ;;  %2785 = vperm.xlu0 %7009, %v8849_v32  }
 0x28c   : > { %4751 = vst.msk [vmem:[#allocation2] sm:$0xff] %vm3530_vm4, %v8863_v31 }
 0x28d   : > { %4754 = vst.msk [vmem:[#allocation2 + $0x18] sm:$0xff] %vm3530_vm4, %v8868_v21  ;;  %v2347_v34 = vpop.xlane.xlu0 %2346  ;;  %6845 = vmatpush3.bf16.msra.mxu1 %v6842_v7 }
 0x28e   : > { %v8882_v24 = vmax.f32 %v8871_v33, %v2347_v34  ;;  %v2353_v19 = vpop.xlane.xlu1 %2352  ;;  %v1231_v34 = vld [vmem:[%s7922_s29 + $0x50] sm:$0xff] }
 0x28f   : > { %v8887_v17 = vmax.f32 %v8875_v25, %v2353_v19  ;;  %2700 = vperm.xlu0 %7009, %v8863_v31   ;;  %v6806_v23 = vpack.c.bf16 %v1232_v28, %v1231_v34  ;;  %v1233_v34 = vld [vmem:[%s7922_s29 + $0x60] sm:$0xff]  ;;  %v1234_v28 = vld [vmem:[%s7922_s29 + $0x68] sm:$0xff] }
 0x290   : > { %4767 = vst.msk [vmem:[#allocation2 + $0x80] sm:$0xff] %vm3530_vm4, %v8882_v24  ;;  %2780 = vperm.xlu1 %7008, %v8882_v24   ;;  %v6810_v11 = vpack.c.bf16 %v1234_v28, %v1233_v34  ;;  %v2604_v34 = vmul.f32 1.442695, %v2523_v14 }
 0x291   : > { %4770 = vst.msk [vmem:[#allocation2 + $0x98] sm:$0xff] %vm3530_vm4, %v8887_v17  ;;  %v2351_v19 = vpop.xlane.xlu0 %2350  ;;  %6807 = vmatprep.subr.bf16.mxu0 %v6806_v23  ;;  %v2525_v26 = vsub.f32 %v8875_v25, %v8887_v17 }
 0x292   : > { %v8902_v30 = vmax.f32 %v8890_v16, %v2351_v19  ;;  %v2319_v18 = vpop.xlane.xlu1 %2318  ;;  %6809 = vmatpush3.bf16.msra.mxu0 %v6806_v23  ;;  %v8931_v23 = vld [vmem:[#allocation2 + $0xa0] sm:$0xff]  ;;  %7010 = vpow2.f32 %v2604_v34 }
 0x293   : > { %v8907_v13 = vmax.f32 %v8895_v20, %v2319_v18  ;;  %2795 = vperm.xlu0 %7009, %v8887_v17   ;;  %6811 = vmatprep.subr.bf16.mxu0 %v6810_v11  ;;  %v2608_v25 = vmul.f32 1.442695, %v2525_v26 }
 0x294   : > { %4769 = vst.msk [vmem:[#allocation2 + $0x90] sm:$0xff] %vm3530_vm4, %v8902_v30  ;;  %2715 = vperm.xlu1 %7008, %v8868_v21  }
 0x295   : > { %4753 = vst.msk [vmem:[#allocation2 + $0x10] sm:$0xff] %vm3530_vm4, %v8907_v13  ;;  %v2323_v19 = vpop.xlane.xlu0 %2322 }
 0x296   : > { %v2325_v15 = vpop.xlane.xlu1 %2324  ;;  %v8924_v18 = vmax.f32 %v8910_v12, %v2323_v19  ;;  %6813 = vmatpush3.bf16.msra.mxu0 %v6810_v11  ;;  %v1236_v19 = vld [vmem:[%s7922_s29 + $0x78] sm:$0xff] }
 0x297   : > { %v8929_v8 = vmax.f32 %v8915_v35, %v2325_v15  ;;  %v6814_v28 = vpack.c.bf16 %v1236_v19, %v1235_v22  ;;  %v1251_v15 = vld [vmem:[%s7922_s29 + $0xf0] sm:$0xff]  ;;  %v8953_v11 = vld [vmem:[#allocation2 + $0x38] sm:$0xff] }
 0x298   : > { %2710 = vperm.xlu1 %7008, %v8907_v13   ;;  %4755 = vst.msk [vmem:[#allocation2 + $0x20] sm:$0xff] %vm3530_vm4, %v8924_v18  ;;  %v6846_v2 = vpack.c.bf16 %v1252_v5, %v1251_v15  ;;  %v8966_v22 = vld [vmem:[#allocation2 + $0xb0] sm:$0xff]  ;;  %v8969_v19 = vld [vmem:[#allocation2 + $0xb8] sm:$0xff] }
 0x299   : > { %4756 = vst.msk [vmem:[#allocation2 + $0x28] sm:$0xff] %vm3530_vm4, %v8929_v8  ;;  %v2355_v32 = vpop.xlane.xlu0 %2354  ;;  %6815 = vmatprep.subr.bf16.mxu0 %v6814_v28  ;;  %v2511_v58 = vsub.f32 %v8915_v35, %v8929_v8  ;;  %v2524_v35 = vsub.f32 %v8890_v16, %v8902_v30  ;;  %v9115_v16 = vld [vmem:[#allocation2 + $0x70] sm:$0xff] }
 0x29a   : > { %v2357_v9 = vpop.xlane.xlu1 %2356  ;;  %v8943_v10 = vmax.f32 %v8931_v23, %v2355_v32  ;;  %6817 = vmatpush3.bf16.msra.mxu0 %v6814_v28  ;;  %6847 = vmatprep.subr.bf16.mxu1 %v6846_v2 }
 0x29b   : > { %v8948_v4 = vmax.f32 %v8934_v29, %v2357_v9  ;;  %6849 = vmatpush3.bf16.msra.mxu1 %v6846_v2  ;;  %v2506_v9 = vsub.f32 %v8851_v55, %v8863_v31 }
 0x29c   : > { %2790 = vperm.xlu1 %7008, %v8902_v30   ;;  %4771 = vst.msk [vmem:[#allocation2 + $0xa0] sm:$0xff] %vm3530_vm4, %v8943_v10  ;;  %v9005_v36 = vpop.eup %7010 }
 0x29d   : > { %4772 = vst.msk [vmem:[#allocation2 + $0xa8] sm:$0xff] %vm3530_vm4, %v8948_v4  ;;  %2805 = vperm.xlu0 %7009, %v8948_v4   ;;  %v2327_v7 = vpop.xlane.xlu0 %2326  ;;  %v2570_v31 = vmul.f32 1.442695, %v2506_v9  ;;  %10945 = vst [vmem:[#allocation65_spill] sm:$0xff] %v9005_v36  ;;  %v2522_v9 = vsub.f32 %v8871_v33, %v8882_v24  ;;  %v9034_v24 = vld [vmem:[#allocation2 + $0x58] sm:$0xff]  ;;  %v9045_v33 = vld [vmem:[#allocation2 + $0xd0] sm:$0xff] }
 0x29e   : > { %v2329_v14 = vpop.xlane.xlu1 %2328  ;;  %v8961_v32 = vmax.f32 %v8950_v3, %v2327_v7  ;;  %v8983_v7 = vld [vmem:[#allocation2 + $0x40] sm:$0xff] }
 0x29f   : > { %v8964_v5 = vmax.f32 %v8953_v11, %v2329_v14  ;;  %v8988_v14 = vld [vmem:[#allocation2 + $0x48] sm:$0xff]  ;;  %7012 = vpow2.f32 %v2570_v31  ;;  %v2602_v17 = vmul.f32 1.442695, %v2522_v9  ;;  %v9052_v9 = vld [vmem:[#allocation2 + $0xd8] sm:$0xff] }
 0x2a0   : > { %2725 = vperm.xlu1 %7008, %v8929_v8   ;;  %4757 = vst.msk [vmem:[#allocation2 + $0x30] sm:$0xff] %vm3530_vm4, %v8961_v32  ;;  %v9098_v8 = vld [vmem:[#allocation2 + $0xe8] sm:$0xff] }
 0x2a1   : > { %4758 = vst.msk [vmem:[#allocation2 + $0x38] sm:$0xff] %vm3530_vm4, %v8964_v5  ;;  %v2359_v34 = vpop.xlane.xlu0 %2358 }
 0x2a2   : > { %v2361_v28 = vpop.xlane.xlu1 %2360  ;;  %v8978_v15 = vmax.f32 %v8966_v22, %v2359_v34  ;;  %v2509_v34 = vsub.f32 %v8856_v27, %v8868_v21  ;;  %v9012_v21 = vld [vmem:[#allocation2 + $0xc8] sm:$0xff]  ;;  %v2572_v27 = vmul.f32 1.442695, %v2507_v1 }
 0x2a3   : > { %v8981_v2 = vmax.f32 %v8969_v19, %v2361_v28 }
 0x2a4   : > { %2720 = vperm.xlu1 %7008, %v8924_v18   ;;  %4773 = vst.msk [vmem:[#allocation2 + $0xb0] sm:$0xff] %vm3530_vm4, %v8978_v15  ;;  %7014 = vpow2.f32 %v2572_v27  ;;  %v9063_v27 = vld [vmem:[#allocation2 + $0x60] sm:$0xff] }
 0x2a5   : > { %4774 = vst.msk [vmem:[#allocation2 + $0xb8] sm:$0xff] %vm3530_vm4, %v8981_v2  ;;  %2815 = vperm.xlu0 %7009, %v8981_v2   ;;  %v2331_v55 = vpop.xlane.xlu0 %2330 }
 0x2a6   : > { %v2333_v28 = vpop.xlane.xlu1 %2332  ;;  %v8998_v0 = vmax.f32 %v8983_v7, %v2331_v55 }
 0x2a7   : > { %v9001_v63 = vmax.f32 %v8988_v14, %v2333_v28  ;;  %v2576_v28 = vmul.f32 1.442695, %v2509_v34 }
 0x2a8   : > { %2800 = vperm.xlu1 %7008, %v8943_v10   ;;  %4759 = vst.msk [vmem:[#allocation2 + $0x40] sm:$0xff] %vm3530_vm4, %v8998_v0 }
 0x2a9   : > { %4760 = vst.msk [vmem:[#allocation2 + $0x48] sm:$0xff] %vm3530_vm4, %v9001_v63  ;;  %3746 = vperm.xlu0 %7009, %v9005_v36   ;;  %v2363_v55 = vpop.xlane.xlu0 %2362  ;;  %7016 = vpow2.f32 %v2576_v28  ;;  %v9065_v36 = vpop.eup %7012 }
 0x2aa   : > { %v2365_v61 = vpop.xlane.xlu1 %2364  ;;  %v9022_v60 = vmax.f32 %v9003_v62, %v2363_v55  ;;  %7018 = vpow2.f32 %v2602_v17  ;;  %10946 = vst [vmem:[#allocation66_spill] sm:$0xff] %v9065_v36 }
 0x2ab   : > { %v9025_v1 = vmax.f32 %v9012_v21, %v2365_v61  ;;  %7020 = vpow2.f32 %v2608_v25  ;;  %v9072_v25 = vld [vmem:[#allocation2 + $0x68] sm:$0xff] }
 0x2ac   : > { %2735 = vperm.xlu1 %7008, %v8964_v5   ;;  %4775 = vst.msk [vmem:[#allocation2 + $0xc0] sm:$0xff] %vm3530_vm4, %v9022_v60 }
 0x2ad   : > { %4776 = vst.msk [vmem:[#allocation2 + $0xc8] sm:$0xff] %vm3530_vm4, %v9025_v1  ;;  %2745 = vperm.xlu0 %7009, %v9001_v63   ;;  %v2335_v61 = vpop.xlane.xlu0 %2334 }
 0x2ae   : > { %v2337_v31 = vpop.xlane.xlu1 %2336  ;;  %v9040_v34 = vmax.f32 %v9027_v59, %v2335_v61  ;;  %v9084_v56 = vpop.eup %7014 }
 0x2af   : > { %v9043_v55 = vmax.f32 %v9034_v24, %v2337_v31  ;;  %10947 = vst [vmem:[#allocation67_spill] sm:$0xff] %v9084_v56 }
 0x2b0   : > { %2730 = vperm.xlu1 %7008, %v8961_v32   ;;  %4761 = vst.msk [vmem:[#allocation2 + $0x50] sm:$0xff] %vm3530_vm4, %v9040_v34 }
 0x2b1   : > { %4762 = vst.msk [vmem:[#allocation2 + $0x58] sm:$0xff] %vm3530_vm4, %v9043_v55  ;;  %2825 = vperm.xlu0 %7009, %v9025_v1   ;;  %v2367_v26 = vpop.xlane.xlu0 %2366 }
 0x2b2   : > { %v2369_v28 = vpop.xlane.xlu1 %2368  ;;  %v9058_v61 = vmax.f32 %v9045_v33, %v2367_v26  ;;  %v2508_v26 = vsub.f32 %v8895_v20, %v8907_v13 }
 0x2b3   : > { %v9061_v31 = vmax.f32 %v9052_v9, %v2369_v28  ;;  %v9091_v13 = vpop.eup %7016 }
 0x2b4   : > { %2810 = vperm.xlu1 %7008, %v8978_v15   ;;  %4777 = vst.msk [vmem:[#allocation2 + $0xd0] sm:$0xff] %vm3530_vm4, %v9058_v61  ;;  %10948 = vst [vmem:[#allocation68_spill] sm:$0xff] %v9091_v13  ;;  %v9110_v52 = vpop.eup %7018 }
 0x2b5   : > { %4778 = vst.msk [vmem:[#allocation2 + $0xd8] sm:$0xff] %vm3530_vm4, %v9061_v31  ;;  %3661 = vperm.xlu0 %7009, %v9065_v36   ;;  %v2339_v28 = vpop.xlane.xlu0 %2338  ;;  %v2580_v36 = vmul.f32 1.442695, %v2511_v58  ;;  %10949 = vst [vmem:[#allocation69_spill] sm:$0xff] %v9110_v52  ;;  %v9117_v30 = vpop.eup %7020 }
 0x2b6   : > { %v2341_v57 = vpop.xlane.xlu1 %2340  ;;  %v9082_v17 = vmax.f32 %v9063_v27, %v2339_v28  ;;  %v2574_v28 = vmul.f32 1.442695, %v2508_v26  ;;  %10950 = vst [vmem:[#allocation70_spill] sm:$0xff] %v9117_v30 }
 0x2b7   : > { %v9087_v54 = vmax.f32 %v9072_v25, %v2341_v57 }
 0x2b8   : > { %3666 = vperm.xlu1 %7008, %v9084_v56   ;;  %4763 = vst.msk [vmem:[#allocation2 + $0x60] sm:$0xff] %vm3530_vm4, %v9082_v17  ;;  %v2527_v56 = vsub.f32 %v8934_v29, %v8948_v4  ;;  %v9124_v4 = vld [vmem:[#allocation2 + $0x78] sm:$0xff]  ;;  %v2606_v29 = vmul.f32 1.442695, %v2524_v35  ;;  %7022 = vpow2.f32 %v2574_v28 }
 0x2b9   : > { %4764 = vst.msk [vmem:[#allocation2 + $0x68] sm:$0xff] %vm3530_vm4, %v9087_v54  ;;  %3676 = vperm.xlu0 %7009, %v9091_v13   ;;  %v2371_v57 = vpop.xlane.xlu0 %2370  ;;  %7024 = vpow2.f32 %v2580_v36  ;;  %v9142_v28 = vld [vmem:[#allocation2 + $0xf8] sm:$0xff] }
 0x2ba   : > { %v2373_v20 = vpop.xlane.xlu1 %2372  ;;  %v9108_v53 = vmax.f32 %v9089_v6, %v2371_v57  ;;  %7026 = vpow2.f32 %v2606_v29  ;;  %v9158_v29 = vld [vmem:[#allocation2 + $0x108] sm:$0xff] }
 0x2bb   : > { %v9113_v51 = vmax.f32 %v9098_v8, %v2373_v20  ;;  %v2612_v20 = vmul.f32 1.442695, %v2527_v56 }
 0x2bc   : > { %3741 = vperm.xlu1 %7008, %v9110_v52   ;;  %4779 = vst.msk [vmem:[#allocation2 + $0xe0] sm:$0xff] %vm3530_vm4, %v9108_v53  ;;  %v9135_v52 = vld [vmem:[#allocation2 + $0xf0] sm:$0xff] }
 0x2bd   : > { %4780 = vst.msk [vmem:[#allocation2 + $0xe8] sm:$0xff] %vm3530_vm4, %v9113_v51  ;;  %3756 = vperm.xlu0 %7009, %v9117_v30   ;;  %v2343_v26 = vpop.xlane.xlu0 %2342  ;;  %7028 = vpow2.f32 %v2612_v20  ;;  %v9160_v30 = vld [vmem:[#allocation2 + $0x100] sm:$0xff]  ;;  %v2510_v20 = vsub.f32 %v8910_v12, %v8924_v18  ;;  %v9180_v12 = vld [vmem:[#allocation2 + $0x188] sm:$0xff] }
 0x2be   : > { %v2345_v57 = vpop.xlane.xlu1 %2344  ;;  %v9130_v13 = vmax.f32 %v9115_v16, %v2343_v26  ;;  %10951 = vst [vmem:[#allocation71_spill] sm:$0xff] %v9160_v30  ;;  %10954 = vst [vmem:[#allocation74_spill] sm:$0xff] %v9180_v12  ;;  %v9182_v18 = vld [vmem:[#allocation2 + $0x180] sm:$0xff] }
 0x2bf   : > { %v9133_v58 = vmax.f32 %v9124_v4, %v2345_v57  ;;  %10955 = vst [vmem:[#allocation75_spill] sm:$0xff] %v9182_v18  ;;  %v2578_v46 = vmul.f32 1.442695, %v2510_v20 }
 0x2c0   : > { %2740 = vperm.xlu1 %7008, %v8998_v0   ;;  %4765 = vst.msk [vmem:[#allocation2 + $0x70] sm:$0xff] %vm3530_vm4, %v9130_v13 }
 0x2c1   : > { %4766 = vst.msk [vmem:[#allocation2 + $0x78] sm:$0xff] %vm3530_vm4, %v9133_v58  ;;  %2755 = vperm.xlu0 %7009, %v9043_v55   ;;  %v2375_v56 = vpop.xlane.xlu0 %2374  ;;  %7030 = vpow2.f32 %v2578_v46 }
 0x2c2   : > { %v2377_v36 = vpop.xlane.xlu1 %2376  ;;  %v9148_v26 = vmax.f32 %v9135_v52, %v2375_v56  ;;  %v2513_v56 = vsub.f32 %v8953_v11, %v8964_v5  ;;  %v9169_v50 = vpop.eup %7022  ;;  %v2526_v11 = vsub.f32 %v8931_v23, %v8943_v10 }
 0x2c3   : > { %v9151_v57 = vmax.f32 %v9142_v28, %v2377_v36  ;;  %10952 = vst [vmem:[#allocation72_spill] sm:$0xff] %v9169_v50  ;;  %v9177_v47 = vpop.eup %7024 }
 0x2c4   : > { %2820 = vperm.xlu1 %7008, %v9022_v60   ;;  %4781 = vst.msk [vmem:[#allocation2 + $0xf0] sm:$0xff] %vm3530_vm4, %v9148_v26  ;;  %10953 = vst [vmem:[#allocation73_spill] sm:$0xff] %v9177_v47 }
 0x2c5   : > { %4782 = vst.msk [vmem:[#allocation2 + $0xf8] sm:$0xff] %vm3530_vm4, %v9151_v57  ;;  %2835 = vperm.xlu0 %7009, %v9061_v31  }
 0x2c6   : > { %v2381_v36 = vpop.xlane.xlu1 %2380  ;;  %v2379_v35 = vpop.xlane.xlu0 %2378 }
 0x2c7   : > { %v9172_v49 = vmax.f32 %v9158_v29, %v2381_v36  ;;  %v9175_v48 = vmax.f32 %v9160_v30, %v2379_v35  ;;  %v2584_v35 = vmul.f32 1.442695, %v2513_v56  ;;  %v2529_v36 = vsub.f32 %v8969_v19, %v8981_v2  ;;  %v9195_v30 = vpop.eup %7026  ;;  %v9208_v56 = vld [vmem:[#allocation2 + $0x110] sm:$0xff] }
 0x2c8   : > { %3671 = vperm.xlu1 %7008, %v9169_v50   ;;  %10956 = vst [vmem:[#allocation76_spill] sm:$0xff] %v9195_v30  ;;  %v9203_v5 = vpop.eup %7028  ;;  %10959 = vst [vmem:[#allocation79_spill] sm:$0xff] %v9208_v56  ;;  %v2610_v19 = vmul.f32 1.442695, %v2526_v11  ;;  %v9224_v11 = vld [vmem:[#allocation2 + $0x198] sm:$0xff]  ;;  %v9226_v2 = vld [vmem:[#allocation2 + $0x190] sm:$0xff] }
 0x2c9   : > { %4784 = vst.msk [vmem:[#allocation2 + $0x108] sm:$0xff] %vm3530_vm4, %v9172_v49  ;;  %3686 = vperm.xlu0 %7009, %v9177_v47   ;;  %4783 = vst.msk [vmem:[#allocation2 + $0x100] sm:$0xff] %vm3530_vm4, %v9175_v48  ;;  %v9206_v47 = vld [vmem:[#allocation2 + $0x118] sm:$0xff]  ;;  %7032 = vpow2.f32 %v2584_v35 }
 0x2ca   : > { %v2413_v50 = vpop.xlane.xlu1 %2412  ;;  %v2411_v20 = vpop.xlane.xlu0 %2410  ;;  %10957 = vst [vmem:[#allocation77_spill] sm:$0xff] %v9203_v5  ;;  %10958 = vst [vmem:[#allocation78_spill] sm:$0xff] %v9206_v47  ;;  %7034 = vpow2.f32 %v2610_v19  ;;  %v9242_v19 = vld [vmem:[#allocation2 + $0x128] sm:$0xff] }
 0x2cb   : > { %v9198_v23 = vmax.f32 %v9180_v12, %v2413_v50  ;;  %v9201_v10 = vmax.f32 %v9182_v18, %v2411_v20  ;;  %v2616_v50 = vmul.f32 1.442695, %v2529_v36  ;;  %10960 = vst [vmem:[#allocation80_spill] sm:$0xff] %v9224_v11  ;;  %10961 = vst [vmem:[#allocation81_spill] sm:$0xff] %v9226_v2  ;;  %v2512_v12 = vsub.f32 %v8950_v3, %v8961_v32 }
 0x2cc   : > { %3751 = vperm.xlu1 %7008, %v9195_v30  }
 0x2cd   : > { %4800 = vst.msk [vmem:[#allocation2 + $0x188] sm:$0xff] %vm3530_vm4, %v9198_v23  ;;  %3766 = vperm.xlu0 %7009, %v9203_v5   ;;  %4799 = vst.msk [vmem:[#allocation2 + $0x180] sm:$0xff] %vm3530_vm4, %v9201_v10  ;;  %7036 = vpow2.f32 %v2616_v50  ;;  %v9244_v5 = vld [vmem:[#allocation2 + $0x120] sm:$0xff] }
 0x2ce   : > { %v2385_v20 = vpop.xlane.xlu1 %2384  ;;  %v2383_v30 = vpop.xlane.xlu0 %2382  ;;  %10963 = vst [vmem:[#allocation83_spill] sm:$0xff] %v9244_v5 }
 0x2cf   : > { %v9218_v18 = vmax.f32 %v9206_v47, %v2385_v20  ;;  %v9221_v46 = vmax.f32 %v9208_v56, %v2383_v30  ;;  %v9257_v56 = vpop.eup %7030  ;;  %v9270_v47 = vld [vmem:[#allocation2 + $0x1a0] sm:$0xff] }
 0x2d0   : > { %2750 = vperm.xlu1 %7008, %v9040_v34   ;;  %10964 = vst [vmem:[#allocation84_spill] sm:$0xff] %v9257_v56  ;;  %10967 = vst [vmem:[#allocation87_spill] sm:$0xff] %v9270_v47 }
 0x2d1   : > { %4786 = vst.msk [vmem:[#allocation2 + $0x118] sm:$0xff] %vm3530_vm4, %v9218_v18  ;;  %2765 = vperm.xlu0 %7009, %v9087_v54   ;;  %4785 = vst.msk [vmem:[#allocation2 + $0x110] sm:$0xff] %vm3530_vm4, %v9221_v46 }
 0x2d2   : > { %v2417_v30 = vpop.xlane.xlu1 %2416  ;;  %v2415_v35 = vpop.xlane.xlu0 %2414 }
 0x2d3   : > { %v9236_v36 = vmax.f32 %v9224_v11, %v2417_v30  ;;  %v9239_v20 = vmax.f32 %v9226_v2, %v2415_v35  ;;  %v2515_v30 = vsub.f32 %v8988_v14, %v9001_v63  ;;  %v9265_v50 = vpop.eup %7032  ;;  %v9268_v11 = vld [vmem:[#allocation2 + $0x1a8] sm:$0xff]  ;;  %v2528_v63 = vsub.f32 %v8966_v22, %v8978_v15 }
 0x2d4   : > { %2830 = vperm.xlu1 %7008, %v9058_v61   ;;  %10965 = vst [vmem:[#allocation85_spill] sm:$0xff] %v9265_v50  ;;  %10966 = vst [vmem:[#allocation86_spill] sm:$0xff] %v9268_v11 }
 0x2d5   : > { %10962 = vst [vmem:[#allocation82_spill] sm:$0xff] %v9239_v20  ;;  %4802 = vst.msk [vmem:[#allocation2 + $0x198] sm:$0xff] %vm3530_vm4, %v9236_v36  ;;  %2845 = vperm.xlu0 %7009, %v9113_v51  }
 0x2d6   : > { %4801 = vst.msk [vmem:[#allocation2 + $0x190] sm:$0xff] %vm3530_vm4, %v9239_v20  ;;  %v2389_v35 = vpop.xlane.xlu1 %2388  ;;  %v2387_v2 = vpop.xlane.xlu0 %2386  ;;  %v2582_v20 = vmul.f32 1.442695, %v2512_v12 }
 0x2d7   : > { %v9260_v3 = vmax.f32 %v9242_v19, %v2389_v35  ;;  %v9263_v32 = vmax.f32 %v9244_v5, %v2387_v2  ;;  %v2588_v2 = vmul.f32 1.442695, %v2515_v30  ;;  %v2531_v35 = vsub.f32 %v9012_v21, %v9025_v1  ;;  %v9283_v5 = vpop.eup %7034  ;;  %v9296_v30 = vld [vmem:[#allocation2 + $0x130] sm:$0xff]  ;;  %v9314_v1 = vld [vmem:[#allocation2 + $0x1b8] sm:$0xff] }
 0x2d8   : > { %3681 = vperm.xlu1 %7008, %v9257_v56   ;;  %10968 = vst [vmem:[#allocation88_spill] sm:$0xff] %v9283_v5  ;;  %v9291_v14 = vpop.eup %7036  ;;  %10970 = vst [vmem:[#allocation90_spill] sm:$0xff] %v9296_v30  ;;  %7038 = vpow2.f32 %v2582_v20  ;;  %v2614_v21 = vmul.f32 1.442695, %v2528_v63 }
 0x2d9   : > { %4788 = vst.msk [vmem:[#allocation2 + $0x128] sm:$0xff] %vm3530_vm4, %v9260_v3  ;;  %3696 = vperm.xlu0 %7009, %v9265_v50   ;;  %4787 = vst.msk [vmem:[#allocation2 + $0x120] sm:$0xff] %vm3530_vm4, %v9263_v32  ;;  %v9294_v50 = vld [vmem:[#allocation2 + $0x138] sm:$0xff]  ;;  %7040 = vpow2.f32 %v2588_v2  ;;  %v9334_v2 = vld [vmem:[#allocation2 + $0x148] sm:$0xff] }
 0x2da   : > { %v2421_v56 = vpop.xlane.xlu1 %2420  ;;  %v2419_v12 = vpop.xlane.xlu0 %2418  ;;  %10969 = vst [vmem:[#allocation89_spill] sm:$0xff] %v9291_v14  ;;  %10971 = vst [vmem:[#allocation91_spill] sm:$0xff] %v9314_v1  ;;  %7042 = vpow2.f32 %v2614_v21 }
 0x2db   : > { %v9286_v22 = vmax.f32 %v9268_v11, %v2421_v56  ;;  %v9289_v15 = vmax.f32 %v9270_v47, %v2419_v12  ;;  %v2620_v56 = vmul.f32 1.442695, %v2531_v35  ;;  %v2517_v12 = vsub.f32 %v9034_v24, %v9043_v55  ;;  %v9336_v11 = vld [vmem:[#allocation2 + $0x140] sm:$0xff] }
 0x2dc   : > { %3761 = vperm.xlu1 %7008, %v9283_v5   ;;  %v2533_v24 = vsub.f32 %v9052_v9, %v9061_v31  ;;  %10973 = vst [vmem:[#allocation93_spill] sm:$0xff] %v9336_v11  ;;  %v2519_v31 = vsub.f32 %v9072_v25, %v9087_v54  ;;  %v10976_v54 = vsub.f32 %v8983_v7, %v8998_v0 }
 0x2dd   : > { %4804 = vst.msk [vmem:[#allocation2 + $0x1a8] sm:$0xff] %vm3530_vm4, %v9286_v22  ;;  %3776 = vperm.xlu0 %7009, %v9291_v14   ;;  %4803 = vst.msk [vmem:[#allocation2 + $0x1a0] sm:$0xff] %vm3530_vm4, %v9289_v15  ;;  %v9316_v14 = vld [vmem:[#allocation2 + $0x1b0] sm:$0xff]  ;;  %7044 = vpow2.f32 %v2620_v56 }
 0x2de   : > { %v2393_v5 = vpop.xlane.xlu1 %2392  ;;  %v2391_v47 = vpop.xlane.xlu0 %2390  ;;  %10972 = vst [vmem:[#allocation92_spill] sm:$0xff] %v9316_v14  ;;  %v2624_v9 = vmul.f32 1.442695, %v2533_v24  ;;  %v2586_v25 = vmul.f32 1.442695, %v10976_v54 }
 0x2df   : > { %v9308_v20 = vmax.f32 %v9294_v50, %v2393_v5  ;;  %v9311_v63 = vmax.f32 %v9296_v30, %v2391_v47  ;;  %v2592_v47 = vmul.f32 1.442695, %v2517_v12  ;;  %v9358_v30 = vld [vmem:[#allocation2 + $0x1c8] sm:$0xff]  ;;  %v2596_v24 = vmul.f32 1.442695, %v2519_v31 }
 0x2e0   : > { %2760 = vperm.xlu1 %7008, %v9082_v17  }
 0x2e1   : > { %4790 = vst.msk [vmem:[#allocation2 + $0x138] sm:$0xff] %vm3530_vm4, %v9308_v20  ;;  %2775 = vperm.xlu0 %7009, %v9133_v58   ;;  %4789 = vst.msk [vmem:[#allocation2 + $0x130] sm:$0xff] %vm3530_vm4, %v9311_v63  ;;  %7046 = vpow2.f32 %v2592_v47  ;;  %v9360_v47 = vld [vmem:[#allocation2 + $0x1c0] sm:$0xff] }
 0x2e2   : > { %v2425_v55 = vpop.xlane.xlu1 %2424  ;;  %v2423_v5 = vpop.xlane.xlu0 %2422  ;;  %7048 = vpow2.f32 %v2624_v9  ;;  %v9385_v9 = vld [vmem:[#allocation2 + $0x150] sm:$0xff] }
 0x2e3   : > { %v9328_v35 = vmax.f32 %v9314_v1, %v2425_v55  ;;  %v9331_v21 = vmax.f32 %v9316_v14, %v2423_v5  ;;  %v9347_v5 = vpop.eup %7038  ;;  %10979 = vst [vmem:[#allocation98_spill] sm:$0xff] %v9385_v9  ;;  %7050 = vpow2.f32 %v2586_v25 }
 0x2e4   : > { %2840 = vperm.xlu1 %7008, %v9108_v53   ;;  %10974 = vst [vmem:[#allocation94_spill] sm:$0xff] %v9347_v5  ;;  %v9355_v1 = vpop.eup %7040  ;;  %7052 = vpow2.f32 %v2596_v24  ;;  %v2537_v24 = vsub.f32 %v9142_v28, %v9151_v57  ;;  %v10986_v28 = vsub.f32 %v9045_v33, %v9058_v61 }
 0x2e5   : > { %4806 = vst.msk [vmem:[#allocation2 + $0x1b8] sm:$0xff] %vm3530_vm4, %v9328_v35  ;;  %2855 = vperm.xlu0 %7009, %v9151_v57   ;;  %4805 = vst.msk [vmem:[#allocation2 + $0x1b0] sm:$0xff] %vm3530_vm4, %v9331_v21 }
 0x2e6   : > { %v2397_v12 = vpop.xlane.xlu1 %2396  ;;  %v2395_v55 = vpop.xlane.xlu0 %2394  ;;  %10975 = vst [vmem:[#allocation95_spill] sm:$0xff] %v9355_v1  ;;  %v2622_v57 = vmul.f32 1.442695, %v10986_v28  ;;  %v9452_v28 = vld [vmem:[#allocation2 + $0x1e8] sm:$0xff] }
 0x2e7   : > { %v9350_v14 = vmax.f32 %v9334_v2, %v2397_v12  ;;  %v9353_v56 = vmax.f32 %v9336_v11, %v2395_v55  ;;  %v2535_v12 = vsub.f32 %v9098_v8, %v9113_v51  ;;  %v9372_v11 = vpop.eup %7042  ;;  %v10980_v51 = vsub.f32 %v9003_v62, %v9022_v60 }
 0x2e8   : > { %3691 = vperm.xlu1 %7008, %v9347_v5   ;;  %10977 = vst [vmem:[#allocation96_spill] sm:$0xff] %v9372_v11  ;;  %v9380_v54 = vpop.eup %7044 }
 0x2e9   : > { %4792 = vst.msk [vmem:[#allocation2 + $0x148] sm:$0xff] %vm3530_vm4, %v9350_v14  ;;  %3706 = vperm.xlu0 %7009, %v9355_v1   ;;  %4791 = vst.msk [vmem:[#allocation2 + $0x140] sm:$0xff] %vm3530_vm4, %v9353_v56  ;;  %v9383_v1 = vld [vmem:[#allocation2 + $0x158] sm:$0xff]  ;;  %v2618_v8 = vmul.f32 1.442695, %v10980_v51 }
 0x2ea   : > { %v2429_v55 = vpop.xlane.xlu1 %2428  ;;  %v2427_v5 = vpop.xlane.xlu0 %2426  ;;  %10978 = vst [vmem:[#allocation97_spill] sm:$0xff] %v9380_v54  ;;  %v2628_v31 = vmul.f32 1.442695, %v2535_v12  ;;  %v9406_v51 = vld [vmem:[#allocation2 + $0x1d8] sm:$0xff] }
 0x2eb   : > { %v9375_v0 = vmax.f32 %v9358_v30, %v2429_v55  ;;  %v9378_v7 = vmax.f32 %v9360_v47, %v2427_v5  ;;  %v2521_v5 = vsub.f32 %v9124_v4, %v9133_v58  ;;  %v9403_v62 = vpop.eup %7046  ;;  %7054 = vpow2.f32 %v2618_v8 }
 0x2ec   : > { %3771 = vperm.xlu1 %7008, %v9372_v11   ;;  %10981 = vst [vmem:[#allocation99_spill] sm:$0xff] %v9403_v62  ;;  %v10983_v58 = vsub.f32 %v9027_v59, %v9040_v34  ;;  %7056 = vpow2.f32 %v2628_v31  ;;  %v9426_v34 = vpop.eup %7048  ;;  %v2632_v31 = vmul.f32 1.442695, %v2537_v24 }
 0x2ed   : > { %4808 = vst.msk [vmem:[#allocation2 + $0x1c8] sm:$0xff] %vm3530_vm4, %v9375_v0  ;;  %3786 = vperm.xlu0 %7009, %v9380_v54   ;;  %4807 = vst.msk [vmem:[#allocation2 + $0x1c0] sm:$0xff] %vm3530_vm4, %v9378_v7  ;;  %v9408_v54 = vld [vmem:[#allocation2 + $0x1d0] sm:$0xff] }
 0x2ee   : > { %v2401_v55 = vpop.xlane.xlu1 %2400  ;;  %v2399_v11 = vpop.xlane.xlu0 %2398  ;;  %10982 = vst [vmem:[#allocation100_spill] sm:$0xff] %v9408_v54  ;;  %v2590_v4 = vmul.f32 1.442695, %v10983_v58  ;;  %10984 = vst [vmem:[#allocation101_spill] sm:$0xff] %v9426_v34  ;;  %v9429_v58 = vld [vmem:[#allocation2 + $0x168] sm:$0xff] }
 0x2ef   : > { %v9398_v25 = vmax.f32 %v9383_v1, %v2401_v55  ;;  %v9401_v60 = vmax.f32 %v9385_v9, %v2399_v11  ;;  %v2600_v11 = vmul.f32 1.442695, %v2521_v5 }
 0x2f0   : > { %2770 = vperm.xlu1 %7008, %v9130_v13   ;;  %7058 = vpow2.f32 %v2590_v4 }
 0x2f1   : > { %4794 = vst.msk [vmem:[#allocation2 + $0x158] sm:$0xff] %vm3530_vm4, %v9398_v25  ;;  %3716 = vperm.xlu0 %7009, %v9403_v62   ;;  %4793 = vst.msk [vmem:[#allocation2 + $0x150] sm:$0xff] %vm3530_vm4, %v9401_v60  ;;  %v9431_v62 = vld [vmem:[#allocation2 + $0x160] sm:$0xff]  ;;  %7060 = vpow2.f32 %v2600_v11  ;;  %v10990_v11 = vsub.f32 %v9063_v27, %v9082_v17  ;;  %v9475_v17 = vld [vmem:[#allocation2 + $0x178] sm:$0xff] }
 0x2f2   : > { %v2433_v12 = vpop.xlane.xlu1 %2432  ;;  %v2431_v55 = vpop.xlane.xlu0 %2430  ;;  %10985 = vst [vmem:[#allocation102_spill] sm:$0xff] %v9431_v62  ;;  %7062 = vpow2.f32 %v2622_v57  ;;  %10993 = vst [vmem:[#allocation108_spill] sm:$0xff] %v9475_v17 }
 0x2f3   : > { %v9421_v8 = vmax.f32 %v9406_v51, %v2433_v12  ;;  %v9424_v59 = vmax.f32 %v9408_v54, %v2431_v55  ;;  %v9441_v55 = vpop.eup %7050  ;;  %v2594_v24 = vmul.f32 1.442695, %v10990_v11  ;;  %7064 = vpow2.f32 %v2632_v31  ;;  %v9477_v11 = vld [vmem:[#allocation2 + $0x170] sm:$0xff] }
 0x2f4   : > { %2850 = vperm.xlu1 %7008, %v9148_v26   ;;  %10987 = vst [vmem:[#allocation103_spill] sm:$0xff] %v9441_v55  ;;  %v9449_v61 = vpop.eup %7052  ;;  %10994 = vst [vmem:[#allocation109_spill] sm:$0xff] %v9477_v11  ;;  %v10995_v31 = vsub.f32 %v9089_v6, %v9108_v53  ;;  %v9498_v6 = vld [vmem:[#allocation2 + $0x1f8] sm:$0xff] }
 0x2f5   : > { %4810 = vst.msk [vmem:[#allocation2 + $0x1d8] sm:$0xff] %vm3530_vm4, %v9421_v8  ;;  %3796 = vperm.xlu0 %7009, %v9426_v34   ;;  %4809 = vst.msk [vmem:[#allocation2 + $0x1d0] sm:$0xff] %vm3530_vm4, %v9424_v59  ;;  %v9454_v34 = vld [vmem:[#allocation2 + $0x1e0] sm:$0xff]  ;;  %7066 = vpow2.f32 %v2594_v24 }
 0x2f6   : > { %v2405_v5 = vpop.xlane.xlu1 %2404  ;;  %v2403_v12 = vpop.xlane.xlu0 %2402  ;;  %10988 = vst [vmem:[#allocation104_spill] sm:$0xff] %v9449_v61  ;;  %10989 = vst [vmem:[#allocation105_spill] sm:$0xff] %v9454_v34 }
 0x2f7   : > { %v9444_v4 = vmax.f32 %v9429_v58, %v2405_v5  ;;  %v9447_v33 = vmax.f32 %v9431_v62, %v2403_v12  ;;  %10998 = vst [vmem:[#allocation112_spill] sm:$0xff] %v9498_v6 }
 0x2f8   : > { %3701 = vperm.xlu1 %7008, %v9441_v55   ;;  %v9464_v55 = vpop.eup %7054 }
 0x2f9   : > { %4796 = vst.msk [vmem:[#allocation2 + $0x168] sm:$0xff] %vm3530_vm4, %v9444_v4  ;;  %3726 = vperm.xlu0 %7009, %v9449_v61   ;;  %4795 = vst.msk [vmem:[#allocation2 + $0x160] sm:$0xff] %vm3530_vm4, %v9447_v33  ;;  %v9472_v27 = vpop.eup %7056  ;;  %v2626_v61 = vmul.f32 1.442695, %v10995_v31  ;;  %v9500_v31 = vld [vmem:[#allocation2 + $0x1f0] sm:$0xff] }
 0x2fa   : > { %v2437_v5 = vpop.xlane.xlu1 %2436  ;;  %v2435_v12 = vpop.xlane.xlu0 %2434  ;;  %10991 = vst [vmem:[#allocation106_spill] sm:$0xff] %v9464_v55  ;;  %10992 = vst [vmem:[#allocation107_spill] sm:$0xff] %v9472_v27 }
 0x2fb   : > { %v9467_v62 = vmax.f32 %v9452_v28, %v2437_v5  ;;  %v9470_v57 = vmax.f32 %v9454_v34, %v2435_v12  ;;  %10999 = vst [vmem:[#allocation113_spill] sm:$0xff] %v9500_v31  ;;  %7068 = vpow2.f32 %v2626_v61 }
 0x2fc   : > { %3781 = vperm.xlu1 %7008, %v9464_v55   ;;  %v9487_v55 = vpop.eup %7058 }
 0x2fd   : > { %4812 = vst.msk [vmem:[#allocation2 + $0x1e8] sm:$0xff] %vm3530_vm4, %v9467_v62  ;;  %3806 = vperm.xlu0 %7009, %v9472_v27   ;;  %4811 = vst.msk [vmem:[#allocation2 + $0x1e0] sm:$0xff] %vm3530_vm4, %v9470_v57  ;;  %v9495_v53 = vpop.eup %7060  ;;  %v11000_v27 = vsub.f32 %v9115_v16, %v9130_v13 }
 0x2fe   : > { %v2409_v5 = vpop.xlane.xlu1 %2408  ;;  %v2407_v12 = vpop.xlane.xlu0 %2406  ;;  %10996 = vst [vmem:[#allocation110_spill] sm:$0xff] %v9487_v55  ;;  %10997 = vst [vmem:[#allocation111_spill] sm:$0xff] %v9495_v53 }
 0x2ff   : > { %v9490_v34 = vmax.f32 %v9475_v17, %v2409_v5  ;;  %v9493_v24 = vmax.f32 %v9477_v11, %v2407_v12  ;;  %v2598_v54 = vmul.f32 1.442695, %v11000_v27  ;;  %v11005_v27 = vsub.f32 %v9135_v52, %v9148_v26 }
 0x300   : > { %3711 = vperm.xlu1 %7008, %v9487_v55   ;;  %v9510_v55 = vpop.eup %7062 }
 0x301   : > { %4798 = vst.msk [vmem:[#allocation2 + $0x178] sm:$0xff] %vm3530_vm4, %v9490_v34  ;;  %3736 = vperm.xlu0 %7009, %v9495_v53   ;;  %4797 = vst.msk [vmem:[#allocation2 + $0x170] sm:$0xff] %vm3530_vm4, %v9493_v24  ;;  %v9518_v16 = vpop.eup %7064  ;;  %7070 = vpow2.f32 %v2598_v54  ;;  %v2630_v53 = vmul.f32 1.442695, %v11005_v27  ;;  %v1269_v27 = vld [vmem:[%s7922_s29 + $0x180] sm:$0xff] }
 0x302   : > { %v2441_v5 = vpop.xlane.xlu1 %2440  ;;  %v2439_v12 = vpop.xlane.xlu0 %2438  ;;  %11001 = vst [vmem:[#allocation114_spill] sm:$0xff] %v9510_v55  ;;  %11004 = vst [vmem:[#allocation117_spill] sm:$0xff] %v9518_v16 }
 0x303   : > { %v9513_v61 = vmax.f32 %v9498_v6, %v2441_v5  ;;  %v9516_v13 = vmax.f32 %v9500_v31, %v2439_v12  ;;  %v1253_v5 = vld [vmem:[%s7922_s29 + $0x100] sm:$0xff]  ;;  %v1254_v12 = vld [vmem:[%s7922_s29 + $0x108] sm:$0xff]  ;;  %v9531_v31 = vpop.eup %7066  ;;  %7072 = vpow2.f32 %v2630_v53 }
 0x304   : > { %3791 = vperm.xlu1 %7008, %v9510_v55   ;;  %11006 = vst [vmem:[#allocation118_spill] sm:$0xff] %v9531_v31  ;;  %v9533_v54 = vpack.c.bf16 %v1254_v12, %v1253_v5 }
 0x305   : > { %11002 = vst [vmem:[#allocation115_spill] sm:$0xff] %v9513_v61  ;;  %11003 = vst [vmem:[#allocation116_spill] sm:$0xff] %v9516_v13  ;;  %3816 = vperm.xlu0 %7009, %v9518_v16   ;;  %v1270_v16 = vld [vmem:[%s7922_s29 + $0x188] sm:$0xff]  ;;  %v9541_v6 = vpop.eup %7068 }
 0x306   : > { %4814 = vst.msk [vmem:[#allocation2 + $0x1f8] sm:$0xff] %vm3530_vm4, %v9513_v61  ;;  %4813 = vst.msk [vmem:[#allocation2 + $0x1f0] sm:$0xff] %vm3530_vm4, %v9516_v13  ;;  %6851 = vmatprep.subr.bf16.mxu0 %v9533_v54  ;;  %v9543_v11 = vpack.c.bf16 %v1270_v16, %v1269_v27 }
 0x307   : > { %v2706_v55 = vpop.permute.xlu1 %2705  ;;  %11007 = vst [vmem:[#allocation119_spill] sm:$0xff] %v9541_v6 }
 0x308   : > { %3721 = vperm.xlu1 %7008, %v9531_v31   ;;  %v3019_v52 = vsub.f32 %v8637_v37, %v2706_v55  ;;  %6883 = vmatprep.subr.bf16.mxu1 %v9543_v11 }
 0x309   : > { %2865 = vperm.xlu0 %7009, %v9172_v49  }
 0x30a   : > { %v2786_v26 = vpop.permute.xlu0 %2785  ;;  %v3084_v53 = vmul.f32 1.442695, %v3019_v52 }
 0x30b   : > { %v3035_v5 = vsub.f32 %v8639_v38, %v2786_v26  ;;  %v9549_v31 = vpop.eup %7070 }
 0x30c   : > { %3801 = vperm.xlu1 %7008, %v9541_v6   ;;  %11008 = vst [vmem:[#allocation120_spill] sm:$0xff] %v9549_v31  ;;  %7074 = vpow2.f32 %v3084_v53  ;;  %v11016_v6 = vld [vmem:[#allocation10_spill] sm:$0xff] }
 0x30d   : > { %2945 = vperm.xlu0 %7009, %v9198_v23   ;;  %v3116_v16 = vmul.f32 1.442695, %v3035_v5  ;;  %v9555_v26 = vpop.eup %7072 }
 0x30e   : > { %v2701_v12 = vpop.permute.xlu0 %2700  ;;  %11009 = vst [vmem:[#allocation121_spill] sm:$0xff] %v9555_v26 }
 0x30f   : > { %v3018_v37 = vsub.f32 %v8642_v39, %v2701_v12  ;;  %v2781_v55 = vpop.permute.xlu1 %2780 }
 0x310   : > { %v3034_v17 = vsub.f32 %v8645_v40, %v2781_v55  ;;  %3731 = vperm.xlu1 %7008, %v9549_v31   ;;  %v1260_v31 = vld [vmem:[%s7922_s29 + $0x138] sm:$0xff] }
 0x311   : > { %v3082_v27 = vmul.f32 1.442695, %v3018_v37  ;;  %2875 = vperm.xlu0 %7009, %v9218_v18   ;;  %v11010_v37 = vsub.f32 %v9158_v29, %v9172_v49 }
 0x312   : > { %v3114_v38 = vmul.f32 1.442695, %v3034_v17  ;;  %v2796_v40 = vpop.permute.xlu0 %2795 }
 0x313   : > { %7076 = vpow2.f32 %v3082_v27  ;;  %v2716_v52 = vpop.permute.xlu1 %2715  ;;  %v3037_v53 = vsub.f32 %v8652_v43, %v2796_v40  ;;  %v2636_v55 = vmul.f32 1.442695, %v11010_v37  ;;  %v1255_v27 = vld [vmem:[%s7922_s29 + $0x110] sm:$0xff] }
 0x314   : > { %7078 = vpow2.f32 %v3114_v38  ;;  %3811 = vperm.xlu1 %7008, %v9555_v26   ;;  %v3021_v39 = vsub.f32 %v8647_v41, %v2716_v52  ;;  %v1256_v38 = vld [vmem:[%s7922_s29 + $0x118] sm:$0xff]  ;;  %v1271_v43 = vld [vmem:[%s7922_s29 + $0x190] sm:$0xff] }
 0x315   : > { %7080 = vpow2.f32 %v3116_v16  ;;  %2955 = vperm.xlu0 %7009, %v9236_v36   ;;  %v1259_v26 = vld [vmem:[%s7922_s29 + $0x130] sm:$0xff] }
 0x316   : > { %v3088_v12 = vmul.f32 1.442695, %v3021_v39  ;;  %v9569_v52 = vpop.eup %7074  ;;  %v1272_v39 = vld [vmem:[%s7922_s29 + $0x198] sm:$0xff] }
 0x317   : > { %v2711_v5 = vpop.permute.xlu1 %2710  ;;  %11011 = vst [vmem:[#allocation122_spill] sm:$0xff] %v9569_v52 }
 0x318   : > { %v3020_v17 = vsub.f32 %v8650_v42, %v2711_v5  ;;  %2860 = vperm.xlu1 %7008, %v9175_v48   ;;  %v3120_v5 = vmul.f32 1.442695, %v3037_v53  ;;  %v1257_v53 = vld [vmem:[%s7922_s29 + $0x120] sm:$0xff] }
 0x319   : > { %2885 = vperm.xlu0 %7009, %v9260_v3  }
 0x31a   : > { %v3086_v41 = vmul.f32 1.442695, %v3020_v17 }
 0x31b   : > { %v2791_v16 = vpop.permute.xlu1 %2790 }
 0x31c   : > { %7082 = vpow2.f32 %v3086_v41  ;;  %v3036_v42 = vsub.f32 %v8655_v44, %v2791_v16  ;;  %2940 = vperm.xlu1 %7008, %v9201_v10   ;;  %v6854_v44 = vpack.c.bf16 %v1256_v38, %v1255_v27  ;;  %v6886_v41 = vpack.c.bf16 %v1272_v39, %v1271_v43  ;;  %v2806_v16 = vpop.permute.xlu0 %2805  ;;  %v1274_v27 = vld [vmem:[%s7922_s29 + $0x1a8] sm:$0xff] }
 0x31d   : > { %v9575_v40 = vpop.eup %7076  ;;  %7084 = vpow2.f32 %v3088_v12  ;;  %2965 = vperm.xlu0 %7009, %v9286_v22   ;;  %v1258_v12 = vld [vmem:[%s7922_s29 + $0x128] sm:$0xff] }
 0x31e   : > { %11012 = vst [vmem:[#allocation123_spill] sm:$0xff] %v9575_v40  ;;  %v9578_v49 = vpop.eup %7078  ;;  %7086 = vpow2.f32 %v2636_v55  ;;  %v3118_v29 = vmul.f32 1.442695, %v3036_v42  ;;  %6402 = vmatprep.mubr.f32.mxu0 %v9575_v40  ;;  %v1273_v55 = vld [vmem:[%s7922_s29 + $0x1a0] sm:$0xff]  ;;  %v6858_v42 = vpack.c.bf16 %v1258_v12, %v1257_v53  ;;  %v11015_v43 = vld [vmem:[#allocation71_spill] sm:$0xff] }
 0x31f   : > { %11013 = vst [vmem:[#allocation124_spill] sm:$0xff] %v9578_v49  ;;  %v9581_v17 = vpop.eup %7080  ;;  %6458 = vmatprep.mubr.f32.mxu1 %v9578_v49  ;;  %v2726_v37 = vpop.permute.xlu1 %2725  ;;  %6403 = vmatmul.mubr.f32.vlgmr.msra.gmra.mrb[32].mxu0 %v9569_v52  ;;  %v2538_v39 = vsub.f32 %v11015_v43, %v9175_v48  ;;  %v11018_v49 = vld [vmem:[#allocation11_spill] sm:$0xff]  ;;  %v11019_v12 = vld [vmem:[#allocation78_spill] sm:$0xff]  ;;  %v6862_v43 = vpack.c.bf16 %v1260_v31, %v1259_v26 }
 0x320   : > { %11014 = vst [vmem:[#allocation125_spill] sm:$0xff] %v9581_v17  ;;  %7088 = vpow2.f32 %v3118_v29  ;;  %2870 = vperm.xlu1 %7008, %v9221_v46   ;;  %6459 = vmatmul.mubr.f32.vlgmr.msra.gmra.mrb[32].mxu1 %v9581_v17  ;;  %v3023_v38 = vsub.f32 %v8657_v45, %v2726_v37  ;;  %v11017_v37 = vld [vmem:[#allocation82_spill] sm:$0xff]  ;;  %v1275_v17 = vld [vmem:[%s7922_s29 + $0x1b0] sm:$0xff]  ;;  %v1278_v26 = vld [vmem:[%s7922_s29 + $0x1c8] sm:$0xff] }
 0x321   : > { %7090 = vpow2.f32 %v3120_v5  ;;  %2895 = vperm.xlu0 %7009, %v9308_v20   ;;  %6853 = vmatpush3.bf16.msra.mxu0 %v9533_v54  ;;  %v6890_v5 = vpack.c.bf16 %v1274_v27, %v1273_v55  ;;  %v1276_v54 = vld [vmem:[%s7922_s29 + $0x1b8] sm:$0xff]  ;;  %v11020_v55 = vsub.f32 %v11019_v12, %v9218_v18  ;;  %v11023_v18 = vld [vmem:[#allocation12_spill] sm:$0xff]  ;;  %v1277_v31 = vld [vmem:[%s7922_s29 + $0x1c0] sm:$0xff] }
 0x322   : > { %6855 = vmatprep.subr.bf16.mxu0 %v6854_v44  ;;  %6885 = vmatpush3.bf16.msra.mxu1 %v9543_v11  ;;  %v3039_v11 = vsub.f32 %v11018_v49, %v2806_v16  ;;  %v3092_v53 = vmul.f32 1.442695, %v3023_v38  ;;  %v2634_v49 = vmul.f32 1.442695, %v2538_v39  ;;  %v1262_v38 = vld [vmem:[%s7922_s29 + $0x148] sm:$0xff]  ;;  %v6894_v52 = vpack.c.bf16 %v1276_v54, %v1275_v17 }
 0x323   : > { %v2721_v29 = vpop.permute.xlu1 %2720  ;;  %6887 = vmatprep.subr.bf16.mxu1 %v6886_v41 }
 0x324   : > { %v3022_v40 = vsub.f32 %v11016_v6, %v2721_v29  ;;  %v9600_v45 = vpop.permute.xlu0 %2815  ;;  %2950 = vperm.xlu1 %7008, %v11017_v37   ;;  %v2640_v6 = vmul.f32 1.442695, %v11020_v55 }
 0x325   : > { %2975 = vperm.xlu0 %7009, %v9328_v35   ;;  %6857 = vmatpush3.bf16.msra.mxu0 %v6854_v44  ;;  %v1261_v44 = vld [vmem:[%s7922_s29 + $0x140] sm:$0xff] }
 0x326   : > { %v9607_v48 = vpop.eup %7082  ;;  %v3090_v27 = vmul.f32 1.442695, %v3022_v40  ;;  %6859 = vmatprep.subr.bf16.mxu0 %v6858_v42  ;;  %6889 = vmatpush3.bf16.msra.mxu1 %v6886_v41  ;;  %v3124_v41 = vmul.f32 1.442695, %v3039_v11  ;;  %v6866_v54 = vpack.c.bf16 %v1262_v38, %v1261_v44  ;;  %v1263_v11 = vld [vmem:[%s7922_s29 + $0x150] sm:$0xff] }
 0x327   : > { %v9612_v29 = vpop.eup %7084  ;;  %v2801_v16 = vpop.permute.xlu1 %2800  ;;  %6405 = vmatprep.mubr.f32.mxu0 %v9607_v48  ;;  %6891 = vmatprep.subr.bf16.mxu1 %v6890_v5 }
 0x328   : > { %11021 = vst [vmem:[#allocation71_spill] sm:$0xff] %v9612_v29  ;;  %v9617_v9 = vpop.eup %7086  ;;  %7092 = vpow2.f32 %v3090_v27  ;;  %v3038_v40 = vsub.f32 %v11023_v18, %v2801_v16  ;;  %v9620_v12 = vpop.permute.xlu0 %3746  ;;  %2880 = vperm.xlu1 %7008, %v9263_v32   ;;  %6406 = vmatmul.mubr.f32.gmra.mrb[34].mxu0 %v9612_v29  ;;  %v6898_v16 = vpack.c.bf16 %v1278_v26, %v1277_v31  ;;  %v11027_v18 = vld [vmem:[#allocation79_spill] sm:$0xff]  ;;  %v1265_v26 = vld [vmem:[%s7922_s29 + $0x160] sm:$0xff] }
 0x329   : > { %11022 = vst [vmem:[#allocation10_spill] sm:$0xff] %v9617_v9  ;;  %11024 = vst [vmem:[#allocation82_spill] sm:$0xff] %v9620_v12  ;;  %7094 = vpow2.f32 %v3092_v53  ;;  %3826 = vperm.xlu0 %7009, %v9617_v9   ;;  %6861 = vmatpush3.bf16.msra.mxu0 %v6858_v42  ;;  %v1264_v53 = vld [vmem:[%s7922_s29 + $0x158] sm:$0xff]  ;;  %v11028_v12 = vld [vmem:[#allocation14_spill] sm:$0xff] }
 0x32a   : > { %v9627_v17 = vpop.eup %7088  ;;  %7096 = vpow2.f32 %v2640_v6  ;;  %v3122_v39 = vmul.f32 1.442695, %v3038_v40  ;;  %6863 = vmatprep.subr.bf16.mxu0 %v6862_v43  ;;  %6893 = vmatpush3.bf16.msra.mxu1 %v6890_v5  ;;  %v1279_v5 = vld [vmem:[%s7922_s29 + $0x1d0] sm:$0xff]  ;;  %v1280_v6 = vld [vmem:[%s7922_s29 + $0x1d8] sm:$0xff]  ;;  %v6870_v38 = vpack.c.bf16 %v1264_v53, %v1263_v11  ;;  %v2540_v40 = vsub.f32 %v11027_v18, %v9221_v46 }
 0x32b   : > { %v9629_v55 = vpop.eup %7090  ;;  %7098 = vpow2.f32 %v2634_v49  ;;  %v2736_v27 = vpop.permute.xlu1 %2735  ;;  %6461 = vmatprep.mubr.f32.mxu1 %v9627_v17  ;;  %6895 = vmatprep.subr.bf16.mxu1 %v6894_v52  ;;  %v11026_v49 = vld [vmem:[#allocation13_spill] sm:$0xff]  ;;  %v6902_v9 = vpack.c.bf16 %v1280_v6, %v1279_v5 }
 0x32c   : > { %11025 = vst [vmem:[#allocation11_spill] sm:$0xff] %v9629_v55  ;;  %7100 = vpow2.f32 %v3122_v39  ;;  %v9634_v42 = vpop.permute.xlu0 %2745  ;;  %2960 = vperm.xlu1 %7008, %v9289_v15   ;;  %6462 = vmatmul.mubr.f32.gmra.mrb[34].mxu1 %v9629_v55  ;;  %v3025_v44 = vsub.f32 %v11026_v49, %v2736_v27  ;;  %v1266_v39 = vld [vmem:[%s7922_s29 + $0x168] sm:$0xff]  ;;  %v1281_v27 = vld [vmem:[%s7922_s29 + $0x1e0] sm:$0xff]  ;;  %v2638_v49 = vmul.f32 1.442695, %v2540_v40  ;;  %v1284_v40 = vld [vmem:[%s7922_s29 + $0x1f8] sm:$0xff] }
 0x32d   : > { %7102 = vpow2.f32 %v3124_v41  ;;  %2905 = vperm.xlu0 %7009, %v9350_v14   ;;  %6865 = vmatpush3.bf16.msra.mxu0 %v6862_v43  ;;  %v1282_v43 = vld [vmem:[%s7922_s29 + $0x1e8] sm:$0xff] }
 0x32e   : > { %6867 = vmatprep.subr.bf16.mxu0 %v6866_v54  ;;  %6897 = vmatpush3.bf16.msra.mxu1 %v6894_v52  ;;  %v11029_v52 = vld [vmem:[#allocation15_spill] sm:$0xff]  ;;  %v3096_v53 = vmul.f32 1.442695, %v3025_v44  ;;  %v1268_v44 = vld [vmem:[%s7922_s29 + $0x178] sm:$0xff] }
 0x32f   : > { %v2731_v31 = vpop.permute.xlu1 %2730  ;;  %6899 = vmatprep.subr.bf16.mxu1 %v6898_v16  ;;  %v3041_v11 = vsub.f32 %v11029_v52, %v9600_v45  ;;  %v1267_v45 = vld [vmem:[%s7922_s29 + $0x170] sm:$0xff] }
 0x330   : > { %v3024_v41 = vsub.f32 %v11028_v12, %v2731_v31  ;;  %v9647_v55 = vpop.permute.xlu0 %2825  ;;  %2890 = vperm.xlu1 %7008, %v9311_v63   ;;  %v6874_v12 = vpack.c.bf16 %v1266_v39, %v1265_v26  ;;  %v6906_v31 = vpack.c.bf16 %v1282_v43, %v1281_v27 }
 0x331   : > { %2985 = vperm.xlu0 %7009, %v9375_v0   ;;  %6869 = vmatpush3.bf16.msra.mxu0 %v6866_v54  ;;  %v11031_v54 = vld [vmem:[#allocation16_spill] sm:$0xff]  ;;  %v3128_v39 = vmul.f32 1.442695, %v3041_v11 }
 0x332   : > { %v9655_v46 = vpop.eup %7092  ;;  %v3094_v5 = vmul.f32 1.442695, %v3024_v41  ;;  %6871 = vmatprep.subr.bf16.mxu0 %v6870_v38  ;;  %6901 = vmatpush3.bf16.msra.mxu1 %v6898_v16  ;;  %v1283_v16 = vld [vmem:[%s7922_s29 + $0x1f0] sm:$0xff] }
 0x333   : > { %v9657_v6 = vpop.eup %7094  ;;  %v2811_v18 = vpop.permute.xlu1 %2810  ;;  %6408 = vmatprep.mubr.f32.mxu0 %v9655_v46  ;;  %6903 = vmatprep.subr.bf16.mxu1 %v6902_v9 }
 0x334   : > { %v9662_v52 = vpop.eup %7096  ;;  %7104 = vpow2.f32 %v3094_v5  ;;  %v3040_v41 = vsub.f32 %v11031_v54, %v2811_v18  ;;  %v9665_v29 = vpop.permute.xlu0 %3661  ;;  %2970 = vperm.xlu1 %7008, %v9331_v21   ;;  %6409 = vmatmul.mubr.f32.gmra.mrb[36].mxu0 %v9657_v6  ;;  %v6878_v5 = vpack.c.bf16 %v1268_v44, %v1267_v45 }
 0x335   : > { %11030 = vst [vmem:[#allocation78_spill] sm:$0xff] %v9662_v52  ;;  %11032 = vst [vmem:[#allocation12_spill] sm:$0xff] %v9665_v29  ;;  %v9671_v26 = vpop.eup %7098  ;;  %7106 = vpow2.f32 %v3096_v53  ;;  %3836 = vperm.xlu0 %7009, %v9662_v52   ;;  %6873 = vmatpush3.bf16.msra.mxu0 %v6870_v38  ;;  %v6910_v29 = vpack.c.bf16 %v1284_v40, %v1283_v16  ;;  %v11035_v53 = vld [vmem:[#allocation17_spill] sm:$0xff] }
 0x336   : > { %11033 = vst [vmem:[#allocation13_spill] sm:$0xff] %v9671_v26  ;;  %v9674_v27 = vpop.eup %7100  ;;  %v3126_v43 = vmul.f32 1.442695, %v3040_v41  ;;  %6875 = vmatprep.subr.bf16.mxu0 %v6874_v12  ;;  %6905 = vmatpush3.bf16.msra.mxu1 %v6902_v9  ;;  %7108 = vpow2.f32 %v2638_v49  ;;  %v3027_v49 = vsub.f32 %v11035_v53, %v9634_v42 }
 0x337   : > { %v9676_v18 = vpop.eup %7102  ;;  %v9678_v54 = vpop.permute.xlu1 %3666  ;;  %6464 = vmatprep.mubr.f32.mxu1 %v9674_v27  ;;  %6907 = vmatprep.subr.bf16.mxu1 %v6906_v31 }
 0x338   : > { %7110 = vpow2.f32 %v3126_v43  ;;  %v9681_v11 = vpop.permute.xlu0 %3676  ;;  %3821 = vperm.xlu1 %7008, %v9671_v26   ;;  %6465 = vmatmul.mubr.f32.gmra.mrb[36].mxu1 %v9676_v18  ;;  %v3100_v42 = vmul.f32 1.442695, %v3027_v49  ;;  %v11040_v26 = vld [vmem:[#allocation20_spill] sm:$0xff] }
 0x339   : > { %7112 = vpow2.f32 %v3128_v39  ;;  %2915 = vperm.xlu0 %7009, %v9398_v25   ;;  %6877 = vmatpush3.bf16.msra.mxu0 %v6874_v12  ;;  %v11038_v39 = vld [vmem:[#allocation19_spill] sm:$0xff] }
 0x33a   : > { %6879 = vmatprep.subr.bf16.mxu0 %v6878_v5  ;;  %6909 = vmatpush3.bf16.msra.mxu1 %v6906_v31  ;;  %v11036_v31 = vld [vmem:[#allocation18_spill] sm:$0xff]  ;;  %v3043_v43 = vsub.f32 %v11038_v39, %v9647_v55 }
 0x33b   : > { %v9686_v9 = vpop.permute.xlu1 %3741  ;;  %6911 = vmatprep.subr.bf16.mxu1 %v6910_v29 }
 0x33c   : > { %v9688_v38 = vpop.permute.xlu0 %3756  ;;  %2900 = vperm.xlu1 %7008, %v9353_v56   ;;  %v3132_v55 = vmul.f32 1.442695, %v3043_v43  ;;  %v11045_v43 = vld [vmem:[#allocation83_spill] sm:$0xff] }
 0x33d   : > { %11034 = vst [vmem:[#allocation79_spill] sm:$0xff] %v9688_v38  ;;  %2995 = vperm.xlu0 %7009, %v9421_v8   ;;  %6881 = vmatpush3.bf16.msra.mxu0 %v6878_v5  ;;  %v11039_v5 = vsub.f32 %v9242_v19, %v9260_v3  ;;  %v11041_v19 = vsub.f32 %v9294_v50, %v9308_v20 }
 0x33e   : > { %v9694_v45 = vpop.eup %7104  ;;  %6913 = vmatpush3.bf16.msra.mxu1 %v6910_v29  ;;  %v2542_v50 = vsub.f32 %v11045_v43, %v9263_v32 }
 0x33f   : > { %v9696_v44 = vpop.eup %7106  ;;  %v2741_v12 = vpop.permute.xlu1 %2740  ;;  %6411 = vmatprep.mubr.f32.mxu0 %v9694_v45  ;;  %v2644_v53 = vmul.f32 1.442695, %v11039_v5  ;;  %v2648_v3 = vmul.f32 1.442695, %v11041_v19  ;;  %v11048_v19 = vld [vmem:[#allocation80_spill] sm:$0xff] }
 0x340   : > { %v3026_v41 = vsub.f32 %v11036_v31, %v2741_v12  ;;  %v2756_v16 = vpop.permute.xlu0 %2755  ;;  %2980 = vperm.xlu1 %7008, %v9378_v7   ;;  %6412 = vmatmul.mubr.f32.gmra.mrb[38].mxu0 %v9696_v44  ;;  %v9702_v40 = vpop.eup %7108  ;;  %v2642_v32 = vmul.f32 1.442695, %v2542_v50 }
 0x341   : > { %11037 = vst [vmem:[#allocation14_spill] sm:$0xff] %v9702_v40  ;;  %2925 = vperm.xlu0 %7009, %v9444_v4  }
 0x342   : > { %v9707_v29 = vpop.eup %7110  ;;  %v3098_v12 = vmul.f32 1.442695, %v3026_v41 }
 0x343   : > { %v9712_v31 = vpop.eup %7112  ;;  %v2821_v52 = vpop.permute.xlu1 %2820  ;;  %6467 = vmatprep.mubr.f32.mxu1 %v9707_v29 }
 0x344   : > { %7114 = vpow2.f32 %v3098_v12  ;;  %v3042_v49 = vsub.f32 %v11040_v26, %v2821_v52  ;;  %v2836_v38 = vpop.permute.xlu0 %2835  ;;  %3831 = vperm.xlu1 %7008, %v9702_v40   ;;  %6468 = vmatmul.mubr.f32.gmra.mrb[38].mxu1 %v9712_v31  ;;  %v11043_v52 = vld [vmem:[#allocation74_spill] sm:$0xff]  ;;  %v11047_v12 = vld [vmem:[#allocation21_spill] sm:$0xff] }
 0x345   : > { %7116 = vpow2.f32 %v3100_v42  ;;  %3005 = vperm.xlu0 %7009, %v9467_v62   ;;  %v11044_v26 = vsub.f32 %v11043_v52, %v9198_v23  ;;  %v11049_v23 = vsub.f32 %v11048_v19, %v9236_v36  ;;  %v11050_v52 = vld [vmem:[#allocation90_spill] sm:$0xff] }
 0x346   : > { %7118 = vpow2.f32 %v2644_v53  ;;  %v3130_v41 = vmul.f32 1.442695, %v3042_v49  ;;  %v3029_v49 = vsub.f32 %v11047_v12, %v2756_v16  ;;  %v11052_v16 = vld [vmem:[#allocation22_spill] sm:$0xff] }
 0x347   : > { %v9722_v39 = vpop.permute.xlu1 %3671  ;;  %v2668_v42 = vmul.f32 1.442695, %v11044_v26  ;;  %v2544_v26 = vsub.f32 %v11050_v52, %v9311_v63  ;;  %v11054_v63 = vld [vmem:[#allocation86_spill] sm:$0xff] }
 0x348   : > { %7120 = vpow2.f32 %v3130_v41  ;;  %v9724_v5 = vpop.permute.xlu0 %3686  ;;  %2910 = vperm.xlu1 %7008, %v9401_v60   ;;  %v3104_v36 = vmul.f32 1.442695, %v3029_v49 }
 0x349   : > { %11042 = vst [vmem:[#allocation15_spill] sm:$0xff] %v9724_v5  ;;  %7122 = vpow2.f32 %v3132_v55  ;;  %2935 = vperm.xlu0 %7009, %v9490_v34  }
 0x34a   : > { %7124 = vpow2.f32 %v2648_v3  ;;  %v2672_v3 = vmul.f32 1.442695, %v11049_v23  ;;  %v11055_v23 = vsub.f32 %v11054_v63, %v9286_v22  ;;  %v11058_v22 = vld [vmem:[#allocation75_spill] sm:$0xff] }
 0x34b   : > { %v9733_v20 = vpop.permute.xlu1 %3751  ;;  %7126 = vpow2.f32 %v2668_v42  ;;  %v11053_v42 = vld [vmem:[#allocation23_spill] sm:$0xff] }
 0x34c   : > { %v9735_v53 = vpop.permute.xlu0 %3766  ;;  %2990 = vperm.xlu1 %7008, %v9424_v59   ;;  %v3045_v19 = vsub.f32 %v11053_v42, %v2836_v38  ;;  %7128 = vpow2.f32 %v2672_v3  ;;  %v2676_v52 = vmul.f32 1.442695, %v11055_v23  ;;  %v11057_v38 = vld [vmem:[#allocation24_spill] sm:$0xff]  ;;  %v2554_v3 = vsub.f32 %v11058_v22, %v9201_v10 }
 0x34d   : > { %11046 = vst [vmem:[#allocation16_spill] sm:$0xff] %v9735_v53  ;;  %3015 = vperm.xlu0 %7009, %v9513_v61   ;;  %7130 = vpow2.f32 %v2642_v32 }
 0x34e   : > { %v9740_v55 = vpop.eup %7114  ;;  %v3136_v32 = vmul.f32 1.442695, %v3045_v19  ;;  %v11062_v19 = vld [vmem:[#allocation81_spill] sm:$0xff] }
 0x34f   : > { %v9745_v41 = vpop.eup %7116  ;;  %v2751_v43 = vpop.permute.xlu1 %2750  ;;  %6414 = vmatprep.mubr.f32.mxu0 %v9740_v55 }
 0x350   : > { %v9750_v40 = vpop.eup %7118  ;;  %v3028_v12 = vsub.f32 %v11052_v16, %v2751_v43  ;;  %v9753_v61 = vpop.permute.xlu0 %2765  ;;  %2920 = vperm.xlu1 %7008, %v9447_v33   ;;  %6415 = vmatmul.mubr.f32.gmra.mrb[40].mxu0 %v9745_v41  ;;  %v2646_v16 = vmul.f32 1.442695, %v2544_v26  ;;  %v11059_v26 = vld [vmem:[#allocation91_spill] sm:$0xff] }
 0x351   : > { %11051 = vst [vmem:[#allocation17_spill] sm:$0xff] %v9750_v40  ;;  %3846 = vperm.xlu0 %7009, %v9750_v40  }
 0x352   : > { %v9759_v50 = vpop.eup %7120  ;;  %v3102_v53 = vmul.f32 1.442695, %v3028_v12  ;;  %v11060_v12 = vsub.f32 %v11059_v26, %v9328_v35  ;;  %v11063_v35 = vld [vmem:[#allocation87_spill] sm:$0xff] }
 0x353   : > { %v9764_v43 = vpop.eup %7122  ;;  %v2831_v5 = vpop.permute.xlu1 %2830  ;;  %6470 = vmatprep.mubr.f32.mxu1 %v9759_v50 }
 0x354   : > { %v9767_v49 = vpop.eup %7124  ;;  %7132 = vpow2.f32 %v3102_v53  ;;  %v3044_v42 = vsub.f32 %v11057_v38, %v2831_v5  ;;  %v9770_v40 = vpop.permute.xlu0 %2845  ;;  %3000 = vperm.xlu1 %7008, %v9470_v57   ;;  %6471 = vmatmul.mubr.f32.gmra.mrb[40].mxu1 %v9764_v43  ;;  %v2680_v53 = vmul.f32 1.442695, %v11060_v12  ;;  %v2547_v5 = vsub.f32 %v9334_v2, %v9350_v14 }
 0x355   : > { %11056 = vst [vmem:[#allocation18_spill] sm:$0xff] %v9767_v49  ;;  %7134 = vpow2.f32 %v3104_v36  ;;  %3856 = vperm.xlu0 %7009, %v9767_v49   ;;  %v9784_v38 = vpop.eup %7126  ;;  %v2666_v36 = vmul.f32 1.442695, %v2554_v3  ;;  %v2563_v2 = vsub.f32 %v9358_v30, %v9375_v0  ;;  %v2549_v0 = vsub.f32 %v9383_v1, %v9398_v25 }
 0x356   : > { %7136 = vpow2.f32 %v2676_v52  ;;  %v3134_v63 = vmul.f32 1.442695, %v3044_v42  ;;  %11061 = vst [vmem:[#allocation19_spill] sm:$0xff] %v9784_v38  ;;  %v2556_v52 = vsub.f32 %v11062_v19, %v11017_v37  ;;  %v2652_v14 = vmul.f32 1.442695, %v2547_v5  ;;  %v9798_v22 = vpop.eup %7128 }
 0x357   : > { %7138 = vpow2.f32 %v2646_v16  ;;  %v9782_v23 = vpop.permute.xlu1 %3681  ;;  %v2558_v16 = vsub.f32 %v11063_v35, %v9289_v15  ;;  %11064 = vst [vmem:[#allocation20_spill] sm:$0xff] %v9798_v22  ;;  %v9803_v37 = vpop.eup %7130  ;;  %v2684_v15 = vmul.f32 1.442695, %v2563_v2 }
 0x358   : > { %7140 = vpow2.f32 %v3134_v63  ;;  %v9786_v10 = vpop.permute.xlu0 %3696  ;;  %2930 = vperm.xlu1 %7008, %v9493_v24   ;;  %11065 = vst [vmem:[#allocation74_spill] sm:$0xff] %v9803_v37  ;;  %v2670_v3 = vmul.f32 1.442695, %v2556_v52  ;;  %v11067_v63 = vld [vmem:[#allocation92_spill] sm:$0xff] }
 0x359   : > { %7142 = vpow2.f32 %v3136_v32  ;;  %3906 = vperm.xlu0 %7009, %v9784_v38   ;;  %v11066_v32 = vld [vmem:[#allocation25_spill] sm:$0xff]  ;;  %v2674_v5 = vmul.f32 1.442695, %v2558_v16  ;;  %v2560_v19 = vsub.f32 %v11067_v63, %v9331_v21  ;;  %v2656_v16 = vmul.f32 1.442695, %v2549_v0 }
 0x35a   : > { %7144 = vpow2.f32 %v2680_v53  ;;  %v3031_v12 = vsub.f32 %v11066_v32, %v9753_v61  ;;  %v11069_v61 = vld [vmem:[#allocation26_spill] sm:$0xff]  ;;  %v2565_v63 = vsub.f32 %v9406_v51, %v9421_v8  ;;  %v11074_v51 = vld [vmem:[#allocation93_spill] sm:$0xff] }
 0x35b   : > { %v9796_v42 = vpop.permute.xlu1 %3761  ;;  %7146 = vpow2.f32 %v2666_v36  ;;  %v2678_v49 = vmul.f32 1.442695, %v2560_v19  ;;  %v2546_v8 = vsub.f32 %v11074_v51, %v9353_v56 }
 0x35c   : > { %v9800_v26 = vpop.permute.xlu0 %3776  ;;  %3010 = vperm.xlu1 %7008, %v9516_v13   ;;  %7148 = vpow2.f32 %v2652_v14  ;;  %v3108_v25 = vmul.f32 1.442695, %v3031_v12  ;;  %v11071_v14 = vld [vmem:[#allocation27_spill] sm:$0xff]  ;;  %v2688_v0 = vmul.f32 1.442695, %v2565_v63 }
 0x35d   : > { %3916 = vperm.xlu0 %7009, %v9798_v22   ;;  %7150 = vpow2.f32 %v2670_v3  ;;  %v3047_v21 = vsub.f32 %v11071_v14, %v9770_v40  ;;  %v11073_v40 = vld [vmem:[#allocation28_spill] sm:$0xff]  ;;  %v2650_v56 = vmul.f32 1.442695, %v2546_v8  ;;  %v11081_v8 = vld [vmem:[#allocation29_spill] sm:$0xff] }
 0x35e   : > { %v9808_v30 = vpop.eup %7132  ;;  %7152 = vpow2.f32 %v2684_v15 }
 0x35f   : > { %v9812_v53 = vpop.eup %7134  ;;  %v2761_v36 = vpop.permute.xlu1 %2760  ;;  %6417 = vmatprep.mubr.f32.mxu0 %v9808_v30  ;;  %7154 = vpow2.f32 %v2674_v5  ;;  %v3140_v15 = vmul.f32 1.442695, %v3047_v21  ;;  %v2551_v5 = vsub.f32 %v9429_v58, %v9444_v4  ;;  %v2567_v4 = vsub.f32 %v9452_v28, %v9467_v62  ;;  %v11078_v21 = vld [vmem:[#allocation98_spill] sm:$0xff] }
 0x360   : > { %v9817_v52 = vpop.eup %7136  ;;  %v3030_v35 = vsub.f32 %v11069_v61, %v2761_v36  ;;  %v9820_v32 = vpop.permute.xlu0 %2775  ;;  %3841 = vperm.xlu1 %7008, %v9803_v37   ;;  %6418 = vmatmul.mubr.f32.gmra.mrb[42].mxu0 %v9812_v53  ;;  %v11115_v37 = vld [vmem:[#allocation33_spill] sm:$0xff] }
 0x361   : > { %11068 = vst [vmem:[#allocation83_spill] sm:$0xff] %v9817_v52  ;;  %v9824_v1 = vpop.eup %7138  ;;  %3926 = vperm.xlu0 %7009, %v9817_v52   ;;  %v2660_v58 = vmul.f32 1.442695, %v2551_v5  ;;  %v3033_v62 = vsub.f32 %v11081_v8, %v9820_v32  ;;  %v11085_v32 = vld [vmem:[#allocation30_spill] sm:$0xff] }
 0x362   : > { %11070 = vst [vmem:[#allocation21_spill] sm:$0xff] %v9824_v1  ;;  %v9829_v2 = vpop.eup %7140  ;;  %v3106_v36 = vmul.f32 1.442695, %v3030_v35 }
 0x363   : > { %v9833_v61 = vpop.eup %7142  ;;  %v2841_v22 = vpop.permute.xlu1 %2840  ;;  %6473 = vmatprep.mubr.f32.mxu1 %v9829_v2 }
 0x364   : > { %v9836_v3 = vpop.eup %7144  ;;  %7156 = vpow2.f32 %v3106_v36  ;;  %v3046_v12 = vsub.f32 %v11073_v40, %v2841_v22  ;;  %v9839_v14 = vpop.permute.xlu0 %2855  ;;  %3851 = vperm.xlu1 %7008, %v9824_v1   ;;  %6474 = vmatmul.mubr.f32.gmra.mrb[42].mxu1 %v9833_v61 }
 0x365   : > { %11072 = vst [vmem:[#allocation80_spill] sm:$0xff] %v9836_v3  ;;  %7158 = vpow2.f32 %v3108_v25  ;;  %3936 = vperm.xlu0 %7009, %v9836_v3   ;;  %v9848_v22 = vpop.eup %7146  ;;  %v2562_v25 = vsub.f32 %v9360_v47, %v9378_v7 }
 0x366   : > { %7160 = vpow2.f32 %v2656_v16  ;;  %v3138_v19 = vmul.f32 1.442695, %v3046_v12  ;;  %11075 = vst [vmem:[#allocation90_spill] sm:$0xff] %v9848_v22  ;;  %v9852_v36 = vpop.eup %7148  ;;  %v2548_v16 = vsub.f32 %v11078_v21, %v9401_v60  ;;  %v2692_v60 = vmul.f32 1.442695, %v2567_v4  ;;  %v11083_v21 = vld [vmem:[#allocation100_spill] sm:$0xff] }
 0x367   : > { %7162 = vpow2.f32 %v2678_v49  ;;  %v9850_v35 = vpop.permute.xlu1 %3691  ;;  %11076 = vst [vmem:[#allocation22_spill] sm:$0xff] %v9852_v36  ;;  %v9862_v49 = vpop.eup %7150  ;;  %v2682_v7 = vmul.f32 1.442695, %v2562_v25  ;;  %v11088_v4 = vld [vmem:[#allocation31_spill] sm:$0xff] }
 0x368   : > { %7164 = vpow2.f32 %v3138_v19  ;;  %v9854_v40 = vpop.permute.xlu0 %3706  ;;  %3901 = vperm.xlu1 %7008, %v9848_v22   ;;  %11077 = vst [vmem:[#allocation23_spill] sm:$0xff] %v9862_v49  ;;  %v9868_v12 = vpop.eup %7152  ;;  %v2654_v19 = vmul.f32 1.442695, %v2548_v16  ;;  %v11116_v22 = vld [vmem:[#allocation34_spill] sm:$0xff] }
 0x369   : > { %7166 = vpow2.f32 %v3140_v15  ;;  %3866 = vperm.xlu0 %7009, %v9852_v36   ;;  %11079 = vst [vmem:[#allocation86_spill] sm:$0xff] %v9868_v12  ;;  %v9873_v47 = vpop.eup %7154  ;;  %v11082_v15 = vld [vmem:[#allocation108_spill] sm:$0xff]  ;;  %v2564_v36 = vsub.f32 %v11083_v21, %v9424_v59  ;;  %v3049_v59 = vsub.f32 %v11088_v4, %v9839_v14 }
 0x36a   : > { %7168 = vpow2.f32 %v2688_v0  ;;  %11080 = vst [vmem:[#allocation24_spill] sm:$0xff] %v9873_v47  ;;  %v2553_v0 = vsub.f32 %v11082_v15, %v9490_v34 }
 0x36b   : > { %v9866_v63 = vpop.permute.xlu1 %3771  ;;  %7170 = vpow2.f32 %v2650_v56 }
 0x36c   : > { %v9870_v51 = vpop.permute.xlu0 %3786  ;;  %3911 = vperm.xlu1 %7008, %v9862_v49   ;;  %7172 = vpow2.f32 %v2660_v58  ;;  %v3112_v58 = vmul.f32 1.442695, %v3033_v62  ;;  %v2664_v15 = vmul.f32 1.442695, %v2553_v0 }
 0x36d   : > { %3946 = vperm.xlu0 %7009, %v9868_v12   ;;  %7174 = vpow2.f32 %v2682_v7  ;;  %v11090_v7 = vld [vmem:[#allocation32_spill] sm:$0xff] }
 0x36e   : > { %v9878_v28 = vpop.eup %7156  ;;  %7176 = vpow2.f32 %v2692_v60  ;;  %v11092_v60 = vld [vmem:[#allocation102_spill] sm:$0xff] }
 0x36f   : > { %v9882_v5 = vpop.eup %7158  ;;  %v2771_v56 = vpop.permute.xlu1 %2770  ;;  %6420 = vmatprep.mubr.f32.mxu0 %v9878_v28  ;;  %7178 = vpow2.f32 %v2654_v19  ;;  %v2550_v0 = vsub.f32 %v11092_v60, %v9447_v33  ;;  %v3144_v19 = vmul.f32 1.442695, %v3049_v59  ;;  %v11096_v33 = vld [vmem:[#allocation105_spill] sm:$0xff] }
 0x370   : > { %v9887_v25 = vpop.eup %7160  ;;  %v3032_v8 = vsub.f32 %v11085_v32, %v2771_v56  ;;  %v9890_v12 = vpop.permute.xlu0 %3716  ;;  %3921 = vperm.xlu1 %7008, %v9873_v47   ;;  %6421 = vmatmul.mubr.f32.gmra.mrb[44].mxu0 %v9882_v5  ;;  %v2686_v32 = vmul.f32 1.442695, %v2564_v36 }
 0x371   : > { %11084 = vst [vmem:[#allocation75_spill] sm:$0xff] %v9887_v25  ;;  %11086 = vst [vmem:[#allocation91_spill] sm:$0xff] %v9890_v12  ;;  %v9894_v34 = vpop.eup %7162  ;;  %3876 = vperm.xlu0 %7009, %v9887_v25  }
 0x372   : > { %11087 = vst [vmem:[#allocation81_spill] sm:$0xff] %v9894_v34  ;;  %v9899_v16 = vpop.eup %7164  ;;  %v3110_v21 = vmul.f32 1.442695, %v3032_v8 }
 0x373   : > { %v9901_v56 = vpop.eup %7166  ;;  %v2851_v3 = vpop.permute.xlu1 %2850  ;;  %6476 = vmatprep.mubr.f32.mxu1 %v9899_v16 }
 0x374   : > { %v9904_v52 = vpop.eup %7168  ;;  %7180 = vpow2.f32 %v3110_v21  ;;  %v3048_v62 = vsub.f32 %v11090_v7, %v2851_v3  ;;  %v9907_v14 = vpop.permute.xlu0 %3796  ;;  %3931 = vperm.xlu1 %7008, %v9894_v34   ;;  %6477 = vmatmul.mubr.f32.gmra.mrb[44].mxu1 %v9901_v56  ;;  %v2658_v7 = vmul.f32 1.442695, %v2550_v0 }
 0x375   : > { %11089 = vst [vmem:[#allocation87_spill] sm:$0xff] %v9904_v52  ;;  %11091 = vst [vmem:[#allocation25_spill] sm:$0xff] %v9907_v14  ;;  %7182 = vpow2.f32 %v3112_v58  ;;  %3956 = vperm.xlu0 %7009, %v9904_v52   ;;  %v9914_v8 = vpop.eup %7170  ;;  %v2566_v58 = vsub.f32 %v11096_v33, %v9470_v57 }
 0x376   : > { %7184 = vpow2.f32 %v2664_v15  ;;  %v3142_v36 = vmul.f32 1.442695, %v3048_v62  ;;  %11093 = vst [vmem:[#allocation92_spill] sm:$0xff] %v9914_v8  ;;  %v9918_v3 = vpop.eup %7172 }
 0x377   : > { %7186 = vpow2.f32 %v2686_v32  ;;  %v9916_v4 = vpop.permute.xlu1 %3701  ;;  %11094 = vst [vmem:[#allocation26_spill] sm:$0xff] %v9918_v3  ;;  %v9926_v59 = vpop.eup %7174  ;;  %v2690_v0 = vmul.f32 1.442695, %v2566_v58 }
 0x378   : > { %7188 = vpow2.f32 %v3142_v36  ;;  %v9920_v21 = vpop.permute.xlu0 %3726  ;;  %3861 = vperm.xlu1 %7008, %v9914_v8   ;;  %11097 = vst [vmem:[#allocation28_spill] sm:$0xff] %v9926_v59  ;;  %v9930_v32 = vpop.eup %7176  ;;  %v11101_v36 = vld [vmem:[#allocation109_spill] sm:$0xff] }
 0x379   : > { %11095 = vst [vmem:[#allocation27_spill] sm:$0xff] %v9920_v21  ;;  %7190 = vpow2.f32 %v3144_v19  ;;  %3886 = vperm.xlu0 %7009, %v9918_v3   ;;  %11098 = vst [vmem:[#allocation93_spill] sm:$0xff] %v9930_v32  ;;  %v9935_v60 = vpop.eup %7178  ;;  %v2552_v57 = vsub.f32 %v11101_v36, %v9493_v24 }
 0x37a   : > { %11100 = vst [vmem:[#allocation29_spill] sm:$0xff] %v9935_v60  ;;  %7192 = vpow2.f32 %v2658_v7 }
 0x37b   : > { %v9928_v15 = vpop.permute.xlu1 %3781  ;;  %7194 = vpow2.f32 %v2690_v0  ;;  %v2662_v24 = vmul.f32 1.442695, %v2552_v57 }
 0x37c   : > { %v9932_v62 = vpop.permute.xlu0 %3806  ;;  %3941 = vperm.xlu1 %7008, %v9926_v59  }
 0x37d   : > { %11099 = vst [vmem:[#allocation98_spill] sm:$0xff] %v9932_v62  ;;  %3966 = vperm.xlu0 %7009, %v9930_v32   ;;  %7196 = vpow2.f32 %v2662_v24  ;;  %v11117_v62 = vld [vmem:[#allocation35_spill] sm:$0xff] }
 0x37e   : > { %v9940_v19 = vpop.eup %7180 }
 0x37f   : > { %v9942_v33 = vpop.eup %7182  ;;  %v9944_v3 = vpop.permute.xlu1 %3711  ;;  %6423 = vmatprep.mubr.f32.mxu0 %v9940_v19 }
 0x380   : > { %11102 = vst [vmem:[#allocation108_spill] sm:$0xff] %v9944_v3  ;;  %v9947_v52 = vpop.eup %7184  ;;  %v9949_v25 = vpop.permute.xlu0 %3736  ;;  %3871 = vperm.xlu1 %7008, %v9935_v60   ;;  %6424 = vmatmul.mubr.f32.gmra.mrb[46].mxu0 %v9942_v33  ;;  %v11119_v3 = vld [vmem:[#allocation37_spill] sm:$0xff] }
 0x381   : > { %11103 = vst [vmem:[#allocation100_spill] sm:$0xff] %v9947_v52  ;;  %11104 = vst [vmem:[#allocation30_spill] sm:$0xff] %v9949_v25  ;;  %v9953_v7 = vpop.eup %7186  ;;  %3896 = vperm.xlu0 %7009, %v9947_v52  }
 0x382   : > { %11105 = vst [vmem:[#allocation31_spill] sm:$0xff] %v9953_v7  ;;  %v9956_v58 = vpop.eup %7188 }
 0x383   : > { %v9958_v36 = vpop.eup %7190  ;;  %v9960_v32 = vpop.permute.xlu1 %3791  ;;  %6479 = vmatprep.mubr.f32.mxu1 %v9956_v58 }
 0x384   : > { %11106 = vst [vmem:[#allocation32_spill] sm:$0xff] %v9960_v32  ;;  %v9963_v59 = vpop.permute.xlu0 %3816  ;;  %3951 = vperm.xlu1 %7008, %v9953_v7   ;;  %6480 = vmatmul.mubr.f32.gmra.mrb[46].mxu1 %v9958_v36  ;;  %v9967_v60 = vpop.eup %7192  ;;  %v11118_v32 = vld [vmem:[#allocation36_spill] sm:$0xff] }
 0x385   : > { %11107 = vst [vmem:[#allocation102_spill] sm:$0xff] %v9963_v59  ;;  %11108 = vst [vmem:[#allocation105_spill] sm:$0xff] %v9967_v60  ;;  %v9972_v52 = vpop.eup %7194 }
 0x386   : > { %11110 = vst [vmem:[#allocation126_spill] sm:$0xff] %v9972_v52 }
 0x387   : > { %v9969_v0 = vpop.permute.xlu1 %3721  ;;  %v9977_v38 = vpop.eup %7196 }
 0x388   : > { %11109 = vst [vmem:[#allocation109_spill] sm:$0xff] %v9969_v0  ;;  %v2866_v57 = vpop.permute.xlu0 %2865  ;;  %3881 = vperm.xlu1 %7008, %v9967_v60   ;;  %11112 = vst [vmem:[#allocation128_spill] sm:$0xff] %v9977_v38 }
 0x389   : > { %v3051_v49 = vsub.f32 %v11115_v37, %v2866_v57  ;;  %v11120_v37 = vld [vmem:[#allocation38_spill] sm:$0xff] }
 0x38b   : > { %v9974_v8 = vpop.permute.xlu1 %3801 }
 0x38c   : > { %11111 = vst [vmem:[#allocation127_spill] sm:$0xff] %v9974_v8  ;;  %v2946_v34 = vpop.permute.xlu0 %2945  ;;  %3961 = vperm.xlu1 %7008, %v9972_v52   ;;  %v3148_v8 = vmul.f32 1.442695, %v3051_v49 }
 0x38d   : > { %v3067_v0 = vsub.f32 %v11117_v62, %v2946_v34 }
 0x38f   : > { %v9979_v7 = vpop.permute.xlu1 %3731 }
 0x390   : > { %11113 = vst [vmem:[#allocation129_spill] sm:$0xff] %v9979_v7  ;;  %v2876_v1 = vpop.permute.xlu0 %2875  ;;  %3891 = vperm.xlu1 %7008, %v9977_v38   ;;  %v3180_v38 = vmul.f32 1.442695, %v3067_v0 }
 0x393   : > { %v9982_v24 = vpop.permute.xlu1 %3811 }
 0x394   : > { %11114 = vst [vmem:[#allocation130_spill] sm:$0xff] %v9982_v24  ;;  %v2956_v47 = vpop.permute.xlu0 %2955  ;;  %v3053_v24 = vsub.f32 %v11119_v3, %v2876_v1 }
 0x396   : > { %v3152_v34 = vmul.f32 1.442695, %v3053_v24 }
 0x397   : > { %v2861_v60 = vpop.permute.xlu1 %2860 }
 0x398   : > { %v3050_v59 = vsub.f32 %v11116_v22, %v2861_v60  ;;  %v2886_v25 = vpop.permute.xlu0 %2885  ;;  %v11121_v22 = vld [vmem:[#allocation122_spill] sm:$0xff] }
 0x39a   : > { %v3146_v52 = vmul.f32 1.442695, %v3050_v59  ;;  %v11122_v59 = vld [vmem:[#allocation39_spill] sm:$0xff] }
 0x39b   : > { %v2941_v21 = vpop.permute.xlu1 %2940  ;;  %v3069_v62 = vsub.f32 %v11122_v59, %v2956_v47  ;;  %v11126_v47 = vld [vmem:[#allocation42_spill] sm:$0xff] }
 0x39c   : > { %7198 = vpow2.f32 %v3146_v52  ;;  %v3066_v7 = vsub.f32 %v11118_v32, %v2941_v21  ;;  %v2966_v14 = vpop.permute.xlu0 %2965  ;;  %v11123_v21 = vld [vmem:[#allocation40_spill] sm:$0xff] }
 0x39d   : > { %7200 = vpow2.f32 %v3148_v8  ;;  %v11124_v32 = vld [vmem:[#allocation124_spill] sm:$0xff] }
 0x39e   : > { %v3178_v12 = vmul.f32 1.442695, %v3066_v7 }
 0x39f   : > { %v2871_v13 = vpop.permute.xlu1 %2870 }
 0x3a0   : > { %7202 = vpow2.f32 %v3178_v12  ;;  %v3052_v57 = vsub.f32 %v11120_v37, %v2871_v13  ;;  %3340 = vadd.xlane.f32.xlu0 %v11121_v22  ;;  %v2896_v49 = vpop.permute.xlu0 %2895  ;;  %v3184_v12 = vmul.f32 1.442695, %v3069_v62  ;;  %v11125_v13 = vld [vmem:[#allocation41_spill] sm:$0xff] }
 0x3a1   : > { %7204 = vpow2.f32 %v3180_v38  ;;  %v3055_v7 = vsub.f32 %v11125_v13, %v2886_v25  ;;  %v11128_v25 = vld [vmem:[#allocation43_spill] sm:$0xff]  ;;  %v11130_v13 = vld [vmem:[#allocation45_spill] sm:$0xff] }
 0x3a2   : > { %v3150_v52 = vmul.f32 1.442695, %v3052_v57  ;;  %v3071_v59 = vsub.f32 %v11128_v25, %v2966_v14  ;;  %v3057_v14 = vsub.f32 %v11130_v13, %v2896_v49 }
 0x3a3   : > { %v2951_v60 = vpop.permute.xlu1 %2950 }
 0x3a4   : > { %7206 = vpow2.f32 %v3150_v52  ;;  %v3068_v8 = vsub.f32 %v11123_v21, %v2951_v60  ;;  %3370 = vadd.xlane.f32.xlu0 %v11124_v32  ;;  %v2976_v1 = vpop.permute.xlu0 %2975  ;;  %v11129_v21 = vld [vmem:[#allocation44_spill] sm:$0xff] }
 0x3a5   : > { %7208 = vpow2.f32 %v3152_v34  ;;  %v3156_v34 = vmul.f32 1.442695, %v3055_v7 }
 0x3a6   : > { %v9994_v3 = vpop.eup %7198  ;;  %v3182_v0 = vmul.f32 1.442695, %v3068_v8 }
 0x3a7   : > { %v9997_v37 = vpop.eup %7200  ;;  %v2881_v38 = vpop.permute.xlu1 %2880  ;;  %6514 = vmatprep.mubr.f32.mxu0 %v9994_v3 }
 0x3a8   : > { %7210 = vpow2.f32 %v3182_v0  ;;  %v3054_v24 = vsub.f32 %v11126_v47, %v2881_v38  ;;  %3342 = vadd.xlane.f32.xlu0 %v9607_v48  ;;  %v10002_v57 = vpop.permute.xlu0 %3826  ;;  %6515 = vmatmul.mubr.f32.vlgmr.msra.gmra.mrb[48].mxu0 %v9997_v37  ;;  %v11131_v47 = vld [vmem:[#allocation46_spill] sm:$0xff] }
 0x3a9   : > { %11127 = vst [vmem:[#allocation33_spill] sm:$0xff] %v10002_v57  ;;  %7212 = vpow2.f32 %v3184_v12  ;;  %v3188_v12 = vmul.f32 1.442695, %v3071_v59  ;;  %v11132_v59 = vld [vmem:[#allocation47_spill] sm:$0xff] }
 0x3aa   : > { %v10005_v22 = vpop.eup %7202  ;;  %v3154_v62 = vmul.f32 1.442695, %v3054_v24  ;;  %v3073_v49 = vsub.f32 %v11132_v59, %v2976_v1 }
 0x3ab   : > { %v10008_v52 = vpop.eup %7204  ;;  %v2961_v60 = vpop.permute.xlu1 %2960  ;;  %6570 = vmatprep.mubr.f32.mxu1 %v10005_v22 }
 0x3ac   : > { %7214 = vpow2.f32 %v3154_v62  ;;  %v3070_v8 = vsub.f32 %v11129_v21, %v2961_v60  ;;  %3374 = vadd.xlane.f32.xlu0 %v9627_v17  ;;  %v2906_v48 = vpop.permute.xlu0 %2905  ;;  %6571 = vmatmul.mubr.f32.vlgmr.msra.gmra.mrb[48].mxu1 %v10008_v52  ;;  %v3192_v1 = vmul.f32 1.442695, %v3073_v49 }
 0x3ad   : > { %7216 = vpow2.f32 %v3156_v34  ;;  %v3160_v34 = vmul.f32 1.442695, %v3057_v14 }
 0x3ae   : > { %v10014_v32 = vpop.eup %7206  ;;  %v3186_v7 = vmul.f32 1.442695, %v3070_v8  ;;  %v11133_v8 = vld [vmem:[#allocation48_spill] sm:$0xff] }
 0x3af   : > { %v10017_v0 = vpop.eup %7208  ;;  %v2891_v38 = vpop.permute.xlu1 %2890  ;;  %6517 = vmatprep.mubr.f32.mxu0 %v10014_v32 }
 0x3b0   : > { %7218 = vpow2.f32 %v3186_v7  ;;  %v3056_v24 = vsub.f32 %v11131_v47, %v2891_v38  ;;  %3346 = vadd.xlane.f32.xlu0 %v9655_v46  ;;  %v2986_v17 = vpop.permute.xlu0 %2985  ;;  %6518 = vmatmul.mubr.f32.gmra.mrb[50].mxu0 %v10017_v0  ;;  %v11135_v7 = vld [vmem:[#allocation125_spill] sm:$0xff] }
 0x3b1   : > { %7220 = vpow2.f32 %v3188_v12 }
 0x3b2   : > { %v10023_v25 = vpop.eup %7210  ;;  %v3158_v62 = vmul.f32 1.442695, %v3056_v24 }
 0x3b3   : > { %v2971_v60 = vpop.permute.xlu1 %2970  ;;  %6573 = vmatprep.mubr.f32.mxu1 %v10023_v25  ;;  %v10027_v21 = vpop.eup %7212 }
 0x3b4   : > { %7222 = vpow2.f32 %v3158_v62  ;;  %v3072_v13 = vsub.f32 %v11133_v8, %v2971_v60  ;;  %3378 = vadd.xlane.f32.xlu0 %v9674_v27  ;;  %v10031_v46 = vpop.permute.xlu0 %3836  ;;  %3372 = vadd.xlane.f32.xlu1 %v11135_v7  ;;  %v11137_v27 = vld [vmem:[#allocation123_spill] sm:$0xff]  ;;  %v11139_v8 = vld [vmem:[#allocation50_spill] sm:$0xff] }
 0x3b5   : > { %11134 = vst [vmem:[#allocation34_spill] sm:$0xff] %v10031_v46  ;;  %6574 = vmatmul.mubr.f32.gmra.mrb[50].mxu1 %v10027_v21  ;;  %7224 = vpow2.f32 %v3160_v34  ;;  %v11138_v34 = vld [vmem:[#allocation49_spill] sm:$0xff] }
 0x3b6   : > { %v10035_v12 = vpop.eup %7214  ;;  %v3190_v14 = vmul.f32 1.442695, %v3072_v13  ;;  %v3059_v49 = vsub.f32 %v11138_v34, %v2906_v48 }
 0x3b7   : > { %v10037_v38 = vpop.permute.xlu1 %3821  ;;  %6520 = vmatprep.mubr.f32.mxu0 %v10035_v12  ;;  %v10040_v47 = vpop.eup %7216 }
 0x3b8   : > { %11136 = vst [vmem:[#allocation35_spill] sm:$0xff] %v10037_v38  ;;  %7226 = vpow2.f32 %v3190_v14  ;;  %3350 = vadd.xlane.f32.xlu0 %v9694_v45  ;;  %3338 = vadd.xlane.f32.xlu1 %v11137_v27  ;;  %v2916_v24 = vpop.permute.xlu0 %2915  ;;  %v11140_v45 = vld [vmem:[#allocation71_spill] sm:$0xff]  ;;  %v3164_v14 = vmul.f32 1.442695, %v3059_v49 }
 0x3b9   : > { %6521 = vmatmul.mubr.f32.gmra.mrb[52].mxu0 %v10040_v47  ;;  %7228 = vpow2.f32 %v3192_v1  ;;  %v11141_v27 = vld [vmem:[#allocation51_spill] sm:$0xff] }
 0x3ba   : > { %v10045_v59 = vpop.eup %7218  ;;  %v3075_v1 = vsub.f32 %v11141_v27, %v2986_v17 }
 0x3bb   : > { %v2901_v62 = vpop.permute.xlu1 %2900  ;;  %6576 = vmatprep.mubr.f32.mxu1 %v10045_v59  ;;  %v10049_v60 = vpop.eup %7220 }
 0x3bc   : > { %v3058_v13 = vsub.f32 %v11139_v8, %v2901_v62  ;;  %3382 = vadd.xlane.f32.xlu0 %v9707_v29  ;;  %3344 = vadd.xlane.f32.xlu1 %v11140_v45  ;;  %v2996_v48 = vpop.permute.xlu0 %2995  ;;  %v11142_v62 = vld [vmem:[#allocation52_spill] sm:$0xff]  ;;  %v11143_v29 = vld [vmem:[#allocation11_spill] sm:$0xff]  ;;  %v3196_v17 = vmul.f32 1.442695, %v3075_v1  ;;  %v11146_v1 = vld [vmem:[#allocation54_spill] sm:$0xff] }
 0x3bd   : > { %6577 = vmatmul.mubr.f32.gmra.mrb[52].mxu1 %v10049_v60 }
 0x3be   : > { %v10055_v7 = vpop.eup %7222  ;;  %v3162_v46 = vmul.f32 1.442695, %v3058_v13 }
 0x3bf   : > { %v2981_v34 = vpop.permute.xlu1 %2980  ;;  %6523 = vmatprep.mubr.f32.mxu0 %v10055_v7  ;;  %v10059_v38 = vpop.eup %7224 }
 0x3c0   : > { %7230 = vpow2.f32 %v3162_v46  ;;  %v3074_v8 = vsub.f32 %v11142_v62, %v2981_v34  ;;  %3354 = vadd.xlane.f32.xlu0 %v9740_v55  ;;  %3376 = vadd.xlane.f32.xlu1 %v11143_v29  ;;  %v2926_v55 = vpop.permute.xlu0 %2925  ;;  %v11145_v46 = vld [vmem:[#allocation53_spill] sm:$0xff] }
 0x3c1   : > { %6524 = vmatmul.mubr.f32.gmra.mrb[54].mxu0 %v10059_v38  ;;  %7232 = vpow2.f32 %v3164_v14  ;;  %v3061_v34 = vsub.f32 %v11145_v46, %v2916_v24  ;;  %v11148_v24 = vld [vmem:[#allocation56_spill] sm:$0xff] }
 0x3c2   : > { %v10065_v45 = vpop.eup %7226  ;;  %v3194_v49 = vmul.f32 1.442695, %v3074_v8 }
 0x3c3   : > { %v10067_v13 = vpop.permute.xlu1 %3831  ;;  %6579 = vmatprep.mubr.f32.mxu1 %v10065_v45  ;;  %v10070_v27 = vpop.eup %7228  ;;  %v3168_v29 = vmul.f32 1.442695, %v3061_v34 }
 0x3c4   : > { %11144 = vst [vmem:[#allocation36_spill] sm:$0xff] %v10067_v13  ;;  %7234 = vpow2.f32 %v3194_v49  ;;  %3386 = vadd.xlane.f32.xlu0 %v9759_v50  ;;  %3348 = vadd.xlane.f32.xlu1 %v9657_v6  ;;  %v11147_v49 = vld [vmem:[#allocation55_spill] sm:$0xff]  ;;  %v3006_v6 = vpop.permute.xlu0 %3005 }
 0x3c5   : > { %6580 = vmatmul.mubr.f32.gmra.mrb[54].mxu1 %v10070_v27  ;;  %7236 = vpow2.f32 %v3196_v17  ;;  %v3077_v50 = vsub.f32 %v11147_v49, %v2996_v48  ;;  %v11149_v48 = vld [vmem:[#allocation57_spill] sm:$0xff] }
 0x3c6   : > { %v3063_v34 = vsub.f32 %v11149_v48, %v2926_v55 }
 0x3c7   : > { %v2911_v14 = vpop.permute.xlu1 %2910 }
 0x3c8   : > { %v3060_v62 = vsub.f32 %v11146_v1, %v2911_v14  ;;  %3358 = vadd.xlane.f32.xlu0 %v9808_v30  ;;  %3380 = vadd.xlane.f32.xlu1 %v9676_v18  ;;  %v3200_v30 = vmul.f32 1.442695, %v3077_v50 }
 0x3ca   : > { %v10079_v8 = vpop.eup %7230  ;;  %v3166_v13 = vmul.f32 1.442695, %v3060_v62 }
 0x3cb   : > { %v2991_v57 = vpop.permute.xlu1 %2990  ;;  %6526 = vmatprep.mubr.f32.mxu0 %v10079_v8  ;;  %v10083_v17 = vpop.eup %7232 }
 0x3cc   : > { %7238 = vpow2.f32 %v3166_v13  ;;  %v3076_v46 = vsub.f32 %v11148_v24, %v2991_v57  ;;  %3390 = vadd.xlane.f32.xlu0 %v9829_v2  ;;  %3352 = vadd.xlane.f32.xlu1 %v9696_v44  ;;  %v11150_v57 = vld [vmem:[#allocation58_spill] sm:$0xff]  ;;  %v2936_v44 = vpop.permute.xlu0 %2935  ;;  %v3172_v2 = vmul.f32 1.442695, %v3063_v34  ;;  %v11152_v24 = vld [vmem:[#allocation60_spill] sm:$0xff] }
 0x3cd   : > { %6527 = vmatmul.mubr.f32.gmra.mrb[56].mxu0 %v10083_v17  ;;  %7240 = vpow2.f32 %v3168_v29  ;;  %v11151_v29 = vld [vmem:[#allocation59_spill] sm:$0xff] }
 0x3ce   : > { %v10089_v18 = vpop.eup %7234  ;;  %v3198_v14 = vmul.f32 1.442695, %v3076_v46  ;;  %v3079_v55 = vsub.f32 %v11151_v29, %v3006_v6 }
 0x3cf   : > { %v2921_v1 = vpop.permute.xlu1 %2920  ;;  %6582 = vmatprep.mubr.f32.mxu1 %v10089_v18  ;;  %v10093_v62 = vpop.eup %7236 }
 0x3d0   : > { %7242 = vpow2.f32 %v3198_v14  ;;  %v3062_v13 = vsub.f32 %v11150_v57, %v2921_v1  ;;  %3362 = vadd.xlane.f32.xlu0 %v9878_v28  ;;  %3384 = vadd.xlane.f32.xlu1 %v9712_v31  ;;  %v3204_v31 = vmul.f32 1.442695, %v3079_v55  ;;  %v11153_v28 = vld [vmem:[#allocation61_spill] sm:$0xff]  ;;  %v11154_v57 = vld [vmem:[#allocation62_spill] sm:$0xff] }
 0x3d1   : > { %6583 = vmatmul.mubr.f32.gmra.mrb[56].mxu1 %v10093_v62  ;;  %7244 = vpow2.f32 %v3200_v30  ;;  %v3065_v14 = vsub.f32 %v11153_v28, %v2936_v44  ;;  %v3016_v30 = vpop.permute.xlu0 %3015  ;;  %v11155_v44 = vld [vmem:[#allocation63_spill] sm:$0xff] }
 0x3d2   : > { %v3170_v49 = vmul.f32 1.442695, %v3062_v13 }
 0x3d3   : > { %v3001_v50 = vpop.permute.xlu1 %3000 }
 0x3d4   : > { %7246 = vpow2.f32 %v3170_v49  ;;  %v3078_v46 = vsub.f32 %v11152_v24, %v3001_v50  ;;  %3394 = vadd.xlane.f32.xlu0 %v9899_v16  ;;  %3356 = vadd.xlane.f32.xlu1 %v9745_v41  ;;  %v3176_v16 = vmul.f32 1.442695, %v3065_v14  ;;  %v11156_v50 = vld [vmem:[#allocation64_spill] sm:$0xff] }
 0x3d5   : > { %7248 = vpow2.f32 %v3172_v2  ;;  %v3081_v2 = vsub.f32 %v11155_v44, %v3016_v30  ;;  %v10130_v28 = vpop.permute.xlu0 %3846  ;;  %v3596_v30 = vld [vmem:[#allocation4 + $0x8] sm:$0xff] }
 0x3d6   : > { %v10103_v48 = vpop.eup %7238  ;;  %v3202_v1 = vmul.f32 1.442695, %v3078_v46 }
 0x3d7   : > { %v2931_v34 = vpop.permute.xlu1 %2930  ;;  %6529 = vmatprep.mubr.f32.mxu0 %v10103_v48  ;;  %v10107_v6 = vpop.eup %7240 }
 0x3d8   : > { %7250 = vpow2.f32 %v3202_v1  ;;  %v3064_v13 = vsub.f32 %v11154_v57, %v2931_v34  ;;  %3366 = vadd.xlane.f32.xlu0 %v9940_v19  ;;  %3388 = vadd.xlane.f32.xlu1 %v9764_v43  ;;  %v3208_v19 = vmul.f32 1.442695, %v3081_v2  ;;  %v3612_v34 = vld [vmem:[#allocation4 + $0x88] sm:$0xff]  ;;  %v3611_v57 = vld [vmem:[#allocation4 + $0x80] sm:$0xff] }
 0x3d9   : > { %6530 = vmatmul.mubr.f32.gmra.mrb[58].mxu0 %v10107_v6  ;;  %7252 = vpow2.f32 %v3204_v31 }
 0x3da   : > { %v10113_v41 = vpop.eup %7242  ;;  %v3174_v29 = vmul.f32 1.442695, %v3064_v13  ;;  %v11157_v13 = vld [vmem:[#allocation12_spill] sm:$0xff] }
 0x3db   : > { %v3011_v55 = vpop.permute.xlu1 %3010  ;;  %6585 = vmatprep.mubr.f32.mxu1 %v10113_v41  ;;  %v10117_v49 = vpop.eup %7244 }
 0x3dc   : > { %7254 = vpow2.f32 %v3174_v29  ;;  %v3080_v24 = vsub.f32 %v11156_v50, %v3011_v55  ;;  %3398 = vadd.xlane.f32.xlu0 %v9956_v58  ;;  %3360 = vadd.xlane.f32.xlu1 %v9812_v53  ;;  %v3995_v50 = vmul.f32 %v9686_v9, %v3611_v57 }
 0x3dd   : > { %6586 = vmatmul.mubr.f32.gmra.mrb[58].mxu1 %v10117_v49  ;;  %7256 = vpow2.f32 %v3176_v16 }
 0x3de   : > { %v10123_v43 = vpop.eup %7246  ;;  %v3206_v46 = vmul.f32 1.442695, %v3080_v24 }
 0x3df   : > { %6532 = vmatprep.mubr.f32.mxu0 %v10123_v43  ;;  %v10126_v31 = vpop.eup %7248 }
 0x3e0   : > { %7258 = vpow2.f32 %v3206_v46  ;;  %3402 = vadd.xlane.f32.xlu0 %v9994_v3  ;;  %3392 = vadd.xlane.f32.xlu1 %v9833_v61  ;;  %v10143_v61 = vpop.permute.xlu0 %3856 }
 0x3e1   : > { %6533 = vmatmul.mubr.f32.gmra.mrb[60].mxu0 %v10126_v31  ;;  %7260 = vpow2.f32 %v3208_v19 }
 0x3e2   : > { %v10133_v53 = vpop.eup %7250 }
 0x3e3   : > { %6588 = vmatprep.mubr.f32.mxu1 %v10133_v53  ;;  %v10136_v58 = vpop.eup %7252 }
 0x3e4   : > { %3434 = vadd.xlane.f32.xlu0 %v10005_v22  ;;  %3364 = vadd.xlane.f32.xlu1 %v9882_v5  ;;  %v10158_v22 = vpop.permute.xlu0 %3906 }
 0x3e5   : > { %6589 = vmatmul.mubr.f32.gmra.mrb[60].mxu1 %v10136_v58 }
 0x3e6   : > { %v10141_v3 = vpop.eup %7254 }
 0x3e7   : > { %6535 = vmatprep.mubr.f32.mxu0 %v10141_v3  ;;  %v10146_v14 = vpop.eup %7256 }
 0x3e8   : > { %3406 = vadd.xlane.f32.xlu0 %v10014_v32  ;;  %3396 = vadd.xlane.f32.xlu1 %v9901_v56  ;;  %v3595_v32 = vld [vmem:[#allocation4] sm:$0xff]  ;;  %v3980_v56 = vmul.f32 %v9678_v54, %v3596_v30  ;;  %v3598_v30 = vld [vmem:[#allocation4 + $0x18] sm:$0xff] }
 0x3e9   : > { %6536 = vmatmul.mubr.f32.gmra.mrb[62].mxu0 %v10146_v14  ;;  %v3979_v16 = vmul.f32 %v11157_v13, %v3595_v32  ;;  %v3597_v32 = vld [vmem:[#allocation4 + $0x10] sm:$0xff] }
 0x3ea   : > { %v10151_v1 = vpop.eup %7258  ;;  %v3613_v13 = vld [vmem:[#allocation4 + $0x90] sm:$0xff] }
 0x3eb   : > { %6591 = vmatprep.mubr.f32.mxu1 %v10151_v1  ;;  %v10154_v5 = vpop.eup %7260 }
 0x3ec   : > { %3438 = vadd.xlane.f32.xlu0 %v10023_v25  ;;  %3368 = vadd.xlane.f32.xlu1 %v9942_v33  ;;  %v11158_v25 = vld [vmem:[#allocation82_spill] sm:$0xff]  ;;  %v10166_v33 = vpop.permute.xlu0 %3916 }
 0x3ed   : > { %6592 = vmatmul.mubr.f32.gmra.mrb[62].mxu1 %v10154_v5  ;;  %v3996_v2 = vmul.f32 %v11158_v25, %v3612_v34  ;;  %v3981_v34 = vmul.f32 %v9722_v39, %v3597_v32  ;;  %v11159_v25 = vld [vmem:[#allocation79_spill] sm:$0xff] }
 0x3f0   : > { %3410 = vadd.xlane.f32.xlu0 %v10035_v12  ;;  %3400 = vadd.xlane.f32.xlu1 %v9958_v36  ;;  %v10171_v36 = vpop.permute.xlu1 %3841  ;;  %v10179_v9 = vpop.permute.xlu0 %3926 }
 0x3f2   : > { %v6404_v44 = vpop.f32.mrb[32].mxu0 }
 0x3f3   : > { %v4624_v29 = vadd.f32 %v6404_v44, %v3980_v56  ;;  %v4109_v55 = vpop.f32.mrb[33].mxu0  ;;  %v6460_v19 = vpop.f32.mrb[32].mxu1 }
 0x3f4   : > { %v4623_v24 = vadd.f32 %v4109_v55, %v3979_v16  ;;  %3442 = vadd.xlane.f32.xlu0 %v10045_v59  ;;  %3404 = vadd.xlane.f32.xlu1 %v9997_v37  ;;  %v4640_v54 = vadd.f32 %v6460_v19, %v3996_v2  ;;  %v4254_v12 = vpop.f32.mrb[33].mxu1  ;;  %v3982_v37 = vmul.f32 %v9681_v11, %v3598_v30  ;;  %v3614_v59 = vld [vmem:[#allocation4 + $0x98] sm:$0xff]  ;;  %v10183_v56 = vpop.permute.xlu1 %3851  ;;  %v11160_v19 = vld [vmem:[#allocation15_spill] sm:$0xff]  ;;  %v3615_v30 = vld [vmem:[#allocation4 + $0xa0] sm:$0xff] }
 0x3f5   : > { %4688 = vst.msk [vmem:[#allocation4 + $0x8] sm:$0xff] %vm1285_vm2, %v4624_v29  ;;  %v4639_v46 = vadd.f32 %v4254_v12, %v3995_v50  ;;  %v3997_v11 = vmul.f32 %v9733_v20, %v3613_v13  ;;  %v10190_v2 = vpop.permute.xlu0 %3936  ;;  %v3600_v50 = vld [vmem:[#allocation4 + $0x28] sm:$0xff]  ;;  %v3599_v20 = vld [vmem:[#allocation4 + $0x20] sm:$0xff] }
 0x3f6   : > { %4687 = vst.msk [vmem:[#allocation4] sm:$0xff] %vm1285_vm2, %v4623_v24  ;;  %4704 = vst.msk [vmem:[#allocation4 + $0x88] sm:$0xff] %vm1285_vm2, %v4640_v54  ;;  %v3616_v54 = vld [vmem:[#allocation4 + $0xa8] sm:$0xff] }
 0x3f7   : > { %4703 = vst.msk [vmem:[#allocation4 + $0x80] sm:$0xff] %vm1285_vm2, %v4639_v46 }
 0x3f8   : > { %3414 = vadd.xlane.f32.xlu0 %v10055_v7  ;;  %3436 = vadd.xlane.f32.xlu1 %v10008_v52  ;;  %v3998_v52 = vmul.f32 %v11159_v25, %v3614_v59  ;;  %v11161_v59 = vld [vmem:[#allocation16_spill] sm:$0xff]  ;;  %v3618_v25 = vld [vmem:[#allocation4 + $0xb8] sm:$0xff] }
 0x3f9   : > { %v10201_v24 = vpop.permute.xlu0 %3866 }
 0x3fb   : > { %v6407_v57 = vpop.f32.mrb[34].mxu0 }
 0x3fc   : > { %v4626_v16 = vadd.f32 %v6407_v57, %v3982_v37  ;;  %3446 = vadd.xlane.f32.xlu0 %v10065_v45  ;;  %v4119_v44 = vpop.f32.mrb[35].mxu0  ;;  %3408 = vadd.xlane.f32.xlu1 %v10017_v0  ;;  %v10195_v45 = vpop.permute.xlu1 %3901 }
 0x3fd   : > { %v4625_v7 = vadd.f32 %v4119_v44, %v3981_v34  ;;  %v3999_v34 = vmul.f32 %v9796_v42, %v3615_v30  ;;  %v10212_v57 = vpop.permute.xlu0 %3946  ;;  %v3602_v44 = vld [vmem:[#allocation4 + $0x38] sm:$0xff]  ;;  %v3601_v42 = vld [vmem:[#allocation4 + $0x30] sm:$0xff]  ;;  %v3620_v30 = vld [vmem:[#allocation4 + $0xc8] sm:$0xff] }
 0x3fe   : > { %4690 = vst.msk [vmem:[#allocation4 + $0x18] sm:$0xff] %vm1285_vm2, %v4626_v16 }
 0x3ff   : > { %4689 = vst.msk [vmem:[#allocation4 + $0x10] sm:$0xff] %vm1285_vm2, %v4625_v7  ;;  %v6463_v39 = vpop.f32.mrb[34].mxu1 }
 0x400   : > { %v4642_v29 = vadd.f32 %v6463_v39, %v3998_v52  ;;  %3418 = vadd.xlane.f32.xlu0 %v10079_v8  ;;  %v4264_v55 = vpop.f32.mrb[35].mxu1  ;;  %3440 = vadd.xlane.f32.xlu1 %v10027_v21  ;;  %v3984_v8 = vmul.f32 %v11160_v19, %v3600_v50  ;;  %v3983_v21 = vmul.f32 %v9782_v23, %v3599_v20  ;;  %v10205_v12 = vpop.permute.xlu1 %3911  ;;  %v3617_v39 = vld [vmem:[#allocation4 + $0xb0] sm:$0xff] }
 0x401   : > { %v4641_v0 = vadd.f32 %v4264_v55, %v3997_v11  ;;  %v10223_v7 = vpop.permute.xlu0 %3876  ;;  %v11163_v19 = vld [vmem:[#allocation112_spill] sm:$0xff] }
 0x402   : > { %4706 = vst.msk [vmem:[#allocation4 + $0x98] sm:$0xff] %vm1285_vm2, %v4642_v29 }
 0x403   : > { %4705 = vst.msk [vmem:[#allocation4 + $0x90] sm:$0xff] %vm1285_vm2, %v4641_v0 }
 0x404   : > { %3450 = vadd.xlane.f32.xlu0 %v10089_v18  ;;  %3412 = vadd.xlane.f32.xlu1 %v10040_v47  ;;  %v4000_v47 = vmul.f32 %v11161_v59, %v3616_v54 }
 0x405   : > { %v10234_v0 = vpop.permute.xlu0 %3956 }
 0x407   : > { %v6410_v46 = vpop.f32.mrb[36].mxu0 }
 0x408   : > { %v4628_v32 = vadd.f32 %v6410_v46, %v3984_v8  ;;  %3422 = vadd.xlane.f32.xlu0 %v10103_v48  ;;  %v4129_v37 = vpop.f32.mrb[37].mxu0  ;;  %3444 = vadd.xlane.f32.xlu1 %v10049_v60  ;;  %v10217_v48 = vpop.permute.xlu1 %3921 }
 0x409   : > { %v4627_v18 = vadd.f32 %v4129_v37, %v3983_v21  ;;  %v3619_v37 = vld [vmem:[#allocation4 + $0xc0] sm:$0xff] }
 0x40a   : > { %4692 = vst.msk [vmem:[#allocation4 + $0x28] sm:$0xff] %vm1285_vm2, %v4628_v32 }
 0x40b   : > { %4691 = vst.msk [vmem:[#allocation4 + $0x20] sm:$0xff] %vm1285_vm2, %v4627_v18  ;;  %v6466_v23 = vpop.f32.mrb[36].mxu1 }
 0x40c   : > { %v4644_v13 = vadd.f32 %v6466_v23, %v4000_v47  ;;  %3454 = vadd.xlane.f32.xlu0 %v10113_v41  ;;  %v4274_v16 = vpop.f32.mrb[37].mxu1  ;;  %3416 = vadd.xlane.f32.xlu1 %v10059_v38  ;;  %v3986_v41 = vmul.f32 %v9786_v10, %v3602_v44  ;;  %v3985_v38 = vmul.f32 %v9850_v35, %v3601_v42  ;;  %v10227_v52 = vpop.permute.xlu1 %3931 }
 0x40d   : > { %v4643_v60 = vadd.f32 %v4274_v16, %v3999_v34  ;;  %v4001_v10 = vmul.f32 %v9866_v63, %v3617_v39  ;;  %v11162_v63 = vld [vmem:[#allocation115_spill] sm:$0xff]  ;;  %v4004_v23 = vmul.f32 %v9870_v51, %v3620_v30  ;;  %v3606_v39 = vld [vmem:[#allocation4 + $0x58] sm:$0xff]  ;;  %v11170_v30 = vld [vmem:[#allocation72_spill] sm:$0xff] }
 0x40e   : > { %4708 = vst.msk [vmem:[#allocation4 + $0xa8] sm:$0xff] %vm1285_vm2, %v4644_v13  ;;  %v2569_v8 = vsub.f32 %v11163_v19, %v11162_v63  ;;  %v11164_v51 = vld [vmem:[#allocation67_spill] sm:$0xff]  ;;  %v3622_v19 = vld [vmem:[#allocation4 + $0xd8] sm:$0xff] }
 0x40f   : > { %4707 = vst.msk [vmem:[#allocation4 + $0xa0] sm:$0xff] %vm1285_vm2, %v4643_v60  ;;  %v3211_v60 = vld [vmem:[#allocation3 + $0x8] sm:$0xff] }
 0x410   : > { %3426 = vadd.xlane.f32.xlu0 %v10123_v43  ;;  %3448 = vadd.xlane.f32.xlu1 %v10070_v27  ;;  %v4002_v27 = vmul.f32 %v9800_v26, %v3618_v25  ;;  %v10245_v26 = vpop.permute.xlu0 %3886  ;;  %v2696_v46 = vmul.f32 1.442695, %v2569_v8  ;;  %v11165_v25 = vld [vmem:[#allocation116_spill] sm:$0xff] }
 0x411   : > { %v11169_v8 = vld [vmem:[#allocation108_spill] sm:$0xff] }
 0x412   : > { %7262 = vpow2.f32 %v2696_v46 }
 0x413   : > { %v6413_v11 = vpop.f32.mrb[38].mxu0 }
 0x414   : > { %v4630_v29 = vadd.f32 %v6413_v11, %v3986_v41  ;;  %3458 = vadd.xlane.f32.xlu0 %v10133_v53  ;;  %v4139_v55 = vpop.f32.mrb[39].mxu0  ;;  %3420 = vadd.xlane.f32.xlu1 %v10083_v17  ;;  %v10239_v53 = vpop.permute.xlu1 %3861  ;;  %v3226_v41 = vld [vmem:[#allocation3 + $0x80] sm:$0xff] }
 0x415   : > { %v4629_v43 = vadd.f32 %v4139_v55, %v3985_v38  ;;  %v11166_v38 = vld [vmem:[#allocation113_spill] sm:$0xff] }
 0x416   : > { %4694 = vst.msk [vmem:[#allocation4 + $0x38] sm:$0xff] %vm1285_vm2, %v4630_v29  ;;  %v2568_v11 = vsub.f32 %v11166_v38, %v11165_v25  ;;  %v3605_v29 = vld [vmem:[#allocation4 + $0x50] sm:$0xff]  ;;  %v11167_v55 = vld [vmem:[#allocation69_spill] sm:$0xff]  ;;  %v3214_v25 = vld [vmem:[#allocation3 + $0x20] sm:$0xff] }
 0x417   : > { %4693 = vst.msk [vmem:[#allocation4 + $0x30] sm:$0xff] %vm1285_vm2, %v4629_v43  ;;  %v6469_v35 = vpop.f32.mrb[38].mxu1  ;;  %v3290_v43 = vmul.f32 %v11167_v55, %v3226_v41  ;;  %v3230_v55 = vld [vmem:[#allocation3 + $0xa0] sm:$0xff] }
 0x418   : > { %v4646_v50 = vadd.f32 %v6469_v35, %v4002_v27  ;;  %3430 = vadd.xlane.f32.xlu0 %v10141_v3  ;;  %v4284_v20 = vpop.f32.mrb[39].mxu1  ;;  %3452 = vadd.xlane.f32.xlu1 %v10093_v62  ;;  %v3604_v3 = vld [vmem:[#allocation4 + $0x48] sm:$0xff]  ;;  %v10249_v54 = vpop.permute.xlu1 %3941  ;;  %v3603_v62 = vld [vmem:[#allocation4 + $0x40] sm:$0xff]  ;;  %v3212_v35 = vld [vmem:[#allocation3 + $0x10] sm:$0xff] }
 0x419   : > { %v4645_v17 = vadd.f32 %v4284_v20, %v4001_v10  ;;  %v3988_v21 = vmul.f32 %v9854_v40, %v3604_v3  ;;  %v3987_v32 = vmul.f32 %v9916_v4, %v3603_v62  ;;  %v4003_v40 = vmul.f32 %v9928_v15, %v3619_v37  ;;  %v11168_v20 = vld [vmem:[#allocation91_spill] sm:$0xff] }
 0x41a   : > { %4710 = vst.msk [vmem:[#allocation4 + $0xb8] sm:$0xff] %vm1285_vm2, %v4646_v50  ;;  %v3275_v15 = vmul.f32 %v11164_v51, %v3211_v60  ;;  %v2694_v50 = vmul.f32 1.442695, %v2568_v11  ;;  %v3989_v3 = vmul.f32 %v11169_v8, %v3605_v29  ;;  %v11173_v51 = vld [vmem:[#allocation76_spill] sm:$0xff] }
 0x41b   : > { %4709 = vst.msk [vmem:[#allocation4 + $0xb0] sm:$0xff] %vm1285_vm2, %v4645_v17  ;;  %v3990_v17 = vmul.f32 %v11168_v20, %v3606_v39  ;;  %v11174_v11 = vld [vmem:[#allocation84_spill] sm:$0xff]  ;;  %v3607_v20 = vld [vmem:[#allocation4 + $0x60] sm:$0xff] }
 0x41c   : > { %3462 = vadd.xlane.f32.xlu0 %v10151_v1  ;;  %3424 = vadd.xlane.f32.xlu1 %v10107_v6  ;;  %v10254_v1 = vpop.permute.xlu0 %3966  ;;  %v10257_v47 = vpop.permute.xlu1 %3871  ;;  %7264 = vpow2.f32 %v2694_v50 }
 0x41d   : > { %v10277_v27 = vpop.eup %7262 }
 0x420   : > { %3456 = vadd.xlane.f32.xlu1 %v10117_v49  ;;  %v10264_v16 = vpop.permute.xlu0 %3896  ;;  %v10267_v44 = vpop.permute.xlu1 %3951 }
 0x423   : > { %v6416_v6 = vpop.f32.mrb[40].mxu0 }
 0x424   : > { %v4632_v18 = vadd.f32 %v6416_v6, %v3988_v21  ;;  %v4149_v59 = vpop.f32.mrb[41].mxu0  ;;  %3428 = vadd.xlane.f32.xlu1 %v10126_v31  ;;  %v10279_v10 = vpop.permute.xlu1 %3881  ;;  %v3621_v21 = vld [vmem:[#allocation4 + $0xd0] sm:$0xff] }
 0x425   : > { %v4631_v34 = vadd.f32 %v4149_v59, %v3987_v32  ;;  %v3276_v32 = vmul.f32 %v11170_v30, %v3212_v35  ;;  %v11171_v59 = vld [vmem:[#allocation25_spill] sm:$0xff]  ;;  %v3608_v35 = vld [vmem:[#allocation4 + $0x68] sm:$0xff] }
 0x426   : > { %4696 = vst.msk [vmem:[#allocation4 + $0x48] sm:$0xff] %vm1285_vm2, %v4632_v18  ;;  %v3228_v18 = vld [vmem:[#allocation3 + $0x90] sm:$0xff]  ;;  %v10300_v50 = vpop.eup %7264 }
 0x427   : > { %4695 = vst.msk [vmem:[#allocation4 + $0x40] sm:$0xff] %vm1285_vm2, %v4631_v34  ;;  %v6472_v4 = vpop.f32.mrb[40].mxu1  ;;  %v4006_v34 = vmul.f32 %v11171_v59, %v3622_v19  ;;  %v11176_v19 = vld [vmem:[#allocation65_spill] sm:$0xff] }
 0x428   : > { %v4648_v49 = vadd.f32 %v6472_v4, %v4004_v23  ;;  %v4294_v13 = vpop.f32.mrb[41].mxu1  ;;  %3460 = vadd.xlane.f32.xlu1 %v10136_v58 }
 0x429   : > { %v4647_v31 = vadd.f32 %v4294_v13, %v4003_v40  ;;  %v11172_v40 = vld [vmem:[#allocation32_spill] sm:$0xff] }
 0x42a   : > { %4712 = vst.msk [vmem:[#allocation4 + $0xc8] sm:$0xff] %vm1285_vm2, %v4648_v49  ;;  %v4005_v4 = vmul.f32 %v11172_v40, %v3621_v21  ;;  %v10289_v49 = vpop.permute.xlu1 %3961  ;;  %v3216_v21 = vld [vmem:[#allocation3 + $0x30] sm:$0xff] }
 0x42b   : > { %4711 = vst.msk [vmem:[#allocation4 + $0xc0] sm:$0xff] %vm1285_vm2, %v4647_v31 }
 0x42c   : > { %3432 = vadd.xlane.f32.xlu1 %v10146_v14 }
 0x42d   : > { %v3341_v42 = vpop.xlane.xlu0 %3340 }
 0x42e   : > { %v3467_v58 = vadd.f32 %v3341_v42, %v3275_v15  ;;  %v3292_v15 = vmul.f32 %v11173_v51, %v3228_v18  ;;  %v10298_v39 = vpop.permute.xlu1 %3891  ;;  %v11178_v18 = vld [vmem:[#allocation109_spill] sm:$0xff] }
 0x42f   : > { %v3991_v59 = vmul.f32 %v11178_v18, %v3607_v20 }
 0x430   : > { %3532 = vst.msk [vmem:[#allocation3 + $0x8] sm:$0xff] %vm3530_vm4, %v3467_v58  ;;  %3464 = vadd.xlane.f32.xlu1 %v10154_v5  ;;  %v3278_v58 = vmul.f32 %v11174_v11, %v3214_v25  ;;  %v3232_v25 = vld [vmem:[#allocation3 + $0xb0] sm:$0xff]  ;;  %v11181_v11 = vld [vmem:[#allocation98_spill] sm:$0xff] }
 0x431   : > { %v3371_v14 = vpop.xlane.xlu0 %3370 }
 0x432   : > { %v3482_v63 = vadd.f32 %v3371_v14, %v3290_v43  ;;  %3976 = vperm.xlu0 %7009, %v10277_v27   ;;  %v3227_v43 = vld [vmem:[#allocation3 + $0x88] sm:$0xff] }
 0x433   : > { %v6419_v62 = vpop.f32.mrb[42].mxu0  ;;  %v3291_v8 = vmul.f32 %v11176_v19, %v3227_v43  ;;  %v11182_v43 = vld [vmem:[#allocation127_spill] sm:$0xff] }
 0x434   : > { %3547 = vst.msk [vmem:[#allocation3 + $0x80] sm:$0xff] %vm3530_vm4, %v3482_v63  ;;  %v4634_v5 = vadd.f32 %v6419_v62, %v3990_v17  ;;  %v4159_v46 = vpop.f32.mrb[43].mxu0  ;;  %v11175_v17 = vld [vmem:[#allocation88_spill] sm:$0xff] }
 0x435   : > { %v4633_v6 = vadd.f32 %v4159_v46, %v3989_v3  ;;  %v3343_v37 = vpop.xlane.xlu0 %3342  ;;  %v3294_v63 = vmul.f32 %v11175_v17, %v3230_v55  ;;  %v11177_v46 = vld [vmem:[#allocation27_spill] sm:$0xff] }
 0x436   : > { %4698 = vst.msk [vmem:[#allocation4 + $0x58] sm:$0xff] %vm1285_vm2, %v4634_v5  ;;  %v3468_v23 = vadd.f32 %v3343_v37, %v3276_v32  ;;  %v3210_v5 = vld [vmem:[#allocation3] sm:$0xff]  ;;  %v3992_v30 = vmul.f32 %v11177_v46, %v3608_v35  ;;  %v3624_v37 = vld [vmem:[#allocation4 + $0xe8] sm:$0xff] }
 0x437   : > { %4697 = vst.msk [vmem:[#allocation4 + $0x50] sm:$0xff] %vm1285_vm2, %v4633_v6  ;;  %v6475_v13 = vpop.f32.mrb[42].mxu1  ;;  %v3218_v46 = vld [vmem:[#allocation3 + $0x40] sm:$0xff] }
 0x438   : > { %3533 = vst.msk [vmem:[#allocation3 + $0x10] sm:$0xff] %vm3530_vm4, %v3468_v23  ;;  %v4650_v31 = vadd.f32 %v6475_v13, %v4006_v34  ;;  %v4304_v60 = vpop.f32.mrb[43].mxu1  ;;  %v3623_v23 = vld [vmem:[#allocation4 + $0xe0] sm:$0xff] }
 0x439   : > { %v4649_v42 = vadd.f32 %v4304_v60, %v4005_v4  ;;  %v3375_v41 = vpop.xlane.xlu0 %3374  ;;  %v11179_v13 = vld [vmem:[#allocation94_spill] sm:$0xff] }
 0x43a   : > { %4714 = vst.msk [vmem:[#allocation4 + $0xd8] sm:$0xff] %vm1285_vm2, %v4650_v31  ;;  %v3484_v38 = vadd.f32 %v3375_v41, %v3292_v15  ;;  %v3280_v31 = vmul.f32 %v11179_v13, %v3216_v21  ;;  %v11180_v60 = vld [vmem:[#allocation66_spill] sm:$0xff]  ;;  %v3215_v13 = vld [vmem:[#allocation3 + $0x28] sm:$0xff] }
 0x43b   : > { %4713 = vst.msk [vmem:[#allocation4 + $0xd0] sm:$0xff] %vm1285_vm2, %v4649_v42  ;;  %v3274_v51 = vmul.f32 %v11180_v60, %v3210_v5 }
 0x43c   : > { %3549 = vst.msk [vmem:[#allocation3 + $0x90] sm:$0xff] %vm3530_vm4, %v3484_v38  ;;  %v3213_v38 = vld [vmem:[#allocation3 + $0x18] sm:$0xff] }
 0x43d   : > { %v3347_v29 = vpop.xlane.xlu0 %3346 }
 0x43e   : > { %v3470_v14 = vadd.f32 %v3347_v29, %v3278_v58  ;;  %v4008_v58 = vmul.f32 %v11181_v11, %v3624_v37  ;;  %v11185_v37 = vld [vmem:[#allocation103_spill] sm:$0xff] }
 0x43f   : > { %v3282_v18 = vmul.f32 %v11185_v37, %v3218_v46 }
 0x440   : > { %3535 = vst.msk [vmem:[#allocation3 + $0x20] sm:$0xff] %vm3530_vm4, %v3470_v14  ;;  %v4007_v14 = vmul.f32 %v11182_v43, %v3623_v23  ;;  %v11189_v43 = vld [vmem:[#allocation30_spill] sm:$0xff] }
 0x441   : > { %v3379_v3 = vpop.xlane.xlu0 %3378  ;;  %v3373_v62 = vpop.xlane.xlu1 %3372  ;;  %3971 = vperm.xlu1 %7008, %v10300_v50  }
 0x442   : > { %v3486_v32 = vadd.f32 %v3379_v3, %v3294_v63  ;;  %v3483_v6 = vadd.f32 %v3373_v62, %v3291_v8  ;;  %v11183_v63 = vld [vmem:[#allocation96_spill] sm:$0xff] }
 0x443   : > { %v6422_v34 = vpop.f32.mrb[44].mxu0  ;;  %v3296_v19 = vmul.f32 %v11183_v63, %v3232_v25  ;;  %v11184_v8 = vld [vmem:[#allocation68_spill] sm:$0xff]  ;;  %v11188_v25 = vld [vmem:[#allocation73_spill] sm:$0xff] }
 0x444   : > { %3551 = vst.msk [vmem:[#allocation3 + $0xa0] sm:$0xff] %vm3530_vm4, %v3486_v32  ;;  %3548 = vst.msk [vmem:[#allocation3 + $0x88] sm:$0xff] %vm3530_vm4, %v3483_v6  ;;  %v4636_v40 = vadd.f32 %v6422_v34, %v3992_v30  ;;  %v4169_v4 = vpop.f32.mrb[45].mxu0  ;;  %v3277_v3 = vmul.f32 %v11184_v8, %v3213_v38  ;;  %v3229_v30 = vld [vmem:[#allocation3 + $0x98] sm:$0xff]  ;;  %v3279_v38 = vmul.f32 %v11188_v25, %v3215_v13 }
 0x445   : > { %v4635_v15 = vadd.f32 %v4169_v4, %v3991_v59  ;;  %v3351_v42 = vpop.xlane.xlu0 %3350  ;;  %v3339_v41 = vpop.xlane.xlu1 %3338  ;;  %v11186_v59 = vld [vmem:[#allocation70_spill] sm:$0xff]  ;;  %v11190_v63 = vld [vmem:[#allocation129_spill] sm:$0xff] }
 0x446   : > { %4700 = vst.msk [vmem:[#allocation4 + $0x68] sm:$0xff] %vm1285_vm2, %v4636_v40  ;;  %v3472_v29 = vadd.f32 %v3351_v42, %v3280_v31  ;;  %v3466_v55 = vadd.f32 %v3339_v41, %v3274_v51  ;;  %v3293_v34 = vmul.f32 %v11186_v59, %v3229_v30  ;;  %v3234_v4 = vld [vmem:[#allocation3 + $0xc0] sm:$0xff]  ;;  %v3610_v51 = vld [vmem:[#allocation4 + $0x78] sm:$0xff]  ;;  %v3236_v59 = vld [vmem:[#allocation3 + $0xd0] sm:$0xff] }
 0x447   : > { %4699 = vst.msk [vmem:[#allocation4 + $0x60] sm:$0xff] %vm1285_vm2, %v4635_v15  ;;  %v6478_v35 = vpop.f32.mrb[44].mxu1  ;;  %v3609_v15 = vld [vmem:[#allocation4 + $0x70] sm:$0xff]  ;;  %v11187_v42 = vld [vmem:[#allocation106_spill] sm:$0xff]  ;;  %v11192_v30 = vld [vmem:[#allocation77_spill] sm:$0xff] }
 0x448   : > { %3537 = vst.msk [vmem:[#allocation3 + $0x30] sm:$0xff] %vm3530_vm4, %v3472_v29  ;;  %3531 = vst.msk [vmem:[#allocation3] sm:$0xff] %vm3530_vm4, %v3466_v55  ;;  %v4652_v20 = vadd.f32 %v6478_v35, %v4008_v58  ;;  %v4314_v17 = vpop.f32.mrb[45].mxu1  ;;  %v3298_v41 = vmul.f32 %v11187_v42, %v3234_v4  ;;  %v3220_v29 = vld [vmem:[#allocation3 + $0x50] sm:$0xff]  ;;  %v3231_v55 = vld [vmem:[#allocation3 + $0xa8] sm:$0xff] }
 0x449   : > { %v4651_v62 = vadd.f32 %v4314_v17, %v4007_v14  ;;  %v3383_v21 = vpop.xlane.xlu0 %3382  ;;  %v3345_v5 = vpop.xlane.xlu1 %3344  ;;  %v3994_v14 = vmul.f32 %v11189_v43, %v3610_v51  ;;  %v3626_v17 = vld [vmem:[#allocation4 + $0xf8] sm:$0xff]  ;;  %v3222_v43 = vld [vmem:[#allocation3 + $0x60] sm:$0xff] }
 0x44a   : > { %4716 = vst.msk [vmem:[#allocation4 + $0xe8] sm:$0xff] %vm1285_vm2, %v4652_v20  ;;  %v3488_v32 = vadd.f32 %v3383_v21, %v3296_v19  ;;  %v3469_v6 = vadd.f32 %v3345_v5, %v3277_v3  ;;  %v3993_v19 = vmul.f32 %v11190_v63, %v3609_v15  ;;  %v3625_v3 = vld [vmem:[#allocation4 + $0xf0] sm:$0xff]  ;;  %v11191_v5 = vld [vmem:[#allocation110_spill] sm:$0xff] }
 0x44b   : > { %4715 = vst.msk [vmem:[#allocation4 + $0xe0] sm:$0xff] %vm1285_vm2, %v4651_v62  ;;  %v3284_v46 = vmul.f32 %v11191_v5, %v3220_v29  ;;  %v3219_v5 = vld [vmem:[#allocation3 + $0x48] sm:$0xff] }
 0x44c   : > { %3553 = vst.msk [vmem:[#allocation3 + $0xb0] sm:$0xff] %vm3530_vm4, %v3488_v32  ;;  %3534 = vst.msk [vmem:[#allocation3 + $0x18] sm:$0xff] %vm3530_vm4, %v3469_v6  ;;  %v3295_v32 = vmul.f32 %v11192_v30, %v3231_v55 }
 0x44d   : > { %v3355_v23 = vpop.xlane.xlu0 %3354  ;;  %v3377_v40 = vpop.xlane.xlu1 %3376 }
 0x44e   : > { %v3474_v31 = vadd.f32 %v3355_v23, %v3282_v18  ;;  %v3485_v60 = vadd.f32 %v3377_v40, %v3293_v34  ;;  %v3217_v34 = vld [vmem:[#allocation3 + $0x38] sm:$0xff]  ;;  %v11193_v23 = vld [vmem:[#allocation102_spill] sm:$0xff] }
 0x44f   : > { %v4010_v40 = vmul.f32 %v11193_v23, %v3626_v17  ;;  %v11197_v17 = vld [vmem:[#allocation118_spill] sm:$0xff]  ;;  %v3224_v23 = vld [vmem:[#allocation3 + $0x70] sm:$0xff] }
 0x450   : > { %3539 = vst.msk [vmem:[#allocation3 + $0x40] sm:$0xff] %vm3530_vm4, %v3474_v31  ;;  %3550 = vst.msk [vmem:[#allocation3 + $0x98] sm:$0xff] %vm3530_vm4, %v3485_v60  ;;  %v11194_v31 = vld [vmem:[#allocation130_spill] sm:$0xff]  ;;  %v3286_v63 = vmul.f32 %v11197_v17, %v3222_v43  ;;  %v11204_v43 = vld [vmem:[#allocation99_spill] sm:$0xff] }
 0x451   : > { %v3387_v11 = vpop.xlane.xlu0 %3386  ;;  %v3349_v58 = vpop.xlane.xlu1 %3348  ;;  %v4009_v60 = vmul.f32 %v11194_v31, %v3625_v3  ;;  %v11201_v31 = vld [vmem:[#allocation120_spill] sm:$0xff]  ;;  %v3242_v17 = vld [vmem:[#allocation3 + $0x100] sm:$0xff] }
 0x452   : > { %v3490_v35 = vadd.f32 %v3387_v11, %v3298_v41  ;;  %v3471_v20 = vadd.f32 %v3349_v58, %v3279_v38  ;;  %v11195_v41 = vld [vmem:[#allocation114_spill] sm:$0xff]  ;;  %v11196_v38 = vld [vmem:[#allocation85_spill] sm:$0xff] }
 0x453   : > { %v6425_v8 = vpop.f32.mrb[46].mxu0  ;;  %v3300_v25 = vmul.f32 %v11195_v41, %v3236_v59  ;;  %v3281_v11 = vmul.f32 %v11196_v38, %v3217_v34  ;;  %v3221_v38 = vld [vmem:[#allocation3 + $0x58] sm:$0xff] }
 0x454   : > { %3555 = vst.msk [vmem:[#allocation3 + $0xc0] sm:$0xff] %vm3530_vm4, %v3490_v35  ;;  %3536 = vst.msk [vmem:[#allocation3 + $0x28] sm:$0xff] %vm3530_vm4, %v3471_v20  ;;  %v4638_v62 = vadd.f32 %v6425_v8, %v3994_v14  ;;  %v4179_v21 = vpop.f32.mrb[47].mxu0  ;;  %v3233_v14 = vld [vmem:[#allocation3 + $0xb8] sm:$0xff] }
 0x455   : > { %v4637_v6 = vadd.f32 %v4179_v21, %v3993_v19  ;;  %v3359_v37 = vpop.xlane.xlu0 %3358  ;;  %v3381_v18 = vpop.xlane.xlu1 %3380  ;;  %v11198_v19 = vld [vmem:[#allocation89_spill] sm:$0xff]  ;;  %v3238_v21 = vld [vmem:[#allocation3 + $0xe0] sm:$0xff] }
 0x456   : > { %4702 = vst.msk [vmem:[#allocation4 + $0x78] sm:$0xff] %vm1285_vm2, %v4638_v62  ;;  %v3476_v4 = vadd.f32 %v3359_v37, %v3284_v46  ;;  %v3487_v13 = vadd.f32 %v3381_v18, %v3295_v32  ;;  %v3297_v8 = vmul.f32 %v11198_v19, %v3233_v14  ;;  %v11199_v32 = vld [vmem:[#allocation119_spill] sm:$0xff]  ;;  %v3285_v14 = vmul.f32 %v11204_v43, %v3221_v38 }
 0x457   : > { %4701 = vst.msk [vmem:[#allocation4 + $0x70] sm:$0xff] %vm1285_vm2, %v4637_v6  ;;  %v6481_v51 = vpop.f32.mrb[46].mxu1  ;;  %v3302_v6 = vmul.f32 %v11199_v32, %v3238_v21  ;;  %v11200_v37 = vld [vmem:[#allocation95_spill] sm:$0xff]  ;;  %v11206_v21 = vld [vmem:[#allocation101_spill] sm:$0xff]  ;;  %v3258_v32 = vld [vmem:[#allocation3 + $0x180] sm:$0xff] }
 0x458   : > { %3541 = vst.msk [vmem:[#allocation3 + $0x50] sm:$0xff] %vm3530_vm4, %v3476_v4  ;;  %3552 = vst.msk [vmem:[#allocation3 + $0xa8] sm:$0xff] %vm3530_vm4, %v3487_v13  ;;  %v4654_v15 = vadd.f32 %v6481_v51, %v4010_v40  ;;  %v4324_v42 = vpop.f32.mrb[47].mxu1  ;;  %v3283_v18 = vmul.f32 %v11200_v37, %v3219_v5  ;;  %v3235_v40 = vld [vmem:[#allocation3 + $0xc8] sm:$0xff]  ;;  %v11202_v51 = vld [vmem:[#allocation97_spill] sm:$0xff] }
 0x459   : > { %v4653_v58 = vadd.f32 %v4324_v42, %v4009_v60  ;;  %v3391_v29 = vpop.xlane.xlu0 %3390  ;;  %v3353_v55 = vpop.xlane.xlu1 %3352  ;;  %v3288_v60 = vmul.f32 %v11201_v31, %v3224_v23  ;;  %v11208_v23 = vld [vmem:[#allocation104_spill] sm:$0xff] }
 0x45a   : > { %4718 = vst.msk [vmem:[#allocation4 + $0xf8] sm:$0xff] %vm1285_vm2, %v4654_v15  ;;  %v3492_v35 = vadd.f32 %v3391_v29, %v3300_v25  ;;  %v3473_v20 = vadd.f32 %v3353_v55, %v3281_v11  ;;  %v3299_v15 = vmul.f32 %v11202_v51, %v3235_v40  ;;  %v3240_v25 = vld [vmem:[#allocation3 + $0xf0] sm:$0xff]  ;;  %v11203_v29 = vld [vmem:[#allocation121_spill] sm:$0xff] }
 0x45b   : > { %4717 = vst.msk [vmem:[#allocation4 + $0xf0] sm:$0xff] %vm1285_vm2, %v4653_v58  ;;  %v3304_v55 = vmul.f32 %v11203_v29, %v3240_v25  ;;  %v3244_v31 = vld [vmem:[#allocation3 + $0x110] sm:$0xff]  ;;  %v11210_v25 = vld [vmem:[#allocation107_spill] sm:$0xff] }
 0x45c   : > { %3557 = vst.msk [vmem:[#allocation3 + $0xd0] sm:$0xff] %vm3530_vm4, %v3492_v35  ;;  %3538 = vst.msk [vmem:[#allocation3 + $0x38] sm:$0xff] %vm3530_vm4, %v3473_v20  ;;  %v3260_v29 = vld [vmem:[#allocation3 + $0x190] sm:$0xff] }
 0x45d   : > { %v3363_v3 = vpop.xlane.xlu0 %3362  ;;  %v3385_v62 = vpop.xlane.xlu1 %3384 }
 0x45e   : > { %v3478_v46 = vadd.f32 %v3363_v3, %v3286_v63  ;;  %v3489_v30 = vadd.f32 %v3385_v62, %v3297_v8  ;;  %v3237_v63 = vld [vmem:[#allocation3 + $0xd8] sm:$0xff] }
 0x45f   : > { %v11205_v3 = vld [vmem:[#allocation13_spill] sm:$0xff]  ;;  %v3301_v5 = vmul.f32 %v11206_v21, %v3237_v63  ;;  %v3246_v21 = vld [vmem:[#allocation3 + $0x120] sm:$0xff] }
 0x460   : > { %3543 = vst.msk [vmem:[#allocation3 + $0x60] sm:$0xff] %vm3530_vm4, %v3478_v46  ;;  %3554 = vst.msk [vmem:[#allocation3 + $0xb8] sm:$0xff] %vm3530_vm4, %v3489_v30  ;;  %v3306_v62 = vmul.f32 %v11205_v3, %v3242_v17  ;;  %v11211_v17 = vld [vmem:[#allocation23_spill] sm:$0xff] }
 0x461   : > { %v3395_v59 = vpop.xlane.xlu0 %3394  ;;  %v3357_v34 = vpop.xlane.xlu1 %3356  ;;  %v3324_v63 = vmul.f32 %v11211_v17, %v3260_v29 }
 0x462   : > { %v3494_v4 = vadd.f32 %v3395_v59, %v3302_v6  ;;  %v3475_v13 = vadd.f32 %v3357_v34, %v3283_v18  ;;  %v3223_v6 = vld [vmem:[#allocation3 + $0x68] sm:$0xff]  ;;  %v11207_v59 = vld [vmem:[#allocation90_spill] sm:$0xff] }
 0x463   : > { %v3322_v34 = vmul.f32 %v11207_v59, %v3258_v32  ;;  %v3287_v40 = vmul.f32 %v11208_v23, %v3223_v6  ;;  %v3644_v59 = vld [vmem:[#allocation4 + $0x188] sm:$0xff]  ;;  %v3643_v23 = vld [vmem:[#allocation4 + $0x180] sm:$0xff] }
 0x464   : > { %3559 = vst.msk [vmem:[#allocation3 + $0xe0] sm:$0xff] %vm3530_vm4, %v3494_v4  ;;  %3540 = vst.msk [vmem:[#allocation3 + $0x48] sm:$0xff] %vm3530_vm4, %v3475_v13 }
 0x465   : > { %v3367_v42 = vpop.xlane.xlu0 %3366  ;;  %v3389_v41 = vpop.xlane.xlu1 %3388 }
 0x466   : > { %v3480_v11 = vadd.f32 %v3367_v42, %v3288_v60  ;;  %v3491_v58 = vadd.f32 %v3389_v41, %v3299_v15  ;;  %v3239_v60 = vld [vmem:[#allocation3 + $0xe8] sm:$0xff]  ;;  %v11209_v42 = vld [vmem:[#allocation14_spill] sm:$0xff] }
 0x467   : > { %v3308_v41 = vmul.f32 %v11209_v42, %v3244_v31  ;;  %v3303_v38 = vmul.f32 %v11210_v25, %v3239_v60  ;;  %v11216_v60 = vld [vmem:[#allocation117_spill] sm:$0xff]  ;;  %v3262_v25 = vld [vmem:[#allocation3 + $0x1a0] sm:$0xff] }
 0x468   : > { %3545 = vst.msk [vmem:[#allocation3 + $0x70] sm:$0xff] %vm3530_vm4, %v3480_v11  ;;  %3556 = vst.msk [vmem:[#allocation3 + $0xc8] sm:$0xff] %vm3530_vm4, %v3491_v58 }
 0x469   : > { %v3399_v35 = vpop.xlane.xlu0 %3398  ;;  %v3361_v20 = vpop.xlane.xlu1 %3360 }
 0x46a   : > { %v3496_v19 = vadd.f32 %v3399_v35, %v3304_v55  ;;  %v3477_v8 = vadd.f32 %v3361_v20, %v3285_v14  ;;  %v3225_v55 = vld [vmem:[#allocation3 + $0x78] sm:$0xff]  ;;  %v3628_v35 = vld [vmem:[#allocation4 + $0x108] sm:$0xff]  ;;  %v3627_v20 = vld [vmem:[#allocation4 + $0x100] sm:$0xff] }
 0x46c   : > { %3561 = vst.msk [vmem:[#allocation3 + $0xf0] sm:$0xff] %vm3530_vm4, %v3496_v19  ;;  %3542 = vst.msk [vmem:[#allocation3 + $0x58] sm:$0xff] %vm3530_vm4, %v3477_v8  ;;  %v11212_v19 = vld [vmem:[#allocation111_spill] sm:$0xff] }
 0x46d   : > { %v3403_v46 = vpop.xlane.xlu0 %3402  ;;  %v3393_v30 = vpop.xlane.xlu1 %3392  ;;  %v3289_v8 = vmul.f32 %v11212_v19, %v3225_v55  ;;  %v3630_v55 = vld [vmem:[#allocation4 + $0x118] sm:$0xff] }
 0x46e   : > { %v3498_v37 = vadd.f32 %v3403_v46, %v3306_v62  ;;  %v3493_v18 = vadd.f32 %v3393_v30, %v3301_v5  ;;  %v3241_v5 = vld [vmem:[#allocation3 + $0xf8] sm:$0xff] }
 0x46f   : > { %v11213_v46 = vld [vmem:[#allocation33_spill] sm:$0xff] }
 0x470   : > { %3563 = vst.msk [vmem:[#allocation3 + $0x100] sm:$0xff] %vm3530_vm4, %v3498_v37  ;;  %3558 = vst.msk [vmem:[#allocation3 + $0xd8] sm:$0xff] %vm3530_vm4, %v3493_v18  ;;  %v4012_v30 = vmul.f32 %v11213_v46, %v3628_v35  ;;  %v11214_v37 = vld [vmem:[#allocation35_spill] sm:$0xff]  ;;  %v3629_v35 = vld [vmem:[#allocation4 + $0x110] sm:$0xff] }
 0x471   : > { %v3435_v4 = vpop.xlane.xlu0 %3434  ;;  %v3365_v13 = vpop.xlane.xlu1 %3364  ;;  %v4011_v18 = vmul.f32 %v11214_v37, %v3627_v20  ;;  %v3259_v46 = vld [vmem:[#allocation3 + $0x188] sm:$0xff]  ;;  %v11220_v37 = vld [vmem:[#allocation36_spill] sm:$0xff] }
 0x472   : > { %v3514_v51 = vadd.f32 %v3435_v4, %v3322_v34  ;;  %v3479_v15 = vadd.f32 %v3365_v13, %v3287_v40  ;;  %v11215_v13 = vld [vmem:[#allocation74_spill] sm:$0xff] }
 0x473   : > { %v3310_v31 = vmul.f32 %v11215_v13, %v3246_v21 }
 0x474   : > { %3579 = vst.msk [vmem:[#allocation3 + $0x180] sm:$0xff] %vm3530_vm4, %v3514_v51  ;;  %3544 = vst.msk [vmem:[#allocation3 + $0x68] sm:$0xff] %vm3530_vm4, %v3479_v15  ;;  %v3305_v51 = vmul.f32 %v11216_v60, %v3241_v5  ;;  %v3248_v5 = vld [vmem:[#allocation3 + $0x130] sm:$0xff] }
 0x475   : > { %v3407_v11 = vpop.xlane.xlu0 %3406  ;;  %v3397_v58 = vpop.xlane.xlu1 %3396 }
 0x476   : > { %v3500_v43 = vadd.f32 %v3407_v11, %v3308_v41  ;;  %v3495_v14 = vadd.f32 %v3397_v58, %v3303_v38  ;;  %v3243_v38 = vld [vmem:[#allocation3 + $0x108] sm:$0xff]  ;;  %v4028_v11 = vmul.f32 %v10158_v22, %v3644_v59  ;;  %v11218_v22 = vld [vmem:[#allocation10_spill] sm:$0xff] }
 0x478   : > { %3565 = vst.msk [vmem:[#allocation3 + $0x110] sm:$0xff] %vm3530_vm4, %v3500_v43  ;;  %3560 = vst.msk [vmem:[#allocation3 + $0xe8] sm:$0xff] %vm3530_vm4, %v3495_v14  ;;  %v4027_v43 = vmul.f32 %v10195_v45, %v3643_v23  ;;  %v11219_v45 = vld [vmem:[#allocation34_spill] sm:$0xff] }
 0x479   : > { %v3439_v3 = vpop.xlane.xlu0 %3438  ;;  %v3369_v62 = vpop.xlane.xlu1 %3368 }
 0x47a   : > { %v3516_v32 = vadd.f32 %v3439_v3, %v3324_v63  ;;  %v3481_v6 = vadd.f32 %v3369_v62, %v3289_v8  ;;  %v11217_v63 = vld [vmem:[#allocation24_spill] sm:$0xff]  ;;  %v3307_v8 = vmul.f32 %v11218_v22, %v3243_v38 }
 0x47b   : > { %v6516_v34 = vpop.f32.mrb[48].mxu0  ;;  %v3326_v19 = vmul.f32 %v11217_v63, %v3262_v25  ;;  %v3264_v25 = vld [vmem:[#allocation3 + $0x1b0] sm:$0xff] }
 0x47c   : > { %3581 = vst.msk [vmem:[#allocation3 + $0x190] sm:$0xff] %vm3530_vm4, %v3516_v32  ;;  %3546 = vst.msk [vmem:[#allocation3 + $0x78] sm:$0xff] %vm3530_vm4, %v3481_v6  ;;  %v4656_v40 = vadd.f32 %v6516_v34, %v4012_v30  ;;  %v4399_v4 = vpop.f32.mrb[49].mxu0  ;;  %v4014_v30 = vmul.f32 %v11219_v45, %v3630_v55  ;;  %v3646_v34 = vld [vmem:[#allocation4 + $0x198] sm:$0xff]  ;;  %v3632_v55 = vld [vmem:[#allocation4 + $0x128] sm:$0xff] }
 0x47d   : > { %v4655_v15 = vadd.f32 %v4399_v4, %v4011_v18  ;;  %v3411_v42 = vpop.xlane.xlu0 %3410  ;;  %v3401_v41 = vpop.xlane.xlu1 %3400  ;;  %v4013_v18 = vmul.f32 %v11220_v37, %v3629_v35  ;;  %v11221_v4 = vld [vmem:[#allocation21_spill] sm:$0xff]  ;;  %v11225_v37 = vld [vmem:[#allocation92_spill] sm:$0xff] }
 0x47e   : > { %4720 = vst.msk [vmem:[#allocation4 + $0x108] sm:$0xff] %vm1285_vm2, %v4656_v40  ;;  %v3502_v58 = vadd.f32 %v3411_v42, %v3310_v31  ;;  %v3497_v29 = vadd.f32 %v3401_v41, %v3305_v51  ;;  %v3312_v13 = vmul.f32 %v11221_v4, %v3248_v5  ;;  %v11222_v31 = vld [vmem:[#allocation19_spill] sm:$0xff]  ;;  %v3645_v51 = vld [vmem:[#allocation4 + $0x190] sm:$0xff]  ;;  %v11223_v35 = vld [vmem:[#allocation81_spill] sm:$0xff] }
 0x47f   : > { %4719 = vst.msk [vmem:[#allocation4 + $0x100] sm:$0xff] %vm1285_vm2, %v4655_v15  ;;  %v6572_v14 = vpop.f32.mrb[48].mxu1  ;;  %v3323_v60 = vmul.f32 %v11222_v31, %v3259_v46  ;;  %v3261_v46 = vld [vmem:[#allocation3 + $0x198] sm:$0xff] }
 0x480   : > { %3567 = vst.msk [vmem:[#allocation3 + $0x120] sm:$0xff] %vm3530_vm4, %v3502_v58  ;;  %3562 = vst.msk [vmem:[#allocation3 + $0xf8] sm:$0xff] %vm3530_vm4, %v3497_v29  ;;  %v4672_v20 = vadd.f32 %v6572_v14, %v4028_v11  ;;  %v4544_v17 = vpop.f32.mrb[49].mxu1  ;;  %v3245_v58 = vld [vmem:[#allocation3 + $0x118] sm:$0xff]  ;;  %v4030_v29 = vmul.f32 %v10166_v33, %v3646_v34 }
 0x481   : > { %v4671_v3 = vadd.f32 %v4544_v17, %v4027_v43  ;;  %v3443_v62 = vpop.xlane.xlu0 %3442  ;;  %v3405_v21 = vpop.xlane.xlu1 %3404  ;;  %v4029_v43 = vmul.f32 %v10205_v12, %v3645_v51  ;;  %v3631_v17 = vld [vmem:[#allocation4 + $0x120] sm:$0xff]  ;;  %v4016_v12 = vmul.f32 %v10130_v28, %v3632_v55  ;;  %v11226_v28 = vld [vmem:[#allocation20_spill] sm:$0xff]  ;;  %v3247_v51 = vld [vmem:[#allocation3 + $0x128] sm:$0xff] }
 0x482   : > { %4736 = vst.msk [vmem:[#allocation4 + $0x188] sm:$0xff] %vm1285_vm2, %v4672_v20  ;;  %v3518_v32 = vadd.f32 %v3443_v62, %v3326_v19  ;;  %v3499_v6 = vadd.f32 %v3405_v21, %v3307_v8  ;;  %v3328_v20 = vmul.f32 %v11223_v35, %v3264_v25  ;;  %v11224_v8 = vld [vmem:[#allocation78_spill] sm:$0xff]  ;;  %v3325_v4 = vmul.f32 %v11226_v28, %v3261_v46  ;;  %v3649_v46 = vld [vmem:[#allocation4 + $0x1b0] sm:$0xff] }
 0x483   : > { %4735 = vst.msk [vmem:[#allocation4 + $0x180] sm:$0xff] %vm1285_vm2, %v4671_v3  ;;  %v6519_v59 = vpop.f32.mrb[50].mxu0  ;;  %v3309_v3 = vmul.f32 %v11224_v8, %v3245_v58  ;;  %v3250_v62 = vld [vmem:[#allocation3 + $0x140] sm:$0xff] }
 0x484   : > { %3583 = vst.msk [vmem:[#allocation3 + $0x1a0] sm:$0xff] %vm3530_vm4, %v3518_v32  ;;  %3564 = vst.msk [vmem:[#allocation3 + $0x108] sm:$0xff] %vm3530_vm4, %v3499_v6  ;;  %v4658_v23 = vadd.f32 %v6519_v59, %v4014_v30  ;;  %v4409_v40 = vpop.f32.mrb[51].mxu0  ;;  %v4015_v30 = vmul.f32 %v10171_v36, %v3631_v17  ;;  %v3648_v32 = vld [vmem:[#allocation4 + $0x1a8] sm:$0xff]  ;;  %v3647_v59 = vld [vmem:[#allocation4 + $0x1a0] sm:$0xff] }
 0x485   : > { %v4657_v15 = vadd.f32 %v4409_v40, %v4013_v18  ;;  %v3415_v42 = vpop.xlane.xlu0 %3414  ;;  %v3437_v41 = vpop.xlane.xlu1 %3436  ;;  %v3314_v18 = vmul.f32 %v11225_v37, %v3250_v62  ;;  %v4031_v25 = vmul.f32 %v10217_v48, %v3647_v59  ;;  %v3263_v48 = vld [vmem:[#allocation3 + $0x1a8] sm:$0xff]  ;;  %v3650_v62 = vld [vmem:[#allocation4 + $0x1b8] sm:$0xff] }
 0x486   : > { %4722 = vst.msk [vmem:[#allocation4 + $0x118] sm:$0xff] %vm1285_vm2, %v4658_v23  ;;  %v3504_v38 = vadd.f32 %v3415_v42, %v3312_v13  ;;  %v3515_v11 = vadd.f32 %v3437_v41, %v3323_v60  ;;  %v3266_v13 = vld [vmem:[#allocation3 + $0x1c0] sm:$0xff]  ;;  %v3634_v41 = vld [vmem:[#allocation4 + $0x138] sm:$0xff] }
 0x487   : > { %4721 = vst.msk [vmem:[#allocation4 + $0x110] sm:$0xff] %vm1285_vm2, %v4657_v15  ;;  %v4032_v15 = vmul.f32 %v10179_v9, %v3648_v32  ;;  %v11228_v9 = vld [vmem:[#allocation17_spill] sm:$0xff] }
 0x488   : > { %3569 = vst.msk [vmem:[#allocation3 + $0x130] sm:$0xff] %vm3530_vm4, %v3504_v38  ;;  %3580 = vst.msk [vmem:[#allocation3 + $0x188] sm:$0xff] %vm3530_vm4, %v3515_v11  ;;  %v6575_v14 = vpop.f32.mrb[50].mxu1  ;;  %v11227_v11 = vld [vmem:[#allocation28_spill] sm:$0xff]  ;;  %v3311_v35 = vmul.f32 %v11228_v9, %v3247_v51  ;;  %v3249_v59 = vld [vmem:[#allocation3 + $0x138] sm:$0xff] }
 0x489   : > { %v4674_v63 = vadd.f32 %v6575_v14, %v4030_v29  ;;  %v4554_v19 = vpop.f32.mrb[51].mxu1  ;;  %v3447_v22 = vpop.xlane.xlu0 %3446  ;;  %v3330_v58 = vmul.f32 %v11227_v11, %v3266_v13  ;;  %v3633_v29 = vld [vmem:[#allocation4 + $0x130] sm:$0xff]  ;;  %v11232_v51 = vld [vmem:[#allocation18_spill] sm:$0xff]  ;;  %v3636_v11 = vld [vmem:[#allocation4 + $0x148] sm:$0xff] }
 0x48a   : > { %v4673_v33 = vadd.f32 %v4554_v19, %v4029_v43  ;;  %v3520_v21 = vadd.f32 %v3447_v22, %v3328_v20  ;;  %v3409_v5 = vpop.xlane.xlu1 %3408  ;;  %v3252_v20 = vld [vmem:[#allocation3 + $0x150] sm:$0xff]  ;;  %v4018_v22 = vmul.f32 %v10143_v61, %v3634_v41  ;;  %v11230_v61 = vld [vmem:[#allocation83_spill] sm:$0xff] }
 0x48b   : > { %4738 = vst.msk [vmem:[#allocation4 + $0x198] sm:$0xff] %vm1285_vm2, %v4674_v63  ;;  %v3501_v45 = vadd.f32 %v3409_v5, %v3309_v3  ;;  %v4017_v3 = vmul.f32 %v10183_v56, %v3633_v29  ;;  %v3327_v32 = vmul.f32 %v11230_v61, %v3263_v48  ;;  %v3256_v61 = vld [vmem:[#allocation3 + $0x170] sm:$0xff] }
 0x48c   : > { %4737 = vst.msk [vmem:[#allocation4 + $0x190] sm:$0xff] %vm1285_vm2, %v4673_v33  ;;  %v6522_v6 = vpop.f32.mrb[52].mxu0 }
 0x48d   : > { %3585 = vst.msk [vmem:[#allocation3 + $0x1b0] sm:$0xff] %vm3530_vm4, %v3520_v21  ;;  %3566 = vst.msk [vmem:[#allocation3 + $0x118] sm:$0xff] %vm3530_vm4, %v3501_v45  ;;  %v4660_v34 = vadd.f32 %v6522_v6, %v4016_v12  ;;  %v4419_v23 = vpop.f32.mrb[53].mxu0  ;;  %v3419_v40 = vpop.xlane.xlu0 %3418  ;;  %v11229_v21 = vld [vmem:[#allocation29_spill] sm:$0xff]  ;;  %v3268_v6 = vld [vmem:[#allocation3 + $0x1d0] sm:$0xff] }
 0x48e   : > { %v4659_v31 = vadd.f32 %v4419_v23, %v4015_v30  ;;  %v3506_v60 = vadd.f32 %v3419_v40, %v3314_v18  ;;  %v3441_v36 = vpop.xlane.xlu1 %3440  ;;  %v3316_v5 = vmul.f32 %v11229_v21, %v3252_v20  ;;  %v4033_v40 = vmul.f32 %v10227_v52, %v3649_v46  ;;  %v3651_v21 = vld [vmem:[#allocation4 + $0x1c0] sm:$0xff] }
 0x48f   : > { %4724 = vst.msk [vmem:[#allocation4 + $0x128] sm:$0xff] %vm1285_vm2, %v4660_v34  ;;  %v3517_v42 = vadd.f32 %v3441_v36, %v3325_v4  ;;  %v4034_v34 = vmul.f32 %v10190_v2, %v3650_v62  ;;  %v11231_v4 = vld [vmem:[#allocation31_spill] sm:$0xff]  ;;  %v3254_v2 = vld [vmem:[#allocation3 + $0x160] sm:$0xff] }
 0x490   : > { %4723 = vst.msk [vmem:[#allocation4 + $0x120] sm:$0xff] %vm1285_vm2, %v4659_v31  ;;  %v6578_v38 = vpop.f32.mrb[52].mxu1  ;;  %v3332_v13 = vmul.f32 %v11231_v4, %v3268_v6  ;;  %v11235_v62 = vld [vmem:[#allocation126_spill] sm:$0xff] }
 0x491   : > { %3571 = vst.msk [vmem:[#allocation3 + $0x140] sm:$0xff] %vm3530_vm4, %v3506_v60  ;;  %3582 = vst.msk [vmem:[#allocation3 + $0x198] sm:$0xff] %vm3530_vm4, %v3517_v42  ;;  %v4676_v55 = vadd.f32 %v6578_v38, %v4032_v15  ;;  %v4564_v43 = vpop.f32.mrb[53].mxu1  ;;  %v3451_v14 = vpop.xlane.xlu0 %3450  ;;  %v3313_v15 = vmul.f32 %v11232_v51, %v3249_v59  ;;  %v3265_v38 = vld [vmem:[#allocation3 + $0x1b8] sm:$0xff] }
 0x492   : > { %v4675_v17 = vadd.f32 %v4564_v43, %v4031_v25  ;;  %v3522_v63 = vadd.f32 %v3451_v14, %v3330_v58  ;;  %v3413_v19 = vpop.xlane.xlu1 %3412  ;;  %v11233_v58 = vld [vmem:[#allocation105_spill] sm:$0xff]  ;;  %v11234_v14 = vld [vmem:[#allocation80_spill] sm:$0xff] }
 0x493   : > { %4740 = vst.msk [vmem:[#allocation4 + $0x1a8] sm:$0xff] %vm1285_vm2, %v4676_v55  ;;  %v3503_v8 = vadd.f32 %v3413_v19, %v3311_v35  ;;  %v3318_v29 = vmul.f32 %v11233_v58, %v3254_v2  ;;  %v3635_v55 = vld [vmem:[#allocation4 + $0x140] sm:$0xff]  ;;  %v3329_v9 = vmul.f32 %v11234_v14, %v3265_v38  ;;  %v4020_v19 = vmul.f32 %v10201_v24, %v3636_v11  ;;  %v3638_v2 = vld [vmem:[#allocation4 + $0x158] sm:$0xff]  ;;  %v11239_v38 = vld [vmem:[#allocation75_spill] sm:$0xff] }
 0x494   : > { %4739 = vst.msk [vmem:[#allocation4 + $0x1a0] sm:$0xff] %vm1285_vm2, %v4675_v17  ;;  %v6525_v33 = vpop.f32.mrb[54].mxu0  ;;  %v3270_v35 = vld [vmem:[#allocation3 + $0x1e0] sm:$0xff]  ;;  %v3654_v14 = vld [vmem:[#allocation4 + $0x1d8] sm:$0xff] }
 0x495   : > { %3587 = vst.msk [vmem:[#allocation3 + $0x1c0] sm:$0xff] %vm3530_vm4, %v3522_v63  ;;  %3568 = vst.msk [vmem:[#allocation3 + $0x128] sm:$0xff] %vm3530_vm4, %v3503_v8  ;;  %v4662_v12 = vadd.f32 %v6525_v33, %v4018_v22  ;;  %v4429_v45 = vpop.f32.mrb[55].mxu0  ;;  %v3423_v30 = vpop.xlane.xlu0 %3422  ;;  %v3251_v63 = vld [vmem:[#allocation3 + $0x148] sm:$0xff]  ;;  %v4019_v8 = vmul.f32 %v10239_v53, %v3635_v55  ;;  %v3334_v33 = vmul.f32 %v11235_v62, %v3270_v35 }
 0x496   : > { %v4661_v37 = vadd.f32 %v4429_v45, %v4017_v3  ;;  %v3508_v18 = vadd.f32 %v3423_v30, %v3316_v5  ;;  %v3445_v56 = vpop.xlane.xlu1 %3444  ;;  %v3652_v22 = vld [vmem:[#allocation4 + $0x1c8] sm:$0xff]  ;;  %v11236_v45 = vld [vmem:[#allocation22_spill] sm:$0xff]  ;;  %v4022_v55 = vmul.f32 %v10223_v7, %v3638_v2 }
 0x497   : > { %4726 = vst.msk [vmem:[#allocation4 + $0x138] sm:$0xff] %vm1285_vm2, %v4662_v12  ;;  %v3519_v23 = vadd.f32 %v3445_v56, %v3327_v32  ;;  %v3315_v30 = vmul.f32 %v11236_v45, %v3251_v63  ;;  %v4036_v53 = vmul.f32 %v10212_v57, %v3652_v22  ;;  %v4035_v56 = vmul.f32 %v10249_v54, %v3651_v21  ;;  %v3272_v57 = vld [vmem:[#allocation3 + $0x1f0] sm:$0xff]  ;;  %v11240_v63 = vld [vmem:[#allocation87_spill] sm:$0xff]  ;;  %v3639_v21 = vld [vmem:[#allocation4 + $0x160] sm:$0xff] }
 0x498   : > { %4725 = vst.msk [vmem:[#allocation4 + $0x130] sm:$0xff] %vm1285_vm2, %v4661_v37  ;;  %v6581_v28 = vpop.f32.mrb[54].mxu1  ;;  %v3267_v37 = vld [vmem:[#allocation3 + $0x1c8] sm:$0xff] }
 0x499   : > { %3573 = vst.msk [vmem:[#allocation3 + $0x150] sm:$0xff] %vm3530_vm4, %v3508_v18  ;;  %3584 = vst.msk [vmem:[#allocation3 + $0x1a8] sm:$0xff] %vm3530_vm4, %v3519_v23  ;;  %v4678_v31 = vadd.f32 %v6581_v28, %v4034_v34  ;;  %v4574_v60 = vpop.f32.mrb[55].mxu1  ;;  %v3455_v36 = vpop.xlane.xlu0 %3454  ;;  %v11237_v34 = vld [vmem:[#allocation128_spill] sm:$0xff]  ;;  %v3640_v62 = vld [vmem:[#allocation4 + $0x168] sm:$0xff] }
 0x49a   : > { %v4677_v42 = vadd.f32 %v4574_v60, %v4033_v40  ;;  %v3524_v41 = vadd.f32 %v3455_v36, %v3332_v13  ;;  %v3417_v25 = vpop.xlane.xlu1 %3416  ;;  %v3320_v23 = vmul.f32 %v11237_v34, %v3256_v61  ;;  %v11238_v13 = vld [vmem:[#allocation86_spill] sm:$0xff] }
 0x49b   : > { %4742 = vst.msk [vmem:[#allocation4 + $0x1b8] sm:$0xff] %vm1285_vm2, %v4678_v31  ;;  %v3505_v52 = vadd.f32 %v3417_v25, %v3313_v15  ;;  %v3331_v31 = vmul.f32 %v11238_v13, %v3267_v37  ;;  %v3253_v15 = vld [vmem:[#allocation3 + $0x158] sm:$0xff] }
 0x49c   : > { %4741 = vst.msk [vmem:[#allocation4 + $0x1b0] sm:$0xff] %vm1285_vm2, %v4677_v42  ;;  %v3336_v42 = vmul.f32 %v10300_v50, %v3272_v57  ;;  %v3642_v13 = vld [vmem:[#allocation4 + $0x178] sm:$0xff]  ;;  %v3641_v57 = vld [vmem:[#allocation4 + $0x170] sm:$0xff] }
 0x49d   : > { %3589 = vst.msk [vmem:[#allocation3 + $0x1d0] sm:$0xff] %vm3530_vm4, %v3524_v41  ;;  %3570 = vst.msk [vmem:[#allocation3 + $0x138] sm:$0xff] %vm3530_vm4, %v3505_v52  ;;  %v3427_v43 = vpop.xlane.xlu0 %3426  ;;  %v3637_v41 = vld [vmem:[#allocation4 + $0x150] sm:$0xff]  ;;  %v3317_v52 = vmul.f32 %v11239_v38, %v3253_v15 }
 0x49e   : > { %v3510_v20 = vadd.f32 %v3427_v43, %v3318_v29  ;;  %v3449_v17 = vpop.xlane.xlu1 %3448  ;;  %v3269_v29 = vld [vmem:[#allocation3 + $0x1d8] sm:$0xff] }
 0x49f   : > { %v3521_v48 = vadd.f32 %v3449_v17, %v3329_v9  ;;  %v4021_v9 = vmul.f32 %v10257_v47, %v3637_v41 }
 0x4a0   : > { %3575 = vst.msk [vmem:[#allocation3 + $0x160] sm:$0xff] %vm3530_vm4, %v3510_v20  ;;  %v6528_v3 = vpop.f32.mrb[56].mxu0  ;;  %v3653_v20 = vld [vmem:[#allocation4 + $0x1d0] sm:$0xff] }
 0x4a1   : > { %3586 = vst.msk [vmem:[#allocation3 + $0x1b8] sm:$0xff] %vm3530_vm4, %v3521_v48  ;;  %v4664_v5 = vadd.f32 %v6528_v3, %v4020_v19  ;;  %v4439_v46 = vpop.f32.mrb[57].mxu0  ;;  %v3459_v12 = vpop.xlane.xlu0 %3458  ;;  %v3333_v19 = vmul.f32 %v11240_v63, %v3269_v29  ;;  %v4038_v3 = vmul.f32 %v10234_v0, %v3654_v14  ;;  %v4037_v47 = vmul.f32 %v10267_v44, %v3653_v20 }
 0x4a2   : > { %v4663_v32 = vadd.f32 %v4439_v46, %v4019_v8  ;;  %v3526_v24 = vadd.f32 %v3459_v12, %v3334_v33  ;;  %v3421_v6 = vpop.xlane.xlu1 %3420  ;;  %v3255_v8 = vld [vmem:[#allocation3 + $0x168] sm:$0xff]  ;;  %v11241_v12 = vld [vmem:[#allocation26_spill] sm:$0xff]  ;;  %v4024_v0 = vmul.f32 %v10245_v26, %v3640_v62  ;;  %v4023_v44 = vmul.f32 %v10279_v10, %v3639_v21  ;;  %v4826_v62 = vld [vmem:[#allocation3 + $0x38] sm:$0xff] (!%p5882_p5) }
 0x4a3   : > { %4728 = vst.msk [vmem:[#allocation4 + $0x148] sm:$0xff] %vm1285_vm2, %v4664_v5  ;;  %v3507_v18 = vadd.f32 %v3421_v6, %v3315_v30  ;;  %v3319_v45 = vmul.f32 %v11241_v12, %v3255_v8  ;;  %v3656_v6 = vld [vmem:[#allocation4 + $0x1e8] sm:$0xff]  ;;  %v4827_v12 = vld [vmem:[#allocation3 + $0x40] sm:$0xff] (!%p5882_p5) }
 0x4a4   : > { %4727 = vst.msk [vmem:[#allocation4 + $0x140] sm:$0xff] %vm1285_vm2, %v4663_v32  ;;  %v6584_v59 = vpop.f32.mrb[56].mxu1  ;;  %v3271_v32 = vld [vmem:[#allocation3 + $0x1e8] sm:$0xff]  ;;  %v4040_v26 = vmul.f32 %v10254_v1, %v3656_v6  ;;  %v4026_v1 = vmul.f32 %v10264_v16, %v3642_v13  ;;  %v4837_v13 = vld [vmem:[#allocation3 + $0x90] sm:$0xff] (!%p5882_p5) }
 0x4a5   : > { %3591 = vst.msk [vmem:[#allocation3 + $0x1e0] sm:$0xff] %vm3530_vm4, %v3526_v24  ;;  %3572 = vst.msk [vmem:[#allocation3 + $0x148] sm:$0xff] %vm3530_vm4, %v3507_v18  ;;  %v4680_v40 = vadd.f32 %v6584_v59, %v4036_v53  ;;  %v4584_v28 = vpop.f32.mrb[57].mxu1  ;;  %v3431_v4 = vpop.xlane.xlu0 %3430  ;;  %v3655_v53 = vld [vmem:[#allocation4 + $0x1e0] sm:$0xff]  ;;  %v11242_v59 = vld [vmem:[#allocation93_spill] sm:$0xff] }
 0x4a6   : > { %v4679_v60 = vadd.f32 %v4584_v28, %v4035_v56  ;;  %v3512_v36 = vadd.f32 %v3431_v4, %v3320_v23  ;;  %v3453_v51 = vpop.xlane.xlu1 %3452  ;;  %v3335_v34 = vmul.f32 %v11242_v59, %v3271_v32  ;;  %v3257_v28 = vld [vmem:[#allocation3 + $0x178] sm:$0xff]  ;;  %v4039_v10 = vmul.f32 %v10289_v49, %v3655_v53  ;;  %v4820_v8 = vld [vmem:[#allocation3 + $0x8] sm:$0xff] (!%p5882_p5)  ;;  %v4829_v32 = vld [vmem:[#allocation3 + $0x50] sm:$0xff] (!%p5882_p5) }
 0x4a7   : > { %4744 = vst.msk [vmem:[#allocation4 + $0x1c8] sm:$0xff] %vm1285_vm2, %v4680_v40  ;;  %v3523_v54 = vadd.f32 %v3453_v51, %v3331_v31  ;;  %v11243_v51 = vld [vmem:[#allocation100_spill] sm:$0xff]  ;;  %v4025_v49 = vmul.f32 %v10298_v39, %v3641_v57  ;;  %v4834_v53 = vld [vmem:[#allocation3 + $0x78] sm:$0xff] (!%p5882_p5) }
 0x4a8   : > { %4743 = vst.msk [vmem:[#allocation4 + $0x1c0] sm:$0xff] %vm1285_vm2, %v4679_v60  ;;  %v3321_v15 = vmul.f32 %v11243_v51, %v3257_v28  ;;  %v4842_v51 = vld [vmem:[#allocation3 + $0xb8] sm:$0xff] (!%p5882_p5) }
 0x4a9   : > { %3577 = vst.msk [vmem:[#allocation3 + $0x170] sm:$0xff] %vm3530_vm4, %v3512_v36  ;;  %3588 = vst.msk [vmem:[#allocation3 + $0x1c8] sm:$0xff] %vm3530_vm4, %v3523_v54  ;;  %v3463_v25 = vpop.xlane.xlu0 %3462 }
 0x4aa   : > { %v3528_v11 = vadd.f32 %v3463_v25, %v3336_v42  ;;  %v3425_v58 = vpop.xlane.xlu1 %3424  ;;  %v3273_v42 = vld [vmem:[#allocation3 + $0x1f8] sm:$0xff] }
 0x4ab   : > { %v3509_v43 = vadd.f32 %v3425_v58, %v3317_v52  ;;  %v3658_v25 = vld [vmem:[#allocation4 + $0x1f8] sm:$0xff]  ;;  %v3337_v29 = vmul.f32 %v10277_v27, %v3273_v42  ;;  %v4821_v27 = vld [vmem:[#allocation3 + $0x10] sm:$0xff] (!%p5882_p5)  ;;  %v4844_v42 = vld [vmem:[#allocation3 + $0xc8] sm:$0xff] (!%p5882_p5) }
 0x4ac   : > { %3593 = vst.msk [vmem:[#allocation3 + $0x1f0] sm:$0xff] %vm3530_vm4, %v3528_v11  ;;  %v6531_v35 = vpop.f32.mrb[58].mxu0  ;;  %7268 = vrcp.f32 (!%p5882_p5), %v4821_v27 }
 0x4ad   : > { %3574 = vst.msk [vmem:[#allocation3 + $0x158] sm:$0xff] %vm3530_vm4, %v3509_v43  ;;  %v4666_v50 = vadd.f32 %v6531_v35, %v4022_v55  ;;  %v4449_v17 = vpop.f32.mrb[59].mxu0 }
 0x4ae   : > { %v4665_v48 = vadd.f32 %v4449_v17, %v4021_v9  ;;  %v3457_v22 = vpop.xlane.xlu1 %3456  ;;  %v3657_v9 = vld [vmem:[#allocation4 + $0x1f0] sm:$0xff] }
 0x4af   : > { %4730 = vst.msk [vmem:[#allocation4 + $0x158] sm:$0xff] %vm1285_vm2, %v4666_v50  ;;  %v3525_v7 = vadd.f32 %v3457_v22, %v3333_v19  ;;  %v4819_v19 = vld [vmem:[#allocation3] sm:$0xff] (!%p5882_p5)  ;;  %v7511_v22 = vmov (!%p5882_p5), 0  }
 0x4b0   : > { %4729 = vst.msk [vmem:[#allocation4 + $0x150] sm:$0xff] %vm1285_vm2, %v4665_v48  ;;  %v6587_v33 = vpop.f32.mrb[58].mxu1  ;;  %v4822_v48 = vld [vmem:[#allocation3 + $0x18] sm:$0xff] (!%p5882_p5)  ;;  %7267 = vset.pattern.permute.xlu1 (!%p5882_p5), %v7511_v22  ;;  %7266 = vset.pattern.permute.xlu0 (!%p5882_p5), %v7511_v22  ;;  %7270 = vrcp.f32 (!%p5882_p5), %v4819_v19  ;;  %v4853_v19 = vld [vmem:[#allocation3 + $0x110] sm:$0xff] (!%p5882_p5)  ;;  %v4856_v22 = vld [vmem:[#allocation3 + $0x128] sm:$0xff] (!%p5882_p5) }
 0x4b1   : > { %3590 = vst.msk [vmem:[#allocation3 + $0x1d8] sm:$0xff] %vm3530_vm4, %v3525_v7  ;;  %v4682_v5 = vadd.f32 %v6587_v33, %v4038_v3  ;;  %v4594_v46 = vpop.f32.mrb[59].mxu1  ;;  %v3977_v38 = vpop.permute.xlu0 %3976  ;;  %7272 = vrcp.f32 (!%p5882_p5), %v4822_v48  ;;  %v4824_v3 = vld [vmem:[#allocation3 + $0x28] sm:$0xff] (!%p5882_p5)  ;;  %v4823_v7 = vld [vmem:[#allocation3 + $0x20] sm:$0xff] (!%p5882_p5) }
 0x4b2   : > { %v4681_v30 = vadd.f32 %v4594_v46, %v4037_v47  ;;  %v3429_v61 = vpop.xlane.xlu1 %3428  ;;  %v4042_v14 = vmul.f32 %v3977_v38, %v3658_v25  ;;  %7274 = vrcp.f32 (!%p5882_p5), %v4820_v8  ;;  %v4825_v47 = vld [vmem:[#allocation3 + $0x30] sm:$0xff] (!%p5882_p5)  ;;  %v4846_v25 = vld [vmem:[#allocation3 + $0xd8] sm:$0xff] (!%p5882_p5) }
 0x4b3   : > { %4746 = vst.msk [vmem:[#allocation4 + $0x1d8] sm:$0xff] %vm1285_vm2, %v4682_v5  ;;  %v3511_v24 = vadd.f32 %v3429_v61, %v3319_v45  ;;  %7276 = vrcp.f32 (!%p5882_p5), %v4824_v3  ;;  %v4828_v5 = vld [vmem:[#allocation3 + $0x48] sm:$0xff] (!%p5882_p5)  ;;  %v4855_v3 = vld [vmem:[#allocation3 + $0x120] sm:$0xff] (!%p5882_p5) }
 0x4b4   : > { %4745 = vst.msk [vmem:[#allocation4 + $0x1d0] sm:$0xff] %vm1285_vm2, %v4681_v30  ;;  %v6534_v37 = vpop.f32.mrb[60].mxu0  ;;  %7278 = vrcp.f32 (!%p5882_p5), %v4823_v7  ;;  %v4830_v30 = vld [vmem:[#allocation3 + $0x58] sm:$0xff] (!%p5882_p5) }
 0x4b5   : > { %3576 = vst.msk [vmem:[#allocation3 + $0x168] sm:$0xff] %vm3530_vm4, %v3511_v24  ;;  %v4668_v18 = vadd.f32 %v6534_v37, %v4024_v0  ;;  %v4459_v56 = vpop.f32.mrb[61].mxu0  ;;  %7280 = vrcp.f32 (!%p5882_p5), %v4826_v62  ;;  %v4832_v24 = vld [vmem:[#allocation3 + $0x68] sm:$0xff] (!%p5882_p5)  ;;  %v4858_v62 = vld [vmem:[#allocation3 + $0x138] sm:$0xff] (!%p5882_p5) }
 0x4b6   : > { %v4667_v23 = vadd.f32 %v4459_v56, %v4023_v44  ;;  %v3461_v40 = vpop.xlane.xlu1 %3460  ;;  %v7269_v33 = vpop.eup (!%p5882_p5), %7268  ;;  %7282 = vrcp.f32 (!%p5882_p5), %v4825_v47  ;;  %v4831_v44 = vld [vmem:[#allocation3 + $0x60] sm:$0xff] (!%p5882_p5)  ;;  %v4833_v56 = vld [vmem:[#allocation3 + $0x70] sm:$0xff] (!%p5882_p5) }
 0x4b7   : > { %4732 = vst.msk [vmem:[#allocation4 + $0x168] sm:$0xff] %vm1285_vm2, %v4668_v18  ;;  %v3527_v4 = vadd.f32 %v3461_v40, %v3335_v34  ;;  %4975 = vperm.xlu1 (!%p5882_p5), %7267, %v7269_v33   ;;  %7284 = vrcp.f32 (!%p5882_p5), %v4828_v5  ;;  %v4836_v34 = vld [vmem:[#allocation3 + $0x88] sm:$0xff] (!%p5882_p5)  ;;  %v4835_v40 = vld [vmem:[#allocation3 + $0x80] sm:$0xff] (!%p5882_p5)  ;;  %v4857_v33 = vld [vmem:[#allocation3 + $0x130] sm:$0xff] (!%p5882_p5) }
 0x4b8   : > { %4731 = vst.msk [vmem:[#allocation4 + $0x160] sm:$0xff] %vm1285_vm2, %v4667_v23  ;;  %v6590_v31 = vpop.f32.mrb[60].mxu1  ;;  %7286 = vrcp.f32 (!%p5882_p5), %v4827_v12  ;;  %v4867_v5 = vld [vmem:[#allocation3 + $0x180] sm:$0xff] (!%p5882_p5) }
 0x4b9   : > { %3592 = vst.msk [vmem:[#allocation3 + $0x1e8] sm:$0xff] %vm3530_vm4, %v3527_v4  ;;  %v4684_v60 = vadd.f32 %v6590_v31, %v4040_v26  ;;  %v4604_v36 = vpop.f32.mrb[61].mxu1  ;;  %7288 = vrcp.f32 (!%p5882_p5), %v4830_v30  ;;  %v4838_v26 = vld [vmem:[#allocation3 + $0x98] sm:$0xff] (!%p5882_p5)  ;;  %v4840_v31 = vld [vmem:[#allocation3 + $0xa8] sm:$0xff] (!%p5882_p5)  ;;  %v4859_v12 = vld [vmem:[#allocation3 + $0x140] sm:$0xff] (!%p5882_p5) }
 0x4ba   : > { %v4683_v54 = vadd.f32 %v4604_v36, %v4039_v10  ;;  %v3433_v2 = vpop.xlane.xlu1 %3432  ;;  %v7271_v21 = vpop.eup (!%p5882_p5), %7270  ;;  %7290 = vrcp.f32 (!%p5882_p5), %v4829_v32  ;;  %v4869_v30 = vld [vmem:[#allocation3 + $0x190] sm:$0xff] (!%p5882_p5)  ;;  %v4868_v32 = vld [vmem:[#allocation3 + $0x188] sm:$0xff] (!%p5882_p5) }
 0x4bb   : > { %4748 = vst.msk [vmem:[#allocation4 + $0x1e8] sm:$0xff] %vm1285_vm2, %v4684_v60  ;;  %v3513_v41 = vadd.f32 %v3433_v2, %v3321_v15  ;;  %v7273_v46 = vpop.eup (!%p5882_p5), %7272  ;;  %4965 = vperm.xlu0 (!%p5882_p5), %7266, %v7271_v21   ;;  %7292 = vrcp.f32 (!%p5882_p5), %v4832_v24  ;;  %v4839_v60 = vld [vmem:[#allocation3 + $0xa0] sm:$0xff] (!%p5882_p5) }
 0x4bc   : > { %4747 = vst.msk [vmem:[#allocation4 + $0x1e0] sm:$0xff] %vm1285_vm2, %v4683_v54  ;;  %v6537_v52 = vpop.f32.mrb[62].mxu0  ;;  %v7275_v45 = vpop.eup (!%p5882_p5), %7274  ;;  %4980 = vperm.xlu1 (!%p5882_p5), %7267, %v7273_v46   ;;  %7294 = vrcp.f32 (!%p5882_p5), %v4831_v44  ;;  %v4841_v54 = vld [vmem:[#allocation3 + $0xb0] sm:$0xff] (!%p5882_p5)  ;;  %v4871_v24 = vld [vmem:[#allocation3 + $0x1a0] sm:$0xff] (!%p5882_p5)  ;;  %v4870_v44 = vld [vmem:[#allocation3 + $0x198] sm:$0xff] (!%p5882_p5) }
 0x4bd   : > { %3578 = vst.msk [vmem:[#allocation3 + $0x178] sm:$0xff] %vm3530_vm4, %v3513_v41  ;;  %v4670_v11 = vadd.f32 %v6537_v52, %v4026_v1  ;;  %v4469_v58 = vpop.f32.mrb[63].mxu0  ;;  %v7277_v61 = vpop.eup (!%p5882_p5), %7276  ;;  %7296 = vrcp.f32 (!%p5882_p5), %v4834_v53  ;;  %v4843_v41 = vld [vmem:[#allocation3 + $0xc0] sm:$0xff] (!%p5882_p5)  ;;  %v4845_v52 = vld [vmem:[#allocation3 + $0xd0] sm:$0xff] (!%p5882_p5) }
 0x4be   : > { %v4669_v55 = vadd.f32 %v4469_v58, %v4025_v49  ;;  %v3465_v43 = vpop.xlane.xlu1 %3464  ;;  %v7279_v0 = vpop.eup (!%p5882_p5), %7278  ;;  %7298 = vrcp.f32 (!%p5882_p5), %v4833_v56  ;;  %v4848_v58 = vld [vmem:[#allocation3 + $0xe8] sm:$0xff] (!%p5882_p5)  ;;  %v4873_v53 = vld [vmem:[#allocation3 + $0x1b0] sm:$0xff] (!%p5882_p5) }
 0x4bf   : > { %4734 = vst.msk [vmem:[#allocation4 + $0x178] sm:$0xff] %vm1285_vm2, %v4670_v11  ;;  %v3529_v16 = vadd.f32 %v3465_v43, %v3337_v29  ;;  %4970 = vperm.xlu0 (!%p5882_p5), %7266, %v7275_v45   ;;  %v7281_v6 = vpop.eup (!%p5882_p5), %7280  ;;  %7300 = vrcp.f32 (!%p5882_p5), %v4836_v34  ;;  %v4872_v56 = vld [vmem:[#allocation3 + $0x1a8] sm:$0xff] (!%p5882_p5)  ;;  %v4875_v34 = vld [vmem:[#allocation3 + $0x1c0] sm:$0xff] (!%p5882_p5) }
 0x4c0   : > { %4733 = vst.msk [vmem:[#allocation4 + $0x170] sm:$0xff] %vm1285_vm2, %v4669_v55  ;;  %v6593_v39 = vpop.f32.mrb[62].mxu1  ;;  %4990 = vperm.xlu1 (!%p5882_p5), %7267, %v7277_v61   ;;  %v7283_v37 = vpop.eup (!%p5882_p5), %7282  ;;  %7302 = vrcp.f32 (!%p5882_p5), %v4835_v40  ;;  %v4847_v55 = vld [vmem:[#allocation3 + $0xe0] sm:$0xff] (!%p5882_p5)  ;;  %v4874_v40 = vld [vmem:[#allocation3 + $0x1b8] sm:$0xff] (!%p5882_p5) }
 0x4c1   : > { %3594 = vst.msk [vmem:[#allocation3 + $0x1f8] sm:$0xff] %vm3530_vm4, %v3529_v16  ;;  %v4686_v35 = vadd.f32 %v6593_v39, %v4042_v14  ;;  %v4614_v20 = vpop.f32.mrb[63].mxu1  ;;  %4818 = sbr.rel (%p5882_p5) target bundleno = 1651 (0x673), region = 116  ;;  %v7285_v18 = vpop.eup (!%p5882_p5), %7284  ;;  %7304 = vrcp.f32 (!%p5882_p5), %v4838_v26  ;;  %v4850_v14 = vld [vmem:[#allocation3 + $0xf8] sm:$0xff] (!%p5882_p5)  ;;  %v4849_v39 = vld [vmem:[#allocation3 + $0xf0] sm:$0xff] (!%p5882_p5) }
 0x4c2   : > { %v3972_v50 = vpop.permute.xlu1 %3971  ;;  %v7287_v59 = vpop.eup (!%p5882_p5), %7286  ;;  %7306 = vrcp.f32 (!%p5882_p5), %v4837_v13  ;;  %v4877_v26 = vld [vmem:[#allocation3 + $0x1d0] sm:$0xff] (!%p5882_p5)  ;;  %v4876_v13 = vld [vmem:[#allocation3 + $0x1c8] sm:$0xff] (!%p5882_p5) }
 0x4c3   : > { %4750 = vst.msk [vmem:[#allocation4 + $0x1f8] sm:$0xff] %vm1285_vm2, %v4686_v35  ;;  %v4041_v17 = vmul.f32 %v3972_v50, %v3657_v9  ;;  %4985 = vperm.xlu0 (!%p5882_p5), %7266, %v7279_v0   ;;  %v7289_v23 = vpop.eup (!%p5882_p5), %7288  ;;  %7308 = vrcp.f32 (!%p5882_p5), %v4840_v31  ;;  %v4852_v35 = vld [vmem:[#allocation3 + $0x108] sm:$0xff] (!%p5882_p5)  ;;  %v4851_v50 = vld [vmem:[#allocation3 + $0x100] sm:$0xff] (!%p5882_p5) }
 0x4c4   : > { %5000 = vperm.xlu1 (!%p5882_p5), %7267, %v7281_v6   ;;  %v7291_v28 = vpop.eup (!%p5882_p5), %7290  ;;  %7310 = vrcp.f32 (!%p5882_p5), %v4839_v60  ;;  %v4879_v31 = vld [vmem:[#allocation3 + $0x1e0] sm:$0xff] (!%p5882_p5)  ;;  %v4878_v60 = vld [vmem:[#allocation3 + $0x1d8] sm:$0xff] (!%p5882_p5) }
 0x4c5   : > { %v4685_v63 = vadd.f32 %v4614_v20, %v4041_v17  ;;  %v7293_v4 = vpop.eup (!%p5882_p5), %7292  ;;  %7312 = vrcp.f32 (!%p5882_p5), %v4842_v51  ;;  %v4881_v51 = vld [vmem:[#allocation3 + $0x1f0] sm:$0xff] (!%p5882_p5) }
 0x4c6   : > { %v7295_v10 = vpop.eup (!%p5882_p5), %7294  ;;  %7314 = vrcp.f32 (!%p5882_p5), %v4841_v54  ;;  %v4880_v54 = vld [vmem:[#allocation3 + $0x1e8] sm:$0xff] (!%p5882_p5) }
 0x4c7   : > { %4749 = vst.msk [vmem:[#allocation4 + $0x1f0] sm:$0xff] %vm1285_vm2, %v4685_v63  ;;  %4995 = vperm.xlu0 (!%p5882_p5), %7266, %v7283_v37   ;;  %v7297_v57 = vpop.eup (!%p5882_p5), %7296  ;;  %7316 = vrcp.f32 (!%p5882_p5), %v4844_v42  ;;  %v4854_v63 = vld [vmem:[#allocation3 + $0x118] sm:$0xff] (!%p5882_p5) }
 0x4c8   : > { %5010 = vperm.xlu1 %7267, %v7285_v18   ;;  %v7299_v36 = vpop.eup %7298  ;;  %7318 = vrcp.f32 %v4843_v41 }
 0x4c9   : > { %v7301_v15 = vpop.eup %7300  ;;  %7320 = vrcp.f32 %v4846_v25 }
 0x4ca   : > { %v7303_v2 = vpop.eup %7302  ;;  %7322 = vrcp.f32 %v4845_v52  ;;  %v4949_v52 = vld [vmem:[#allocation4 + $0x10] sm:$0xff] }
 0x4cb   : > { %5005 = vperm.xlu0 %7266, %v7287_v59   ;;  %v7305_v1 = vpop.eup %7304  ;;  %7324 = vrcp.f32 %v4848_v58 }
 0x4cc   : > { %5020 = vperm.xlu1 %7267, %v7289_v23   ;;  %v7307_v49 = vpop.eup %7306  ;;  %7326 = vrcp.f32 %v4847_v55 }
 0x4cd   : > { %v7309_v38 = vpop.eup %7308  ;;  %7328 = vrcp.f32 %v4850_v14  ;;  %v4950_v14 = vld [vmem:[#allocation4 + $0x18] sm:$0xff] }
 0x4ce   : > { %v7311_v11 = vpop.eup %7310  ;;  %7330 = vrcp.f32 %v4849_v39 }
 0x4cf   : > { %5015 = vperm.xlu0 %7266, %v7291_v28   ;;  %v7313_v29 = vpop.eup %7312  ;;  %7332 = vrcp.f32 %v4852_v35 }
 0x4d0   : > { %5030 = vperm.xlu1 %7267, %v7293_v4   ;;  %v7315_v43 = vpop.eup %7314  ;;  %7334 = vrcp.f32 %v4851_v50  ;;  %v4952_v50 = vld [vmem:[#allocation4 + $0x28] sm:$0xff] }
 0x4d1   : > { %v7317_v16 = vpop.eup %7316  ;;  %7336 = vrcp.f32 %v4854_v63 }
 0x4d2   : > { %v7319_v9 = vpop.eup %7318  ;;  %7338 = vrcp.f32 %v4853_v19 }
 0x4d3   : > { %5025 = vperm.xlu0 %7266, %v7295_v10   ;;  %v7321_v20 = vpop.eup %7320  ;;  %7340 = vrcp.f32 %v4856_v22  ;;  %v4954_v22 = vld [vmem:[#allocation4 + $0x38] sm:$0xff] }
 0x4d4   : > { %5040 = vperm.xlu1 %7267, %v7297_v57   ;;  %v7323_v17 = vpop.eup %7322  ;;  %7342 = vrcp.f32 %v4855_v3 }
 0x4d5   : > { %v7325_v27 = vpop.eup %7324  ;;  %7344 = vrcp.f32 %v4858_v62 }
 0x4d6   : > { %v7327_v48 = vpop.eup %7326  ;;  %7346 = vrcp.f32 %v4857_v33  ;;  %v4956_v33 = vld [vmem:[#allocation4 + $0x48] sm:$0xff] }
 0x4d7   : > { %5035 = vperm.xlu0 %7266, %v7299_v36   ;;  %v7329_v8 = vpop.eup %7328  ;;  %7348 = vrcp.f32 %v4867_v5 }
 0x4d8   : > { %5099 = vperm.xlu1 %7267, %v7301_v15   ;;  %v7331_v7 = vpop.eup %7330  ;;  %7350 = vrcp.f32 %v4859_v12 }
 0x4d9   : > { %v7333_v47 = vpop.eup %7332  ;;  %7352 = vrcp.f32 %v4869_v30  ;;  %v4958_v30 = vld [vmem:[#allocation4 + $0x58] sm:$0xff] }
 0x4da   : > { %v7335_v21 = vpop.eup %7334  ;;  %7354 = vrcp.f32 %v4868_v32 }
 0x4db   : > { %5094 = vperm.xlu0 %7266, %v7303_v2   ;;  %v7337_v46 = vpop.eup %7336  ;;  %7356 = vrcp.f32 %v4871_v24 }
 0x4dc   : > { %5109 = vperm.xlu1 %7267, %v7305_v1   ;;  %v7339_v45 = vpop.eup %7338  ;;  %7358 = vrcp.f32 %v4870_v44  ;;  %v4960_v44 = vld [vmem:[#allocation4 + $0x68] sm:$0xff] }
 0x4dd   : > { %v7341_v61 = vpop.eup %7340  ;;  %7360 = vrcp.f32 %v4873_v53 }
 0x4de   : > { %v7343_v0 = vpop.eup %7342  ;;  %7362 = vrcp.f32 %v4872_v56 }
 0x4df   : > { %5104 = vperm.xlu0 %7266, %v7307_v49   ;;  %v7345_v6 = vpop.eup %7344  ;;  %7364 = vrcp.f32 %v4875_v34  ;;  %v4962_v34 = vld [vmem:[#allocation4 + $0x78] sm:$0xff] }
 0x4e0   : > { %5119 = vperm.xlu1 %7267, %v7309_v38   ;;  %v7347_v37 = vpop.eup %7346  ;;  %7366 = vrcp.f32 %v4874_v40 }
 0x4e1   : > { %v7349_v18 = vpop.eup %7348  ;;  %7368 = vrcp.f32 %v4877_v26 }
 0x4e2   : > { %v7351_v59 = vpop.eup %7350  ;;  %7370 = vrcp.f32 %v4876_v13  ;;  %v5077_v13 = vld [vmem:[#allocation4 + $0x88] sm:$0xff] }
 0x4e3   : > { %5114 = vperm.xlu0 %7266, %v7311_v11   ;;  %v7353_v23 = vpop.eup %7352  ;;  %7372 = vrcp.f32 %v4879_v31  ;;  %v4947_v11 = vld [vmem:[#allocation4] sm:$0xff] }
 0x4e4   : > { %5129 = vperm.xlu1 %7267, %v7313_v29   ;;  %v7355_v28 = vpop.eup %7354  ;;  %7374 = vrcp.f32 %v4878_v60 }
 0x4e5   : > { %v7357_v4 = vpop.eup %7356  ;;  %7376 = vrcp.f32 %v4881_v51  ;;  %v5079_v51 = vld [vmem:[#allocation4 + $0x98] sm:$0xff] }
 0x4e6   : > { %v7359_v10 = vpop.eup %7358  ;;  %7378 = vrcp.f32 %v4880_v54 }
 0x4e7   : > { %5124 = vperm.xlu0 %7266, %v7315_v43   ;;  %v7361_v57 = vpop.eup %7360 }
 0x4e8   : > { %5139 = vperm.xlu1 %7267, %v7317_v16   ;;  %v7363_v36 = vpop.eup %7362  ;;  %v4948_v16 = vld [vmem:[#allocation4 + $0x8] sm:$0xff] }
 0x4e9   : > { %v7365_v15 = vpop.eup %7364 }
 0x4ea   : > { %v7367_v2 = vpop.eup %7366 }
 0x4eb   : > { %5134 = vperm.xlu0 %7266, %v7319_v9   ;;  %v7369_v42 = vpop.eup %7368 }
 0x4ec   : > { %5149 = vperm.xlu1 %7267, %v7321_v20   ;;  %v7371_v1 = vpop.eup %7370 }
 0x4ed   : > { %v7373_v41 = vpop.eup %7372 }
 0x4ee   : > { %v7375_v49 = vpop.eup %7374 }
 0x4ef   : > { %5144 = vperm.xlu0 %7266, %v7323_v17   ;;  %v7377_v25 = vpop.eup %7376  ;;  %v4951_v17 = vld [vmem:[#allocation4 + $0x20] sm:$0xff] }
 0x4f0   : > { %5159 = vperm.xlu1 %7267, %v7325_v27   ;;  %v7379_v38 = vpop.eup %7378 }
 0x4f3   : > { %5154 = vperm.xlu0 %7266, %v7327_v48  }
 0x4f4   : > { %5169 = vperm.xlu1 %7267, %v7329_v8   ;;  %v4953_v8 = vld [vmem:[#allocation4 + $0x30] sm:$0xff] }
 0x4f7   : > { %5164 = vperm.xlu0 %7266, %v7331_v7  }
 0x4f8   : > { %5293 = vperm.xlu1 %7267, %v7333_v47  }
 0x4fb   : > { %5288 = vperm.xlu0 %7266, %v7335_v21   ;;  %v4955_v21 = vld [vmem:[#allocation4 + $0x40] sm:$0xff] }
 0x4fc   : > { %5303 = vperm.xlu1 %7267, %v7337_v46  }
 0x4ff   : > { %5298 = vperm.xlu0 %7266, %v7339_v45  }
 0x500   : > { %5313 = vperm.xlu1 %7267, %v7341_v61   ;;  %v4957_v61 = vld [vmem:[#allocation4 + $0x50] sm:$0xff] }
 0x503   : > { %5308 = vperm.xlu0 %7266, %v7343_v0  }
 0x504   : > { %5323 = vperm.xlu1 %7267, %v7345_v6  }
 0x507   : > { %5318 = vperm.xlu0 %7266, %v7347_v37   ;;  %v4959_v37 = vld [vmem:[#allocation4 + $0x60] sm:$0xff] }
 0x508   : > { %5417 = vperm.xlu1 %7267, %v7349_v18  }
 0x50b   : > { %5328 = vperm.xlu0 %7266, %v7351_v59  }
 0x50c   : > { %5427 = vperm.xlu1 %7267, %v7353_v23   ;;  %v4961_v23 = vld [vmem:[#allocation4 + $0x70] sm:$0xff] }
 0x50f   : > { %5422 = vperm.xlu0 %7266, %v7355_v28  }
 0x510   : > { %5437 = vperm.xlu1 %7267, %v7357_v4  }
 0x513   : > { %5432 = vperm.xlu0 %7266, %v7359_v10   ;;  %v5076_v10 = vld [vmem:[#allocation4 + $0x80] sm:$0xff] }
 0x514   : > { %5447 = vperm.xlu1 %7267, %v7361_v57  }
 0x517   : > { %5442 = vperm.xlu0 %7266, %v7363_v36  }
 0x518   : > { %5457 = vperm.xlu1 %7267, %v7365_v15   ;;  %v5078_v15 = vld [vmem:[#allocation4 + $0x90] sm:$0xff] }
 0x51b   : > { %5452 = vperm.xlu0 %7266, %v7367_v2  }
 0x51c   : > { %5467 = vperm.xlu1 %7267, %v7369_v42  }
 0x51f   : > { %5462 = vperm.xlu0 %7266, %v7371_v1  }
 0x520   : > { %5477 = vperm.xlu1 %7267, %v7373_v41   ;;  %v5081_v41 = vld [vmem:[#allocation4 + $0xa8] sm:$0xff] }
 0x523   : > { %5472 = vperm.xlu0 %7266, %v7375_v49   ;;  %v5080_v49 = vld [vmem:[#allocation4 + $0xa0] sm:$0xff] }
 0x524   : > { %5487 = vperm.xlu1 %7267, %v7377_v25  }
 0x527   : > { %5482 = vperm.xlu0 %7266, %v7379_v38  }
 0x536   : > { %v4976_v58 = vpop.permute.xlu1 %4975 }
 0x537   : > { %v5045_v29 = vmul.f32 %v4976_v58, %v4949_v52  ;;  %v5083_v58 = vld [vmem:[#allocation4 + $0xb8] sm:$0xff] }
 0x539   : > { %5061 = vst.msk [vmem:[%s7924_s28 + $0x20] sm:$0xff] %vm1285_vm2, %v5045_v29  ;;  %v5082_v29 = vld [vmem:[#allocation4 + $0xb0] sm:$0xff] }
 0x53a   : > { %v4966_v55 = vpop.permute.xlu0 %4965 }
 0x53b   : > { %v5043_v43 = vmul.f32 %v4966_v55, %v4947_v11  ;;  %v4981_v39 = vpop.permute.xlu1 %4980 }
 0x53c   : > { %v5046_v9 = vmul.f32 %v4981_v39, %v4950_v14  ;;  %v5085_v39 = vld [vmem:[#allocation4 + $0xc8] sm:$0xff] }
 0x53d   : > { %5059 = vst.msk [vmem:[%s7924_s28] sm:$0xff] %vm1285_vm2, %v5043_v43 }
 0x53e   : > { %v4971_v35 = vpop.permute.xlu0 %4970  ;;  %5062 = vst.msk [vmem:[%s7924_s28 + $0x30] sm:$0xff] %vm1285_vm2, %v5046_v9  ;;  %v5084_v9 = vld [vmem:[#allocation4 + $0xc0] sm:$0xff] }
 0x53f   : > { %v5044_v20 = vmul.f32 %v4971_v35, %v4948_v16  ;;  %v4991_v63 = vpop.permute.xlu1 %4990 }
 0x540   : > { %v5048_v27 = vmul.f32 %v4991_v63, %v4952_v50  ;;  %v5087_v63 = vld [vmem:[#allocation4 + $0xd8] sm:$0xff] }
 0x541   : > { %5060 = vst.msk [vmem:[%s7924_s28 + $0x10] sm:$0xff] %vm1285_vm2, %v5044_v20 }
 0x542   : > { %v4986_v19 = vpop.permute.xlu0 %4985  ;;  %5064 = vst.msk [vmem:[%s7924_s28 + $0x50] sm:$0xff] %vm1285_vm2, %v5048_v27  ;;  %v5086_v27 = vld [vmem:[#allocation4 + $0xd0] sm:$0xff] }
 0x543   : > { %v5047_v48 = vmul.f32 %v4986_v19, %v4951_v17  ;;  %v5001_v3 = vpop.permute.xlu1 %5000  ;;  %v4860_v19 = vld [vmem:[#allocation3 + $0x148] sm:$0xff] }
 0x544   : > { %v5050_v7 = vmul.f32 %v5001_v3, %v4954_v22  ;;  %v4882_v22 = vld [vmem:[#allocation3 + $0x1f8] sm:$0xff]  ;;  %7380 = vrcp.f32 %v4860_v19 }
 0x545   : > { %5063 = vst.msk [vmem:[%s7924_s28 + $0x40] sm:$0xff] %vm1285_vm2, %v5047_v48  ;;  %7382 = vrcp.f32 %v4882_v22 }
 0x546   : > { %v4996_v62 = vpop.permute.xlu0 %4995  ;;  %5066 = vst.msk [vmem:[%s7924_s28 + $0x70] sm:$0xff] %vm1285_vm2, %v5050_v7 }
 0x547   : > { %v5049_v47 = vmul.f32 %v4996_v62, %v4953_v8  ;;  %v5011_v5 = vpop.permute.xlu1 %5010  ;;  %v5089_v62 = vld [vmem:[#allocation4 + $0xe8] sm:$0xff] }
 0x548   : > { %v5052_v46 = vmul.f32 %v5011_v5, %v4956_v33  ;;  %v4862_v33 = vld [vmem:[#allocation3 + $0x158] sm:$0xff]  ;;  %v4861_v5 = vld [vmem:[#allocation3 + $0x150] sm:$0xff] }
 0x549   : > { %5065 = vst.msk [vmem:[%s7924_s28 + $0x60] sm:$0xff] %vm1285_vm2, %v5049_v47  ;;  %v5088_v47 = vld [vmem:[#allocation4 + $0xe0] sm:$0xff]  ;;  %7384 = vrcp.f32 %v4862_v33 }
 0x54a   : > { %v5006_v12 = vpop.permute.xlu0 %5005  ;;  %5068 = vst.msk [vmem:[%s7924_s28 + $0x90] sm:$0xff] %vm1285_vm2, %v5052_v46  ;;  %7386 = vrcp.f32 %v4861_v5  ;;  %v5405_v5 = vld [vmem:[#allocation4 + $0x1b0] sm:$0xff] }
 0x54b   : > { %v5051_v45 = vmul.f32 %v5006_v12, %v4955_v21  ;;  %v5021_v32 = vpop.permute.xlu1 %5020 }
 0x54c   : > { %v5054_v0 = vmul.f32 %v5021_v32, %v4958_v30  ;;  %v5091_v30 = vld [vmem:[#allocation4 + $0xf8] sm:$0xff]  ;;  %v4864_v32 = vld [vmem:[#allocation3 + $0x168] sm:$0xff] }
 0x54d   : > { %5067 = vst.msk [vmem:[%s7924_s28 + $0x80] sm:$0xff] %vm1285_vm2, %v5051_v45  ;;  %7388 = vrcp.f32 %v4864_v32  ;;  %v5407_v32 = vld [vmem:[#allocation4 + $0x1c0] sm:$0xff] }
 0x54e   : > { %v5016_v24 = vpop.permute.xlu0 %5015  ;;  %5070 = vst.msk [vmem:[%s7924_s28 + $0xb0] sm:$0xff] %vm1285_vm2, %v5054_v0 }
 0x54f   : > { %v5053_v6 = vmul.f32 %v5016_v24, %v4957_v61  ;;  %v5031_v53 = vpop.permute.xlu1 %5030  ;;  %v5090_v61 = vld [vmem:[#allocation4 + $0xf0] sm:$0xff]  ;;  %v4863_v24 = vld [vmem:[#allocation3 + $0x160] sm:$0xff] }
 0x550   : > { %v5056_v18 = vmul.f32 %v5031_v53, %v4960_v44  ;;  %v5271_v53 = vld [vmem:[#allocation4 + $0x108] sm:$0xff]  ;;  %7390 = vrcp.f32 %v4863_v24 }
 0x551   : > { %5069 = vst.msk [vmem:[%s7924_s28 + $0xa0] sm:$0xff] %vm1285_vm2, %v5053_v6 }
 0x552   : > { %v5026_v56 = vpop.permute.xlu0 %5025  ;;  %5072 = vst.msk [vmem:[%s7924_s28 + $0xd0] sm:$0xff] %vm1285_vm2, %v5056_v18  ;;  %v5270_v18 = vld [vmem:[#allocation4 + $0x100] sm:$0xff] }
 0x553   : > { %v5055_v59 = vmul.f32 %v5026_v56, %v4959_v37  ;;  %v5041_v40 = vpop.permute.xlu1 %5040  ;;  %v4866_v56 = vld [vmem:[#allocation3 + $0x178] sm:$0xff] }
 0x554   : > { %v5058_v28 = vmul.f32 %v5041_v40, %v4962_v34  ;;  %7392 = vrcp.f32 %v4866_v56 }
 0x555   : > { %5071 = vst.msk [vmem:[%s7924_s28 + $0xc0] sm:$0xff] %vm1285_vm2, %v5055_v59  ;;  %v7381_v59 = vpop.eup %7380 }
 0x556   : > { %v5036_v26 = vpop.permute.xlu0 %5035  ;;  %5074 = vst.msk [vmem:[%s7924_s28 + $0xf0] sm:$0xff] %vm1285_vm2, %v5058_v28  ;;  %v7383_v40 = vpop.eup %7382 }
 0x557   : > { %v5057_v4 = vmul.f32 %v5036_v26, %v4961_v23  ;;  %v5100_v31 = vpop.permute.xlu1 %5099  ;;  %v4865_v23 = vld [vmem:[#allocation3 + $0x170] sm:$0xff] }
 0x558   : > { %v5173_v57 = vmul.f32 %v5100_v31, %v5077_v13  ;;  %v5273_v13 = vld [vmem:[#allocation4 + $0x118] sm:$0xff]  ;;  %7394 = vrcp.f32 %v4865_v23  ;;  %v7385_v31 = vpop.eup %7384 }
 0x559   : > { %5073 = vst.msk [vmem:[%s7924_s28 + $0xe0] sm:$0xff] %vm1285_vm2, %v5057_v4 }
 0x55a   : > { %v5095_v60 = vpop.permute.xlu0 %5094  ;;  %5206 = vrot.lane.b32.xlu1 %v5173_v57, %s7512_s15 }
 0x55b   : > { %v5172_v36 = vmul.f32 %v5095_v60, %v5076_v10  ;;  %v5110_v54 = vpop.permute.xlu1 %5109  ;;  %v5272_v10 = vld [vmem:[#allocation4 + $0x110] sm:$0xff]  ;;  %v7387_v60 = vpop.eup %7386 }
 0x55c   : > { %v5175_v2 = vmul.f32 %v5110_v54, %v5079_v51  ;;  %v5275_v54 = vld [vmem:[#allocation4 + $0x128] sm:$0xff] }
 0x55d   : > { %5204 = vrot.lane.b32.xlu0 %v5172_v36, %s7512_s15 }
 0x55e   : > { %v5105_v42 = vpop.permute.xlu0 %5104  ;;  %5210 = vrot.lane.b32.xlu1 %v5175_v2, %s7512_s15  ;;  %v5274_v2 = vld [vmem:[#allocation4 + $0x120] sm:$0xff] }
 0x55f   : > { %v5174_v1 = vmul.f32 %v5105_v42, %v5078_v15  ;;  %v5120_v25 = vpop.permute.xlu1 %5119  ;;  %v7389_v42 = vpop.eup %7388 }
 0x560   : > { %v5177_v38 = vmul.f32 %v5120_v25, %v5081_v41  ;;  %v7391_v41 = vpop.eup %7390 }
 0x561   : > { %5208 = vrot.lane.b32.xlu0 %v5174_v1, %s7512_s15 }
 0x562   : > { %v5115_v52 = vpop.permute.xlu0 %5114  ;;  %5214 = vrot.lane.b32.xlu1 %v5177_v38, %s7512_s15 }
 0x563   : > { %v5176_v11 = vmul.f32 %v5115_v52, %v5080_v49  ;;  %v5130_v55 = vpop.permute.xlu1 %5129  ;;  %v5277_v52 = vld [vmem:[#allocation4 + $0x138] sm:$0xff] }
 0x564   : > { %v5179_v43 = vmul.f32 %v5130_v55, %v5083_v58  ;;  %v7393_v58 = vpop.eup %7392 }
 0x565   : > { %5212 = vrot.lane.b32.xlu0 %v5176_v11, %s7512_s15  ;;  %v5276_v11 = vld [vmem:[#allocation4 + $0x130] sm:$0xff]  ;;  %v7395_v55 = vpop.eup %7394 }
 0x566   : > { %v5125_v14 = vpop.permute.xlu0 %5124  ;;  %5218 = vrot.lane.b32.xlu1 %v5179_v43, %s7512_s15 }
 0x567   : > { %v5178_v16 = vmul.f32 %v5125_v14, %v5082_v29  ;;  %v5140_v35 = vpop.permute.xlu1 %5139 }
 0x568   : > { %v5181_v20 = vmul.f32 %v5140_v35, %v5085_v39  ;;  %v5399_v39 = vld [vmem:[#allocation4 + $0x180] sm:$0xff] }
 0x569   : > { %5216 = vrot.lane.b32.xlu0 %v5178_v16, %s7512_s15 }
 0x56a   : > { %v5135_v50 = vpop.permute.xlu0 %5134  ;;  %5222 = vrot.lane.b32.xlu1 %v5181_v20, %s7512_s15 }
 0x56b   : > { %v5180_v17 = vmul.f32 %v5135_v50, %v5084_v9  ;;  %v5150_v48 = vpop.permute.xlu1 %5149  ;;  %v5278_v9 = vld [vmem:[#allocation4 + $0x140] sm:$0xff] }
 0x56c   : > { %v5183_v8 = vmul.f32 %v5150_v48, %v5087_v63  ;;  %v5401_v63 = vld [vmem:[#allocation4 + $0x190] sm:$0xff] }
 0x56d   : > { %5220 = vrot.lane.b32.xlu0 %v5180_v17, %s7512_s15 }
 0x56e   : > { %v5145_v3 = vpop.permute.xlu0 %5144  ;;  %5226 = vrot.lane.b32.xlu1 %v5183_v8, %s7512_s15 }
 0x56f   : > { %v5182_v7 = vmul.f32 %v5145_v3, %v5086_v27  ;;  %v5160_v21 = vpop.permute.xlu1 %5159  ;;  %v5400_v27 = vld [vmem:[#allocation4 + $0x188] sm:$0xff]  ;;  %v5403_v3 = vld [vmem:[#allocation4 + $0x1a0] sm:$0xff] }
 0x570   : > { %v5185_v46 = vmul.f32 %v5160_v21, %v5089_v62 }
 0x571   : > { %5224 = vrot.lane.b32.xlu0 %v5182_v7, %s7512_s15  ;;  %v5402_v7 = vld [vmem:[#allocation4 + $0x198] sm:$0xff] }
 0x572   : > { %v5155_v12 = vpop.permute.xlu0 %5154  ;;  %5230 = vrot.lane.b32.xlu1 %v5185_v46, %s7512_s15  ;;  %v5404_v46 = vld [vmem:[#allocation4 + $0x1a8] sm:$0xff] }
 0x573   : > { %v5184_v45 = vmul.f32 %v5155_v12, %v5088_v47  ;;  %v5170_v0 = vpop.permute.xlu1 %5169 }
 0x574   : > { %v5187_v6 = vmul.f32 %v5170_v0, %v5091_v30  ;;  %v5406_v0 = vld [vmem:[#allocation4 + $0x1b8] sm:$0xff] }
 0x575   : > { %5228 = vrot.lane.b32.xlu0 %v5184_v45, %s7512_s15 }
 0x576   : > { %v5165_v44 = vpop.permute.xlu0 %5164  ;;  %5234 = vrot.lane.b32.xlu1 %v5187_v6, %s7512_s15 }
 0x577   : > { %v5186_v37 = vmul.f32 %v5165_v44, %v5090_v61  ;;  %v5294_v34 = vpop.permute.xlu1 %5293 }
 0x578   : > { %v5367_v28 = vmul.f32 %v5294_v34, %v5271_v53  ;;  %v5409_v53 = vld [vmem:[#allocation4 + $0x1d0] sm:$0xff] }
 0x579   : > { %5232 = vrot.lane.b32.xlu0 %v5186_v37, %s7512_s15 }
 0x57a   : > { %v5289_v26 = vpop.permute.xlu0 %5288  ;;  %5383 = vst.msk [vmem:[%s7924_s28 + $0x18] sm:$0xff] %vm1285_vm2, %v5367_v28  ;;  %5333 = vperm.xlu1 %7267, %v7381_v59   ;;  %v5410_v28 = vld [vmem:[#allocation4 + $0x1d8] sm:$0xff] }
 0x57b   : > { %v5366_v4 = vmul.f32 %v5289_v26, %v5270_v18  ;;  %v5304_v57 = vpop.permute.xlu1 %5303  ;;  %v5408_v18 = vld [vmem:[#allocation4 + $0x1c8] sm:$0xff] }
 0x57c   : > { %v5369_v36 = vmul.f32 %v5304_v57, %v5273_v13  ;;  %v5412_v57 = vld [vmem:[#allocation4 + $0x1e8] sm:$0xff] }
 0x57d   : > { %5382 = vst.msk [vmem:[%s7924_s28 + $0x8] sm:$0xff] %vm1285_vm2, %v5366_v4  ;;  %5492 = vperm.xlu0 %7266, %v7383_v40   ;;  %v5411_v40 = vld [vmem:[#allocation4 + $0x1e0] sm:$0xff] }
 0x57e   : > { %v5299_v51 = vpop.permute.xlu0 %5298  ;;  %5385 = vst.msk [vmem:[%s7924_s28 + $0x38] sm:$0xff] %vm1285_vm2, %v5369_v36  ;;  %5343 = vperm.xlu1 %7267, %v7385_v31   ;;  %v5413_v31 = vld [vmem:[#allocation4 + $0x1f0] sm:$0xff] }
 0x57f   : > { %v5368_v15 = vmul.f32 %v5299_v51, %v5272_v10  ;;  %v5314_v1 = vpop.permute.xlu1 %5313 }
 0x580   : > { %v5371_v49 = vmul.f32 %v5314_v1, %v5275_v54 }
 0x581   : > { %5384 = vst.msk [vmem:[%s7924_s28 + $0x28] sm:$0xff] %vm1285_vm2, %v5368_v15  ;;  %5338 = vperm.xlu0 %7266, %v7387_v60  }
 0x582   : > { %v5309_v25 = vpop.permute.xlu0 %5308  ;;  %5387 = vst.msk [vmem:[%s7924_s28 + $0x58] sm:$0xff] %vm1285_vm2, %v5371_v49  ;;  %5353 = vperm.xlu1 %7267, %v7389_v42  }
 0x583   : > { %v5370_v38 = vmul.f32 %v5309_v25, %v5274_v2  ;;  %v5324_v29 = vpop.permute.xlu1 %5323 }
 0x584   : > { %v5373_v43 = vmul.f32 %v5324_v29, %v5277_v52 }
 0x585   : > { %5386 = vst.msk [vmem:[%s7924_s28 + $0x48] sm:$0xff] %vm1285_vm2, %v5370_v38  ;;  %5348 = vperm.xlu0 %7266, %v7391_v41  }
 0x586   : > { %v5319_v14 = vpop.permute.xlu0 %5318  ;;  %5389 = vst.msk [vmem:[%s7924_s28 + $0x78] sm:$0xff] %vm1285_vm2, %v5373_v43  ;;  %5363 = vperm.xlu1 %7267, %v7393_v58  }
 0x587   : > { %v5372_v16 = vmul.f32 %v5319_v14, %v5276_v11  ;;  %v5418_v35 = vpop.permute.xlu1 %5417 }
 0x588   : > { %v5495_v20 = vmul.f32 %v5418_v35, %v5399_v39  ;;  %v5279_v39 = vld [vmem:[#allocation4 + $0x148] sm:$0xff] }
 0x589   : > { %5388 = vst.msk [vmem:[%s7924_s28 + $0x68] sm:$0xff] %vm1285_vm2, %v5372_v16  ;;  %5358 = vperm.xlu0 %7266, %v7395_v55  }
 0x58a   : > { %v5329_v50 = vpop.permute.xlu0 %5328 }
 0x58b   : > { %v5374_v17 = vmul.f32 %v5329_v50, %v5278_v9  ;;  %v5428_v19 = vpop.permute.xlu1 %5427  ;;  %v5414_v9 = vld [vmem:[#allocation4 + $0x1f8] sm:$0xff] }
 0x58c   : > { %v5497_v48 = vmul.f32 %v5428_v19, %v5401_v63  ;;  %v5281_v63 = vld [vmem:[#allocation4 + $0x158] sm:$0xff] }
 0x58d   : > { %5390 = vst.msk [vmem:[%s7924_s28 + $0x88] sm:$0xff] %vm1285_vm2, %v5374_v17  ;;  %5527 = vrot.lane.b32.xlu0 %v5495_v20, %s7512_s15 }
 0x58e   : > { %v5423_v22 = vpop.permute.xlu0 %5422 }
 0x58f   : > { %v5496_v8 = vmul.f32 %v5423_v22, %v5400_v27  ;;  %v5438_v62 = vpop.permute.xlu1 %5437  ;;  %v5280_v27 = vld [vmem:[#allocation4 + $0x150] sm:$0xff] }
 0x590   : > { %v5499_v47 = vmul.f32 %v5438_v62, %v5403_v3  ;;  %v5283_v3 = vld [vmem:[#allocation4 + $0x168] sm:$0xff] }
 0x591   : > { %5531 = vrot.lane.b32.xlu0 %v5497_v48, %s7512_s15  ;;  %5529 = vrot.lane.b32.xlu1 %v5496_v8, %s7512_s15 }
 0x592   : > { %v5433_v33 = vpop.permute.xlu0 %5432 }
 0x593   : > { %v5498_v21 = vmul.f32 %v5433_v33, %v5402_v7  ;;  %v5448_v12 = vpop.permute.xlu1 %5447  ;;  %v5282_v7 = vld [vmem:[#allocation4 + $0x160] sm:$0xff] }
 0x594   : > { %v5501_v45 = vmul.f32 %v5448_v12, %v5405_v5  ;;  %v5285_v5 = vld [vmem:[#allocation4 + $0x178] sm:$0xff] }
 0x595   : > { %5535 = vrot.lane.b32.xlu0 %v5499_v47, %s7512_s15  ;;  %5533 = vrot.lane.b32.xlu1 %v5498_v21, %s7512_s15 }
 0x596   : > { %v5443_v30 = vpop.permute.xlu0 %5442 }
 0x597   : > { %v5500_v61 = vmul.f32 %v5443_v30, %v5404_v46  ;;  %v5458_v24 = vpop.permute.xlu1 %5457  ;;  %v5284_v46 = vld [vmem:[#allocation4 + $0x170] sm:$0xff] }
 0x598   : > { %v5503_v6 = vmul.f32 %v5458_v24, %v5407_v32 }
 0x599   : > { %5539 = vrot.lane.b32.xlu0 %v5501_v45, %s7512_s15  ;;  %5537 = vrot.lane.b32.xlu1 %v5500_v61, %s7512_s15 }
 0x59a   : > { %v5453_v44 = vpop.permute.xlu0 %5452 }
 0x59b   : > { %v5502_v37 = vmul.f32 %v5453_v44, %v5406_v0  ;;  %v5468_v56 = vpop.permute.xlu1 %5467 }
 0x59c   : > { %v5505_v59 = vmul.f32 %v5468_v56, %v5409_v53 }
 0x59d   : > { %5543 = vrot.lane.b32.xlu0 %v5503_v6, %s7512_s15  ;;  %5541 = vrot.lane.b32.xlu1 %v5502_v37, %s7512_s15 }
 0x59e   : > { %v5463_v34 = vpop.permute.xlu0 %5462 }
 0x59f   : > { %v5504_v23 = vmul.f32 %v5463_v34, %v5408_v18  ;;  %v5478_v26 = vpop.permute.xlu1 %5477 }
 0x5a0   : > { %v5507_v4 = vmul.f32 %v5478_v26, %v5411_v40 }
 0x5a1   : > { %5547 = vrot.lane.b32.xlu0 %v5505_v59, %s7512_s15  ;;  %5545 = vrot.lane.b32.xlu1 %v5504_v23, %s7512_s15 }
 0x5a2   : > { %v5473_v13 = vpop.permute.xlu0 %5472 }
 0x5a3   : > { %v5506_v10 = vmul.f32 %v5473_v13, %v5410_v28  ;;  %v5488_v60 = vpop.permute.xlu1 %5487 }
 0x5a4   : > { %v5509_v36 = vmul.f32 %v5488_v60, %v5413_v31 }
 0x5a5   : > { %5551 = vrot.lane.b32.xlu0 %v5507_v4, %s7512_s15  ;;  %5549 = vrot.lane.b32.xlu1 %v5506_v10, %s7512_s15 }
 0x5a6   : > { %v5483_v51 = vpop.permute.xlu0 %5482 }
 0x5a7   : > { %v5508_v15 = vmul.f32 %v5483_v51, %v5412_v57 }
 0x5a9   : > { %5555 = vrot.lane.b32.xlu0 %v5509_v36, %s7512_s15  ;;  %5553 = vrot.lane.b32.xlu1 %v5508_v15, %s7512_s15 }
 0x5cc   : > { %v5207_v54 = vpop.permute.xlu1 %5206 }
 0x5cd   : > { %5254 = vst.msk [vmem:[%s7924_s28 + $0x10] sm:$0xff] %vm5252_vm5, %v5207_v54 }
 0x5cf   : > { %v5205_v2 = vpop.permute.xlu0 %5204 }
 0x5d0   : > { %5253 = vst.msk [vmem:[%s7924_s28] sm:$0xff] %vm5252_vm5, %v5205_v2  ;;  %v5211_v42 = vpop.permute.xlu1 %5210 }
 0x5d1   : > { %5256 = vst.msk [vmem:[%s7924_s28 + $0x30] sm:$0xff] %vm5252_vm5, %v5211_v42 }
 0x5d3   : > { %v5209_v1 = vpop.permute.xlu0 %5208 }
 0x5d4   : > { %5255 = vst.msk [vmem:[%s7924_s28 + $0x20] sm:$0xff] %vm5252_vm5, %v5209_v1  ;;  %v5215_v41 = vpop.permute.xlu1 %5214 }
 0x5d5   : > { %5258 = vst.msk [vmem:[%s7924_s28 + $0x50] sm:$0xff] %vm5252_vm5, %v5215_v41 }
 0x5d7   : > { %v5213_v49 = vpop.permute.xlu0 %5212 }
 0x5d8   : > { %5257 = vst.msk [vmem:[%s7924_s28 + $0x40] sm:$0xff] %vm5252_vm5, %v5213_v49  ;;  %v5219_v25 = vpop.permute.xlu1 %5218 }
 0x5d9   : > { %5260 = vst.msk [vmem:[%s7924_s28 + $0x70] sm:$0xff] %vm5252_vm5, %v5219_v25 }
 0x5db   : > { %v5217_v38 = vpop.permute.xlu0 %5216 }
 0x5dc   : > { %5259 = vst.msk [vmem:[%s7924_s28 + $0x60] sm:$0xff] %vm5252_vm5, %v5217_v38  ;;  %v5223_v52 = vpop.permute.xlu1 %5222 }
 0x5dd   : > { %5262 = vst.msk [vmem:[%s7924_s28 + $0x90] sm:$0xff] %vm5252_vm5, %v5223_v52 }
 0x5df   : > { %v5221_v11 = vpop.permute.xlu0 %5220 }
 0x5e0   : > { %5261 = vst.msk [vmem:[%s7924_s28 + $0x80] sm:$0xff] %vm5252_vm5, %v5221_v11  ;;  %v5227_v58 = vpop.permute.xlu1 %5226 }
 0x5e1   : > { %5264 = vst.msk [vmem:[%s7924_s28 + $0xb0] sm:$0xff] %vm5252_vm5, %v5227_v58 }
 0x5e3   : > { %v5225_v29 = vpop.permute.xlu0 %5224 }
 0x5e4   : > { %5263 = vst.msk [vmem:[%s7924_s28 + $0xa0] sm:$0xff] %vm5252_vm5, %v5225_v29  ;;  %v5231_v55 = vpop.permute.xlu1 %5230 }
 0x5e5   : > { %5266 = vst.msk [vmem:[%s7924_s28 + $0xd0] sm:$0xff] %vm5252_vm5, %v5231_v55 }
 0x5e7   : > { %v5229_v43 = vpop.permute.xlu0 %5228 }
 0x5e8   : > { %5265 = vst.msk [vmem:[%s7924_s28 + $0xc0] sm:$0xff] %vm5252_vm5, %v5229_v43  ;;  %v5235_v14 = vpop.permute.xlu1 %5234 }
 0x5e9   : > { %5268 = vst.msk [vmem:[%s7924_s28 + $0xf0] sm:$0xff] %vm5252_vm5, %v5235_v14 }
 0x5eb   : > { %v5233_v16 = vpop.permute.xlu0 %5232 }
 0x5ec   : > { %5267 = vst.msk [vmem:[%s7924_s28 + $0xe0] sm:$0xff] %vm5252_vm5, %v5233_v16 }
 0x5f9   : > { %v5334_v35 = vpop.permute.xlu1 %5333 }
 0x5fa   : > { %v5375_v20 = vmul.f32 %v5334_v35, %v5279_v39 }
 0x5fc   : > { %v5493_v50 = vpop.permute.xlu0 %5492  ;;  %5391 = vst.msk [vmem:[%s7924_s28 + $0x98] sm:$0xff] %vm1285_vm2, %v5375_v20 }
 0x5fd   : > { %v5510_v17 = vmul.f32 %v5493_v50, %v5414_v9  ;;  %v5344_v19 = vpop.permute.xlu1 %5343 }
 0x5fe   : > { %v5377_v48 = vmul.f32 %v5344_v19, %v5281_v63 }
 0x5ff   : > { %5557 = vrot.lane.b32.xlu1 %v5510_v17, %s7512_s15 }
 0x600   : > { %v5339_v22 = vpop.permute.xlu0 %5338  ;;  %5393 = vst.msk [vmem:[%s7924_s28 + $0xb8] sm:$0xff] %vm1285_vm2, %v5377_v48 }
 0x601   : > { %v5376_v8 = vmul.f32 %v5339_v22, %v5280_v27  ;;  %v5354_v62 = vpop.permute.xlu1 %5353 }
 0x602   : > { %v5379_v47 = vmul.f32 %v5354_v62, %v5283_v3 }
 0x603   : > { %5392 = vst.msk [vmem:[%s7924_s28 + $0xa8] sm:$0xff] %vm1285_vm2, %v5376_v8 }
 0x604   : > { %v5349_v33 = vpop.permute.xlu0 %5348  ;;  %5395 = vst.msk [vmem:[%s7924_s28 + $0xd8] sm:$0xff] %vm1285_vm2, %v5379_v47 }
 0x605   : > { %v5378_v21 = vmul.f32 %v5349_v33, %v5282_v7  ;;  %v5364_v12 = vpop.permute.xlu1 %5363 }
 0x606   : > { %v5381_v45 = vmul.f32 %v5364_v12, %v5285_v5 }
 0x607   : > { %5394 = vst.msk [vmem:[%s7924_s28 + $0xc8] sm:$0xff] %vm1285_vm2, %v5378_v21 }
 0x608   : > { %v5359_v30 = vpop.permute.xlu0 %5358  ;;  %5397 = vst.msk [vmem:[%s7924_s28 + $0xf8] sm:$0xff] %vm1285_vm2, %v5381_v45 }
 0x609   : > { %v5380_v61 = vmul.f32 %v5359_v30, %v5284_v46  ;;  %v5530_v32 = vpop.permute.xlu1 %5529 }
 0x60a   : > { %5576 = vst.msk [vmem:[%s7924_s28 + $0x18] sm:$0xff] %vm5252_vm5, %v5530_v32 }
 0x60b   : > { %5396 = vst.msk [vmem:[%s7924_s28 + $0xe8] sm:$0xff] %vm1285_vm2, %v5380_v61 }
 0x60c   : > { %v5528_v0 = vpop.permute.xlu0 %5527 }
 0x60d   : > { %5575 = vst.msk [vmem:[%s7924_s28 + $0x8] sm:$0xff] %vm5252_vm5, %v5528_v0  ;;  %v5534_v24 = vpop.permute.xlu1 %5533 }
 0x60e   : > { %5578 = vst.msk [vmem:[%s7924_s28 + $0x38] sm:$0xff] %vm5252_vm5, %v5534_v24 }
 0x610   : > { %v5532_v6 = vpop.permute.xlu0 %5531 }
 0x611   : > { %5577 = vst.msk [vmem:[%s7924_s28 + $0x28] sm:$0xff] %vm5252_vm5, %v5532_v6  ;;  %v5538_v44 = vpop.permute.xlu1 %5537 }
 0x612   : > { %5580 = vst.msk [vmem:[%s7924_s28 + $0x58] sm:$0xff] %vm5252_vm5, %v5538_v44 }
 0x614   : > { %v5536_v37 = vpop.permute.xlu0 %5535 }
 0x615   : > { %5579 = vst.msk [vmem:[%s7924_s28 + $0x48] sm:$0xff] %vm5252_vm5, %v5536_v37  ;;  %v5542_v53 = vpop.permute.xlu1 %5541 }
 0x616   : > { %5582 = vst.msk [vmem:[%s7924_s28 + $0x78] sm:$0xff] %vm5252_vm5, %v5542_v53 }
 0x618   : > { %v5540_v18 = vpop.permute.xlu0 %5539 }
 0x619   : > { %5581 = vst.msk [vmem:[%s7924_s28 + $0x68] sm:$0xff] %vm5252_vm5, %v5540_v18  ;;  %v5546_v56 = vpop.permute.xlu1 %5545 }
 0x61a   : > { %5584 = vst.msk [vmem:[%s7924_s28 + $0x98] sm:$0xff] %vm5252_vm5, %v5546_v56 }
 0x61c   : > { %v5544_v59 = vpop.permute.xlu0 %5543 }
 0x61d   : > { %5583 = vst.msk [vmem:[%s7924_s28 + $0x88] sm:$0xff] %vm5252_vm5, %v5544_v59  ;;  %v5550_v34 = vpop.permute.xlu1 %5549 }
 0x61e   : > { %5586 = vst.msk [vmem:[%s7924_s28 + $0xb8] sm:$0xff] %vm5252_vm5, %v5550_v34 }
 0x620   : > { %v5548_v23 = vpop.permute.xlu0 %5547 }
 0x621   : > { %5585 = vst.msk [vmem:[%s7924_s28 + $0xa8] sm:$0xff] %vm5252_vm5, %v5548_v23  ;;  %v5554_v40 = vpop.permute.xlu1 %5553 }
 0x622   : > { %5588 = vst.msk [vmem:[%s7924_s28 + $0xd8] sm:$0xff] %vm5252_vm5, %v5554_v40 }
 0x624   : > { %v5552_v28 = vpop.permute.xlu0 %5551 }
 0x625   : > { %5587 = vst.msk [vmem:[%s7924_s28 + $0xc8] sm:$0xff] %vm5252_vm5, %v5552_v28 }
 0x628   : > { %v5556_v26 = vpop.permute.xlu0 %5555 }
 0x629   : > { %5589 = vst.msk [vmem:[%s7924_s28 + $0xe8] sm:$0xff] %vm5252_vm5, %v5556_v26 }
 0x671   : > { %v5558_v4 = vpop.permute.xlu1 %5557 }
 0x672   : > { %5590 = vst.msk [vmem:[%s7924_s28 + $0xf8] sm:$0xff] %vm5252_vm5, %v5558_v4 }
 0x673 PF: > { %s5889_s17 = sshll.u32 %s7494_s18, 12  ;;  %s5608_s1 = sshll.u32 %s7924_s28, 4  ;;  %s10668_s1 = int_to_ptr.vmem [resolvable:$true] %s5608_s1 }
 0x674   : > { %s10665_s10 = scalar_lea.hbm %s10733_s3, %s5889_s17  ;;  %s10672_s11 = scalar_lea.sflag [#allocation8], %s815_s5 }
 0x675   : > { %s7396_s22 = scalar_lea.vmem %s10668_s1, 4096  ;;  %s7513_s18 = smov [#allocation7]  }
 0x676   : > { %p7397_p6 = scmp.ne.s32.totalorder %s10668_s1, %s7396_s22  ;;  %s7400_s23 = sshll.u32 %s7513_s18, 4  ;;  %s7401_s23 = int_to_ptr.vmem [resolvable:$false] %s7400_s23 }
 0x677   : > { %s7402_s27 = scalar_lea.vmem %s7401_s23, 8192  ;;  %p7403_p10 = scmp.lt.s32.totalorder %s10668_s1, %s7401_s23 }
 0x678   : > { %p7398_p8 = pnand %p7397_p6, %p7608_p7  ;;  %p7404_p11 = scmp.lt.s32.totalorder %s7402_s27, %s7396_s22 }
 0x67a   : > { %p7399_p9 = pneg %p7398_p8  ;;  %p7405_p13 = por %p7404_p11, %p7403_p10 }
 0x67c   : > { %p7406_p0 = pnand %p7405_p13, %p7399_p9 }
 0x67e   : > { %7409 = shalt.err (!%p7406_p0)
}
 0x67f   : > { %s7410_s5 = scalar_lea.hbm %s10665_s10, 4096  ;;  %s7414_s28 = scalar_lea.hbm %s10733_s3, 8192 }
 0x680   : > { %p7411_p1 = scmp.ne.s32.totalorder %s10665_s10, %s7410_s5  ;;  %p7415_p4 = scmp.lt.u32.totalorder %s10665_s10, %s10733_s3 }
 0x681   : > { %p7416_p5 = scmp.lt.u32.totalorder %s7414_s28, %s7410_s5  ;;  %p7418_p8 = scmp.lt.u32.totalorder %s7410_s5, %s10665_s10 }
 0x682   : > { %p7412_p2 = pnand %p7411_p1, %p7608_p7 }
 0x683   : > { %p7417_p6 = por %p7416_p5, %p7415_p4 }
 0x684   : > { %p7413_p3 = pneg %p7412_p2 }
 0x685   : > { %p7419_p9 = por %p7418_p8, %p7417_p6 }
 0x687   : > { %p7420_p10 = pnand %p7419_p9, %p7413_p3 }
 0x689   : > { %7423 = shalt.err (!%p7420_p10)
}
 0x68a   : > { %s7514_s26 = smov 256   ;;  %s7515_s9 = smov 16  }
 0x68b   : > { %6914 = dma.vmem_to_hbm [thread:$0]  (%p7608_p7), %s10668_s1, 4096, %s10665_s10, %s10672_s11, %s7514_s26, %s7514_s26, %s7515_s9  }
 0x68c PF: > { %p6920_p11 = scmp.ge.s32.totalorder %s7506_s21, 2  ;;  %s5623_s22 = sand.u32 1, %s7470_s12  }
 0x68d   : > { %s5624_s18 = scalar_lea.sflag [#allocation8], %s5623_s22 }
 0x68e   : > { %p6917_p13 = pnand %p6920_p11, %p7616_p12 }
 0x690   : > { %7465 = dma.done.wait (!%p6917_p13), %s5624_s18, 4096  }
 0x691   : > { %7467 = vsyncadd (!%p6917_p13), %s5624_s18, 4294963200  ;;  %s16_s21 = sadd.s32 1, %s7506_s21   ;;  %s11244_s12 = smov %s7474_s13 }
 0x692   : > { %p13_p0 = scmp.ge.s32.totalorder %s16_s21, 6   ;;  %s11245_s13 = smov %s7478_s14 }
 0x693   : > { %s11246_s14 = smov %s7621_s7  ;;  %s11247_s15 = smov %s7486_s16 }
 0x694   : > { %s11248_s16 = smov %s7624_s8  ;;  %s11249_s17 = smov %s7498_s19 }
 0x695   : > { %s11250_s18 = smov %s7502_s20  ;;  %s11251_s19 = smov %s11254_s24 }
 0x696   : > { %s11252_s20 = smov %s11258_s25  ;;  %15 = sbr.rel (!%p13_p0) target bundleno = 8 (0x8), region = 170 }
 0x69d   :  { %5629 = vsyncpa [#allocation8], 1 }
 0x69e   :  { %5631 = vsyncpa [#allocation8 + $0x1], 1 }

</bundles_post_ra>
